<compile_context>
chip_gen: v5e
topology: v5e:2x2
jax: 0.10.0
libtpu: 0.0.40
codegen_flags: <defaults>
</compile_context>

<pallas_src>
import jax
import jax.numpy as jnp
from jax.experimental import pallas as pl
from jax.experimental.pallas import tpu as pltpu

HIDDEN = 2048  # matches nn.Linear(in_dim, 2048) etc. in the PyTorch module


# ----------------------------- Pallas kernel ---------------------------------
def _env_encoder_kernel(x_ref, w1_ref, b1_ref, w2_ref, b2_ref, w3_ref,
                        o_ref, h1_ref, acc_ref):
    c = pl.program_id(0)          # core-split index (parallel on v7x)
    j = pl.program_id(1)          # W2-column / W3-row tile within this split
    ng = pl.num_programs(1)
    t = c * ng + j                # global tile index

    @pl.when(j == 0)
    def _():
        # Layer 1: (M, K1) @ (K1, H) with K1=16 -> single MXU push.  Kept in
        # f32 then cast to bf16 so layer 2 runs a pure bf16 x bf16 matmul.
        # (Recomputed once per core-split block; negligible.)
        h1 = jnp.dot(x_ref[...], w1_ref[...],
                     preferred_element_type=jnp.float32)
        h1_ref[...] = jnp.clip(h1 + b1_ref[...], 0.0, 6.0).astype(jnp.bfloat16)

    # Layer 2 column tile: (M, H) @ (H, tn) -> (M, tn), + bias, ReLU6.
    h2 = jnp.dot(h1_ref[...], w2_ref[...], preferred_element_type=jnp.float32)
    h2 = jnp.clip(h2 + b2_ref[t], 0.0, 6.0)

    # Layer 3 fused on the fly: this h2 column chunk is exactly one reduction
    # chunk of layer 3, so contract it with the matching W3 row tile.
    part = jnp.dot(h2.astype(w3_ref.dtype), w3_ref[...],
                   preferred_element_type=jnp.float32)

    @pl.when(j == 0)
    def _():
        acc_ref[...] = part            # direct write: no zero-fill / RMW

    @pl.when(j > 0)
    def _():
        acc_ref[...] += part

    @pl.when(j == ng - 1)
    def _():
        # Per-core-split PARTIAL layer-3 sum; bias + ReLU6 happen after the
        # cross-core combine in the XLA epilogue.
        o_ref[...] = acc_ref[...]


# ------------------------------ wrappers --------------------------------------
def _pick_tn(h, itemsize, budget_bytes=12 << 20):
    """Largest multiple-of-128 divisor of h whose double-buffered W2 tile
    (2 * h * tn * itemsize bytes) stays under the scoped-VMEM budget."""
    candidates = [t for t in range(128, h + 1, 128)
                  if h % t == 0 and 2 * h * t * itemsize <= budget_bytes]
    return max(candidates) if candidates else h


def pack_env_encoder_params(params, *, vmem_budget_bytes=12 << 20):
    """One-time weight transform: bf16 streaming weights, contiguous W2 tiles."""
    (w1, b1), (w2, b2), (w3, b3) = params
    H = w2.shape[0]
    tn = _pick_tn(H, jnp.dtype(jnp.bfloat16).itemsize, vmem_budget_bytes)
    T = H // tn
    # W2[k, t*tn + c] -> w2p[t, k, c]: each tile w2p[t] is a contiguous slab.
    w2p = jnp.asarray(w2, jnp.bfloat16).reshape(H, T, tn).transpose(1, 0, 2)
    b2p = jnp.asarray(b2, jnp.float32).reshape(T, 1, tn)
    return (jnp.asarray(w1, jnp.float32),
            jnp.asarray(b1, jnp.float32).reshape(1, -1),
            w2p,
            b2p,
            jnp.asarray(w3, jnp.bfloat16),
            jnp.asarray(b3, jnp.float32))


def env_encoder_pallas(x, packed):
    """relu6(relu6(relu6(x@W1+b1)@W2+b2)@W3+b3) with one pallas_call + tiny epilogue."""
    w1, b1, w2p, b2p, w3, b3 = packed
    M, K1 = x.shape
    H = w1.shape[1]
    T, _, tn = w2p.shape
    N3 = w3.shape[1]
    assert w1.shape == (K1, H) and w2p.shape == (T, H, tn) and w3.shape == (H, N3)
    assert b1.shape == (1, H) and b2p.shape == (T, 1, tn) and b3.shape == (N3,)
    assert T * tn == H

    # Split the layer-3 reduction (W2 columns / W3 rows) across the two v7x
    # TensorCores when possible; on 1-TC chips the axis runs serially.
    ncs = 2 if T % 2 == 0 else 1
    ng = T // ncs

    flops = 2 * M * (K1 * H + H * H + H * N3)
    bytes_accessed = (4 * (x.size + w1.size + b1.size + b2p.size + b3.size)
                      + 2 * (w2p.size + w3.size) + 4 * ncs * M * N3)

    partials = pl.pallas_call(
        _env_encoder_kernel,
        out_shape=jax.ShapeDtypeStruct((ncs, M, N3), jnp.float32),
        grid_spec=pltpu.PrefetchScalarGridSpec(
            num_scalar_prefetch=0,
            grid=(ncs, ng),
            in_specs=[
                pl.BlockSpec((M, K1), lambda c, j: (0, 0)),          # x    (resident)
                pl.BlockSpec((K1, H), lambda c, j: (0, 0)),          # W1   (resident, f32)
                pl.BlockSpec((1, H), lambda c, j: (0, 0)),           # b1   (resident)
                pl.BlockSpec((None, H, tn),
                             lambda c, j: (c * ng + j, 0, 0)),       # W2 tile (bf16, contiguous)
                pl.BlockSpec((T, 1, tn), lambda c, j: (0, 0, 0)),    # b2   (resident, packed)
                pl.BlockSpec((tn, N3),
                             lambda c, j: (c * ng + j, 0)),          # W3 row tile (bf16)
            ],
            out_specs=pl.BlockSpec((None, M, N3), lambda c, j: (c, 0, 0)),
            scratch_shapes=[
                pltpu.VMEM((M, H), jnp.bfloat16),    # h1 = relu6(x@W1+b1)
                pltpu.VMEM((M, N3), jnp.float32),    # per-split layer-3 accumulator
            ],
        ),
        compiler_params=pltpu.CompilerParams(
            # Leading split axis is independent (shards across v7x cores);
            # the tile axis carries h1/acc and must run sequentially.
            dimension_semantics=("parallel", "arbitrary"),
        ),
        cost_estimate=pl.CostEstimate(
            flops=flops, transcendentals=0, bytes_accessed=bytes_accessed),
    )(x, w1, b1, w2p, b2p, w3)

    # Cross-split combine + bias + ReLU6 (nonlinearity must follow the sum).
    y = jnp.clip(jnp.sum(partials, axis=0) + b3, 0.0, 6.0)
    return y.astype(x.dtype)


@jax.jit
def env_encoder_forward(x, packed):
    return env_encoder_pallas(x, packed)


# --------------------------- params / reference -------------------------------
def init_env_encoder_params(key, in_dim, out_dim, dtype=jnp.float32):
    """PyTorch-style uniform(-1/sqrt(fan_in), 1/sqrt(fan_in)) init, W as (in, out)."""
    dims = [(in_dim, HIDDEN), (HIDDEN, HIDDEN), (HIDDEN, out_dim)]
    params = []
    for (fan_in, fan_out) in dims:
        key, kw, kb = jax.random.split(key, 3)
        bound = 1.0 / jnp.sqrt(jnp.array(fan_in, dtype))
        w = jax.random.uniform(kw, (fan_in, fan_out), dtype, -bound, bound)
        b = jax.random.uniform(kb, (fan_out,), dtype, -bound, bound)
        params.append((w, b))
    return params


def env_encoder_reference(x, params):
    h = x
    for (w, b) in params:
        h = jnp.clip(jnp.dot(h, w, precision=jax.lax.Precision.HIGHEST) + b, 0.0, 6.0)
    return h


# ----------------------------------- main -------------------------------------
if __name__ == "__main__":
    batch = 8
    in_dim = 16
    out_dim = 128

    key = jax.random.PRNGKey(0)
    key, kx = jax.random.split(key)
    x = jax.random.normal(kx, (batch, in_dim), jnp.float32)
    params = init_env_encoder_params(key, in_dim, out_dim)
    packed = pack_env_encoder_params(params)   # one-time bf16 cast + W2 repack

    y = env_encoder_forward(x, packed)
    jax.block_until_ready(y)

    # correctness checks
    assert y.shape == (batch, out_dim)
    assert bool(jnp.all(y >= 0.0)) and bool(jnp.all(y <= 6.0))   # ReLU6 range
    y_ref = env_encoder_reference(x, params)
    # bf16 weight streaming vs f32 HIGHEST reference: error is ~1e-3 for these
    # 1/sqrt(fan_in)-scaled weights; 1e-1 leaves ample margin.
    err = float(jnp.max(jnp.abs(y - y_ref)))
    assert err < 1e-1, f"max abs error {err}"

    print("KERNEL_OK")
</pallas_src>

<mosaic_0001>
module attributes {stable_mosaic.version = 11 : i64} {
  func.func @_env_encoder_kernel(%arg0: i32, %arg1: i32, %arg2: memref<8x16xf32, #tpu.memory_space<vmem>>, %arg3: memref<16x2048xf32, #tpu.memory_space<vmem>>, %arg4: memref<1x2048xf32, #tpu.memory_space<vmem>>, %arg5: memref<1x2048x1024xbf16, #tpu.memory_space<vmem>>, %arg6: memref<2x1x1024xf32, #tpu.memory_space<vmem>>, %arg7: memref<1024x128xbf16, #tpu.memory_space<vmem>>, %arg8: memref<1x8x128xf32, #tpu.memory_space<vmem>>, %arg9: memref<8x2048xbf16, #tpu.memory_space<vmem>>, %arg10: memref<8x128xf32, #tpu.memory_space<vmem>>) attributes {dimension_semantics = [#tpu.dimension_semantics<parallel>, #tpu.dimension_semantics<arbitrary>], iteration_bounds = array<i64: 2, 1>, scalar_prefetch = 0 : i64, scratch_operands = 2 : i64, tpu.core_type = #tpu.core_type<tc>, window_params = [{pipeline_mode = #tpu.pipeline_mode<synchronous>, transform_indices = @transform_0, window_bounds = array<i64: 8, 16>}, {pipeline_mode = #tpu.pipeline_mode<synchronous>, transform_indices = @transform_1, window_bounds = array<i64: 16, 2048>}, {pipeline_mode = #tpu.pipeline_mode<synchronous>, transform_indices = @transform_2, window_bounds = array<i64: 1, 2048>}, {transform_indices = @transform_3, window_bounds = array<i64: 1, 2048, 1024>}, {pipeline_mode = #tpu.pipeline_mode<synchronous>, transform_indices = @transform_4, window_bounds = array<i64: 2, 1, 1024>}, {transform_indices = @transform_5, window_bounds = array<i64: 1024, 128>}, {transform_indices = @transform_6, window_bounds = array<i64: 1, 8, 128>}]} {
    %c1_i32 = arith.constant 1 : i32
    %0 = arith.muli %arg0, %c1_i32 : i32
    %1 = arith.addi %0, %arg1 : i32
    %c0_i32 = arith.constant 0 : i32
    %2 = arith.cmpi eq, %arg1, %c0_i32 : i32
    %3 = arith.extui %2 : i1 to i32
    %c0_i32_0 = arith.constant 0 : i32
    %4 = arith.cmpi ne, %3, %c0_i32_0 : i32
    scf.if %4 {
      %c0_18 = arith.constant 0 : index
      %c0_19 = arith.constant 0 : index
      %30 = vector.load %arg2[%c0_18, %c0_19] : memref<8x16xf32, #tpu.memory_space<vmem>>, vector<8x16xf32>
      %c0_20 = arith.constant 0 : index
      %c0_21 = arith.constant 0 : index
      %31 = vector.load %arg3[%c0_20, %c0_21] : memref<16x2048xf32, #tpu.memory_space<vmem>>, vector<16x2048xf32>
      %cst_22 = arith.constant dense<0.000000e+00> : vector<8x2048xf32>
      %32 = tpu.matmul %30, %31, %cst_22 {dimension_numbers = #tpu.dot_dimension_numbers<[1], [0], [0], [1], [0, 0, 1, 1], [], []>} : vector<8x16xf32>, vector<16x2048xf32>, vector<8x2048xf32> -> vector<8x2048xf32>
      %c0_23 = arith.constant 0 : index
      %c0_24 = arith.constant 0 : index
      %33 = vector.load %arg4[%c0_23, %c0_24] : memref<1x2048xf32, #tpu.memory_space<vmem>>, vector<1x2048xf32>
      %34 = vector.broadcast %33 : vector<1x2048xf32> to vector<8x2048xf32>
      %35 = arith.addf %32, %34 : vector<8x2048xf32>
      %cst_25 = arith.constant 0.000000e+00 : f32
      %cst_26 = arith.constant 6.000000e+00 : f32
      %36 = vector.broadcast %cst_25 : f32 to vector<8x2048xf32>
      %37 = arith.maximumf %36, %35 : vector<8x2048xf32>
      %38 = vector.broadcast %cst_26 : f32 to vector<8x2048xf32>
      %39 = arith.minimumf %38, %37 : vector<8x2048xf32>
      %40 = arith.truncf %39 : vector<8x2048xf32> to vector<8x2048xbf16>
      %c0_27 = arith.constant 0 : index
      %c0_28 = arith.constant 0 : index
      %41 = vector.load %arg9[%c0_27, %c0_28] : memref<8x2048xbf16, #tpu.memory_space<vmem>>, vector<8x2048xbf16>
      tpu.vector_store %arg9[%c0_27, %c0_28], %40 {strides = array<i32>} : memref<8x2048xbf16, #tpu.memory_space<vmem>>, vector<8x2048xbf16>,
    } else {
    }
    %c0 = arith.constant 0 : index
    %c0_1 = arith.constant 0 : index
    %5 = vector.load %arg9[%c0, %c0_1] : memref<8x2048xbf16, #tpu.memory_space<vmem>>, vector<8x2048xbf16>
    %c0_2 = arith.constant 0 : index
    %c0_3 = arith.constant 0 : index
    %c0_4 = arith.constant 0 : index
    %6 = vector.load %arg5[%c0_2, %c0_3, %c0_4] : memref<1x2048x1024xbf16, #tpu.memory_space<vmem>>, vector<1x2048x1024xbf16>
    %7 = vector.shape_cast %6 : vector<1x2048x1024xbf16> to vector<2048x1024xbf16>
    %cst = arith.constant dense<0.000000e+00> : vector<8x1024xf32>
    %8 = tpu.matmul %5, %7, %cst {dimension_numbers = #tpu.dot_dimension_numbers<[1], [0], [0], [1], [0, 0, 1, 1], [], []>} : vector<8x2048xbf16>, vector<2048x1024xbf16>, vector<8x1024xf32> -> vector<8x1024xf32>
    %9 = arith.index_cast %1 : i32 to index
    %c0_5 = arith.constant 0 : index
    %c0_6 = arith.constant 0 : index
    %10 = vector.load %arg6[%9, %c0_5, %c0_6] : memref<2x1x1024xf32, #tpu.memory_space<vmem>>, vector<1x1x1024xf32>
    %11 = vector.shape_cast %10 : vector<1x1x1024xf32> to vector<1x1024xf32>
    %12 = vector.broadcast %11 : vector<1x1024xf32> to vector<8x1024xf32>
    %13 = arith.addf %8, %12 : vector<8x1024xf32>
    %cst_7 = arith.constant 0.000000e+00 : f32
    %cst_8 = arith.constant 6.000000e+00 : f32
    %14 = vector.broadcast %cst_7 : f32 to vector<8x1024xf32>
    %15 = arith.maximumf %14, %13 : vector<8x1024xf32>
    %16 = vector.broadcast %cst_8 : f32 to vector<8x1024xf32>
    %17 = arith.minimumf %16, %15 : vector<8x1024xf32>
    %18 = arith.truncf %17 : vector<8x1024xf32> to vector<8x1024xbf16>
    %c0_9 = arith.constant 0 : index
    %c0_10 = arith.constant 0 : index
    %19 = vector.load %arg7[%c0_9, %c0_10] : memref<1024x128xbf16, #tpu.memory_space<vmem>>, vector<1024x128xbf16>
    %cst_11 = arith.constant dense<0.000000e+00> : vector<8x128xf32>
    %20 = tpu.matmul %18, %19, %cst_11 {dimension_numbers = #tpu.dot_dimension_numbers<[1], [0], [0], [1], [0, 0, 1, 1], [], []>} : vector<8x1024xbf16>, vector<1024x128xbf16>, vector<8x128xf32> -> vector<8x128xf32>
    %c0_i32_12 = arith.constant 0 : i32
    %21 = arith.cmpi eq, %arg1, %c0_i32_12 : i32
    %22 = arith.extui %21 : i1 to i32
    %c0_i32_13 = arith.constant 0 : i32
    %23 = arith.cmpi ne, %22, %c0_i32_13 : i32
    scf.if %23 {
      %c0_18 = arith.constant 0 : index
      %c0_19 = arith.constant 0 : index
      %30 = vector.load %arg10[%c0_18, %c0_19] : memref<8x128xf32, #tpu.memory_space<vmem>>, vector<8x128xf32>
      tpu.vector_store %arg10[%c0_18, %c0_19], %20 {strides = array<i32>} : memref<8x128xf32, #tpu.memory_space<vmem>>, vector<8x128xf32>,
    } else {
    }
    %c0_i32_14 = arith.constant 0 : i32
    %24 = arith.cmpi sgt, %arg1, %c0_i32_14 : i32
    %25 = arith.extui %24 : i1 to i32
    %c0_i32_15 = arith.constant 0 : i32
    %26 = arith.cmpi ne, %25, %c0_i32_15 : i32
    scf.if %26 {
      %c0_18 = arith.constant 0 : index
      %c0_19 = arith.constant 0 : index
      %30 = vector.load %arg10[%c0_18, %c0_19] : memref<8x128xf32, #tpu.memory_space<vmem>>, vector<8x128xf32>
      %31 = arith.addf %30, %20 : vector<8x128xf32>
      %c0_20 = arith.constant 0 : index
      %c0_21 = arith.constant 0 : index
      %32 = vector.load %arg10[%c0_20, %c0_21] : memref<8x128xf32, #tpu.memory_space<vmem>>, vector<8x128xf32>
      tpu.vector_store %arg10[%c0_20, %c0_21], %31 {strides = array<i32>} : memref<8x128xf32, #tpu.memory_space<vmem>>, vector<8x128xf32>,
    } else {
    }
    %c0_i32_16 = arith.constant 0 : i32
    %27 = arith.cmpi eq, %arg1, %c0_i32_16 : i32
    %28 = arith.extui %27 : i1 to i32
    %c0_i32_17 = arith.constant 0 : i32
    %29 = arith.cmpi ne, %28, %c0_i32_17 : i32
    scf.if %29 {
      %c0_18 = arith.constant 0 : index
      %c0_19 = arith.constant 0 : index
      %30 = vector.load %arg10[%c0_18, %c0_19] : memref<8x128xf32, #tpu.memory_space<vmem>>, vector<8x128xf32>
      %c0_20 = arith.constant 0 : index
      %c0_21 = arith.constant 0 : index
      %c0_22 = arith.constant 0 : index
      %31 = vector.load %arg8[%c0_20, %c0_21, %c0_22] : memref<1x8x128xf32, #tpu.memory_space<vmem>>, vector<1x8x128xf32>
      %32 = vector.shape_cast %31 : vector<1x8x128xf32> to vector<8x128xf32>
      %33 = vector.shape_cast %30 : vector<8x128xf32> to vector<1x8x128xf32>
      tpu.vector_store %arg8[%c0_20, %c0_21, %c0_22], %33 {strides = array<i32>} : memref<1x8x128xf32, #tpu.memory_space<vmem>>, vector<1x8x128xf32>,
    } else {
    }
    return
  }
  func.func @transform_0(%arg0: i32, %arg1: i32) -> (i32, i32) {
    %c0_i32 = arith.constant 0 : i32
    %c0_i32_0 = arith.constant 0 : i32
    %c0_i32_1 = arith.constant 0 : i32
    return %c0_i32, %c0_i32_0 : i32, i32
  }
  func.func @transform_1(%arg0: i32, %arg1: i32) -> (i32, i32) {
    %c0_i32 = arith.constant 0 : i32
    %c0_i32_0 = arith.constant 0 : i32
    %c0_i32_1 = arith.constant 0 : i32
    return %c0_i32, %c0_i32_0 : i32, i32
  }
  func.func @transform_2(%arg0: i32, %arg1: i32) -> (i32, i32) {
    %c0_i32 = arith.constant 0 : i32
    %c0_i32_0 = arith.constant 0 : i32
    %c0_i32_1 = arith.constant 0 : i32
    return %c0_i32, %c0_i32_0 : i32, i32
  }
  func.func @transform_3(%arg0: i32, %arg1: i32) -> (i32, i32, i32) {
    %c1_i32 = arith.constant 1 : i32
    %0 = arith.muli %arg0, %c1_i32 : i32
    %1 = arith.addi %0, %arg1 : i32
    %c0_i32 = arith.constant 0 : i32
    %c0_i32_0 = arith.constant 0 : i32
    %c0_i32_1 = arith.constant 0 : i32
    return %1, %c0_i32, %c0_i32_0 : i32, i32, i32
  }
  func.func @transform_4(%arg0: i32, %arg1: i32) -> (i32, i32, i32) {
    %c0_i32 = arith.constant 0 : i32
    %c0_i32_0 = arith.constant 0 : i32
    %c0_i32_1 = arith.constant 0 : i32
    %c0_i32_2 = arith.constant 0 : i32
    return %c0_i32, %c0_i32_0, %c0_i32_1 : i32, i32, i32
  }
  func.func @transform_5(%arg0: i32, %arg1: i32) -> (i32, i32) {
    %c1_i32 = arith.constant 1 : i32
    %0 = arith.muli %arg0, %c1_i32 : i32
    %1 = arith.addi %0, %arg1 : i32
    %c0_i32 = arith.constant 0 : i32
    %c0_i32_0 = arith.constant 0 : i32
    return %1, %c0_i32 : i32, i32
  }
  func.func @transform_6(%arg0: i32, %arg1: i32) -> (i32, i32, i32) {
    %c0_i32 = arith.constant 0 : i32
    %c0_i32_0 = arith.constant 0 : i32
    %c0_i32_1 = arith.constant 0 : i32
    return %arg0, %c0_i32, %c0_i32_0 : i32, i32, i32
  }
}

</mosaic_0001>

<bundles_post_ra>
// kernel: env_encoder_forward.1
= control target key start
LH: loop header
LB: loop body
LE: loop exit
PB: predicated region body
PF: predicated region fallthrough
CT: control target
= control target key end

     0   :  { %s18035_s0 = inlined_call_operand.hbm [shape: f32[8,16], index: 0, kind: input, shape index: {}]   ;;  %s18036_s1 = inlined_call_operand.hbm [shape: f32[16,2048], index: 1, kind: input, shape index: {}]   ;;  %s18037_s2 = inlined_call_operand.hbm [shape: f32[1,2048], index: 2, kind: input, shape index: {}]   ;;  %s18038_s3 = inlined_call_operand.hbm [shape: bf16[2,2048,1024], index: 3, kind: input, shape index: {}]   ;;  %s18039_s4 = inlined_call_operand.hbm [shape: f32[2,1,1024], index: 4, kind: input, shape index: {}]   ;;  %s18040_s5 = inlined_call_operand.hbm [shape: bf16[2048,128], index: 5, kind: input, shape index: {}]   ;;  %s18041_s6 = inlined_call_operand.vmem [shape: f32[2,8,128], index: 6, kind: output, shape index: {}]  }
   0x1   :  { %18043 = sst [smem:[#allocation19_spill]] %s18035_s0 }
   0x2   :  { %18044 = sst [smem:[#allocation20_spill]] %s18036_s1 }
   0x3   :  { %18045 = sst [smem:[#allocation21_spill]] %s18037_s2 }
   0x4   :  { %18046 = sst [smem:[#allocation22_spill]] %s18038_s3 }
   0x5   :  { %18047 = sst [smem:[#allocation23_spill]] %s18039_s4 }
   0x6   :  { %11 = vsyncpa [#allocation5], 0 }
   0x7   :  { %12 = vsyncpa [#allocation7], 0 }
   0x8   :  { %13 = vsyncpa [#allocation10], 0 }
   0x9   :  { %15 = vsyncpa [#allocation10 + $0x1], 0 }
   0xa   :  { %16 = vsyncpa [#allocation13], 0 }
   0xb   :  { %18 = vsyncpa [#allocation13 + $0x1], 0  ;;  %s15422_s21 = smov 0   ;;  %s15424_s22 = smov 0  }
   0xc   :  { %s15426_s23 = smov 0   ;;  %s15428_s24 = smov 0  }
   0xd   :  { %s15430_s25 = smov 0   ;;  %s15432_s26 = smov 0  }
   0xe LB: > { %s18042_s27 = sadd.s32 4294967295, %s15374_s26   ;;  %p121_p0 = scmp.ne.s32.totalorder %s15358_s22, %s15354_s21  ;;  %s15374_s26 = sphi %s15432_s26, %s24_s26   ;;  %s15370_s25 = sphi %s15430_s25, %s18064_s25   ;;  %s15366_s24 = sphi %s15428_s24, %s18063_s24   ;;  %s15362_s23 = sphi %s15426_s23, %s18062_s23   ;;  %s15358_s22 = sphi %s15424_s22, %s18061_s22   ;;  %s15354_s21 = sphi %s15422_s21, %s18060_s21  }
   0xf   : > { %p15454_p1 = scmp.eq.s32.totalorder %s18042_s27, 0  ;;  %p9534_p2 = scmp.ge.s32.totalorder %s15374_s26, 1 }
  0x10   : > { %p207_p3 = scmp.lt.s32.totalorder %s15374_s26, 3  ;;  %s18050_s1 = sld [smem:[#allocation20_spill]] }
  0x11   : > { %p15462_p4 = por %p15454_p1, %p121_p0  ;;  %s15376_s10 = smov [#allocation6]  }
  0x12   : > { %p15469_p5 = pnand %p9534_p2, %p207_p3  ;;  %s232_s11 = sshll.u32 %s15376_s10, 4  ;;  %s233_s11 = int_to_ptr.vmem [resolvable:$true] %s232_s11 }
  0x13   : > { %s18053_s4 = sld [smem:[#allocation23_spill]]  ;;  %s15377_s16 = smov 2048  }
  0x14   : > { %p15035_p6 = pneg %p15469_p5  ;;  %s15378_s17 = smov 128  }
  0x15   : > { %s15379_s18 = smov [#allocation11]   ;;  %s15380_s20 = smov 8  }
  0x16   : > { %s230_s8 = sshll.u32 %s18050_s1, 4  ;;  %p15477_p7 = pnand %p15035_p6, %p15454_p1  ;;  %s231_s8 = int_to_ptr.hbm [resolvable:$true] %s230_s8 }
  0x17   : > { %s258_s19 = sshll.u32 %s15379_s18, 4  ;;  %s18054_s0 = sld [smem:[#allocation19_spill]]  ;;  %s259_s19 = int_to_ptr.vmem [resolvable:$true] %s258_s19 }
  0x18   : > { %15041 = dma.hbm_to_vmem [thread:$0]  (!%p15477_p7), %s231_s8, 4096, %s233_s11, [#allocation7], %s15377_s16, %s15377_s16, %s15378_s17  }
  0x19   : > { %s256_s15 = sshll.u32 %s18053_s4, 4  ;;  %s15381_s10 = smov [#allocation4]   ;;  %s257_s15 = int_to_ptr.hbm [resolvable:$true] %s256_s15 }
  0x1a   : > { %15047 = dma.hbm_to_vmem [thread:$0]  (!%p15477_p7), %s257_s15, 256, %s259_s19, [#allocation10], %s15378_s17, %s15378_s17, %s15380_s20  }
  0x1b   : > { %s221_s13 = sshll.u32 %s15381_s10, 4  ;;  %s18055_s2 = sld [smem:[#allocation21_spill]]  ;;  %s222_s13 = int_to_ptr.vmem [resolvable:$true] %s221_s13 }
  0x1c   : > { %s15382_s15 = smov [#allocation8]   ;;  %s36_s17 = sadd.s32 1, %s15370_s25 }
  0x1d   : > { %s219_s7 = sshll.u32 %s18054_s0, 4  ;;  %s247_s16 = sshll.u32 %s15382_s15, 4  ;;  %s220_s7 = int_to_ptr.hbm [resolvable:$true] %s219_s7  ;;  %s248_s16 = int_to_ptr.vmem [resolvable:$true] %s247_s16 }
  0x1e   : > { %15038 = dma.hbm_to_vmem [thread:$0]  (!%p15477_p7), %s220_s7, 128, %s222_s13, [#allocation5]  }
  0x1f   : > { %p38_p8 = scmp.ge.s32.totalorder %s36_s17, 2  ;;  %s108_s18 = sadd.s32 1, %s15362_s23 }
  0x20   : > { %p115_p9 = scmp.ne.s32.totalorder %s15362_s23, %s15358_s22  ;;  %p116_p10 = scmp.eq.s32.totalorder %s15374_s26, 0 }
  0x21   : > { %s245_s14 = sshll.u32 %s18055_s2, 4  ;;  %s18066_s17 = smov (%p38_p8, %s36_s17), 0  ;;  %s246_s14 = int_to_ptr.hbm [resolvable:$true] %s245_s14 }
  0x22   : > { %15044 = dma.hbm_to_vmem [thread:$0]  (!%p15477_p7), %s246_s14, 256, %s248_s16, [#allocation7]  }
  0x23   : > { %p15505_p11 = por %p116_p10, %p115_p9  ;;  %p15059_p12 = scmp.lt.s32.totalorder %s15374_s26, 2 }
  0x24   : > { %s105_s20 = ssub.s32 %s15370_s25, %s18066_s17  ;;  %s272_s21 = sand.u32 1, %s15374_s26  }
  0x25   : > { %p106_p13 = scmp.eq.s32.totalorder %s105_s20, 0  ;;  %s15514_s12 = sand.u32 1, %s15362_s23  }
  0x26   : > { %s13925_s30 = sshll.u32 %s15370_s25, 13  ;;  %s9540_s10 = sshll.u32 %s15514_s12, 13 }
  0x27   : > { %s15518_s7 = scalar_select %p106_p13, %s15362_s23, %s108_s18  }
  0x28   : > { %s18057_s3 = sld [smem:[#allocation22_spill]]  ;;  %s276_s15 = scalar_lea.vmem [#allocation9], %s9540_s10 }
  0x29   : > { %s285_s16 = sshll.u32 %s276_s15, 4  ;;  %p15528_p0 = pnand %p15059_p12, %p15505_p11  ;;  %s286_s16 = int_to_ptr.vmem [resolvable:$true] %s285_s16 }
  0x2a   : > { %s273_s18 = scalar_lea.sflag [#allocation10], %s272_s21  ;;  %s15383_s27 = smov 512  }
  0x2b   : > { %s15384_s0 = smov 32   ;;  %s13926_s13 = sshll.u32 %s15370_s25, 9 }
  0x2c   : > { %s296_s2 = scalar_lea.sflag [#allocation13], %s15514_s12  ;;  %s15386_s4 = smov 4  }
  0x2e   : > { %s282_s11 = scalar_lea.hbm %s18057_s3, %s13925_s30  ;;  %s9543_s30 = sshll.u32 %s15514_s12, 9 }
  0x2f   : > { %s283_s14 = sshll.u32 %s282_s11, 4  ;;  %s305_s11 = scalar_lea.hbm %s18040_s5, %s13926_s13  ;;  %s284_s14 = int_to_ptr.hbm [resolvable:$true] %s283_s14 }
  0x30   : > { %15051 = dma.hbm_to_vmem [thread:$0]  (!%p15528_p0), %s284_s14, 131072, %s286_s16, %s273_s18, %s15383_s27, %s15383_s27, %s15384_s0  }
  0x31   : > { %s306_s15 = sshll.u32 %s305_s11, 4  ;;  %s299_s19 = scalar_lea.vmem [#allocation12], %s9543_s30  ;;  %s307_s15 = int_to_ptr.hbm [resolvable:$true] %s306_s15 }
  0x32   : > { %s308_s1 = sshll.u32 %s299_s19, 4  ;;  %s15385_s3 = smov 64   ;;  %s309_s1 = int_to_ptr.vmem [resolvable:$true] %s308_s1 }
  0x33   : > { %15054 = dma.hbm_to_vmem [thread:$0]  (!%p15528_p0), %s307_s15, 8192, %s309_s1, %s296_s2, %s15385_s3, %s15385_s3, %s15386_s4  }
  0x34   : > { %320 = sbr.rel (%p15469_p5) target bundleno = 2178 (0x882), region = 44 }
  0x39   : > { %15333 = dma.done.wait (%p15454_p1), [#allocation5], 128  }
  0x3a   : > { %15335 = vsyncadd (%p15454_p1), [#allocation5], 4294967168 }
  0x3b   : > { %15337 = dma.done.wait (%p15454_p1), [#allocation7], 4352  }
  0x3c   : > { %15339 = vsyncadd (%p15454_p1), [#allocation7], 4294962944  ;;  %s18059_s0 = sadd.s32 4294967295, %s15374_s26   ;;  %s339_s2 = sand.u32 1, %s15358_s22  }
  0x3d   : > { %s337_s1 = sand.u32 1, %s18059_s0   ;;  %s9550_s3 = sshll.u32 %s339_s2, 13 }
  0x3e   : > { %s338_s4 = scalar_lea.sflag [#allocation10], %s337_s1  ;;  %s15555_s27 = scalar_lea.vmem [#allocation9], %s9550_s3 }
  0x3f   : > { %15341 = dma.done.wait (%p15462_p4), %s338_s4, 131072  }
  0x40   : > { %15343 = vsyncadd (%p15462_p4), %s338_s4, 4294836224 }
  0x41   : > { %15345 = dma.done.wait (%p15454_p1), [#allocation10], 256  }
  0x42   : > { %15347 = vsyncadd (%p15454_p1), [#allocation10], 4294967040  ;;  %s9552_s9 = sshll.u32 %s339_s2, 9  ;;  %s353_s21 = scalar_lea.sflag [#allocation13], %s339_s2 }
  0x43   : > { %s15565_s12 = scalar_lea.vmem [#allocation12], %s9552_s9 }
  0x44   : > { %15349 = dma.done.wait (%p15462_p4), %s353_s21, 8192  }
  0x45   : > { %15351 = vsyncadd (%p15462_p4), %s353_s21, 4294959104  ;;  %v419_v0 = vld [vmem:[#allocation6 + $0x80] sm:$0xff]  ;;  %v420_v1 = vld [vmem:[#allocation6 + $0x88] sm:$0xff]  ;;  %vm471_vm0 = vcmask 130048   ;;  %s9570_s28 = sshll.u32 %s15366_s24, 3  ;;  %p393_p1 = scmp.lt.s32.totalorder %s15366_s24, 1 }
  0x46   : > { %v421_v2 = vld [vmem:[#allocation6 + $0x90] sm:$0xff]  ;;  %489 = vmatpush.msra.mxu0 %v419_v0  ;;  %509 = vmatpush.msra.mxu1 %v420_v1  ;;  %v422_v3 = vld [vmem:[#allocation6 + $0x98] sm:$0xff]  ;;  %v403_v4 = vld [vmem:[#allocation6] sm:$0xff]  ;;  %s16078_s29 = scalar_lea.vmem [#allocation11], %s9570_s28 }
  0x47   : > { %v404_v5 = vld [vmem:[#allocation6 + $0x8] sm:$0xff]  ;;  %529 = vmatpush.msra.mxu2 %v421_v2  ;;  %549 = vmatpush.msra.mxu3 %v422_v3  ;;  %v405_v6 = vld [vmem:[#allocation6 + $0x10] sm:$0xff]  ;;  %v406_v7 = vld [vmem:[#allocation6 + $0x18] sm:$0xff]  ;;  %s18068_s24 = smov (!%p393_p1, %s15366_s24), 1 }
  0x48   : > { %v15571_v8 = vld [vmem:[#allocation4] sm:$0xff]  ;;  %490 = vmatpush.msra.mxu0 %v403_v4  ;;  %510 = vmatpush.msra.mxu1 %v404_v5  ;;  %v423_v9 = vld [vmem:[#allocation6 + $0xa0] sm:$0xff]  ;;  %v424_v10 = vld [vmem:[#allocation6 + $0xa8] sm:$0xff]  ;;  %s9553_s14 = sshll.u32 %s18068_s24, 3 }
  0x49   : > { %530 = vmatpush.msra.mxu2 %v405_v6  ;;  %550 = vmatpush.msra.mxu3 %v406_v7  ;;  %v425_v11 = vld [vmem:[#allocation6 + $0xb0] sm:$0xff]  ;;  %v426_v12 = vld [vmem:[#allocation6 + $0xb8] sm:$0xff]  ;;  %v407_v13 = vld [vmem:[#allocation6 + $0x20] sm:$0xff]  ;;  %s396_s18 = scalar_lea.vmem %s18041_s6, %s9553_s14 }
  0x4a   : > { %9554 = vmatmul.msk.f32.vlgmr.msra.gmra.mxu0 %vm471_vm0, %v15571_v8  ;;  %9555 = vmatmul.msk.f32.vlgmr.msra.gmra.mxu1 %vm471_vm0, %v15571_v8  ;;  %v408_v14 = vld [vmem:[#allocation6 + $0x28] sm:$0xff]  ;;  %v409_v15 = vld [vmem:[#allocation6 + $0x30] sm:$0xff]  ;;  %v410_v16 = vld [vmem:[#allocation6 + $0x38] sm:$0xff] }
  0x4b   : > { %9556 = vmatmul.msk.f32.vlgmr.msra.gmra.mxu2 %vm471_vm0, %v15571_v8  ;;  %9557 = vmatmul.msk.f32.vlgmr.msra.gmra.mxu3 %vm471_vm0, %v15571_v8  ;;  %v427_v17 = vld [vmem:[#allocation6 + $0xc0] sm:$0xff]  ;;  %v428_v18 = vld [vmem:[#allocation6 + $0xc8] sm:$0xff]  ;;  %v429_v19 = vld [vmem:[#allocation6 + $0xd0] sm:$0xff] }
  0x4c   : > { %569 = vmatpush.msrb.mxu0 %v423_v9  ;;  %589 = vmatpush.msrb.mxu1 %v424_v10  ;;  %v430_v20 = vld [vmem:[#allocation6 + $0xd8] sm:$0xff]  ;;  %v411_v21 = vld [vmem:[#allocation6 + $0x40] sm:$0xff]  ;;  %v412_v22 = vld [vmem:[#allocation6 + $0x48] sm:$0xff] }
  0x4d   : > { %609 = vmatpush.msrb.mxu2 %v425_v11  ;;  %629 = vmatpush.msrb.mxu3 %v426_v12  ;;  %v413_v23 = vld [vmem:[#allocation6 + $0x50] sm:$0xff]  ;;  %v414_v24 = vld [vmem:[#allocation6 + $0x58] sm:$0xff]  ;;  %v431_v25 = vld [vmem:[#allocation6 + $0xe0] sm:$0xff] }
  0x4e   : > { %570 = vmatpush.msrb.mxu0 %v407_v13  ;;  %590 = vmatpush.msrb.mxu1 %v408_v14  ;;  %v432_v26 = vld [vmem:[#allocation6 + $0xe8] sm:$0xff]  ;;  %v433_v27 = vld [vmem:[#allocation6 + $0xf0] sm:$0xff]  ;;  %v434_v28 = vld [vmem:[#allocation6 + $0xf8] sm:$0xff] }
  0x4f   : > { %610 = vmatpush.msrb.mxu2 %v409_v15  ;;  %630 = vmatpush.msrb.mxu3 %v410_v16  ;;  %v415_v29 = vld [vmem:[#allocation6 + $0x60] sm:$0xff]  ;;  %v416_v30 = vld [vmem:[#allocation6 + $0x68] sm:$0xff]  ;;  %v417_v31 = vld [vmem:[#allocation6 + $0x70] sm:$0xff] }
  0x50   : > { %649 = vmatpush.msra.mxu0 %v427_v17  ;;  %669 = vmatpush.msra.mxu1 %v428_v18  ;;  %v418_v32 = vld [vmem:[#allocation6 + $0x78] sm:$0xff]  ;;  %v9797_v33 = vld [vmem:[%s15555_s27 + $0x1c0] sm:$0xf] }
  0x51   : > { %689 = vmatpush.msra.mxu2 %v429_v19  ;;  %709 = vmatpush.msra.mxu3 %v430_v20  ;;  %v13987_v34 = vld [vmem:[%s15555_s27 + $0x1dc] sm:$0xf0] }
  0x52   : > { %9558 = vmatmul.msk.f32.vlgmr.msrb.gmra.mxu0 %vm471_vm0, %v15571_v8  ;;  %9559 = vmatmul.msk.f32.vlgmr.msrb.gmra.mxu1 %vm471_vm0, %v15571_v8  ;;  %v10053_v35 = vld [vmem:[%s15555_s27 + $0x3c0] sm:$0xf]  ;;  %v9798_v41 = vor.u32 %v13987_v34, %v9797_v33 }
  0x53   : > { %9560 = vmatmul.msk.f32.vlgmr.msrb.gmra.mxu2 %vm471_vm0, %v15571_v8  ;;  %9561 = vmatmul.msk.f32.vlgmr.msrb.gmra.mxu3 %vm471_vm0, %v15571_v8  ;;  %v14051_v36 = vld [vmem:[%s15555_s27 + $0x3dc] sm:$0xf0] }
  0x54   : > { %650 = vmatpush.msra.mxu0 %v411_v21  ;;  %670 = vmatpush.msra.mxu1 %v412_v22  ;;  %v10309_v37 = vld [vmem:[%s15555_s27 + $0x5c0] sm:$0xf]  ;;  %v10054_v42 = vor.u32 %v14051_v36, %v10053_v35 }
  0x55   : > { %690 = vmatpush.msra.mxu2 %v413_v23  ;;  %710 = vmatpush.msra.mxu3 %v414_v24  ;;  %v14115_v38 = vld [vmem:[%s15555_s27 + $0x5dc] sm:$0xf0] }
  0x56   : > { %729 = vmatpush.msrb.mxu0 %v431_v25  ;;  %749 = vmatpush.msrb.mxu1 %v432_v26  ;;  %v10565_v39 = vld [vmem:[%s15555_s27 + $0x7c0] sm:$0xf]  ;;  %v10310_v47 = vor.u32 %v14115_v38, %v10309_v37 }
  0x57   : > { %v14179_v40 = vld [vmem:[%s15555_s27 + $0x7dc] sm:$0xf0]  ;;  %769 = vmatpush.msrb.mxu2 %v433_v27  ;;  %789 = vmatpush.msrb.mxu3 %v434_v28 }
  0x58   : > { %730 = vmatpush.msrb.mxu0 %v415_v29  ;;  %750 = vmatpush.msrb.mxu1 %v416_v30  ;;  %v9765_v43 = vld [vmem:[%s15555_s27 + $0x180] sm:$0xf]  ;;  %v10566_v48 = vor.u32 %v14179_v40, %v10565_v39 }
  0x59   : > { %v13979_v44 = vld [vmem:[%s15555_s27 + $0x19c] sm:$0xf0]  ;;  %770 = vmatpush.msrb.mxu2 %v417_v31  ;;  %790 = vmatpush.msrb.mxu3 %v418_v32 }
  0x5a   : > { %v10021_v45 = vld [vmem:[%s15555_s27 + $0x380] sm:$0xf]  ;;  %9562 = vmatmul.msk.f32.vlgmr.msra.gmra.mxu0 %vm471_vm0, %v15571_v8  ;;  %9563 = vmatmul.msk.f32.vlgmr.msra.gmra.mxu1 %vm471_vm0, %v15571_v8  ;;  %v9766_v53 = vor.u32 %v13979_v44, %v9765_v43 }
  0x5b   : > { %v14043_v46 = vld [vmem:[%s15555_s27 + $0x39c] sm:$0xf0]  ;;  %9564 = vmatmul.msk.f32.vlgmr.msra.gmra.mxu2 %vm471_vm0, %v15571_v8  ;;  %9565 = vmatmul.msk.f32.vlgmr.msra.gmra.mxu3 %vm471_vm0, %v15571_v8 }
  0x5c   : > { %v10277_v49 = vld [vmem:[%s15555_s27 + $0x580] sm:$0xf]  ;;  %7071 = vmatpush.bf16.msra.mxu0 %v9798_v41  ;;  %7084 = vmatpush.bf16.msra.mxu1 %v10054_v42  ;;  %v10022_v54 = vor.u32 %v14043_v46, %v10021_v45 }
  0x5d   : > { %v14107_v50 = vld [vmem:[%s15555_s27 + $0x59c] sm:$0xf0]  ;;  %7097 = vmatpush.bf16.msra.mxu2 %v10310_v47  ;;  %7110 = vmatpush.bf16.msra.mxu3 %v10566_v48 }
  0x5e   : > { %v10533_v51 = vld [vmem:[%s15555_s27 + $0x780] sm:$0xf]  ;;  %v10278_v59 = vor.u32 %v14107_v50, %v10277_v49 }
  0x5f   : > { %v14171_v52 = vld [vmem:[%s15555_s27 + $0x79c] sm:$0xf0] }
  0x60   : > { %v9733_v55 = vld [vmem:[%s15555_s27 + $0x140] sm:$0xf]  ;;  %v10534_v60 = vor.u32 %v14171_v52, %v10533_v51  ;;  %7072 = vmatpush.bf16.msra.mxu0 %v9766_v53  ;;  %7085 = vmatpush.bf16.msra.mxu1 %v10022_v54 }
  0x61   : > { %v13971_v56 = vld [vmem:[%s15555_s27 + $0x15c] sm:$0xf0]  ;;  %7098 = vmatpush.bf16.msra.mxu2 %v10278_v59 }
  0x62   : > { %v9989_v57 = vld [vmem:[%s15555_s27 + $0x340] sm:$0xf]  ;;  %v9734_v1 = vor.u32 %v13971_v56, %v9733_v55  ;;  %7111 = vmatpush.bf16.msra.mxu3 %v10534_v60  ;;  %9566 = vmatmul.msk.f32.vlgmr.msrb.gmra.mxu0 %vm471_vm0, %v15571_v8 }
  0x63   : > { %v14035_v58 = vld [vmem:[%s15555_s27 + $0x35c] sm:$0xf0]  ;;  %9567 = vmatmul.msk.f32.vlgmr.msrb.gmra.mxu1 %vm471_vm0, %v15571_v8  ;;  %9568 = vmatmul.msk.f32.vlgmr.msrb.gmra.mxu2 %vm471_vm0, %v15571_v8 }
  0x64   : > { %v10245_v61 = vld [vmem:[%s15555_s27 + $0x540] sm:$0xf]  ;;  %v9990_v2 = vor.u32 %v14035_v58, %v9989_v57  ;;  %9569 = vmatmul.msk.f32.vlgmr.msrb.gmra.mxu3 %vm471_vm0, %v15571_v8  ;;  %7073 = vmatpush.bf16.msra.mxu0 %v9734_v1 }
  0x65   : > { %v14099_v62 = vld [vmem:[%s15555_s27 + $0x55c] sm:$0xf0] }
  0x66   : > { %v10501_v63 = vld [vmem:[%s15555_s27 + $0x740] sm:$0xf]  ;;  %v10246_v7 = vor.u32 %v14099_v62, %v10245_v61  ;;  %7086 = vmatpush.bf16.msra.mxu1 %v9990_v2 }
  0x67   : > { %v14163_v0 = vld [vmem:[%s15555_s27 + $0x75c] sm:$0xf0] }
  0x68   : > { %v9701_v3 = vld [vmem:[%s15555_s27 + $0x100] sm:$0xf]  ;;  %v10502_v9 = vor.u32 %v14163_v0, %v10501_v63  ;;  %7099 = vmatpush.bf16.msra.mxu2 %v10246_v7 }
  0x69   : > { %v13963_v4 = vld [vmem:[%s15555_s27 + $0x11c] sm:$0xf0] }
  0x6a   : > { %v9957_v5 = vld [vmem:[%s15555_s27 + $0x300] sm:$0xf]  ;;  %v9702_v14 = vor.u32 %v13963_v4, %v9701_v3  ;;  %7112 = vmatpush.bf16.msra.mxu3 %v10502_v9 }
  0x6b   : > { %v14027_v6 = vld [vmem:[%s15555_s27 + $0x31c] sm:$0xf0] }
  0x6c   : > { %v10213_v10 = vld [vmem:[%s15555_s27 + $0x500] sm:$0xf]  ;;  %v9958_v15 = vor.u32 %v14027_v6, %v9957_v5  ;;  %7074 = vmatpush.bf16.msra.mxu0 %v9702_v14 }
  0x6d   : > { %v14091_v11 = vld [vmem:[%s15555_s27 + $0x51c] sm:$0xf0] }
  0x6e   : > { %v10469_v12 = vld [vmem:[%s15555_s27 + $0x700] sm:$0xf]  ;;  %v10214_v20 = vor.u32 %v14091_v11, %v10213_v10  ;;  %7087 = vmatpush.bf16.msra.mxu1 %v9958_v15 }
  0x6f   : > { %v14155_v13 = vld [vmem:[%s15555_s27 + $0x71c] sm:$0xf0] }
  0x70   : > { %v9669_v16 = vld [vmem:[%s15555_s27 + $0xc0] sm:$0xf]  ;;  %v10470_v21 = vor.u32 %v14155_v13, %v10469_v12  ;;  %7100 = vmatpush.bf16.msra.mxu2 %v10214_v20 }
  0x71   : > { %v13955_v17 = vld [vmem:[%s15555_s27 + $0xdc] sm:$0xf0] }
  0x72   : > { %v9925_v18 = vld [vmem:[%s15555_s27 + $0x2c0] sm:$0xf]  ;;  %v9670_v25 = vor.u32 %v13955_v17, %v9669_v16  ;;  %7113 = vmatpush.bf16.msra.mxu3 %v10470_v21 }
  0x73   : > { %v14019_v19 = vld [vmem:[%s15555_s27 + $0x2dc] sm:$0xf0] }
  0x74   : > { %v10181_v22 = vld [vmem:[%s15555_s27 + $0x4c0] sm:$0xf]  ;;  %v9926_v26 = vor.u32 %v14019_v19, %v9925_v18  ;;  %7075 = vmatpush.bf16.msra.mxu0 %v9670_v25 }
  0x75   : > { %v14083_v8 = vld [vmem:[%s15555_s27 + $0x4dc] sm:$0xf0] }
  0x76   : > { %v10437_v23 = vld [vmem:[%s15555_s27 + $0x6c0] sm:$0xf]  ;;  %v10182_v31 = vor.u32 %v14083_v8, %v10181_v22  ;;  %7088 = vmatpush.bf16.msra.mxu1 %v9926_v26 }
  0x77   : > { %v14147_v24 = vld [vmem:[%s15555_s27 + $0x6dc] sm:$0xf0] }
  0x78   : > { %v9637_v27 = vld [vmem:[%s15555_s27 + $0x80] sm:$0xf]  ;;  %v10438_v32 = vor.u32 %v14147_v24, %v10437_v23  ;;  %7101 = vmatpush.bf16.msra.mxu2 %v10182_v31 }
  0x79   : > { %v13947_v28 = vld [vmem:[%s15555_s27 + $0x9c] sm:$0xf0] }
  0x7a   : > { %v9893_v29 = vld [vmem:[%s15555_s27 + $0x280] sm:$0xf]  ;;  %v9638_v37 = vor.u32 %v13947_v28, %v9637_v27  ;;  %7114 = vmatpush.bf16.msra.mxu3 %v10438_v32 }
  0x7b   : > { %v14011_v30 = vld [vmem:[%s15555_s27 + $0x29c] sm:$0xf0] }
  0x7c   : > { %v10149_v33 = vld [vmem:[%s15555_s27 + $0x480] sm:$0xf]  ;;  %v9894_v38 = vor.u32 %v14011_v30, %v9893_v29  ;;  %7076 = vmatpush.bf16.msra.mxu0 %v9638_v37 }
  0x7d   : > { %v14075_v34 = vld [vmem:[%s15555_s27 + $0x49c] sm:$0xf0] }
  0x7e   : > { %v10405_v35 = vld [vmem:[%s15555_s27 + $0x680] sm:$0xf]  ;;  %v10150_v43 = vor.u32 %v14075_v34, %v10149_v33  ;;  %7089 = vmatpush.bf16.msra.mxu1 %v9894_v38 }
  0x7f   : > { %v14139_v36 = vld [vmem:[%s15555_s27 + $0x69c] sm:$0xf0] }
  0x80   : > { %v9605_v39 = vld [vmem:[%s15555_s27 + $0x40] sm:$0xf]  ;;  %v10406_v44 = vor.u32 %v14139_v36, %v10405_v35  ;;  %7102 = vmatpush.bf16.msra.mxu2 %v10150_v43 }
  0x81   : > { %v13939_v40 = vld [vmem:[%s15555_s27 + $0x5c] sm:$0xf0] }
  0x82   : > { %v9861_v41 = vld [vmem:[%s15555_s27 + $0x240] sm:$0xf]  ;;  %v9606_v50 = vor.u32 %v13939_v40, %v9605_v39  ;;  %7115 = vmatpush.bf16.msra.mxu3 %v10406_v44 }
  0x83   : > { %v14003_v42 = vld [vmem:[%s15555_s27 + $0x25c] sm:$0xf0] }
  0x84   : > { %v10117_v45 = vld [vmem:[%s15555_s27 + $0x440] sm:$0xf]  ;;  %v9862_v51 = vor.u32 %v14003_v42, %v9861_v41  ;;  %7077 = vmatpush.bf16.msra.mxu0 %v9606_v50 }
  0x85   : > { %v14067_v46 = vld [vmem:[%s15555_s27 + $0x45c] sm:$0xf0] }
  0x86   : > { %v10373_v47 = vld [vmem:[%s15555_s27 + $0x640] sm:$0xf]  ;;  %v10118_v58 = vor.u32 %v14067_v46, %v10117_v45  ;;  %7090 = vmatpush.bf16.msra.mxu1 %v9862_v51 }
  0x87   : > { %v14131_v48 = vld [vmem:[%s15555_s27 + $0x65c] sm:$0xf0] }
  0x88   : > { %v9573_v49 = vld [vmem:[%s15555_s27] sm:$0xf]  ;;  %v10374_v59 = vor.u32 %v14131_v48, %v10373_v47  ;;  %7103 = vmatpush.bf16.msra.mxu2 %v10118_v58 }
  0x89   : > { %v13931_v52 = vld [vmem:[%s15555_s27 + $0x1c] sm:$0xf0] }
  0x8a   : > { %v9829_v53 = vld [vmem:[%s15555_s27 + $0x200] sm:$0xf]  ;;  %v9574_v2 = vor.u32 %v13931_v52, %v9573_v49  ;;  %7116 = vmatpush.bf16.msra.mxu3 %v10374_v59 }
  0x8b   : > { %v13995_v54 = vld [vmem:[%s15555_s27 + $0x21c] sm:$0xf0] }
  0x8c   : > { %v10821_v55 = vld [vmem:[%s15555_s27 + $0x9c0] sm:$0xf]  ;;  %v9830_v3 = vor.u32 %v13995_v54, %v9829_v53  ;;  %7078 = vmatpush.bf16.msra.mxu0 %v9574_v2 }
  0x8d   : > { %v14243_v56 = vld [vmem:[%s15555_s27 + $0x9dc] sm:$0xf0] }
  0x8e   : > { %v11077_v57 = vld [vmem:[%s15555_s27 + $0xbc0] sm:$0xf]  ;;  %v10822_v7 = vor.u32 %v14243_v56, %v10821_v55  ;;  %7091 = vmatpush.bf16.msra.mxu1 %v9830_v3 }
  0x8f   : > { %v14307_v60 = vld [vmem:[%s15555_s27 + $0xbdc] sm:$0xf0] }
  0x90   : > { %v10085_v61 = vld [vmem:[%s15555_s27 + $0x400] sm:$0xf]  ;;  %v11078_v9 = vor.u32 %v14307_v60, %v11077_v57  ;;  %7123 = vmatpush.bf16.msrb.mxu0 %v10822_v7 }
  0x91   : > { %v14059_v62 = vld [vmem:[%s15555_s27 + $0x41c] sm:$0xf0] }
  0x92   : > { %v10341_v63 = vld [vmem:[%s15555_s27 + $0x600] sm:$0xf]  ;;  %v10086_v14 = vor.u32 %v14059_v62, %v10085_v61  ;;  %7136 = vmatpush.bf16.msrb.mxu1 %v11078_v9 }
  0x93   : > { %v14123_v0 = vld [vmem:[%s15555_s27 + $0x61c] sm:$0xf0] }
  0x94   : > { %v11333_v1 = vld [vmem:[%s15555_s27 + $0xdc0] sm:$0xf]  ;;  %v10342_v15 = vor.u32 %v14123_v0, %v10341_v63  ;;  %7104 = vmatpush.bf16.msra.mxu2 %v10086_v14 }
  0x95   : > { %v14371_v4 = vld [vmem:[%s15555_s27 + $0xddc] sm:$0xf0] }
  0x96   : > { %v11589_v5 = vld [vmem:[%s15555_s27 + $0xfc0] sm:$0xf]  ;;  %v11334_v16 = vor.u32 %v14371_v4, %v11333_v1  ;;  %7117 = vmatpush.bf16.msra.mxu3 %v10342_v15 }
  0x97   : > { %v14435_v6 = vld [vmem:[%s15555_s27 + $0xfdc] sm:$0xf0] }
  0x98   : > { %v10789_v10 = vld [vmem:[%s15555_s27 + $0x980] sm:$0xf]  ;;  %v11590_v17 = vor.u32 %v14435_v6, %v11589_v5  ;;  %7149 = vmatpush.bf16.msrb.mxu2 %v11334_v16 }
  0x99   : > { %v14235_v11 = vld [vmem:[%s15555_s27 + $0x99c] sm:$0xf0] }
  0x9a   : > { %v11045_v12 = vld [vmem:[%s15555_s27 + $0xb80] sm:$0xf]  ;;  %v10790_v22 = vor.u32 %v14235_v11, %v10789_v10  ;;  %7162 = vmatpush.bf16.msrb.mxu3 %v11590_v17 }
  0x9b   : > { %v14299_v13 = vld [vmem:[%s15555_s27 + $0xb9c] sm:$0xf0] }
  0x9c   : > { %v11301_v18 = vld [vmem:[%s15555_s27 + $0xd80] sm:$0xf]  ;;  %v11046_v8 = vor.u32 %v14299_v13, %v11045_v12  ;;  %7124 = vmatpush.bf16.msrb.mxu0 %v10790_v22 }
  0x9d   : > { %v14363_v19 = vld [vmem:[%s15555_s27 + $0xd9c] sm:$0xf0] }
  0x9e   : > { %v11557_v20 = vld [vmem:[%s15555_s27 + $0xf80] sm:$0xf]  ;;  %v11302_v27 = vor.u32 %v14363_v19, %v11301_v18  ;;  %7137 = vmatpush.bf16.msrb.mxu1 %v11046_v8 }
  0x9f   : > { %v14427_v21 = vld [vmem:[%s15555_s27 + $0xf9c] sm:$0xf0] }
  0xa0   : > { %v10757_v23 = vld [vmem:[%s15555_s27 + $0x940] sm:$0xf]  ;;  %v11558_v28 = vor.u32 %v14427_v21, %v11557_v20  ;;  %7150 = vmatpush.bf16.msrb.mxu2 %v11302_v27 }
  0xa1   : > { %v14227_v24 = vld [vmem:[%s15555_s27 + $0x95c] sm:$0xf0] }
  0xa2   : > { %v11013_v25 = vld [vmem:[%s15555_s27 + $0xb40] sm:$0xf]  ;;  %v10758_v33 = vor.u32 %v14227_v24, %v10757_v23  ;;  %7163 = vmatpush.bf16.msrb.mxu3 %v11558_v28 }
  0xa3   : > { %v14291_v26 = vld [vmem:[%s15555_s27 + $0xb5c] sm:$0xf0] }
  0xa4   : > { %v11269_v29 = vld [vmem:[%s15555_s27 + $0xd40] sm:$0xf]  ;;  %v11014_v34 = vor.u32 %v14291_v26, %v11013_v25  ;;  %7125 = vmatpush.bf16.msrb.mxu0 %v10758_v33  ;;  %v15733_v33 = vld [vmem:[#allocation8] sm:$0xff] }
  0xa5   : > { %v14355_v30 = vld [vmem:[%s15555_s27 + $0xd5c] sm:$0xf0] }
  0xa6   : > { %v11525_v31 = vld [vmem:[%s15555_s27 + $0xf40] sm:$0xf]  ;;  %v11270_v39 = vor.u32 %v14355_v30, %v11269_v29  ;;  %7138 = vmatpush.bf16.msrb.mxu1 %v11014_v34  ;;  %v439_v34 = vperm.slane %v15733_v33, 0 }
  0xa7   : > { %v14419_v32 = vld [vmem:[%s15555_s27 + $0xf5c] sm:$0xf0] }
  0xa8   : > { %v10725_v35 = vld [vmem:[%s15555_s27 + $0x900] sm:$0xf]  ;;  %v11526_v40 = vor.u32 %v14419_v32, %v11525_v31  ;;  %7151 = vmatpush.bf16.msrb.mxu2 %v11270_v39 }
  0xa9   : > { %v14219_v36 = vld [vmem:[%s15555_s27 + $0x91c] sm:$0xf0] }
  0xaa   : > { %v10981_v37 = vld [vmem:[%s15555_s27 + $0xb00] sm:$0xf]  ;;  %v10726_v41 = vor.u32 %v14219_v36, %v10725_v35  ;;  %7164 = vmatpush.bf16.msrb.mxu3 %v11526_v40  ;;  %v440_v35 = vperm.slane %v15733_v33, 1 }
  0xab   : > { %v14283_v38 = vld [vmem:[%s15555_s27 + $0xb1c] sm:$0xf0] }
  0xac   : > { %v10982_v42 = vor.u32 %v14283_v38, %v10981_v37  ;;  %7126 = vmatpush.bf16.msrb.mxu0 %v10726_v41  ;;  %v10693_v43 = vld [vmem:[%s15555_s27 + $0x8c0] sm:$0xf] }
  0xad   : > { %v14211_v44 = vld [vmem:[%s15555_s27 + $0x8dc] sm:$0xf0] }
  0xae   : > { %7139 = vmatpush.bf16.msrb.mxu1 %v10982_v42  ;;  %v10949_v45 = vld [vmem:[%s15555_s27 + $0xac0] sm:$0xf]  ;;  %v10694_v46 = vor.u32 %v14211_v44, %v10693_v43  ;;  %v441_v42 = vperm.slane %v15733_v33, 2  ;;  %v442_v43 = vperm.slane %v15733_v33, 3 }
  0xaf   : > { %v14275_v47 = vld [vmem:[%s15555_s27 + $0xadc] sm:$0xf0] }
  0xb0   : > { %v10950_v48 = vor.u32 %v14275_v47, %v10949_v45  ;;  %v11237_v49 = vld [vmem:[%s15555_s27 + $0xd00] sm:$0xf]  ;;  %7127 = vmatpush.bf16.msrb.mxu0 %v10694_v46  ;;  %v443_v46 = vperm.slane %v15733_v33, 4  ;;  %v444_v47 = vperm.slane %v15733_v33, 5 }
  0xb1   : > { %v14347_v50 = vld [vmem:[%s15555_s27 + $0xd1c] sm:$0xf0] }
  0xb2   : > { %v11238_v51 = vor.u32 %v14347_v50, %v11237_v49  ;;  %v11493_v52 = vld [vmem:[%s15555_s27 + $0xf00] sm:$0xf]  ;;  %7140 = vmatpush.bf16.msrb.mxu1 %v10950_v48 }
  0xb3   : > { %v14411_v53 = vld [vmem:[%s15555_s27 + $0xf1c] sm:$0xf0] }
  0xb4   : > { %v11494_v54 = vor.u32 %v14411_v53, %v11493_v52  ;;  %v10661_v55 = vld [vmem:[%s15555_s27 + $0x880] sm:$0xf]  ;;  %7152 = vmatpush.bf16.msrb.mxu2 %v11238_v51 }
  0xb5   : > { %v14203_v56 = vld [vmem:[%s15555_s27 + $0x89c] sm:$0xf0] }
  0xb6   : > { %v10917_v57 = vld [vmem:[%s15555_s27 + $0xa80] sm:$0xf]  ;;  %v10662_v58 = vor.u32 %v14203_v56, %v10661_v55  ;;  %7165 = vmatpush.bf16.msrb.mxu3 %v11494_v54 }
  0xb7   : > { %v14267_v59 = vld [vmem:[%s15555_s27 + $0xa9c] sm:$0xf0] }
  0xb8   : > { %v10918_v60 = vor.u32 %v14267_v59, %v10917_v57  ;;  %v11205_v61 = vld [vmem:[%s15555_s27 + $0xcc0] sm:$0xf]  ;;  %7128 = vmatpush.bf16.msrb.mxu0 %v10662_v58 }
  0xb9   : > { %v14339_v62 = vld [vmem:[%s15555_s27 + $0xcdc] sm:$0xf0] }
  0xba   : > { %v11461_v63 = vld [vmem:[%s15555_s27 + $0xec0] sm:$0xf]  ;;  %v11206_v0 = vor.u32 %v14339_v62, %v11205_v61  ;;  %7141 = vmatpush.bf16.msrb.mxu1 %v10918_v60 }
  0xbb   : > { %v14403_v1 = vld [vmem:[%s15555_s27 + $0xedc] sm:$0xf0] }
  0xbc   : > { %v11462_v2 = vor.u32 %v14403_v1, %v11461_v63  ;;  %v10629_v3 = vld [vmem:[%s15555_s27 + $0x840] sm:$0xf]  ;;  %7153 = vmatpush.bf16.msrb.mxu2 %v11206_v0 }
  0xbd   : > { %v14195_v4 = vld [vmem:[%s15555_s27 + $0x85c] sm:$0xf0] }
  0xbe   : > { %v10630_v5 = vor.u32 %v14195_v4, %v10629_v3  ;;  %v10885_v6 = vld [vmem:[%s15555_s27 + $0xa40] sm:$0xf]  ;;  %7166 = vmatpush.bf16.msrb.mxu3 %v11462_v2 }
  0xbf   : > { %v14259_v7 = vld [vmem:[%s15555_s27 + $0xa5c] sm:$0xf0] }
  0xc0   : > { %v10886_v9 = vor.u32 %v14259_v7, %v10885_v6  ;;  %v11173_v10 = vld [vmem:[%s15555_s27 + $0xc80] sm:$0xf]  ;;  %7129 = vmatpush.bf16.msrb.mxu0 %v10630_v5 }
  0xc1   : > { %v14331_v11 = vld [vmem:[%s15555_s27 + $0xc9c] sm:$0xf0] }
  0xc2   : > { %v11429_v12 = vld [vmem:[%s15555_s27 + $0xe80] sm:$0xf]  ;;  %v11174_v13 = vor.u32 %v14331_v11, %v11173_v10  ;;  %7142 = vmatpush.bf16.msrb.mxu1 %v10886_v9 }
  0xc3   : > { %v14395_v14 = vld [vmem:[%s15555_s27 + $0xe9c] sm:$0xf0] }
  0xc4   : > { %v11430_v15 = vor.u32 %v14395_v14, %v11429_v12  ;;  %v10597_v16 = vld [vmem:[%s15555_s27 + $0x800] sm:$0xf]  ;;  %7154 = vmatpush.bf16.msrb.mxu2 %v11174_v13 }
  0xc5   : > { %v14187_v17 = vld [vmem:[%s15555_s27 + $0x81c] sm:$0xf0] }
  0xc6   : > { %v10853_v18 = vld [vmem:[%s15555_s27 + $0xa00] sm:$0xf]  ;;  %v10598_v19 = vor.u32 %v14187_v17, %v10597_v16  ;;  %7167 = vmatpush.bf16.msrb.mxu3 %v11430_v15 }
  0xc7   : > { %v14251_v20 = vld [vmem:[%s15555_s27 + $0xa1c] sm:$0xf0]  ;;  %v492_v36 = vpop.f32.mrf.mxu0  ;;  %v512_v37 = vpop.f32.mrf.mxu1 }
  0xc8   : > { %v10854_v21 = vor.u32 %v14251_v20, %v10853_v18  ;;  %v11141_v22 = vld [vmem:[%s15555_s27 + $0xc40] sm:$0xf]  ;;  %7130 = vmatpush.bf16.msrb.mxu0 %v10598_v19  ;;  %v493_v38 = vadd.f32 %v492_v36, %v439_v34  ;;  %v513_v39 = vadd.f32 %v512_v37, %v440_v35  ;;  %v445_v20 = vperm.slane %v15733_v33, 6 }
  0xc9   : > { %v14323_v8 = vld [vmem:[%s15555_s27 + $0xc5c] sm:$0xf0] }
  0xca   : > { %v11397_v23 = vld [vmem:[%s15555_s27 + $0xe40] sm:$0xf]  ;;  %7143 = vmatpush.bf16.msrb.mxu1 %v10854_v21  ;;  %v11142_v25 = vor.u32 %v14323_v8, %v11141_v22  ;;  %v795_v40 = vmax.f32 %v493_v38, 0.0  ;;  %v796_v41 = vmax.f32 %v513_v39, 0.0  ;;  %v446_v21 = vperm.slane %v15733_v33, 7 }
  0xcb   : > { %v14387_v24 = vld [vmem:[%s15555_s27 + $0xe5c] sm:$0xf0] }
  0xcc   : > { %v11398_v26 = vor.u32 %v14387_v24, %v11397_v23  ;;  %7155 = vmatpush.bf16.msrb.mxu2 %v11142_v25  ;;  %v11109_v27 = vld [vmem:[%s15555_s27 + $0xc00] sm:$0xf]  ;;  %v811_v44 = vmin.f32 %v795_v40, 6.0  ;;  %v812_v45 = vmin.f32 %v796_v41, 6.0 }
  0xcd   : > { %v14315_v28 = vld [vmem:[%s15555_s27 + $0xc1c] sm:$0xf0] }
  0xce   : > { %7168 = vmatpush.bf16.msrb.mxu3 %v11398_v26  ;;  %v11365_v29 = vld [vmem:[%s15555_s27 + $0xe00] sm:$0xf]  ;;  %v11110_v31 = vor.u32 %v14315_v28, %v11109_v27  ;;  %v827_v49 = vpack.c.bf16 %v812_v45, %v811_v44  ;;  %v532_v50 = vpop.f32.mrf.mxu2  ;;  %v552_v51 = vpop.f32.mrf.mxu3  ;;  %v15765_v28 = vld [vmem:[#allocation8 + $0x8] sm:$0xff] }
  0xcf   : > { %v14379_v30 = vld [vmem:[%s15555_s27 + $0xe1c] sm:$0xf0]  ;;  %v533_v55 = vadd.f32 %v532_v50, %v441_v42  ;;  %v553_v56 = vadd.f32 %v552_v51, %v442_v43  ;;  %v572_v57 = vpop.f32.mrf.mxu0  ;;  %v592_v58 = vpop.f32.mrf.mxu1  ;;  %v447_v44 = vperm.slane %v15765_v28, 0  ;;  %v448_v45 = vperm.slane %v15765_v28, 1 }
  0xd0   : > { %v11366_v32 = vor.u32 %v14379_v30, %v11365_v29  ;;  %7156 = vmatpush.bf16.msrb.mxu2 %v11110_v31  ;;  %v11845_v48 = vld [vmem:[%s15555_s27 + $0x11c0] sm:$0xf]  ;;  %v1903_v59 = vunpack.c.l.b16 %v827_v49  ;;  %v1904_v60 = vunpack.c.h.b16 %v827_v49  ;;  %v573_v61 = vadd.f32 %v572_v57, %v443_v46 }
  0xd1   : > { %v14499_v52 = vld [vmem:[%s15555_s27 + $0x11dc] sm:$0xf0]  ;;  %v593_v62 = vadd.f32 %v592_v58, %v444_v47  ;;  %v797_v3 = vmax.f32 %v533_v55, 0.0  ;;  %v798_v4 = vmax.f32 %v553_v56, 0.0 }
  0xd2   : > { %7169 = vmatpush.bf16.msrb.mxu3 %v11366_v32  ;;  %v12101_v53 = vld [vmem:[%s15555_s27 + $0x13c0] sm:$0xf]  ;;  %v11846_v5 = vor.u32 %v14499_v52, %v11845_v48  ;;  %v15752_v11 = vpack.c.b16 %v1903_v59, %v1903_v59  ;;  %v15754_v12 = vpack.c.b16 %v1904_v60, %v1904_v60  ;;  %v799_v13 = vmax.f32 %v573_v61, 0.0 }
  0xd3   : > { %v14563_v54 = vld [vmem:[%s15555_s27 + $0x13dc] sm:$0xf0]  ;;  %v800_v14 = vmax.f32 %v593_v62, 0.0  ;;  %v813_v17 = vmin.f32 %v797_v3, 6.0  ;;  %v814_v18 = vmin.f32 %v798_v4, 6.0 }
  0xd4   : > { %v11813_v63 = vld [vmem:[%s15555_s27 + $0x1180] sm:$0xf]  ;;  %v12102_v6 = vor.u32 %v14563_v54, %v12101_v53  ;;  %7079 = vmatmul.bf16.vlgmr.msra.gmra.mxu0 %v15752_v11  ;;  %7092 = vmatmul.bf16.vlgmr.msra.gmra.mxu1 %v15754_v12  ;;  %v815_v22 = vmin.f32 %v799_v13, 6.0 }
  0xd5   : > { %v14491_v0 = vld [vmem:[%s15555_s27 + $0x119c] sm:$0xf0]  ;;  %v816_v8 = vmin.f32 %v800_v14, 6.0  ;;  %v828_v23 = vpack.c.bf16 %v814_v18, %v813_v17  ;;  %7175 = vmatpush.bf16.msra.mxu0 %v11846_v5  ;;  %v449_v14 = vperm.slane %v15765_v28, 2 }
  0xd6   : > { %v12069_v1 = vld [vmem:[%s15555_s27 + $0x1380] sm:$0xf]  ;;  %7188 = vmatpush.bf16.msra.mxu1 %v12102_v6  ;;  %v11814_v24 = vor.u32 %v14491_v0, %v11813_v63  ;;  %v612_v32 = vpop.f32.mrf.mxu2  ;;  %v632_v33 = vpop.f32.mrf.mxu3 }
  0xd7   : > { %v14555_v2 = vld [vmem:[%s15555_s27 + $0x139c] sm:$0xf0]  ;;  %v1905_v34 = vunpack.c.l.b16 %v828_v23  ;;  %v1906_v35 = vunpack.c.h.b16 %v828_v23  ;;  %v613_v36 = vadd.f32 %v612_v32, %v445_v20  ;;  %v633_v37 = vadd.f32 %v632_v33, %v446_v21  ;;  %v652_v54 = vpop.f32.mrf.mxu0  ;;  %v672_v55 = vpop.f32.mrf.mxu1 }
  0xd8   : > { %v12357_v7 = vld [vmem:[%s15555_s27 + $0x15c0] sm:$0xf]  ;;  %v12070_v25 = vor.u32 %v14555_v2, %v12069_v1  ;;  %v829_v40 = vpack.c.bf16 %v816_v8, %v815_v22  ;;  %v653_v3 = vadd.f32 %v652_v54, %v447_v44  ;;  %v673_v4 = vadd.f32 %v672_v55, %v448_v45 }
  0xd9   : > { %v14627_v9 = vld [vmem:[%s15555_s27 + $0x15dc] sm:$0xf0]  ;;  %v15773_v46 = vpack.c.b16 %v1905_v34, %v1905_v34  ;;  %v15775_v47 = vpack.c.b16 %v1906_v35, %v1906_v35  ;;  %7176 = vmatpush.bf16.msra.mxu0 %v11814_v24  ;;  %v801_v48 = vmax.f32 %v613_v36, 0.0  ;;  %v802_v49 = vmax.f32 %v633_v37, 0.0 }
  0xda   : > { %v12613_v10 = vld [vmem:[%s15555_s27 + $0x17c0] sm:$0xf]  ;;  %v12358_v29 = vor.u32 %v14627_v9, %v12357_v7  ;;  %7189 = vmatpush.bf16.msra.mxu1 %v12070_v25  ;;  %v1907_v62 = vunpack.c.l.b16 %v829_v40  ;;  %v1908_v5 = vunpack.c.h.b16 %v829_v40  ;;  %v803_v25 = vmax.f32 %v653_v3, 0.0 }
  0xdb   : > { %v14691_v15 = vld [vmem:[%s15555_s27 + $0x17dc] sm:$0xf0]  ;;  %7105 = vmatmul.bf16.vlgmr.msra.gmra.mxu2 %v15773_v46  ;;  %7118 = vmatmul.bf16.vlgmr.msra.gmra.mxu3 %v15775_v47  ;;  %v817_v56 = vmin.f32 %v801_v48, 6.0  ;;  %v818_v57 = vmin.f32 %v802_v49, 6.0 }
  0xdc   : > { %v11781_v16 = vld [vmem:[%s15555_s27 + $0x1140] sm:$0xf]  ;;  %v12614_v30 = vor.u32 %v14691_v15, %v12613_v10  ;;  %7201 = vmatpush.bf16.msra.mxu2 %v12358_v29  ;;  %v450_v15 = vperm.slane %v15765_v28, 3  ;;  %v15795_v22 = vpack.c.b16 %v1907_v62, %v1907_v62 }
  0xdd   : > { %v14483_v19 = vld [vmem:[%s15555_s27 + $0x115c] sm:$0xf0]  ;;  %v830_v9 = vpack.c.bf16 %v818_v57, %v817_v56 }
  0xde   : > { %v12037_v26 = vld [vmem:[%s15555_s27 + $0x1340] sm:$0xf]  ;;  %v11782_v31 = vor.u32 %v14483_v19, %v11781_v16  ;;  %7214 = vmatpush.bf16.msra.mxu3 %v12614_v30  ;;  %v692_v20 = vpop.f32.mrf.mxu2  ;;  %v712_v21 = vpop.f32.mrf.mxu3 }
  0xdf   : > { %v14547_v27 = vld [vmem:[%s15555_s27 + $0x135c] sm:$0xf0]  ;;  %v1909_v32 = vunpack.c.l.b16 %v830_v9  ;;  %v1910_v33 = vunpack.c.h.b16 %v830_v9  ;;  %v693_v36 = vadd.f32 %v692_v20, %v449_v14  ;;  %v713_v37 = vadd.f32 %v712_v21, %v450_v15 }
  0xe0   : > { %v12325_v38 = vld [vmem:[%s15555_s27 + $0x1580] sm:$0xf]  ;;  %v12038_v41 = vor.u32 %v14547_v27, %v12037_v26  ;;  %7177 = vmatpush.bf16.msra.mxu0 %v11782_v31  ;;  %v804_v26 = vmax.f32 %v673_v4, 0.0  ;;  %v15799_v27 = vpack.c.b16 %v1908_v5, %v1908_v5 }
  0xe1   : > { %v14619_v39 = vld [vmem:[%s15555_s27 + $0x159c] sm:$0xf0]  ;;  %v805_v56 = vmax.f32 %v693_v36, 0.0  ;;  %v806_v57 = vmax.f32 %v713_v37, 0.0 }
  0xe2   : > { %v12581_v42 = vld [vmem:[%s15555_s27 + $0x1780] sm:$0xf]  ;;  %v12326_v58 = vor.u32 %v14619_v39, %v12325_v38  ;;  %7190 = vmatpush.bf16.msra.mxu1 %v12038_v41 }
  0xe3   : > { %v14683_v43 = vld [vmem:[%s15555_s27 + $0x179c] sm:$0xf0]  ;;  %v822_v9 = vmin.f32 %v806_v57, 6.0 }
  0xe4   : > { %v11749_v50 = vld [vmem:[%s15555_s27 + $0x1100] sm:$0xf]  ;;  %v12582_v59 = vor.u32 %v14683_v43, %v12581_v42  ;;  %7202 = vmatpush.bf16.msra.mxu2 %v12326_v58  ;;  %7131 = vmatmul.bf16.vlgmr.msrb.gmra.mxu0 %v15795_v22  ;;  %v819_v42 = vmin.f32 %v803_v25, 6.0  ;;  %v820_v43 = vmin.f32 %v804_v26, 6.0 }
  0xe5   : > { %v14475_v51 = vld [vmem:[%s15555_s27 + $0x111c] sm:$0xf0]  ;;  %7144 = vmatmul.bf16.vlgmr.msrb.gmra.mxu1 %v15799_v27 }
  0xe6   : > { %v12005_v52 = vld [vmem:[%s15555_s27 + $0x1300] sm:$0xf]  ;;  %v11750_v60 = vor.u32 %v14475_v51, %v11749_v50  ;;  %7215 = vmatpush.bf16.msra.mxu3 %v12582_v59  ;;  %v831_v62 = vpack.c.bf16 %v820_v43, %v819_v42 }
  0xe7   : > { %v14539_v53 = vld [vmem:[%s15555_s27 + $0x131c] sm:$0xf0] }
  0xe8   : > { %v12293_v61 = vld [vmem:[%s15555_s27 + $0x1540] sm:$0xf]  ;;  %v12006_v63 = vor.u32 %v14539_v53, %v12005_v52  ;;  %7178 = vmatpush.bf16.msra.mxu0 %v11750_v60  ;;  %v15813_v52 = vpack.c.b16 %v1909_v32, %v1909_v32  ;;  %v15815_v53 = vpack.c.b16 %v1910_v33, %v1910_v33  ;;  %v1912_v26 = vunpack.c.h.b16 %v831_v62 }
  0xe9   : > { %v14611_v0 = vld [vmem:[%s15555_s27 + $0x155c] sm:$0xf0] }
  0xea   : > { %v12549_v1 = vld [vmem:[%s15555_s27 + $0x1740] sm:$0xf]  ;;  %v12294_v16 = vor.u32 %v14611_v0, %v12293_v61  ;;  %7191 = vmatpush.bf16.msra.mxu1 %v12006_v63 }
  0xeb   : > { %v14675_v2 = vld [vmem:[%s15555_s27 + $0x175c] sm:$0xf0]  ;;  %7157 = vmatmul.bf16.vlgmr.msrb.gmra.mxu2 %v15813_v52  ;;  %7170 = vmatmul.bf16.vlgmr.msrb.gmra.mxu3 %v15815_v53 }
  0xec   : > { %v11973_v6 = vld [vmem:[%s15555_s27 + $0x12c0] sm:$0xf]  ;;  %v12550_v17 = vor.u32 %v14675_v2, %v12549_v1  ;;  %7203 = vmatpush.bf16.msra.mxu2 %v12294_v16 }
  0xed   : > { %v14531_v7 = vld [vmem:[%s15555_s27 + $0x12dc] sm:$0xf0] }
  0xee   : > { %v11717_v10 = vld [vmem:[%s15555_s27 + $0x10c0] sm:$0xf]  ;;  %v11974_v8 = vor.u32 %v14531_v7, %v11973_v6  ;;  %7216 = vmatpush.bf16.msra.mxu3 %v12550_v17  ;;  %v821_v7 = vmin.f32 %v805_v56, 6.0 }
  0xef   : > { %v14467_v13 = vld [vmem:[%s15555_s27 + $0x10dc] sm:$0xf0] }
  0xf0   : > { %v12261_v18 = vld [vmem:[%s15555_s27 + $0x1500] sm:$0xf]  ;;  %v11718_v29 = vor.u32 %v14467_v13, %v11717_v10  ;;  %7192 = vmatpush.bf16.msra.mxu1 %v11974_v8 }
  0xf1   : > { %v14603_v19 = vld [vmem:[%s15555_s27 + $0x151c] sm:$0xf0] }
  0xf2   : > { %v12517_v23 = vld [vmem:[%s15555_s27 + $0x1700] sm:$0xf]  ;;  %v12262_v38 = vor.u32 %v14603_v19, %v12261_v18  ;;  %7179 = vmatpush.bf16.msra.mxu0 %v11718_v29  ;;  %v1911_v19 = vunpack.c.l.b16 %v831_v62  ;;  %v832_v29 = vpack.c.bf16 %v822_v9, %v821_v7 }
  0xf3   : > { %v14667_v24 = vld [vmem:[%s15555_s27 + $0x171c] sm:$0xf0] }
  0xf4   : > { %v11941_v30 = vld [vmem:[%s15555_s27 + $0x1280] sm:$0xf]  ;;  %v12518_v39 = vor.u32 %v14667_v24, %v12517_v23  ;;  %7204 = vmatpush.bf16.msra.mxu2 %v12262_v38  ;;  %v1914_v56 = vunpack.c.h.b16 %v832_v29 }
  0xf5   : > { %v14523_v31 = vld [vmem:[%s15555_s27 + $0x129c] sm:$0xf0] }
  0xf6   : > { %v11685_v34 = vld [vmem:[%s15555_s27 + $0x1080] sm:$0xf]  ;;  %v11942_v44 = vor.u32 %v14523_v31, %v11941_v30  ;;  %7217 = vmatpush.bf16.msra.mxu3 %v12518_v39  ;;  %v15843_v39 = vpack.c.b16 %v1911_v19, %v1911_v19 }
  0xf7   : > { %v14459_v35 = vld [vmem:[%s15555_s27 + $0x109c] sm:$0xf0] }
  0xf8   : > { %v12229_v40 = vld [vmem:[%s15555_s27 + $0x14c0] sm:$0xf]  ;;  %v11686_v49 = vor.u32 %v14459_v35, %v11685_v34  ;;  %7193 = vmatpush.bf16.msra.mxu1 %v11942_v44 }
  0xf9   : > { %v14595_v41 = vld [vmem:[%s15555_s27 + $0x14dc] sm:$0xf0] }
  0xfa   : > { %v12485_v45 = vld [vmem:[%s15555_s27 + $0x16c0] sm:$0xf]  ;;  %v12230_v58 = vor.u32 %v14595_v41, %v12229_v40  ;;  %7180 = vmatpush.bf16.msra.mxu0 %v11686_v49  ;;  %v15851_v49 = vpack.c.b16 %v1912_v26, %v1912_v26 }
  0xfb   : > { %v14659_v48 = vld [vmem:[%s15555_s27 + $0x16dc] sm:$0xf0] }
  0xfc   : > { %v11909_v50 = vld [vmem:[%s15555_s27 + $0x1240] sm:$0xf]  ;;  %v12486_v59 = vor.u32 %v14659_v48, %v12485_v45  ;;  %7205 = vmatpush.bf16.msra.mxu2 %v12230_v58 }
  0xfd   : > { %v14515_v51 = vld [vmem:[%s15555_s27 + $0x125c] sm:$0xf0] }
  0xfe   : > { %v11653_v54 = vld [vmem:[%s15555_s27 + $0x1040] sm:$0xf]  ;;  %v11910_v63 = vor.u32 %v14515_v51, %v11909_v50  ;;  %7218 = vmatpush.bf16.msra.mxu3 %v12486_v59  ;;  %v1913_v50 = vunpack.c.l.b16 %v832_v29 }
  0xff   : > { %v14451_v55 = vld [vmem:[%s15555_s27 + $0x105c] sm:$0xf0] }
 0x100   : > { %v12197_v60 = vld [vmem:[%s15555_s27 + $0x1480] sm:$0xf]  ;;  %v11654_v3 = vor.u32 %v14451_v55, %v11653_v54  ;;  %7194 = vmatpush.bf16.msra.mxu1 %v11910_v63 }
 0x101   : > { %v14587_v61 = vld [vmem:[%s15555_s27 + $0x149c] sm:$0xf0] }
 0x102   : > { %v12453_v0 = vld [vmem:[%s15555_s27 + $0x1680] sm:$0xf]  ;;  %v12198_v14 = vor.u32 %v14587_v61, %v12197_v60  ;;  %7181 = vmatpush.bf16.msra.mxu0 %v11654_v3 }
 0x103   : > { %v14651_v1 = vld [vmem:[%s15555_s27 + $0x169c] sm:$0xf0] }
 0x104   : > { %v11621_v2 = vld [vmem:[%s15555_s27 + $0x1000] sm:$0xf]  ;;  %v12454_v15 = vor.u32 %v14651_v1, %v12453_v0  ;;  %7206 = vmatpush.bf16.msra.mxu2 %v12198_v14  ;;  %v752_v14 = vpop.f32.mrf.mxu1 }
 0x105   : > { %v14443_v4 = vld [vmem:[%s15555_s27 + $0x101c] sm:$0xf0] }
 0x106   : > { %v11877_v5 = vld [vmem:[%s15555_s27 + $0x1200] sm:$0xf]  ;;  %v11622_v24 = vor.u32 %v14443_v4, %v11621_v2  ;;  %7219 = vmatpush.bf16.msra.mxu3 %v12454_v15  ;;  %v451_v4 = vperm.slane %v15765_v28, 4  ;;  %v15869_v15 = vpack.c.b16 %v1914_v56, %v1914_v56 }
 0x107   : > { %v14507_v6 = vld [vmem:[%s15555_s27 + $0x121c] sm:$0xf0] }
 0x108   : > { %v13125_v10 = vld [vmem:[%s15555_s27 + $0x1bc0] sm:$0xf]  ;;  %v11878_v20 = vor.u32 %v14507_v6, %v11877_v5  ;;  %7182 = vmatpush.bf16.msra.mxu0 %v11622_v24  ;;  %v452_v5 = vperm.slane %v15765_v28, 5  ;;  %v15864_v6 = vpack.c.b16 %v1913_v50, %v1913_v50 }
 0x109   : > { %v14819_v13 = vld [vmem:[%s15555_s27 + $0x1bdc] sm:$0xf0] }
 0x10a   : > { %v12869_v16 = vld [vmem:[%s15555_s27 + $0x19c0] sm:$0xf]  ;;  %v13126_v25 = vor.u32 %v14819_v13, %v13125_v10  ;;  %7195 = vmatpush.bf16.msra.mxu1 %v11878_v20  ;;  %v732_v13 = vpop.f32.mrf.mxu0  ;;  %v753_v26 = vadd.f32 %v752_v14, %v452_v5 }
 0x10b   : > { %v14755_v17 = vld [vmem:[%s15555_s27 + $0x19dc] sm:$0xf0]  ;;  %7183 = vmatmul.bf16.vlgmr.msra.gmra.mxu0 %v15843_v39 }
 0x10c   : > { %v12165_v18 = vld [vmem:[%s15555_s27 + $0x1440] sm:$0xf]  ;;  %v12870_v30 = vor.u32 %v14755_v17, %v12869_v16 }
 0x10d   : > { %v14579_v21 = vld [vmem:[%s15555_s27 + $0x145c] sm:$0xf0]  ;;  %7196 = vmatmul.bf16.vlgmr.msra.gmra.mxu1 %v15851_v49 }
 0x10e   : > { %v12421_v8 = vld [vmem:[%s15555_s27 + $0x1640] sm:$0xf]  ;;  %v12166_v34 = vor.u32 %v14579_v21, %v12165_v18  ;;  %7240 = vmatpush.bf16.msrb.mxu1 %v13126_v25  ;;  %7227 = vmatpush.bf16.msrb.mxu0 %v12870_v30  ;;  %v733_v25 = vadd.f32 %v732_v13, %v451_v4 }
 0x10f   : > { %v14643_v23 = vld [vmem:[%s15555_s27 + $0x165c] sm:$0xf0] }
 0x110   : > { %v12837_v31 = vld [vmem:[%s15555_s27 + $0x1980] sm:$0xf]  ;;  %v12422_v35 = vor.u32 %v14643_v23, %v12421_v8  ;;  %7207 = vmatpush.bf16.msra.mxu2 %v12166_v34  ;;  %v453_v34 = vperm.slane %v15765_v28, 6 }
 0x111   : > { %v13093_v32 = vld [vmem:[%s15555_s27 + $0x1b80] sm:$0xf] }
 0x112   : > { %v14811_v33 = vld [vmem:[%s15555_s27 + $0x1b9c] sm:$0xf0]  ;;  %7220 = vmatpush.bf16.msra.mxu3 %v12422_v35  ;;  %v454_v35 = vperm.slane %v15765_v28, 7 }
 0x113   : > { %v14747_v36 = vld [vmem:[%s15555_s27 + $0x199c] sm:$0xf0]  ;;  %v13094_v43 = vor.u32 %v14811_v33, %v13093_v32 }
 0x114   : > { %v12133_v37 = vld [vmem:[%s15555_s27 + $0x1400] sm:$0xf]  ;;  %v12838_v51 = vor.u32 %v14747_v36, %v12837_v31 }
 0x115   : > { %v14571_v38 = vld [vmem:[%s15555_s27 + $0x141c] sm:$0xf0]  ;;  %7241 = vmatpush.bf16.msrb.mxu1 %v13094_v43 }
 0x116   : > { %v12389_v40 = vld [vmem:[%s15555_s27 + $0x1600] sm:$0xf]  ;;  %v12134_v57 = vor.u32 %v14571_v38, %v12133_v37  ;;  %7228 = vmatpush.bf16.msrb.mxu0 %v12838_v51 }
 0x117   : > { %v14635_v41 = vld [vmem:[%s15555_s27 + $0x161c] sm:$0xf0] }
 0x118   : > { %v13381_v42 = vld [vmem:[%s15555_s27 + $0x1dc0] sm:$0xf]  ;;  %v12390_v58 = vor.u32 %v14635_v41, %v12389_v40  ;;  %7208 = vmatpush.bf16.msra.mxu2 %v12134_v57  ;;  %v772_v41 = vpop.f32.mrf.mxu2 }
 0x119   : > { %v14883_v44 = vld [vmem:[%s15555_s27 + $0x1ddc] sm:$0xf0]  ;;  %v773_v57 = vadd.f32 %v772_v41, %v453_v34  ;;  %v10055_v34 = vld [vmem:[%s15555_s27 + $0x3e0] sm:$0xf0] }
 0x11a   : > { %v13637_v45 = vld [vmem:[%s15555_s27 + $0x1fc0] sm:$0xf]  ;;  %v13382_v61 = vor.u32 %v14883_v44, %v13381_v42  ;;  %7221 = vmatpush.bf16.msra.mxu3 %v12390_v58  ;;  %v792_v42 = vpop.f32.mrf.mxu3  ;;  %v807_v44 = vmax.f32 %v733_v25, 0.0 }
 0x11b   : > { %v14947_v48 = vld [vmem:[%s15555_s27 + $0x1fdc] sm:$0xf0]  ;;  %7209 = vmatmul.bf16.vlgmr.msra.gmra.mxu2 %v15864_v6  ;;  %v793_v58 = vadd.f32 %v792_v42, %v454_v35 }
 0x11c   : > { %v13061_v54 = vld [vmem:[%s15555_s27 + $0x1b40] sm:$0xf]  ;;  %v13638_v62 = vor.u32 %v14947_v48, %v13637_v45  ;;  %7253 = vmatpush.bf16.msrb.mxu2 %v13382_v61  ;;  %v808_v45 = vmax.f32 %v753_v26, 0.0 }
 0x11d   : > { %v14803_v55 = vld [vmem:[%s15555_s27 + $0x1b5c] sm:$0xf0]  ;;  %7222 = vmatmul.bf16.vlgmr.msra.gmra.mxu3 %v15869_v15 }
 0x11e   : > { %v12805_v59 = vld [vmem:[%s15555_s27 + $0x1940] sm:$0xf]  ;;  %v13062_v1 = vor.u32 %v14803_v55, %v13061_v54  ;;  %7266 = vmatpush.bf16.msrb.mxu3 %v13638_v62 }
 0x11f   : > { %v14739_v60 = vld [vmem:[%s15555_s27 + $0x195c] sm:$0xf0] }
 0x120   : > { %v13349_v63 = vld [vmem:[%s15555_s27 + $0x1d80] sm:$0xf]  ;;  %v12806_v7 = vor.u32 %v14739_v60, %v12805_v59  ;;  %7242 = vmatpush.bf16.msrb.mxu1 %v13062_v1 }
 0x121   : > { %v14875_v0 = vld [vmem:[%s15555_s27 + $0x1d9c] sm:$0xf0] }
 0x122   : > { %v13605_v2 = vld [vmem:[%s15555_s27 + $0x1f80] sm:$0xf]  ;;  %v13350_v18 = vor.u32 %v14875_v0, %v13349_v63  ;;  %7229 = vmatpush.bf16.msrb.mxu0 %v12806_v7  ;;  %v823_v63 = vmin.f32 %v807_v44, 6.0  ;;  %v824_v0 = vmin.f32 %v808_v45, 6.0 }
 0x123   : > { %v14939_v3 = vld [vmem:[%s15555_s27 + $0x1f9c] sm:$0xf0] }
 0x124   : > { %v13029_v9 = vld [vmem:[%s15555_s27 + $0x1b00] sm:$0xf]  ;;  %v13606_v19 = vor.u32 %v14939_v3, %v13605_v2  ;;  %7254 = vmatpush.bf16.msrb.mxu2 %v13350_v18 }
 0x125   : > { %v14795_v10 = vld [vmem:[%s15555_s27 + $0x1b1c] sm:$0xf0] }
 0x126   : > { %v12773_v16 = vld [vmem:[%s15555_s27 + $0x1900] sm:$0xf]  ;;  %v13030_v21 = vor.u32 %v14795_v10, %v13029_v9  ;;  %7267 = vmatpush.bf16.msrb.mxu3 %v13606_v19  ;;  %v809_v9 = vmax.f32 %v773_v57, 0.0  ;;  %v810_v10 = vmax.f32 %v793_v58, 0.0  ;;  %v10023_v57 = vld [vmem:[%s15555_s27 + $0x3a0] sm:$0xf0] }
 0x127   : > { %v14731_v17 = vld [vmem:[%s15555_s27 + $0x191c] sm:$0xf0] }
 0x128   : > { %v13317_v20 = vld [vmem:[%s15555_s27 + $0x1d40] sm:$0xf]  ;;  %v12774_v29 = vor.u32 %v14731_v17, %v12773_v16  ;;  %7243 = vmatpush.bf16.msrb.mxu1 %v13030_v21 }
 0x129   : > { %v14867_v8 = vld [vmem:[%s15555_s27 + $0x1d5c] sm:$0xf0] }
 0x12a   : > { %v13573_v23 = vld [vmem:[%s15555_s27 + $0x1f40] sm:$0xf]  ;;  %v13318_v36 = vor.u32 %v14867_v8, %v13317_v20  ;;  %7230 = vmatpush.bf16.msrb.mxu0 %v12774_v29  ;;  %v833_v20 = vpack.c.bf16 %v824_v0, %v823_v63 }
 0x12b   : > { %v14931_v24 = vld [vmem:[%s15555_s27 + $0x1f5c] sm:$0xf0] }
 0x12c   : > { %v12997_v30 = vld [vmem:[%s15555_s27 + $0x1ac0] sm:$0xf]  ;;  %v13574_v37 = vor.u32 %v14931_v24, %v13573_v23  ;;  %7255 = vmatpush.bf16.msrb.mxu2 %v13318_v36  ;;  %v1915_v41 = vunpack.c.l.b16 %v833_v20  ;;  %v1916_v42 = vunpack.c.h.b16 %v833_v20  ;;  %v13967_v20 = vld [vmem:[%s15555_s27 + $0x144] sm:$0xf] }
 0x12d   : > { %v14787_v31 = vld [vmem:[%s15555_s27 + $0x1adc] sm:$0xf0] }
 0x12e   : > { %v12741_v32 = vld [vmem:[%s15555_s27 + $0x18c0] sm:$0xf]  ;;  %v12998_v43 = vor.u32 %v14787_v31, %v12997_v30  ;;  %7268 = vmatpush.bf16.msrb.mxu3 %v13574_v37  ;;  %v825_v31 = vmin.f32 %v809_v9, 6.0  ;;  %v13983_v37 = vld [vmem:[%s15555_s27 + $0x1c4] sm:$0xf]  ;;  %v15923_v63 = vpack.c.b16 %v1915_v41, %v1915_v41  ;;  %v15925_v0 = vpack.c.b16 %v1916_v42, %v1916_v42 }
 0x12f   : > { %v14723_v33 = vld [vmem:[%s15555_s27 + $0x18dc] sm:$0xf0]  ;;  %v10567_v9 = vld [vmem:[%s15555_s27 + $0x7e0] sm:$0xf0] }
 0x130   : > { %v13285_v38 = vld [vmem:[%s15555_s27 + $0x1d00] sm:$0xf]  ;;  %v12742_v50 = vor.u32 %v14723_v33, %v12741_v32  ;;  %7244 = vmatpush.bf16.msrb.mxu1 %v12998_v43  ;;  %v826_v32 = vmin.f32 %v810_v10, 6.0  ;;  %v14047_v33 = vld [vmem:[%s15555_s27 + $0x3c4] sm:$0xf] }
 0x131   : > { %v14859_v40 = vld [vmem:[%s15555_s27 + $0x1d1c] sm:$0xf0]  ;;  %v14095_v41 = vld [vmem:[%s15555_s27 + $0x544] sm:$0xf] }
 0x132   : > { %v13541_v48 = vld [vmem:[%s15555_s27 + $0x1f00] sm:$0xf]  ;;  %v13286_v59 = vor.u32 %v14859_v40, %v13285_v38  ;;  %7231 = vmatpush.bf16.msrb.mxu0 %v12742_v50  ;;  %v9799_v38 = vld [vmem:[%s15555_s27 + $0x1e0] sm:$0xf0]  ;;  %v10058_v50 = vor.u32 %v14047_v33, %v10055_v34 }
 0x133   : > { %v14923_v28 = vld [vmem:[%s15555_s27 + $0x1f1c] sm:$0xf0]  ;;  %v14023_v33 = vld [vmem:[%s15555_s27 + $0x304] sm:$0xf] }
 0x134   : > { %v12965_v51 = vld [vmem:[%s15555_s27 + $0x1a80] sm:$0xf]  ;;  %v13542_v60 = vor.u32 %v14923_v28, %v13541_v48  ;;  %7256 = vmatpush.bf16.msrb.mxu2 %v13286_v59  ;;  %v9959_v34 = vld [vmem:[%s15555_s27 + $0x320] sm:$0xf0] }
 0x135   : > { %v14779_v54 = vld [vmem:[%s15555_s27 + $0x1a9c] sm:$0xf0]  ;;  %v9962_v42 = vor.u32 %v14023_v33, %v9959_v34  ;;  %v13927_v33 = vld [vmem:[%s15555_s27 + $0x4] sm:$0xf] }
 0x136   : > { %v12709_v55 = vld [vmem:[%s15555_s27 + $0x1880] sm:$0xf]  ;;  %v12966_v1 = vor.u32 %v14779_v54, %v12965_v51  ;;  %7269 = vmatpush.bf16.msrb.mxu3 %v13542_v60  ;;  %v834_v51 = vpack.c.bf16 %v826_v32, %v825_v31  ;;  %v9802_v54 = vor.u32 %v13983_v37, %v9799_v38  ;;  %v9767_v60 = vld [vmem:[%s15555_s27 + $0x1a0] sm:$0xf0] }
 0x137   : > { %v14715_v56 = vld [vmem:[%s15555_s27 + $0x189c] sm:$0xf0]  ;;  %v9703_v37 = vld [vmem:[%s15555_s27 + $0x120] sm:$0xf0] }
 0x138   : > { %v13253_v61 = vld [vmem:[%s15555_s27 + $0x1cc0] sm:$0xf]  ;;  %v12710_v4 = vor.u32 %v14715_v56, %v12709_v55  ;;  %7245 = vmatpush.bf16.msrb.mxu1 %v12966_v1  ;;  %v13975_v55 = vld [vmem:[%s15555_s27 + $0x184] sm:$0xf]  ;;  %v1917_v10 = vunpack.c.l.b16 %v834_v51 }
 0x139   : > { %v14851_v62 = vld [vmem:[%s15555_s27 + $0x1cdc] sm:$0xf0]  ;;  %v14039_v56 = vld [vmem:[%s15555_s27 + $0x384] sm:$0xf] }
 0x13a   : > { %v13509_v2 = vld [vmem:[%s15555_s27 + $0x1ec0] sm:$0xf]  ;;  %v13254_v16 = vor.u32 %v14851_v62, %v13253_v61  ;;  %7232 = vmatpush.bf16.msrb.mxu0 %v12710_v4  ;;  %v10026_v4 = vor.u32 %v14039_v56, %v10023_v57  ;;  %v15943_v31 = vpack.c.b16 %v1917_v10, %v1917_v10  ;;  %v14087_v57 = vld [vmem:[%s15555_s27 + $0x504] sm:$0xf] }
 0x13b   : > { %v14915_v3 = vld [vmem:[%s15555_s27 + $0x1edc] sm:$0xf0]  ;;  %v13991_v34 = vld [vmem:[%s15555_s27 + $0x204] sm:$0xf] }
 0x13c   : > { %v12933_v5 = vld [vmem:[%s15555_s27 + $0x1a40] sm:$0xf]  ;;  %v13510_v17 = vor.u32 %v14915_v3, %v13509_v2  ;;  %7257 = vmatpush.bf16.msrb.mxu2 %v13254_v16  ;;  %v14111_v3 = vld [vmem:[%s15555_s27 + $0x5c4] sm:$0xf] }
 0x13d   : > { %v14771_v7 = vld [vmem:[%s15555_s27 + $0x1a5c] sm:$0xf0]  ;;  %v9991_v16 = vld [vmem:[%s15555_s27 + $0x360] sm:$0xf0] }
 0x13e   : > { %v12677_v13 = vld [vmem:[%s15555_s27 + $0x1840] sm:$0xf]  ;;  %v12934_v21 = vor.u32 %v14771_v7, %v12933_v5  ;;  %7270 = vmatpush.bf16.msrb.mxu3 %v13510_v17  ;;  %v10311_v5 = vld [vmem:[%s15555_s27 + $0x5e0] sm:$0xf0]  ;;  %v1918_v17 = vunpack.c.h.b16 %v834_v51 }
 0x13f   : > { %v14707_v14 = vld [vmem:[%s15555_s27 + $0x185c] sm:$0xf0]  ;;  %v14175_v7 = vld [vmem:[%s15555_s27 + $0x7c4] sm:$0xf] }
 0x140   : > { %v13221_v18 = vld [vmem:[%s15555_s27 + $0x1c80] sm:$0xf]  ;;  %v12678_v25 = vor.u32 %v14707_v14, %v12677_v13  ;;  %7246 = vmatpush.bf16.msrb.mxu1 %v12934_v21  ;;  %v9770_v13 = vor.u32 %v13975_v55, %v9767_v60  ;;  %v14031_v14 = vld [vmem:[%s15555_s27 + $0x344] sm:$0xf] }
 0x141   : > { %v14843_v19 = vld [vmem:[%s15555_s27 + $0x1c9c] sm:$0xf0]  ;;  %v9735_v21 = vld [vmem:[%s15555_s27 + $0x160] sm:$0xf0] }
 0x142   : > { %v13477_v8 = vld [vmem:[%s15555_s27 + $0x1e80] sm:$0xf]  ;;  %v13222_v35 = vor.u32 %v14843_v19, %v13221_v18  ;;  %7233 = vmatpush.bf16.msrb.mxu0 %v12678_v25  ;;  %v9994_v25 = vor.u32 %v14031_v14, %v9991_v16  ;;  %v9738_v32 = vor.u32 %v13967_v20, %v9735_v21  ;;  %v13951_v51 = vld [vmem:[%s15555_s27 + $0xc4] sm:$0xf] }
 0x143   : > { %v14907_v23 = vld [vmem:[%s15555_s27 + $0x1e9c] sm:$0xf0]  ;;  %v14151_v60 = vld [vmem:[%s15555_s27 + $0x704] sm:$0xf] }
 0x144   : > { %v12645_v24 = vld [vmem:[%s15555_s27 + $0x1800] sm:$0xf]  ;;  %v13478_v36 = vor.u32 %v14907_v23, %v13477_v8  ;;  %7258 = vmatpush.bf16.msrb.mxu2 %v13222_v35  ;;  %v10314_v8 = vor.u32 %v14111_v3, %v10311_v5  ;;  %v10570_v23 = vor.u32 %v14175_v7, %v10567_v9  ;;  %v15947_v35 = vpack.c.b16 %v1918_v17, %v1918_v17  ;;  %v13943_v3 = vld [vmem:[%s15555_s27 + $0x84] sm:$0xf] }
 0x145   : > { %v14699_v26 = vld [vmem:[%s15555_s27 + $0x181c] sm:$0xf0]  ;;  %v14079_v9 = vld [vmem:[%s15555_s27 + $0x4c4] sm:$0xf] }
 0x146   : > { %v12901_v29 = vld [vmem:[%s15555_s27 + $0x1a00] sm:$0xf]  ;;  %v12646_v28 = vor.u32 %v14699_v26, %v12645_v24  ;;  %7271 = vmatpush.bf16.msrb.mxu3 %v13478_v36  ;;  %v14103_v24 = vld [vmem:[%s15555_s27 + $0x584] sm:$0xf] }
 0x147   : > { %v14763_v30 = vld [vmem:[%s15555_s27 + $0x1a1c] sm:$0xf0]  ;;  %v10279_v26 = vld [vmem:[%s15555_s27 + $0x5a0] sm:$0xf0] }
 0x148   : > { %v13189_v40 = vld [vmem:[%s15555_s27 + $0x1c40] sm:$0xf]  ;;  %v12902_v43 = vor.u32 %v14763_v30, %v12901_v29  ;;  %7234 = vmatpush.bf16.msrb.mxu0 %v12646_v28  ;;  %v14167_v29 = vld [vmem:[%s15555_s27 + $0x784] sm:$0xf]  ;;  %v10282_v38 = vor.u32 %v14103_v24, %v10279_v26 }
 0x149   : > { %v14835_v44 = vld [vmem:[%s15555_s27 + $0x1c5c] sm:$0xf0]  ;;  %v10535_v30 = vld [vmem:[%s15555_s27 + $0x7a0] sm:$0xf0] }
 0x14a   : > { %v13445_v45 = vld [vmem:[%s15555_s27 + $0x1e40] sm:$0xf]  ;;  %v13190_v58 = vor.u32 %v14835_v44, %v13189_v40  ;;  %7247 = vmatpush.bf16.msrb.mxu1 %v12902_v43  ;;  %v13959_v36 = vld [vmem:[%s15555_s27 + $0x104] sm:$0xf]  ;;  %v10538_v40 = vor.u32 %v14167_v29, %v10535_v30 }
 0x14b   : > { %v14899_v48 = vld [vmem:[%s15555_s27 + $0x1e5c] sm:$0xf0]  ;;  %7235 = vmatmul.bf16.vlgmr.msrb.gmra.mxu0 %v15923_v63  ;;  %v10247_v43 = vld [vmem:[%s15555_s27 + $0x560] sm:$0xf0] }
 0x14c   : > { %v13446_v59 = vor.u32 %v14899_v48, %v13445_v45  ;;  %v13157_v61 = vld [vmem:[%s15555_s27 + $0x1c00] sm:$0xf]  ;;  %7279 = vmatpush.bf16.msra.mxu0 %v9802_v54  ;;  %7259 = vmatpush.bf16.msrb.mxu2 %v13190_v58  ;;  %v14159_v44 = vld [vmem:[%s15555_s27 + $0x744] sm:$0xf]  ;;  %v9706_v48 = vor.u32 %v13959_v36, %v9703_v37  ;;  %v10250_v55 = vor.u32 %v14095_v41, %v10247_v43 }
 0x14d   : > { %v14827_v62 = vld [vmem:[%s15555_s27 + $0x1c1c] sm:$0xf0]  ;;  %7248 = vmatmul.bf16.vlgmr.msrb.gmra.mxu1 %v15925_v0  ;;  %v10503_v45 = vld [vmem:[%s15555_s27 + $0x760] sm:$0xf0] }
 0x14e   : > { %v13413_v1 = vld [vmem:[%s15555_s27 + $0x1e00] sm:$0xf]  ;;  %7292 = vmatpush.bf16.msra.mxu1 %v10058_v50  ;;  %7272 = vmatpush.bf16.msrb.mxu3 %v13446_v59  ;;  %v13158_v18 = vor.u32 %v14827_v62, %v13157_v61  ;;  %v14015_v28 = vld [vmem:[%s15555_s27 + $0x2c4] sm:$0xf]  ;;  %v10506_v56 = vor.u32 %v14159_v44, %v10503_v45 }
 0x14f   : > { %v14891_v2 = vld [vmem:[%s15555_s27 + $0x1e1c] sm:$0xf0]  ;;  %v9927_v50 = vld [vmem:[%s15555_s27 + $0x2e0] sm:$0xf0] }
 0x150   : > { %v13414_v19 = vor.u32 %v14891_v2, %v13413_v1  ;;  %7280 = vmatpush.bf16.msra.mxu0 %v9770_v13  ;;  %7260 = vmatpush.bf16.msrb.mxu2 %v13158_v18  ;;  %v9671_v54 = vld [vmem:[%s15555_s27 + $0xe0] sm:$0xf0]  ;;  %v9930_v58 = vor.u32 %v14015_v28, %v9927_v50 }
 0x151   : > { %v10215_v59 = vld [vmem:[%s15555_s27 + $0x520] sm:$0xf0]  ;;  %v9674_v62 = vor.u32 %v13951_v51, %v9671_v54 }
 0x152   : > { %7293 = vmatpush.bf16.msra.mxu1 %v10026_v4  ;;  %7273 = vmatpush.bf16.msrb.mxu3 %v13414_v19  ;;  %v10471_v61 = vld [vmem:[%s15555_s27 + $0x720] sm:$0xf0]  ;;  %v10218_v5 = vor.u32 %v14087_v57, %v10215_v59 }
 0x153   : > { %7261 = vmatmul.bf16.vlgmr.msrb.gmra.mxu2 %v15943_v31  ;;  %v14007_v1 = vld [vmem:[%s15555_s27 + $0x284] sm:$0xf]  ;;  %v10474_v7 = vor.u32 %v14151_v60, %v10471_v61 }
 0x154   : > { %7305 = vmatpush.bf16.msra.mxu2 %v10314_v8  ;;  %7281 = vmatpush.bf16.msra.mxu0 %v9738_v32  ;;  %v9895_v2 = vld [vmem:[%s15555_s27 + $0x2a0] sm:$0xf0] }
 0x155   : > { %7274 = vmatmul.bf16.vlgmr.msrb.gmra.mxu3 %v15947_v35  ;;  %v9639_v4 = vld [vmem:[%s15555_s27 + $0xa0] sm:$0xf0]  ;;  %v9898_v10 = vor.u32 %v14007_v1, %v9895_v2 }
 0x156   : > { %7318 = vmatpush.bf16.msra.mxu3 %v10570_v23  ;;  %7294 = vmatpush.bf16.msra.mxu1 %v9994_v25  ;;  %v10183_v13 = vld [vmem:[%s15555_s27 + $0x4e0] sm:$0xf0]  ;;  %v9642_v17 = vor.u32 %v13943_v3, %v9639_v4 }
 0x157   : > { %v14143_v14 = vld [vmem:[%s15555_s27 + $0x6c4] sm:$0xf]  ;;  %v10186_v8 = vor.u32 %v14079_v9, %v10183_v13 }
 0x158   : > { %7306 = vmatpush.bf16.msra.mxu2 %v10282_v38  ;;  %7282 = vmatpush.bf16.msra.mxu0 %v9706_v48  ;;  %v10439_v16 = vld [vmem:[%s15555_s27 + $0x6e0] sm:$0xf0] }
 0x159   : > { %v13999_v18 = vld [vmem:[%s15555_s27 + $0x244] sm:$0xf]  ;;  %v10442_v23 = vor.u32 %v14143_v14, %v10439_v16 }
 0x15a   : > { %7319 = vmatpush.bf16.msra.mxu3 %v10538_v40  ;;  %7295 = vmatpush.bf16.msra.mxu1 %v9962_v42  ;;  %v9863_v19 = vld [vmem:[%s15555_s27 + $0x260] sm:$0xf0] }
 0x15b   : > { %v13935_v20 = vld [vmem:[%s15555_s27 + $0x44] sm:$0xf]  ;;  %v9866_v25 = vor.u32 %v13999_v18, %v9863_v19 }
 0x15c   : > { %7307 = vmatpush.bf16.msra.mxu2 %v10250_v55  ;;  %7283 = vmatpush.bf16.msra.mxu0 %v9674_v62  ;;  %v9607_v21 = vld [vmem:[%s15555_s27 + $0x60] sm:$0xf0] }
 0x15d   : > { %v14071_v24 = vld [vmem:[%s15555_s27 + $0x484] sm:$0xf]  ;;  %v9610_v32 = vor.u32 %v13935_v20, %v9607_v21 }
 0x15e   : > { %7320 = vmatpush.bf16.msra.mxu3 %v10506_v56  ;;  %7296 = vmatpush.bf16.msra.mxu1 %v9930_v58  ;;  %v10151_v26 = vld [vmem:[%s15555_s27 + $0x4a0] sm:$0xf0] }
 0x15f   : > { %v14135_v29 = vld [vmem:[%s15555_s27 + $0x684] sm:$0xf]  ;;  %v10154_v41 = vor.u32 %v14071_v24, %v10151_v26 }
 0x160   : > { %7308 = vmatpush.bf16.msra.mxu2 %v10218_v5  ;;  %v10407_v30 = vld [vmem:[%s15555_s27 + $0x6a0] sm:$0xf0]  ;;  %7284 = vmatpush.bf16.msra.mxu0 %v9642_v17 }
 0x161   : > { %v9831_v36 = vld [vmem:[%s15555_s27 + $0x220] sm:$0xf0]  ;;  %v10410_v42 = vor.u32 %v14135_v29, %v10407_v30 }
 0x162   : > { %7321 = vmatpush.bf16.msra.mxu3 %v10474_v7  ;;  %7297 = vmatpush.bf16.msra.mxu1 %v9898_v10  ;;  %v9575_v37 = vld [vmem:[%s15555_s27 + $0x20] sm:$0xf0]  ;;  %v9834_v48 = vor.u32 %v13991_v34, %v9831_v36 }
 0x163   : > { %v14303_v38 = vld [vmem:[%s15555_s27 + $0xbc4] sm:$0xf]  ;;  %v9578_v54 = vor.u32 %v13927_v33, %v9575_v37 }
 0x164   : > { %v11079_v40 = vld [vmem:[%s15555_s27 + $0xbe0] sm:$0xf0]  ;;  %7309 = vmatpush.bf16.msra.mxu2 %v10186_v8  ;;  %7285 = vmatpush.bf16.msra.mxu0 %v9610_v32 }
 0x165   : > { %v14239_v43 = vld [vmem:[%s15555_s27 + $0x9c4] sm:$0xf]  ;;  %v11082_v55 = vor.u32 %v14303_v38, %v11079_v40 }
 0x166   : > { %7322 = vmatpush.bf16.msra.mxu3 %v10442_v23  ;;  %v10823_v44 = vld [vmem:[%s15555_s27 + $0x9e0] sm:$0xf0]  ;;  %7298 = vmatpush.bf16.msra.mxu1 %v9866_v25 }
 0x167   : > { %v14063_v45 = vld [vmem:[%s15555_s27 + $0x444] sm:$0xf]  ;;  %v10826_v56 = vor.u32 %v14239_v43, %v10823_v44 }
 0x168   : > { %v10119_v28 = vld [vmem:[%s15555_s27 + $0x460] sm:$0xf0]  ;;  %7310 = vmatpush.bf16.msra.mxu2 %v10154_v41  ;;  %7286 = vmatpush.bf16.msra.mxu0 %v9578_v54 }
 0x169   : > { %v14127_v50 = vld [vmem:[%s15555_s27 + $0x644] sm:$0xf]  ;;  %v10122_v60 = vor.u32 %v14063_v45, %v10119_v28 }
 0x16a   : > { %v10375_v51 = vld [vmem:[%s15555_s27 + $0x660] sm:$0xf0]  ;;  %7323 = vmatpush.bf16.msra.mxu3 %v10410_v42  ;;  %7299 = vmatpush.bf16.msra.mxu1 %v9834_v48 }
 0x16b   : > { %v14231_v57 = vld [vmem:[%s15555_s27 + $0x984] sm:$0xf]  ;;  %v10378_v61 = vor.u32 %v14127_v50, %v10375_v51  ;;  %7287 = vmatmul.bf16.vlgmr.msra.gmra.mxu0 %v15752_v11 }
 0x16c   : > { %v14295_v58 = vld [vmem:[%s15555_s27 + $0xb84] sm:$0xf]  ;;  %7331 = vmatpush.bf16.msrb.mxu0 %v10826_v56  ;;  %7311 = vmatpush.bf16.msra.mxu2 %v10122_v60 }
 0x16d   : > { %v11047_v59 = vld [vmem:[%s15555_s27 + $0xba0] sm:$0xf0]  ;;  %7300 = vmatmul.bf16.vlgmr.msra.gmra.mxu1 %v15754_v12 }
 0x16e   : > { %v10791_v62 = vld [vmem:[%s15555_s27 + $0x9a0] sm:$0xf0]  ;;  %7344 = vmatpush.bf16.msrb.mxu1 %v11082_v55  ;;  %v11050_v7 = vor.u32 %v14295_v58, %v11047_v59  ;;  %7324 = vmatpush.bf16.msra.mxu3 %v10378_v61 }
 0x16f   : > { %v14055_v1 = vld [vmem:[%s15555_s27 + $0x404] sm:$0xf]  ;;  %v10794_v14 = vor.u32 %v14231_v57, %v10791_v62 }
 0x170   : > { %v10087_v2 = vld [vmem:[%s15555_s27 + $0x420] sm:$0xf0] }
 0x171   : > { %v14119_v3 = vld [vmem:[%s15555_s27 + $0x604] sm:$0xf]  ;;  %v10090_v18 = vor.u32 %v14055_v1, %v10087_v2  ;;  %7332 = vmatpush.bf16.msrb.mxu0 %v10794_v14 }
 0x172   : > { %v10343_v4 = vld [vmem:[%s15555_s27 + $0x620] sm:$0xf0]  ;;  %7345 = vmatpush.bf16.msrb.mxu1 %v11050_v7 }
 0x173   : > { %v14367_v5 = vld [vmem:[%s15555_s27 + $0xdc4] sm:$0xf]  ;;  %v10346_v19 = vor.u32 %v14119_v3, %v10343_v4  ;;  %7312 = vmatpush.bf16.msra.mxu2 %v10090_v18 }
 0x174   : > { %v11335_v9 = vld [vmem:[%s15555_s27 + $0xde0] sm:$0xf0] }
 0x175   : > { %v14431_v10 = vld [vmem:[%s15555_s27 + $0xfc4] sm:$0xf]  ;;  %v11338_v20 = vor.u32 %v14367_v5, %v11335_v9  ;;  %7325 = vmatpush.bf16.msra.mxu3 %v10346_v19 }
 0x176   : > { %v11591_v13 = vld [vmem:[%s15555_s27 + $0xfe0] sm:$0xf0]  ;;  %7313 = vmatmul.bf16.vlgmr.msra.gmra.mxu2 %v15773_v46 }
 0x177   : > { %v14287_v16 = vld [vmem:[%s15555_s27 + $0xb44] sm:$0xf]  ;;  %v11594_v21 = vor.u32 %v14431_v10, %v11591_v13  ;;  %7357 = vmatpush.bf16.msrb.mxu2 %v11338_v20 }
 0x178   : > { %v11015_v17 = vld [vmem:[%s15555_s27 + $0xb60] sm:$0xf0]  ;;  %7326 = vmatmul.bf16.vlgmr.msra.gmra.mxu3 %v15775_v47 }
 0x179   : > { %v14223_v8 = vld [vmem:[%s15555_s27 + $0x944] sm:$0xf]  ;;  %v11018_v25 = vor.u32 %v14287_v16, %v11015_v17  ;;  %7370 = vmatpush.bf16.msrb.mxu3 %v11594_v21 }
 0x17a   : > { %v10759_v23 = vld [vmem:[%s15555_s27 + $0x960] sm:$0xf0] }
 0x17b   : > { %v14359_v24 = vld [vmem:[%s15555_s27 + $0xd84] sm:$0xf]  ;;  %v10762_v34 = vor.u32 %v14223_v8, %v10759_v23  ;;  %7346 = vmatpush.bf16.msrb.mxu1 %v11018_v25 }
 0x17c   : > { %v11303_v26 = vld [vmem:[%s15555_s27 + $0xda0] sm:$0xf0] }
 0x17d   : > { %v14423_v29 = vld [vmem:[%s15555_s27 + $0xf84] sm:$0xf]  ;;  %v11306_v36 = vor.u32 %v14359_v24, %v11303_v26  ;;  %7333 = vmatpush.bf16.msrb.mxu0 %v10762_v34 }
 0x17e   : > { %v11559_v30 = vld [vmem:[%s15555_s27 + $0xfa0] sm:$0xf0] }
 0x17f   : > { %v14279_v32 = vld [vmem:[%s15555_s27 + $0xb04] sm:$0xf]  ;;  %v11562_v37 = vor.u32 %v14423_v29, %v11559_v30  ;;  %7358 = vmatpush.bf16.msrb.mxu2 %v11306_v36 }
 0x180   : > { %v10983_v33 = vld [vmem:[%s15555_s27 + $0xb20] sm:$0xf0] }
 0x181   : > { %v14215_v38 = vld [vmem:[%s15555_s27 + $0x904] sm:$0xf]  ;;  %v10986_v42 = vor.u32 %v14279_v32, %v10983_v33  ;;  %7371 = vmatpush.bf16.msrb.mxu3 %v11562_v37 }
 0x182   : > { %v10727_v40 = vld [vmem:[%s15555_s27 + $0x920] sm:$0xf0] }
 0x183   : > { %v14351_v41 = vld [vmem:[%s15555_s27 + $0xd44] sm:$0xf]  ;;  %v10730_v50 = vor.u32 %v14215_v38, %v10727_v40  ;;  %7347 = vmatpush.bf16.msrb.mxu1 %v10986_v42 }
 0x184   : > { %v11271_v43 = vld [vmem:[%s15555_s27 + $0xd60] sm:$0xf0] }
 0x185   : > { %v14415_v44 = vld [vmem:[%s15555_s27 + $0xf44] sm:$0xf]  ;;  %v11274_v51 = vor.u32 %v14351_v41, %v11271_v43  ;;  %7334 = vmatpush.bf16.msrb.mxu0 %v10730_v50 }
 0x186   : > { %v11527_v45 = vld [vmem:[%s15555_s27 + $0xf60] sm:$0xf0] }
 0x187   : > { %v14271_v48 = vld [vmem:[%s15555_s27 + $0xac4] sm:$0xf]  ;;  %v11530_v54 = vor.u32 %v14415_v44, %v11527_v45  ;;  %7359 = vmatpush.bf16.msrb.mxu2 %v11274_v51 }
 0x188   : > { %v10951_v28 = vld [vmem:[%s15555_s27 + $0xae0] sm:$0xf0] }
 0x189   : > { %v14207_v55 = vld [vmem:[%s15555_s27 + $0x8c4] sm:$0xf]  ;;  %v10954_v58 = vor.u32 %v14271_v48, %v10951_v28  ;;  %7372 = vmatpush.bf16.msrb.mxu3 %v11530_v54 }
 0x18a   : > { %v10695_v56 = vld [vmem:[%s15555_s27 + $0x8e0] sm:$0xf0] }
 0x18b   : > { %v14343_v57 = vld [vmem:[%s15555_s27 + $0xd04] sm:$0xf]  ;;  %v10698_v2 = vor.u32 %v14207_v55, %v10695_v56  ;;  %7348 = vmatpush.bf16.msrb.mxu1 %v10954_v58 }
 0x18c   : > { %v11239_v59 = vld [vmem:[%s15555_s27 + $0xd20] sm:$0xf0] }
 0x18d   : > { %v14407_v60 = vld [vmem:[%s15555_s27 + $0xf04] sm:$0xf]  ;;  %v11242_v3 = vor.u32 %v14343_v57, %v11239_v59  ;;  %7335 = vmatpush.bf16.msrb.mxu0 %v10698_v2 }
 0x18e   : > { %v11495_v61 = vld [vmem:[%s15555_s27 + $0xf20] sm:$0xf0] }
 0x18f   : > { %v14263_v62 = vld [vmem:[%s15555_s27 + $0xa84] sm:$0xf]  ;;  %v11498_v4 = vor.u32 %v14407_v60, %v11495_v61  ;;  %7360 = vmatpush.bf16.msrb.mxu2 %v11242_v3 }
 0x190   : > { %v10919_v1 = vld [vmem:[%s15555_s27 + $0xaa0] sm:$0xf0] }
 0x191   : > { %v14199_v5 = vld [vmem:[%s15555_s27 + $0x884] sm:$0xf]  ;;  %v10922_v10 = vor.u32 %v14263_v62, %v10919_v1  ;;  %7373 = vmatpush.bf16.msrb.mxu3 %v11498_v4 }
 0x192   : > { %v10663_v7 = vld [vmem:[%s15555_s27 + $0x8a0] sm:$0xf0] }
 0x193   : > { %v14335_v9 = vld [vmem:[%s15555_s27 + $0xcc4] sm:$0xf]  ;;  %v10666_v19 = vor.u32 %v14199_v5, %v10663_v7  ;;  %7349 = vmatpush.bf16.msrb.mxu1 %v10922_v10 }
 0x194   : > { %v11207_v13 = vld [vmem:[%s15555_s27 + $0xce0] sm:$0xf0] }
 0x195   : > { %v14399_v14 = vld [vmem:[%s15555_s27 + $0xec4] sm:$0xf]  ;;  %v11210_v20 = vor.u32 %v14335_v9, %v11207_v13  ;;  %7336 = vmatpush.bf16.msrb.mxu0 %v10666_v19  ;;  %v16081_v19 = vld [vmem:[%s16078_s29] sm:$0xff] }
 0x196   : > { %v11463_v16 = vld [vmem:[%s15555_s27 + $0xee0] sm:$0xf0] }
 0x197   : > { %v14255_v17 = vld [vmem:[%s15555_s27 + $0xa44] sm:$0xf]  ;;  %v11466_v21 = vor.u32 %v14399_v14, %v11463_v16  ;;  %7361 = vmatpush.bf16.msrb.mxu2 %v11210_v20 }
 0x198   : > { %v10887_v18 = vld [vmem:[%s15555_s27 + $0xa60] sm:$0xf0] }
 0x199   : > { %v14191_v8 = vld [vmem:[%s15555_s27 + $0x844] sm:$0xf]  ;;  %v10890_v25 = vor.u32 %v14255_v17, %v10887_v18  ;;  %7374 = vmatpush.bf16.msrb.mxu3 %v11466_v21 }
 0x19a   : > { %v10631_v23 = vld [vmem:[%s15555_s27 + $0x860] sm:$0xf0] }
 0x19b   : > { %v14327_v24 = vld [vmem:[%s15555_s27 + $0xc84] sm:$0xf]  ;;  %v10634_v34 = vor.u32 %v14191_v8, %v10631_v23  ;;  %7350 = vmatpush.bf16.msrb.mxu1 %v10890_v25 }
 0x19c   : > { %v11175_v26 = vld [vmem:[%s15555_s27 + $0xca0] sm:$0xf0] }
 0x19d   : > { %v14391_v29 = vld [vmem:[%s15555_s27 + $0xe84] sm:$0xf]  ;;  %v11178_v38 = vor.u32 %v14327_v24, %v11175_v26  ;;  %7337 = vmatpush.bf16.msrb.mxu0 %v10634_v34 }
 0x19e   : > { %v11431_v30 = vld [vmem:[%s15555_s27 + $0xea0] sm:$0xf0] }
 0x19f   : > { %v14247_v32 = vld [vmem:[%s15555_s27 + $0xa04] sm:$0xf]  ;;  %v11434_v40 = vor.u32 %v14391_v29, %v11431_v30  ;;  %7362 = vmatpush.bf16.msrb.mxu2 %v11178_v38 }
 0x1a0   : > { %v10855_v33 = vld [vmem:[%s15555_s27 + $0xa20] sm:$0xf0] }
 0x1a1   : > { %v14559_v36 = vld [vmem:[%s15555_s27 + $0x13c4] sm:$0xf]  ;;  %v10858_v44 = vor.u32 %v14247_v32, %v10855_v33  ;;  %7375 = vmatpush.bf16.msrb.mxu3 %v11434_v40  ;;  %v1879_v33 = vperm.slane %v16081_v19, 0 }
 0x1a2   : > { %v12103_v37 = vld [vmem:[%s15555_s27 + $0x13e0] sm:$0xf0] }
 0x1a3   : > { %v14183_v41 = vld [vmem:[%s15555_s27 + $0x804] sm:$0xf]  ;;  %v12106_v50 = vor.u32 %v14559_v36, %v12103_v37  ;;  %7351 = vmatpush.bf16.msrb.mxu1 %v10858_v44 }
 0x1a4   : > { %v10599_v42 = vld [vmem:[%s15555_s27 + $0x820] sm:$0xf0] }
 0x1a5   : > { %v14495_v43 = vld [vmem:[%s15555_s27 + $0x11c4] sm:$0xf]  ;;  %v10602_v55 = vor.u32 %v14183_v41, %v10599_v42  ;;  %v7080_v42 = vpop.f32.mrf.mxu0 }
 0x1a6   : > { %v11847_v45 = vld [vmem:[%s15555_s27 + $0x11e0] sm:$0xf0]  ;;  %7352 = vmatmul.bf16.vlgmr.msrb.gmra.mxu1 %v15799_v27 }
 0x1a7   : > { %v14319_v48 = vld [vmem:[%s15555_s27 + $0xc44] sm:$0xf]  ;;  %v11850_v58 = vor.u32 %v14495_v43, %v11847_v45  ;;  %7396 = vmatpush.bf16.msra.mxu1 %v12106_v50  ;;  %7338 = vmatpush.bf16.msrb.mxu0 %v10602_v55  ;;  %v7093_v43 = vpop.f32.mrf.mxu1 }
 0x1a8   : > { %v11143_v28 = vld [vmem:[%s15555_s27 + $0xc60] sm:$0xf0] }
 0x1a9   : > { %v14383_v51 = vld [vmem:[%s15555_s27 + $0xe44] sm:$0xf]  ;;  %v11146_v59 = vor.u32 %v14319_v48, %v11143_v28 }
 0x1aa   : > { %v11399_v54 = vld [vmem:[%s15555_s27 + $0xe60] sm:$0xf0]  ;;  %7339 = vmatmul.bf16.vlgmr.msrb.gmra.mxu0 %v15795_v22 }
 0x1ab   : > { %v14551_v56 = vld [vmem:[%s15555_s27 + $0x1384] sm:$0xf]  ;;  %v11402_v1 = vor.u32 %v14383_v51, %v11399_v54  ;;  %7383 = vmatpush.bf16.msra.mxu0 %v11850_v58  ;;  %7363 = vmatpush.bf16.msrb.mxu2 %v11146_v59  ;;  %v7081_v51 = vadd.f32 %v7080_v42, %v1879_v33  ;;  %v7106_v42 = vpop.f32.mrf.mxu2 }
 0x1ac   : > { %v12071_v57 = vld [vmem:[%s15555_s27 + $0x13a0] sm:$0xf0] }
 0x1ad   : > { %v14487_v60 = vld [vmem:[%s15555_s27 + $0x1184] sm:$0xf]  ;;  %v12074_v5 = vor.u32 %v14551_v56, %v12071_v57  ;;  %7376 = vmatpush.bf16.msrb.mxu3 %v11402_v1  ;;  %v7094_v58 = vadd.f32 %v7093_v43, %v7081_v51  ;;  %v7119_v43 = vpop.f32.mrf.mxu3 }
 0x1ae   : > { %v11815_v61 = vld [vmem:[%s15555_s27 + $0x11a0] sm:$0xf0] }
 0x1af   : > { %v14311_v62 = vld [vmem:[%s15555_s27 + $0xc04] sm:$0xf]  ;;  %v11818_v17 = vor.u32 %v14487_v60, %v11815_v61  ;;  %7397 = vmatpush.bf16.msra.mxu1 %v12074_v5 }
 0x1b0   : > { %v11111_v2 = vld [vmem:[%s15555_s27 + $0xc20] sm:$0xf0] }
 0x1b1   : > { %v14375_v3 = vld [vmem:[%s15555_s27 + $0xe04] sm:$0xf]  ;;  %v11114_v18 = vor.u32 %v14311_v62, %v11111_v2  ;;  %7384 = vmatpush.bf16.msra.mxu0 %v11818_v17  ;;  %v7082_v17 = vpop.f32.mrf.mxu0 }
 0x1b2   : > { %v11367_v4 = vld [vmem:[%s15555_s27 + $0xe20] sm:$0xf0] }
 0x1b3   : > { %v14623_v7 = vld [vmem:[%s15555_s27 + $0x15c4] sm:$0xf]  ;;  %v11370_v20 = vor.u32 %v14375_v3, %v11367_v4  ;;  %7364 = vmatpush.bf16.msrb.mxu2 %v11114_v18  ;;  %v7095_v18 = vpop.f32.mrf.mxu1 }
 0x1b4   : > { %v12359_v9 = vld [vmem:[%s15555_s27 + $0x15e0] sm:$0xf0] }
 0x1b5   : > { %v14687_v10 = vld [vmem:[%s15555_s27 + $0x17c4] sm:$0xf]  ;;  %v12362_v21 = vor.u32 %v14623_v7, %v12359_v9  ;;  %7377 = vmatpush.bf16.msrb.mxu3 %v11370_v20 }
 0x1b6   : > { %v12615_v13 = vld [vmem:[%s15555_s27 + $0x17e0] sm:$0xf0]  ;;  %7365 = vmatmul.bf16.vlgmr.msrb.gmra.mxu2 %v15813_v52 }
 0x1b7   : > { %v14543_v14 = vld [vmem:[%s15555_s27 + $0x1344] sm:$0xf]  ;;  %v12618_v25 = vor.u32 %v14687_v10, %v12615_v13  ;;  %7409 = vmatpush.bf16.msra.mxu2 %v12362_v21 }
 0x1b8   : > { %v12039_v16 = vld [vmem:[%s15555_s27 + $0x1360] sm:$0xf0]  ;;  %7378 = vmatmul.bf16.vlgmr.msrb.gmra.mxu3 %v15815_v53 }
 0x1b9   : > { %v14479_v8 = vld [vmem:[%s15555_s27 + $0x1144] sm:$0xf]  ;;  %v12042_v26 = vor.u32 %v14543_v14, %v12039_v16  ;;  %7422 = vmatpush.bf16.msra.mxu3 %v12618_v25 }
 0x1ba   : > { %v11783_v23 = vld [vmem:[%s15555_s27 + $0x1160] sm:$0xf0] }
 0x1bb   : > { %v14615_v24 = vld [vmem:[%s15555_s27 + $0x1584] sm:$0xf]  ;;  %v11786_v37 = vor.u32 %v14479_v8, %v11783_v23  ;;  %7398 = vmatpush.bf16.msra.mxu1 %v12042_v26 }
 0x1bc   : > { %v12327_v29 = vld [vmem:[%s15555_s27 + $0x15a0] sm:$0xf0] }
 0x1bd   : > { %v14679_v30 = vld [vmem:[%s15555_s27 + $0x1784] sm:$0xf]  ;;  %v12330_v38 = vor.u32 %v14615_v24, %v12327_v29  ;;  %7385 = vmatpush.bf16.msra.mxu0 %v11786_v37 }
 0x1be   : > { %v12583_v32 = vld [vmem:[%s15555_s27 + $0x17a0] sm:$0xf0] }
 0x1bf   : > { %v14535_v34 = vld [vmem:[%s15555_s27 + $0x1304] sm:$0xf]  ;;  %v12586_v44 = vor.u32 %v14679_v30, %v12583_v32  ;;  %7410 = vmatpush.bf16.msra.mxu2 %v12330_v38 }
 0x1c0   : > { %v12007_v36 = vld [vmem:[%s15555_s27 + $0x1320] sm:$0xf0] }
 0x1c1   : > { %v14471_v40 = vld [vmem:[%s15555_s27 + $0x1104] sm:$0xf]  ;;  %v12010_v45 = vor.u32 %v14535_v34, %v12007_v36  ;;  %7423 = vmatpush.bf16.msra.mxu3 %v12586_v44 }
 0x1c2   : > { %v11751_v41 = vld [vmem:[%s15555_s27 + $0x1120] sm:$0xf0] }
 0x1c3   : > { %v14607_v48 = vld [vmem:[%s15555_s27 + $0x1544] sm:$0xf]  ;;  %v11754_v57 = vor.u32 %v14471_v40, %v11751_v41  ;;  %7399 = vmatpush.bf16.msra.mxu1 %v12010_v45 }
 0x1c4   : > { %v12295_v28 = vld [vmem:[%s15555_s27 + $0x1560] sm:$0xf0] }
 0x1c5   : > { %v14671_v50 = vld [vmem:[%s15555_s27 + $0x1744] sm:$0xf]  ;;  %v12298_v59 = vor.u32 %v14607_v48, %v12295_v28  ;;  %7386 = vmatpush.bf16.msra.mxu0 %v11754_v57  ;;  %v7107_v28 = vadd.f32 %v7106_v42, %v7094_v58 }
 0x1c6   : > { %v12551_v54 = vld [vmem:[%s15555_s27 + $0x1760] sm:$0xf0] }
 0x1c7   : > { %v14527_v55 = vld [vmem:[%s15555_s27 + $0x12c4] sm:$0xf]  ;;  %v12554_v62 = vor.u32 %v14671_v50, %v12551_v54  ;;  %7411 = vmatpush.bf16.msra.mxu2 %v12298_v59 }
 0x1c8   : > { %v11975_v56 = vld [vmem:[%s15555_s27 + $0x12e0] sm:$0xf0] }
 0x1c9   : > { %v14463_v60 = vld [vmem:[%s15555_s27 + $0x10c4] sm:$0xf]  ;;  %v11978_v1 = vor.u32 %v14527_v55, %v11975_v56  ;;  %7424 = vmatpush.bf16.msra.mxu3 %v12554_v62 }
 0x1ca   : > { %v11719_v61 = vld [vmem:[%s15555_s27 + $0x10e0] sm:$0xf0] }
 0x1cb   : > { %v14599_v2 = vld [vmem:[%s15555_s27 + $0x1504] sm:$0xf]  ;;  %v11722_v10 = vor.u32 %v14463_v60, %v11719_v61  ;;  %7400 = vmatpush.bf16.msra.mxu1 %v11978_v1  ;;  %v7120_v60 = vadd.f32 %v7119_v43, %v7107_v28 }
 0x1cc   : > { %v12263_v3 = vld [vmem:[%s15555_s27 + $0x1520] sm:$0xf0] }
 0x1cd   : > { %v14663_v4 = vld [vmem:[%s15555_s27 + $0x1704] sm:$0xf]  ;;  %v12266_v13 = vor.u32 %v14599_v2, %v12263_v3  ;;  %7387 = vmatpush.bf16.msra.mxu0 %v11722_v10  ;;  %v7132_v3 = vpop.f32.mrf.mxu0  ;;  %v7145_v10 = vpop.f32.mrf.mxu1 }
 0x1ce   : > { %v12519_v5 = vld [vmem:[%s15555_s27 + $0x1720] sm:$0xf0] }
 0x1cf   : > { %v14519_v7 = vld [vmem:[%s15555_s27 + $0x1284] sm:$0xf]  ;;  %v12522_v20 = vor.u32 %v14663_v4, %v12519_v5  ;;  %7412 = vmatpush.bf16.msra.mxu2 %v12266_v13 }
 0x1d0   : > { %v11943_v9 = vld [vmem:[%s15555_s27 + $0x12a0] sm:$0xf0] }
 0x1d1   : > { %v14455_v14 = vld [vmem:[%s15555_s27 + $0x1084] sm:$0xf]  ;;  %v11946_v21 = vor.u32 %v14519_v7, %v11943_v9  ;;  %7425 = vmatpush.bf16.msra.mxu3 %v12522_v20  ;;  %v7133_v9 = vadd.f32 %v7132_v3, %v7120_v60 }
 0x1d2   : > { %v11687_v16 = vld [vmem:[%s15555_s27 + $0x10a0] sm:$0xf0] }
 0x1d3   : > { %v14591_v8 = vld [vmem:[%s15555_s27 + $0x14c4] sm:$0xf]  ;;  %v11690_v30 = vor.u32 %v14455_v14, %v11687_v16  ;;  %7401 = vmatpush.bf16.msra.mxu1 %v11946_v21 }
 0x1d4   : > { %v12231_v23 = vld [vmem:[%s15555_s27 + $0x14e0] sm:$0xf0] }
 0x1d5   : > { %v14655_v24 = vld [vmem:[%s15555_s27 + $0x16c4] sm:$0xf]  ;;  %v12234_v32 = vor.u32 %v14591_v8, %v12231_v23  ;;  %7388 = vmatpush.bf16.msra.mxu0 %v11690_v30  ;;  %v7146_v23 = vadd.f32 %v7145_v10, %v7133_v9  ;;  %v7108_v30 = vpop.f32.mrf.mxu2 }
 0x1d6   : > { %v12487_v25 = vld [vmem:[%s15555_s27 + $0x16e0] sm:$0xf0] }
 0x1d7   : > { %v14511_v26 = vld [vmem:[%s15555_s27 + $0x1244] sm:$0xf]  ;;  %v12490_v36 = vor.u32 %v14655_v24, %v12487_v25  ;;  %7413 = vmatpush.bf16.msra.mxu2 %v12234_v32  ;;  %v7121_v32 = vpop.f32.mrf.mxu3 }
 0x1d8   : > { %v11911_v29 = vld [vmem:[%s15555_s27 + $0x1260] sm:$0xf0] }
 0x1d9   : > { %v14447_v33 = vld [vmem:[%s15555_s27 + $0x1044] sm:$0xf]  ;;  %v11914_v37 = vor.u32 %v14511_v26, %v11911_v29  ;;  %7426 = vmatpush.bf16.msra.mxu3 %v12490_v36 }
 0x1da   : > { %v11655_v34 = vld [vmem:[%s15555_s27 + $0x1060] sm:$0xf0] }
 0x1db   : > { %v14583_v38 = vld [vmem:[%s15555_s27 + $0x1484] sm:$0xf]  ;;  %v11658_v50 = vor.u32 %v14447_v33, %v11655_v34  ;;  %7402 = vmatpush.bf16.msra.mxu1 %v11914_v37 }
 0x1dc   : > { %v12199_v40 = vld [vmem:[%s15555_s27 + $0x14a0] sm:$0xf0] }
 0x1dd   : > { %v14647_v41 = vld [vmem:[%s15555_s27 + $0x1684] sm:$0xf]  ;;  %v12202_v55 = vor.u32 %v14583_v38, %v12199_v40  ;;  %7389 = vmatpush.bf16.msra.mxu0 %v11658_v50  ;;  %v7134_v50 = vpop.f32.mrf.mxu0 }
 0x1de   : > { %v12455_v44 = vld [vmem:[%s15555_s27 + $0x16a0] sm:$0xf0] }
 0x1df   : > { %v14503_v45 = vld [vmem:[%s15555_s27 + $0x1204] sm:$0xf]  ;;  %v12458_v61 = vor.u32 %v14647_v41, %v12455_v44  ;;  %7414 = vmatpush.bf16.msra.mxu2 %v12202_v55 }
 0x1e0   : > { %v11879_v48 = vld [vmem:[%s15555_s27 + $0x1220] sm:$0xf0] }
 0x1e1   : > { %v14815_v51 = vld [vmem:[%s15555_s27 + $0x1bc4] sm:$0xf]  ;;  %v11882_v62 = vor.u32 %v14503_v45, %v11879_v48  ;;  %7427 = vmatpush.bf16.msra.mxu3 %v12458_v61 }
 0x1e2   : > { %v13127_v54 = vld [vmem:[%s15555_s27 + $0x1be0] sm:$0xf0] }
 0x1e3   : > { %v14439_v56 = vld [vmem:[%s15555_s27 + $0x1004] sm:$0xf]  ;;  %v13130_v4 = vor.u32 %v14815_v51, %v13127_v54  ;;  %7403 = vmatpush.bf16.msra.mxu1 %v11882_v62 }
 0x1e4   : > { %v11623_v57 = vld [vmem:[%s15555_s27 + $0x1020] sm:$0xf0] }
 0x1e5   : > { %v14751_v59 = vld [vmem:[%s15555_s27 + $0x19c4] sm:$0xf]  ;;  %v11626_v13 = vor.u32 %v14439_v56, %v11623_v57 }
 0x1e6   : > { %v12871_v1 = vld [vmem:[%s15555_s27 + $0x19e0] sm:$0xf0]  ;;  %7404 = vmatmul.bf16.vlgmr.msra.gmra.mxu1 %v15851_v49 }
 0x1e7   : > { %v14575_v58 = vld [vmem:[%s15555_s27 + $0x1444] sm:$0xf]  ;;  %v12874_v17 = vor.u32 %v14751_v59, %v12871_v1  ;;  %7448 = vmatpush.bf16.msrb.mxu1 %v13130_v4  ;;  %7390 = vmatpush.bf16.msra.mxu0 %v11626_v13  ;;  %v7147_v59 = vpop.f32.mrf.mxu1  ;;  %v7158_v4 = vpop.f32.mrf.mxu2 }
 0x1e8   : > { %v12167_v2 = vld [vmem:[%s15555_s27 + $0x1460] sm:$0xf0] }
 0x1e9   : > { %v14639_v5 = vld [vmem:[%s15555_s27 + $0x1644] sm:$0xf]  ;;  %v12170_v18 = vor.u32 %v14575_v58, %v12167_v2 }
 0x1ea   : > { %v12423_v7 = vld [vmem:[%s15555_s27 + $0x1660] sm:$0xf0]  ;;  %7391 = vmatmul.bf16.vlgmr.msra.gmra.mxu0 %v15843_v39 }
 0x1eb   : > { %v14807_v14 = vld [vmem:[%s15555_s27 + $0x1b84] sm:$0xf]  ;;  %v12426_v24 = vor.u32 %v14639_v5, %v12423_v7  ;;  %7435 = vmatpush.bf16.msrb.mxu0 %v12874_v17  ;;  %7415 = vmatpush.bf16.msra.mxu2 %v12170_v18  ;;  %v7171_v5 = vpop.f32.mrf.mxu3 }
 0x1ec   : > { %v13095_v16 = vld [vmem:[%s15555_s27 + $0x1ba0] sm:$0xf0] }
 0x1ed   : > { %v14743_v20 = vld [vmem:[%s15555_s27 + $0x1984] sm:$0xf]  ;;  %v13098_v33 = vor.u32 %v14807_v14, %v13095_v16  ;;  %7428 = vmatpush.bf16.msra.mxu3 %v12426_v24  ;;  %v7159_v16 = vadd.f32 %v7158_v4, %v7146_v23 }
 0x1ee   : > { %v12839_v21 = vld [vmem:[%s15555_s27 + $0x19a0] sm:$0xf0] }
 0x1ef   : > { %v14567_v8 = vld [vmem:[%s15555_s27 + $0x1404] sm:$0xf]  ;;  %v12842_v42 = vor.u32 %v14743_v20, %v12839_v21  ;;  %7449 = vmatpush.bf16.msrb.mxu1 %v13098_v33 }
 0x1f0   : > { %v12135_v25 = vld [vmem:[%s15555_s27 + $0x1420] sm:$0xf0] }
 0x1f1   : > { %v14631_v26 = vld [vmem:[%s15555_s27 + $0x1604] sm:$0xf]  ;;  %v12138_v43 = vor.u32 %v14567_v8, %v12135_v25  ;;  %7436 = vmatpush.bf16.msrb.mxu0 %v12842_v42  ;;  %v7172_v8 = vadd.f32 %v7171_v5, %v7159_v16 }
 0x1f2   : > { %v12391_v29 = vld [vmem:[%s15555_s27 + $0x1620] sm:$0xf0] }
 0x1f3   : > { %v14879_v34 = vld [vmem:[%s15555_s27 + $0x1dc4] sm:$0xf]  ;;  %v12394_v44 = vor.u32 %v14631_v26, %v12391_v29  ;;  %7416 = vmatpush.bf16.msra.mxu2 %v12138_v43  ;;  %v7184_v26 = vpop.f32.mrf.mxu0  ;;  %v7173_v50 = vpop.f32.mrf.mxu3 }
 0x1f4   : > { %v13383_v36 = vld [vmem:[%s15555_s27 + $0x1de0] sm:$0xf0] }
 0x1f5   : > { %v14943_v37 = vld [vmem:[%s15555_s27 + $0x1fc4] sm:$0xf]  ;;  %v13386_v45 = vor.u32 %v14879_v34, %v13383_v36  ;;  %7429 = vmatpush.bf16.msra.mxu3 %v12394_v44  ;;  %v7185_v36 = vadd.f32 %v7184_v26, %v7172_v8 }
 0x1f6   : > { %v13639_v38 = vld [vmem:[%s15555_s27 + $0x1fe0] sm:$0xf0]  ;;  %7417 = vmatmul.bf16.vlgmr.msra.gmra.mxu2 %v15864_v6 }
 0x1f7   : > { %v14799_v40 = vld [vmem:[%s15555_s27 + $0x1b44] sm:$0xf]  ;;  %v13642_v51 = vor.u32 %v14943_v37, %v13639_v38  ;;  %7461 = vmatpush.bf16.msrb.mxu2 %v13386_v45 }
 0x1f8   : > { %v13063_v41 = vld [vmem:[%s15555_s27 + $0x1b60] sm:$0xf0]  ;;  %7430 = vmatmul.bf16.vlgmr.msra.gmra.mxu3 %v15869_v15 }
 0x1f9   : > { %v14735_v48 = vld [vmem:[%s15555_s27 + $0x1944] sm:$0xf]  ;;  %v13066_v54 = vor.u32 %v14799_v40, %v13063_v41  ;;  %7474 = vmatpush.bf16.msrb.mxu3 %v13642_v51  ;;  %v7197_v41 = vpop.f32.mrf.mxu1 }
 0x1fa   : > { %v12807_v28 = vld [vmem:[%s15555_s27 + $0x1960] sm:$0xf0]  ;;  %v7198_v43 = vadd.f32 %v7197_v41, %v7185_v36 }
 0x1fb   : > { %v14871_v55 = vld [vmem:[%s15555_s27 + $0x1d84] sm:$0xf]  ;;  %v12810_v1 = vor.u32 %v14735_v48, %v12807_v28  ;;  %7450 = vmatpush.bf16.msrb.mxu1 %v13066_v54  ;;  %v7160_v28 = vpop.f32.mrf.mxu2 }
 0x1fc   : > { %v13351_v56 = vld [vmem:[%s15555_s27 + $0x1da0] sm:$0xf0] }
 0x1fd   : > { %v14935_v57 = vld [vmem:[%s15555_s27 + $0x1f84] sm:$0xf]  ;;  %v13354_v58 = vor.u32 %v14871_v55, %v13351_v56  ;;  %7437 = vmatpush.bf16.msrb.mxu0 %v12810_v1 }
 0x1fe   : > { %v13607_v60 = vld [vmem:[%s15555_s27 + $0x1fa0] sm:$0xf0] }
 0x1ff   : > { %v14791_v61 = vld [vmem:[%s15555_s27 + $0x1b04] sm:$0xf]  ;;  %v13610_v7 = vor.u32 %v14935_v57, %v13607_v60  ;;  %7462 = vmatpush.bf16.msrb.mxu2 %v13354_v58 }
 0x200   : > { %v13031_v62 = vld [vmem:[%s15555_s27 + $0x1b20] sm:$0xf0] }
 0x201   : > { %v14727_v2 = vld [vmem:[%s15555_s27 + $0x1904] sm:$0xf]  ;;  %v13034_v9 = vor.u32 %v14791_v61, %v13031_v62  ;;  %7475 = vmatpush.bf16.msrb.mxu3 %v13610_v7 }
 0x202   : > { %v12775_v3 = vld [vmem:[%s15555_s27 + $0x1920] sm:$0xf0] }
 0x203   : > { %v14863_v10 = vld [vmem:[%s15555_s27 + $0x1d44] sm:$0xf]  ;;  %v12778_v21 = vor.u32 %v14727_v2, %v12775_v3  ;;  %7451 = vmatpush.bf16.msrb.mxu1 %v13034_v9  ;;  %v7210_v26 = vpop.f32.mrf.mxu2 }
 0x204   : > { %v13319_v13 = vld [vmem:[%s15555_s27 + $0x1d60] sm:$0xf0]  ;;  %v7211_v36 = vadd.f32 %v7210_v26, %v7198_v43  ;;  %v9773_v43 = vld [vmem:[%s15555_s27 + $0x188] sm:$0xf] }
 0x205   : > { %v14927_v14 = vld [vmem:[%s15555_s27 + $0x1f44] sm:$0xf]  ;;  %v13322_v24 = vor.u32 %v14863_v10, %v13319_v13  ;;  %7438 = vmatpush.bf16.msrb.mxu0 %v12778_v21  ;;  %v7186_v10 = vpop.f32.mrf.mxu0  ;;  %v7199_v21 = vpop.f32.mrf.mxu1 }
 0x206   : > { %v13575_v17 = vld [vmem:[%s15555_s27 + $0x1f60] sm:$0xf0]  ;;  %v9741_v10 = vld [vmem:[%s15555_s27 + $0x148] sm:$0xf] }
 0x207   : > { %v14783_v18 = vld [vmem:[%s15555_s27 + $0x1ac4] sm:$0xf]  ;;  %v13578_v29 = vor.u32 %v14927_v14, %v13575_v17  ;;  %7463 = vmatpush.bf16.msrb.mxu2 %v13322_v24  ;;  %v10541_v21 = vld [vmem:[%s15555_s27 + $0x788] sm:$0xf] }
 0x208   : > { %v12999_v20 = vld [vmem:[%s15555_s27 + $0x1ae0] sm:$0xf0] }
 0x209   : > { %v14719_v25 = vld [vmem:[%s15555_s27 + $0x18c4] sm:$0xf]  ;;  %v13002_v30 = vor.u32 %v14783_v18, %v12999_v20  ;;  %7476 = vmatpush.bf16.msrb.mxu3 %v13578_v29  ;;  %v10061_v18 = vld [vmem:[%s15555_s27 + $0x3c8] sm:$0xf] }
 0x20a   : > { %v12743_v23 = vld [vmem:[%s15555_s27 + $0x18e0] sm:$0xf0]  ;;  %v14052_v20 = vld [vmem:[%s15555_s27 + $0x3e4] sm:$0xf0] }
 0x20b   : > { %v14855_v32 = vld [vmem:[%s15555_s27 + $0x1d04] sm:$0xf]  ;;  %v12746_v42 = vor.u32 %v14719_v25, %v12743_v23  ;;  %7452 = vmatpush.bf16.msrb.mxu1 %v13002_v30  ;;  %v9805_v23 = vld [vmem:[%s15555_s27 + $0x1c8] sm:$0xf] }
 0x20c   : > { %v13287_v33 = vld [vmem:[%s15555_s27 + $0x1d20] sm:$0xf0] }
 0x20d   : > { %v14919_v34 = vld [vmem:[%s15555_s27 + $0x1f04] sm:$0xf]  ;;  %v13290_v44 = vor.u32 %v14855_v32, %v13287_v33  ;;  %7439 = vmatpush.bf16.msrb.mxu0 %v12746_v42  ;;  %v13988_v32 = vld [vmem:[%s15555_s27 + $0x1e4] sm:$0xf0] }
 0x20e   : > { %v13543_v37 = vld [vmem:[%s15555_s27 + $0x1f20] sm:$0xf0]  ;;  %v9806_v28 = vor.u32 %v13988_v32, %v9805_v23  ;;  %v14028_v23 = vld [vmem:[%s15555_s27 + $0x324] sm:$0xf0] }
 0x20f   : > { %v14775_v38 = vld [vmem:[%s15555_s27 + $0x1a84] sm:$0xf]  ;;  %v13546_v51 = vor.u32 %v14919_v34, %v13543_v37  ;;  %7464 = vmatpush.bf16.msrb.mxu2 %v13290_v44  ;;  %v7223_v37 = vpop.f32.mrf.mxu3  ;;  %v10029_v44 = vld [vmem:[%s15555_s27 + $0x388] sm:$0xf] }
 0x210   : > { %v12967_v40 = vld [vmem:[%s15555_s27 + $0x1aa0] sm:$0xf0]  ;;  %v13964_v32 = vld [vmem:[%s15555_s27 + $0x124] sm:$0xf0] }
 0x211   : > { %v14711_v45 = vld [vmem:[%s15555_s27 + $0x1884] sm:$0xf]  ;;  %v12970_v54 = vor.u32 %v14775_v38, %v12967_v40  ;;  %7477 = vmatpush.bf16.msrb.mxu3 %v13546_v51  ;;  %v10062_v38 = vor.u32 %v14052_v20, %v10061_v18  ;;  %v13980_v51 = vld [vmem:[%s15555_s27 + $0x1a4] sm:$0xf0] }
 0x212   : > { %v12711_v48 = vld [vmem:[%s15555_s27 + $0x18a0] sm:$0xf0]  ;;  %v10285_v18 = vld [vmem:[%s15555_s27 + $0x588] sm:$0xf] }
 0x213   : > { %v14847_v55 = vld [vmem:[%s15555_s27 + $0x1cc4] sm:$0xf]  ;;  %v12714_v62 = vor.u32 %v14711_v45, %v12711_v48  ;;  %7453 = vmatpush.bf16.msrb.mxu1 %v12970_v54  ;;  %v14044_v45 = vld [vmem:[%s15555_s27 + $0x3a4] sm:$0xf0]  ;;  %v16208_v48 = vadd.f32 %v7223_v37, %v7211_v36 }
 0x214   : > { %v13255_v56 = vld [vmem:[%s15555_s27 + $0x1ce0] sm:$0xf0]  ;;  %v14108_v20 = vld [vmem:[%s15555_s27 + $0x5a4] sm:$0xf0] }
 0x215   : > { %v14911_v57 = vld [vmem:[%s15555_s27 + $0x1ec4] sm:$0xf]  ;;  %v13258_v1 = vor.u32 %v14847_v55, %v13255_v56  ;;  %7440 = vmatpush.bf16.msrb.mxu0 %v12714_v62  ;;  %v14116_v62 = vld [vmem:[%s15555_s27 + $0x5e4] sm:$0xf0] }
 0x216   : > { %v13511_v59 = vld [vmem:[%s15555_s27 + $0x1ee0] sm:$0xf0]  ;;  %v10253_v36 = vld [vmem:[%s15555_s27 + $0x548] sm:$0xf] }
 0x217   : > { %v14767_v60 = vld [vmem:[%s15555_s27 + $0x1a44] sm:$0xf]  ;;  %v13514_v3 = vor.u32 %v14911_v57, %v13511_v59  ;;  %7465 = vmatpush.bf16.msrb.mxu2 %v13258_v1  ;;  %v10573_v1 = vld [vmem:[%s15555_s27 + $0x7c8] sm:$0xf] }
 0x218   : > { %v12935_v61 = vld [vmem:[%s15555_s27 + $0x1a60] sm:$0xf0]  ;;  %v14100_v37 = vld [vmem:[%s15555_s27 + $0x564] sm:$0xf0] }
 0x219   : > { %v14703_v58 = vld [vmem:[%s15555_s27 + $0x1844] sm:$0xf]  ;;  %v12938_v4 = vor.u32 %v14767_v60, %v12935_v61  ;;  %7478 = vmatpush.bf16.msrb.mxu3 %v13514_v3  ;;  %v10030_v60 = vor.u32 %v14044_v45, %v10029_v44  ;;  %v10317_v61 = vld [vmem:[%s15555_s27 + $0x5c8] sm:$0xf]  ;;  %v10254_v45 = vor.u32 %v14100_v37, %v10253_v36 }
 0x21a   : > { %v12679_v2 = vld [vmem:[%s15555_s27 + $0x1860] sm:$0xf0]  ;;  %v14036_v3 = vld [vmem:[%s15555_s27 + $0x364] sm:$0xf0] }
 0x21b   : > { %v14839_v5 = vld [vmem:[%s15555_s27 + $0x1c84] sm:$0xf]  ;;  %v12682_v17 = vor.u32 %v14703_v58, %v12679_v2  ;;  %7454 = vmatpush.bf16.msrb.mxu1 %v12938_v4  ;;  %v14180_v58 = vld [vmem:[%s15555_s27 + $0x7e4] sm:$0xf0]  ;;  %v9774_v4 = vor.u32 %v13980_v51, %v9773_v43  ;;  %v7236_v43 = vpop.f32.mrf.mxu0  ;;  %v7249_v51 = vpop.f32.mrf.mxu1 }
 0x21c   : > { %v13223_v7 = vld [vmem:[%s15555_s27 + $0x1ca0] sm:$0xf0]  ;;  %v9997_v2 = vld [vmem:[%s15555_s27 + $0x348] sm:$0xf] }
 0x21d   : > { %v14903_v9 = vld [vmem:[%s15555_s27 + $0x1e84] sm:$0xf]  ;;  %v13226_v8 = vor.u32 %v14839_v5, %v13223_v7  ;;  %7441 = vmatpush.bf16.msrb.mxu0 %v12682_v17  ;;  %v9998_v17 = vor.u32 %v14036_v3, %v9997_v2  ;;  %v13996_v36 = vld [vmem:[%s15555_s27 + $0x224] sm:$0xf0] }
 0x21e   : > { %v13479_v13 = vld [vmem:[%s15555_s27 + $0x1ea0] sm:$0xf0] }
 0x21f   : > { %v14759_v14 = vld [vmem:[%s15555_s27 + $0x1a04] sm:$0xf]  ;;  %v13482_v29 = vor.u32 %v14903_v9, %v13479_v13  ;;  %7466 = vmatpush.bf16.msrb.mxu2 %v13226_v8  ;;  %v10318_v9 = vor.u32 %v14116_v62, %v10317_v61  ;;  %v13972_v13 = vld [vmem:[%s15555_s27 + $0x164] sm:$0xf0]  ;;  %v7225_v8 = vpop.f32.mrf.mxu3 }
 0x220   : > { %v12903_v16 = vld [vmem:[%s15555_s27 + $0x1a20] sm:$0xf0]  ;;  %v9742_v26 = vor.u32 %v13972_v13, %v9741_v10  ;;  %v14156_v61 = vld [vmem:[%s15555_s27 + $0x724] sm:$0xf0] }
 0x221   : > { %v14695_v24 = vld [vmem:[%s15555_s27 + $0x1804] sm:$0xf]  ;;  %v12906_v30 = vor.u32 %v14759_v14, %v12903_v16  ;;  %7479 = vmatpush.bf16.msrb.mxu3 %v13482_v29  ;;  %v7212_v14 = vpop.f32.mrf.mxu2  ;;  %v10574_v16 = vor.u32 %v14180_v58, %v10573_v1  ;;  %v10286_v29 = vor.u32 %v14108_v20, %v10285_v18  ;;  %v9901_v62 = vld [vmem:[%s15555_s27 + $0x288] sm:$0xf] }
 0x222   : > { %v12647_v25 = vld [vmem:[%s15555_s27 + $0x1820] sm:$0xf0]  ;;  %v14012_v1 = vld [vmem:[%s15555_s27 + $0x2a4] sm:$0xf0] }
 0x223   : > { %v14831_v33 = vld [vmem:[%s15555_s27 + $0x1c44] sm:$0xf]  ;;  %v12650_v42 = vor.u32 %v14695_v24, %v12647_v25  ;;  %7455 = vmatpush.bf16.msrb.mxu1 %v12906_v30  ;;  %v14172_v24 = vld [vmem:[%s15555_s27 + $0x7a4] sm:$0xf0] }
 0x224   : > { %v13191_v34 = vld [vmem:[%s15555_s27 + $0x1c60] sm:$0xf0]  ;;  %v9965_v25 = vld [vmem:[%s15555_s27 + $0x308] sm:$0xf] }
 0x225   : > { %v14895_v40 = vld [vmem:[%s15555_s27 + $0x1e44] sm:$0xf]  ;;  %v13194_v50 = vor.u32 %v14831_v33, %v13191_v34  ;;  %7442 = vmatpush.bf16.msrb.mxu0 %v12650_v42  ;;  %v9709_v30 = vld [vmem:[%s15555_s27 + $0x108] sm:$0xf]  ;;  %v10542_v33 = vor.u32 %v14172_v24, %v10541_v21  ;;  %v9966_v34 = vor.u32 %v14028_v23, %v9965_v25 }
 0x226   : > { %v13447_v41 = vld [vmem:[%s15555_s27 + $0x1e60] sm:$0xf0]  ;;  %7456 = vmatmul.bf16.vlgmr.msrb.gmra.mxu1 %v15925_v0  ;;  %v14020_v42 = vld [vmem:[%s15555_s27 + $0x2e4] sm:$0xf0]  ;;  %v9710_v44 = vor.u32 %v13964_v32, %v9709_v30  ;;  %v7238_v30 = vpop.f32.mrf.mxu0  ;;  %v7251_v32 = vpop.f32.mrf.mxu1 }
 0x227   : > { %v14823_v54 = vld [vmem:[%s15555_s27 + $0x1c04] sm:$0xf]  ;;  %v13450_v55 = vor.u32 %v14895_v40, %v13447_v41  ;;  %7500 = vmatpush.bf16.msra.mxu1 %v10062_v38  ;;  %7467 = vmatpush.bf16.msrb.mxu2 %v13194_v50  ;;  %v10509_v38 = vld [vmem:[%s15555_s27 + $0x748] sm:$0xf] }
 0x228   : > { %v13159_v56 = vld [vmem:[%s15555_s27 + $0x1c20] sm:$0xf0]  ;;  %7443 = vmatmul.bf16.vlgmr.msrb.gmra.mxu0 %v15923_v63  ;;  %v14164_v40 = vld [vmem:[%s15555_s27 + $0x764] sm:$0xf0] }
 0x229   : > { %v14887_v57 = vld [vmem:[%s15555_s27 + $0x1e04] sm:$0xf]  ;;  %7487 = vmatpush.bf16.msra.mxu0 %v9806_v28  ;;  %v13162_v5 = vor.u32 %v14823_v54, %v13159_v56  ;;  %7480 = vmatpush.bf16.msrb.mxu3 %v13450_v55  ;;  %v9933_v41 = vld [vmem:[%s15555_s27 + $0x2c8] sm:$0xf]  ;;  %v10510_v54 = vor.u32 %v14164_v40, %v10509_v38 }
 0x22a   : > { %v13415_v59 = vld [vmem:[%s15555_s27 + $0x1e20] sm:$0xf0]  ;;  %v9677_v28 = vld [vmem:[%s15555_s27 + $0xc8] sm:$0xf]  ;;  %v9934_v55 = vor.u32 %v14020_v42, %v9933_v41 }
 0x22b   : > { %v13418_v7 = vor.u32 %v14887_v57, %v13415_v59  ;;  %7501 = vmatpush.bf16.msra.mxu1 %v10030_v60  ;;  %7468 = vmatpush.bf16.msrb.mxu2 %v13162_v5  ;;  %v13956_v50 = vld [vmem:[%s15555_s27 + $0xe4] sm:$0xf0]  ;;  %v7237_v60 = vadd.f32 %v7236_v43, %v16208_v48 }
 0x22c   : > { %v10221_v56 = vld [vmem:[%s15555_s27 + $0x508] sm:$0xf]  ;;  %v9678_v58 = vor.u32 %v13956_v50, %v9677_v28  ;;  %v7262_v28 = vpop.f32.mrf.mxu2 }
 0x22d   : > { %7488 = vmatpush.bf16.msra.mxu0 %v9774_v4  ;;  %7481 = vmatpush.bf16.msrb.mxu3 %v13418_v7  ;;  %v14092_v57 = vld [vmem:[%s15555_s27 + $0x524] sm:$0xf0]  ;;  %v7250_v2 = vadd.f32 %v7249_v51, %v7237_v60  ;;  %v9902_v7 = vor.u32 %v14012_v1, %v9901_v62 }
 0x22e   : > { %7469 = vmatmul.bf16.vlgmr.msrb.gmra.mxu2 %v15943_v31  ;;  %v10477_v59 = vld [vmem:[%s15555_s27 + $0x708] sm:$0xf]  ;;  %v10222_v3 = vor.u32 %v14092_v57, %v10221_v56  ;;  %v7275_v57 = vpop.f32.mrf.mxu3 }
 0x22f   : > { %7513 = vmatpush.bf16.msra.mxu2 %v10318_v9  ;;  %7502 = vmatpush.bf16.msra.mxu1 %v9998_v17  ;;  %v9645_v4 = vld [vmem:[%s15555_s27 + $0x88] sm:$0xf]  ;;  %v10478_v48 = vor.u32 %v14156_v61, %v10477_v59  ;;  %v7263_v56 = vadd.f32 %v7262_v28, %v7250_v2 }
 0x230   : > { %7482 = vmatmul.bf16.vlgmr.msrb.gmra.mxu3 %v15947_v35  ;;  %v13948_v5 = vld [vmem:[%s15555_s27 + $0xa4] sm:$0xf0] }
 0x231   : > { %7526 = vmatpush.bf16.msra.mxu3 %v10574_v16  ;;  %7489 = vmatpush.bf16.msra.mxu0 %v9742_v26  ;;  %v10189_v9 = vld [vmem:[%s15555_s27 + $0x4c8] sm:$0xf]  ;;  %v9646_v18 = vor.u32 %v13948_v5, %v9645_v4 }
 0x232   : > { %v14084_v10 = vld [vmem:[%s15555_s27 + $0x4e4] sm:$0xf0] }
 0x233   : > { %7514 = vmatpush.bf16.msra.mxu2 %v10286_v29  ;;  %7503 = vmatpush.bf16.msra.mxu1 %v9966_v34  ;;  %v10445_v13 = vld [vmem:[%s15555_s27 + $0x6c8] sm:$0xf]  ;;  %v10190_v20 = vor.u32 %v14084_v10, %v10189_v9 }
 0x234   : > { %v14148_v14 = vld [vmem:[%s15555_s27 + $0x6e4] sm:$0xf0] }
 0x235   : > { %7527 = vmatpush.bf16.msra.mxu3 %v10542_v33  ;;  %7490 = vmatpush.bf16.msra.mxu0 %v9710_v44  ;;  %v9869_v16 = vld [vmem:[%s15555_s27 + $0x248] sm:$0xf]  ;;  %v10446_v24 = vor.u32 %v14148_v14, %v10445_v13 }
 0x236   : > { %v14004_v17 = vld [vmem:[%s15555_s27 + $0x264] sm:$0xf0] }
 0x237   : > { %7515 = vmatpush.bf16.msra.mxu2 %v10254_v45  ;;  %7504 = vmatpush.bf16.msra.mxu1 %v9934_v55  ;;  %v9613_v21 = vld [vmem:[%s15555_s27 + $0x48] sm:$0xf]  ;;  %v9870_v25 = vor.u32 %v14004_v17, %v9869_v16 }
 0x238   : > { %v13940_v8 = vld [vmem:[%s15555_s27 + $0x64] sm:$0xf0] }
 0x239   : > { %7528 = vmatpush.bf16.msra.mxu3 %v10510_v54  ;;  %7491 = vmatpush.bf16.msra.mxu0 %v9678_v58  ;;  %v10157_v23 = vld [vmem:[%s15555_s27 + $0x488] sm:$0xf]  ;;  %v9614_v37 = vor.u32 %v13940_v8, %v9613_v21 }
 0x23a   : > { %v14076_v26 = vld [vmem:[%s15555_s27 + $0x4a4] sm:$0xf0] }
 0x23b   : > { %7516 = vmatpush.bf16.msra.mxu2 %v10222_v3  ;;  %7505 = vmatpush.bf16.msra.mxu1 %v9902_v7  ;;  %v10413_v29 = vld [vmem:[%s15555_s27 + $0x688] sm:$0xf]  ;;  %v10158_v41 = vor.u32 %v14076_v26, %v10157_v23  ;;  %v16279_v3 = vadd.f32 %v7275_v57, %v7263_v56 }
 0x23c   : > { %v14140_v33 = vld [vmem:[%s15555_s27 + $0x6a4] sm:$0xf0] }
 0x23d   : > { %7529 = vmatpush.bf16.msra.mxu3 %v10478_v48  ;;  %v9837_v34 = vld [vmem:[%s15555_s27 + $0x208] sm:$0xf]  ;;  %7492 = vmatpush.bf16.msra.mxu0 %v9646_v18  ;;  %v10414_v50 = vor.u32 %v14140_v33, %v10413_v29  ;;  %v7264_v33 = vpop.f32.mrf.mxu2 }
 0x23e   : > { %v11085_v38 = vld [vmem:[%s15555_s27 + $0xbc8] sm:$0xf]  ;;  %v9838_v43 = vor.u32 %v13996_v36, %v9837_v34 }
 0x23f   : > { %v14308_v40 = vld [vmem:[%s15555_s27 + $0xbe4] sm:$0xf0]  ;;  %7517 = vmatpush.bf16.msra.mxu2 %v10190_v20  ;;  %7506 = vmatpush.bf16.msra.mxu1 %v9870_v25 }
 0x240   : > { %v9581_v42 = vld [vmem:[%s15555_s27 + $0x8] sm:$0xf]  ;;  %v11086_v59 = vor.u32 %v14308_v40, %v11085_v38 }
 0x241   : > { %v13932_v44 = vld [vmem:[%s15555_s27 + $0x24] sm:$0xf0]  ;;  %7530 = vmatpush.bf16.msra.mxu3 %v10446_v24  ;;  %7493 = vmatpush.bf16.msra.mxu0 %v9614_v37 }
 0x242   : > { %v10829_v45 = vld [vmem:[%s15555_s27 + $0x9c8] sm:$0xf]  ;;  %v9582_v62 = vor.u32 %v13932_v44, %v9581_v42 }
 0x243   : > { %v14244_v51 = vld [vmem:[%s15555_s27 + $0x9e4] sm:$0xf0]  ;;  %7518 = vmatpush.bf16.msra.mxu2 %v10158_v41  ;;  %7507 = vmatpush.bf16.msra.mxu1 %v9838_v43  ;;  %v7277_v41 = vpop.f32.mrf.mxu3  ;;  %v1880_v43 = vperm.slane %v16081_v19, 1 }
 0x244   : > { %v10125_v54 = vld [vmem:[%s15555_s27 + $0x448] sm:$0xf]  ;;  %v10830_v4 = vor.u32 %v14244_v51, %v10829_v45 }
 0x245   : > { %v14068_v55 = vld [vmem:[%s15555_s27 + $0x464] sm:$0xf0]  ;;  %7531 = vmatpush.bf16.msra.mxu3 %v10414_v50  ;;  %7494 = vmatpush.bf16.msra.mxu0 %v9582_v62 }
 0x246   : > { %v10381_v60 = vld [vmem:[%s15555_s27 + $0x648] sm:$0xf]  ;;  %v10126_v5 = vor.u32 %v14068_v55, %v10125_v54  ;;  %7508 = vmatmul.bf16.vlgmr.msra.gmra.mxu1 %v15754_v12 }
 0x247   : > { %v14132_v61 = vld [vmem:[%s15555_s27 + $0x664] sm:$0xf0]  ;;  %7552 = vmatpush.bf16.msrb.mxu1 %v11086_v59 }
 0x248   : > { %v11053_v1 = vld [vmem:[%s15555_s27 + $0xb88] sm:$0xf]  ;;  %v10382_v9 = vor.u32 %v14132_v61, %v10381_v60  ;;  %7519 = vmatpush.bf16.msra.mxu2 %v10126_v5  ;;  %7495 = vmatmul.bf16.vlgmr.msra.gmra.mxu0 %v15752_v11 }
 0x249   : > { %v14300_v58 = vld [vmem:[%s15555_s27 + $0xba4] sm:$0xf0]  ;;  %7539 = vmatpush.bf16.msrb.mxu0 %v10830_v4 }
 0x24a   : > { %v10797_v2 = vld [vmem:[%s15555_s27 + $0x988] sm:$0xf]  ;;  %v11054_v16 = vor.u32 %v14300_v58, %v11053_v1  ;;  %7532 = vmatpush.bf16.msra.mxu3 %v10382_v9 }
 0x24b   : > { %v14236_v48 = vld [vmem:[%s15555_s27 + $0x9a4] sm:$0xf0] }
 0x24c   : > { %v10093_v7 = vld [vmem:[%s15555_s27 + $0x408] sm:$0xf]  ;;  %v10798_v25 = vor.u32 %v14236_v48, %v10797_v2  ;;  %7553 = vmatpush.bf16.msrb.mxu1 %v11054_v16  ;;  %v7288_v2 = vpop.f32.mrf.mxu0  ;;  %v7301_v48 = vpop.f32.mrf.mxu1 }
 0x24d   : > { %v14060_v10 = vld [vmem:[%s15555_s27 + $0x424] sm:$0xf0]  ;;  %v7289_v16 = vadd.f32 %v7288_v2, %v1880_v43 }
 0x24e   : > { %v10349_v13 = vld [vmem:[%s15555_s27 + $0x608] sm:$0xf]  ;;  %v10094_v23 = vor.u32 %v14060_v10, %v10093_v7  ;;  %7540 = vmatpush.bf16.msrb.mxu0 %v10798_v25 }
 0x24f   : > { %v14124_v14 = vld [vmem:[%s15555_s27 + $0x624] sm:$0xf0] }
 0x250   : > { %v11341_v17 = vld [vmem:[%s15555_s27 + $0xdc8] sm:$0xf]  ;;  %v10350_v26 = vor.u32 %v14124_v14, %v10349_v13  ;;  %7520 = vmatpush.bf16.msra.mxu2 %v10094_v23 }
 0x251   : > { %v14372_v18 = vld [vmem:[%s15555_s27 + $0xde4] sm:$0xf0] }
 0x252   : > { %v11597_v20 = vld [vmem:[%s15555_s27 + $0xfc8] sm:$0xf]  ;;  %v11342_v29 = vor.u32 %v14372_v18, %v11341_v17  ;;  %7533 = vmatpush.bf16.msra.mxu3 %v10350_v26 }
 0x253   : > { %v14436_v21 = vld [vmem:[%s15555_s27 + $0xfe4] sm:$0xf0]  ;;  %7521 = vmatmul.bf16.vlgmr.msra.gmra.mxu2 %v15773_v46 }
 0x254   : > { %v11021_v8 = vld [vmem:[%s15555_s27 + $0xb48] sm:$0xf]  ;;  %v11598_v34 = vor.u32 %v14436_v21, %v11597_v20  ;;  %7565 = vmatpush.bf16.msrb.mxu2 %v11342_v29 }
 0x255   : > { %v14292_v24 = vld [vmem:[%s15555_s27 + $0xb64] sm:$0xf0]  ;;  %7534 = vmatmul.bf16.vlgmr.msra.gmra.mxu3 %v15775_v47 }
 0x256   : > { %v10765_v30 = vld [vmem:[%s15555_s27 + $0x948] sm:$0xf]  ;;  %v11022_v36 = vor.u32 %v14292_v24, %v11021_v8  ;;  %7578 = vmatpush.bf16.msrb.mxu3 %v11598_v34  ;;  %v7302_v8 = vadd.f32 %v7301_v48, %v7289_v16 }
 0x257   : > { %v14228_v32 = vld [vmem:[%s15555_s27 + $0x964] sm:$0xf0] }
 0x258   : > { %v11309_v37 = vld [vmem:[%s15555_s27 + $0xd88] sm:$0xf]  ;;  %v10766_v28 = vor.u32 %v14228_v32, %v10765_v30  ;;  %7554 = vmatpush.bf16.msrb.mxu1 %v11022_v36 }
 0x259   : > { %v14364_v38 = vld [vmem:[%s15555_s27 + $0xda4] sm:$0xf0] }
 0x25a   : > { %v11565_v40 = vld [vmem:[%s15555_s27 + $0xf88] sm:$0xf]  ;;  %v11310_v50 = vor.u32 %v14364_v38, %v11309_v37  ;;  %7541 = vmatpush.bf16.msrb.mxu0 %v10766_v28 }
 0x25b   : > { %v14428_v42 = vld [vmem:[%s15555_s27 + $0xfa4] sm:$0xf0] }
 0x25c   : > { %v10989_v44 = vld [vmem:[%s15555_s27 + $0xb08] sm:$0xf]  ;;  %v11566_v55 = vor.u32 %v14428_v42, %v11565_v40  ;;  %7566 = vmatpush.bf16.msrb.mxu2 %v11310_v50 }
 0x25d   : > { %v14284_v45 = vld [vmem:[%s15555_s27 + $0xb24] sm:$0xf0] }
 0x25e   : > { %v10733_v51 = vld [vmem:[%s15555_s27 + $0x908] sm:$0xf]  ;;  %v10990_v56 = vor.u32 %v14284_v45, %v10989_v44  ;;  %7579 = vmatpush.bf16.msrb.mxu3 %v11566_v55  ;;  %v7290_v44 = vpop.f32.mrf.mxu0  ;;  %v7303_v45 = vpop.f32.mrf.mxu1 }
 0x25f   : > { %v14220_v54 = vld [vmem:[%s15555_s27 + $0x924] sm:$0xf0] }
 0x260   : > { %v11277_v57 = vld [vmem:[%s15555_s27 + $0xd48] sm:$0xf]  ;;  %v10734_v19 = vor.u32 %v14220_v54, %v10733_v51  ;;  %7555 = vmatpush.bf16.msrb.mxu1 %v10990_v56 }
 0x261   : > { %v14356_v59 = vld [vmem:[%s15555_s27 + $0xd64] sm:$0xf0] }
 0x262   : > { %v11533_v60 = vld [vmem:[%s15555_s27 + $0xf48] sm:$0xf]  ;;  %v11278_v58 = vor.u32 %v14356_v59, %v11277_v57  ;;  %7542 = vmatpush.bf16.msrb.mxu0 %v10734_v19 }
 0x263   : > { %v14420_v61 = vld [vmem:[%s15555_s27 + $0xf64] sm:$0xf0] }
 0x264   : > { %v10957_v62 = vld [vmem:[%s15555_s27 + $0xac8] sm:$0xf]  ;;  %v11534_v7 = vor.u32 %v14420_v61, %v11533_v60  ;;  %7567 = vmatpush.bf16.msrb.mxu2 %v11278_v58 }
 0x265   : > { %v14276_v1 = vld [vmem:[%s15555_s27 + $0xae4] sm:$0xf0] }
 0x266   : > { %v10701_v4 = vld [vmem:[%s15555_s27 + $0x8c8] sm:$0xf]  ;;  %v10958_v9 = vor.u32 %v14276_v1, %v10957_v62  ;;  %7580 = vmatpush.bf16.msrb.mxu3 %v11534_v7 }
 0x267   : > { %v14212_v5 = vld [vmem:[%s15555_s27 + $0x8e4] sm:$0xf0] }
 0x268   : > { %v11245_v10 = vld [vmem:[%s15555_s27 + $0xd08] sm:$0xf]  ;;  %v10702_v21 = vor.u32 %v14212_v5, %v10701_v4  ;;  %7556 = vmatpush.bf16.msrb.mxu1 %v10958_v9  ;;  %v7314_v4 = vpop.f32.mrf.mxu2  ;;  %v7327_v5 = vpop.f32.mrf.mxu3 }
 0x269   : > { %v14348_v13 = vld [vmem:[%s15555_s27 + $0xd24] sm:$0xf0] }
 0x26a   : > { %v11501_v14 = vld [vmem:[%s15555_s27 + $0xf08] sm:$0xf]  ;;  %v11246_v24 = vor.u32 %v14348_v13, %v11245_v10  ;;  %7543 = vmatpush.bf16.msrb.mxu0 %v10702_v21  ;;  %v7315_v13 = vadd.f32 %v7314_v4, %v7302_v8 }
 0x26b   : > { %v14412_v17 = vld [vmem:[%s15555_s27 + $0xf24] sm:$0xf0] }
 0x26c   : > { %v10925_v18 = vld [vmem:[%s15555_s27 + $0xa88] sm:$0xf]  ;;  %v11502_v26 = vor.u32 %v14412_v17, %v11501_v14  ;;  %7568 = vmatpush.bf16.msrb.mxu2 %v11246_v24  ;;  %v16350_v24 = vadd.f32 %v7327_v5, %v7315_v13 }
 0x26d   : > { %v14268_v20 = vld [vmem:[%s15555_s27 + $0xaa4] sm:$0xf0] }
 0x26e   : > { %v10669_v25 = vld [vmem:[%s15555_s27 + $0x888] sm:$0xf]  ;;  %v10926_v29 = vor.u32 %v14268_v20, %v10925_v18  ;;  %7581 = vmatpush.bf16.msrb.mxu3 %v11502_v26 }
 0x26f   : > { %v14204_v23 = vld [vmem:[%s15555_s27 + $0x8a4] sm:$0xf0] }
 0x270   : > { %v11213_v30 = vld [vmem:[%s15555_s27 + $0xcc8] sm:$0xf]  ;;  %v10670_v38 = vor.u32 %v14204_v23, %v10669_v25  ;;  %7557 = vmatpush.bf16.msrb.mxu1 %v10926_v29 }
 0x271   : > { %v14340_v32 = vld [vmem:[%s15555_s27 + $0xce4] sm:$0xf0] }
 0x272   : > { %v11469_v33 = vld [vmem:[%s15555_s27 + $0xec8] sm:$0xf]  ;;  %v11214_v40 = vor.u32 %v14340_v32, %v11213_v30  ;;  %7544 = vmatpush.bf16.msrb.mxu0 %v10670_v38 }
 0x273   : > { %v14404_v34 = vld [vmem:[%s15555_s27 + $0xee4] sm:$0xf0] }
 0x274   : > { %v10893_v36 = vld [vmem:[%s15555_s27 + $0xa48] sm:$0xf]  ;;  %v11470_v28 = vor.u32 %v14404_v34, %v11469_v33  ;;  %7569 = vmatpush.bf16.msrb.mxu2 %v11214_v40 }
 0x275   : > { %v14260_v37 = vld [vmem:[%s15555_s27 + $0xa64] sm:$0xf0] }
 0x276   : > { %v10637_v41 = vld [vmem:[%s15555_s27 + $0x848] sm:$0xf]  ;;  %v10894_v50 = vor.u32 %v14260_v37, %v10893_v36  ;;  %7582 = vmatpush.bf16.msrb.mxu3 %v11470_v28 }
 0x277   : > { %v14196_v42 = vld [vmem:[%s15555_s27 + $0x864] sm:$0xf0] }
 0x278   : > { %v11181_v43 = vld [vmem:[%s15555_s27 + $0xc88] sm:$0xf]  ;;  %v10638_v59 = vor.u32 %v14196_v42, %v10637_v41  ;;  %7558 = vmatpush.bf16.msrb.mxu1 %v10894_v50  ;;  %v7316_v50 = vpop.f32.mrf.mxu2 }
 0x279   : > { %v14332_v51 = vld [vmem:[%s15555_s27 + $0xca4] sm:$0xf0] }
 0x27a   : > { %v11437_v54 = vld [vmem:[%s15555_s27 + $0xe88] sm:$0xf]  ;;  %v11182_v62 = vor.u32 %v14332_v51, %v11181_v43  ;;  %7545 = vmatpush.bf16.msrb.mxu0 %v10638_v59  ;;  %v7329_v43 = vpop.f32.mrf.mxu3 }
 0x27b   : > { %v14396_v55 = vld [vmem:[%s15555_s27 + $0xea4] sm:$0xf0] }
 0x27c   : > { %v10861_v56 = vld [vmem:[%s15555_s27 + $0xa08] sm:$0xf]  ;;  %v11438_v2 = vor.u32 %v14396_v55, %v11437_v54  ;;  %7570 = vmatpush.bf16.msrb.mxu2 %v11182_v62 }
 0x27d   : > { %v14252_v57 = vld [vmem:[%s15555_s27 + $0xa24] sm:$0xf0] }
 0x27e   : > { %v12109_v60 = vld [vmem:[%s15555_s27 + $0x13c8] sm:$0xf]  ;;  %v10862_v48 = vor.u32 %v14252_v57, %v10861_v56  ;;  %7583 = vmatpush.bf16.msrb.mxu3 %v11438_v2 }
 0x27f   : > { %v14564_v61 = vld [vmem:[%s15555_s27 + $0x13e4] sm:$0xf0] }
 0x280   : > { %v10605_v1 = vld [vmem:[%s15555_s27 + $0x808] sm:$0xf]  ;;  %v12110_v14 = vor.u32 %v14564_v61, %v12109_v60  ;;  %7559 = vmatpush.bf16.msrb.mxu1 %v10862_v48 }
 0x281   : > { %v14188_v19 = vld [vmem:[%s15555_s27 + $0x824] sm:$0xf0] }
 0x282   : > { %v11853_v58 = vld [vmem:[%s15555_s27 + $0x11c8] sm:$0xf]  ;;  %v10606_v18 = vor.u32 %v14188_v19, %v10605_v1 }
 0x283   : > { %v14500_v7 = vld [vmem:[%s15555_s27 + $0x11e4] sm:$0xf0]  ;;  %7560 = vmatmul.bf16.vlgmr.msrb.gmra.mxu1 %v15799_v27 }
 0x284   : > { %v11149_v9 = vld [vmem:[%s15555_s27 + $0xc48] sm:$0xf]  ;;  %v11854_v25 = vor.u32 %v14500_v7, %v11853_v58  ;;  %7604 = vmatpush.bf16.msra.mxu1 %v12110_v14  ;;  %7546 = vmatpush.bf16.msrb.mxu0 %v10606_v18 }
 0x285   : > { %v14324_v10 = vld [vmem:[%s15555_s27 + $0xc64] sm:$0xf0] }
 0x286   : > { %v11405_v16 = vld [vmem:[%s15555_s27 + $0xe48] sm:$0xf]  ;;  %v11150_v23 = vor.u32 %v14324_v10, %v11149_v9 }
 0x287   : > { %v14388_v17 = vld [vmem:[%s15555_s27 + $0xe64] sm:$0xf0]  ;;  %7547 = vmatmul.bf16.vlgmr.msrb.gmra.mxu0 %v15795_v22 }
 0x288   : > { %v12077_v20 = vld [vmem:[%s15555_s27 + $0x1388] sm:$0xf]  ;;  %v11406_v30 = vor.u32 %v14388_v17, %v11405_v16  ;;  %7591 = vmatpush.bf16.msra.mxu0 %v11854_v25  ;;  %7571 = vmatpush.bf16.msrb.mxu2 %v11150_v23 }
 0x289   : > { %v14556_v21 = vld [vmem:[%s15555_s27 + $0x13a4] sm:$0xf0] }
 0x28a   : > { %v11821_v8 = vld [vmem:[%s15555_s27 + $0x1188] sm:$0xf]  ;;  %v12078_v36 = vor.u32 %v14556_v21, %v12077_v20  ;;  %7584 = vmatpush.bf16.msrb.mxu3 %v11406_v30 }
 0x28b   : > { %v14492_v26 = vld [vmem:[%s15555_s27 + $0x11a4] sm:$0xf0] }
 0x28c   : > { %v11117_v29 = vld [vmem:[%s15555_s27 + $0xc08] sm:$0xf]  ;;  %v11822_v45 = vor.u32 %v14492_v26, %v11821_v8  ;;  %7605 = vmatpush.bf16.msra.mxu1 %v12078_v36  ;;  %v7353_v8 = vpop.f32.mrf.mxu1 }
 0x28d   : > { %v14316_v32 = vld [vmem:[%s15555_s27 + $0xc24] sm:$0xf0] }
 0x28e   : > { %v11373_v33 = vld [vmem:[%s15555_s27 + $0xe08] sm:$0xf]  ;;  %v11118_v28 = vor.u32 %v14316_v32, %v11117_v29  ;;  %7592 = vmatpush.bf16.msra.mxu0 %v11822_v45 }
 0x28f   : > { %v14380_v34 = vld [vmem:[%s15555_s27 + $0xe24] sm:$0xf0] }
 0x290   : > { %v12365_v37 = vld [vmem:[%s15555_s27 + $0x15c8] sm:$0xf]  ;;  %v11374_v51 = vor.u32 %v14380_v34, %v11373_v33  ;;  %7572 = vmatpush.bf16.msrb.mxu2 %v11118_v28  ;;  %v7340_v34 = vpop.f32.mrf.mxu0 }
 0x291   : > { %v14628_v38 = vld [vmem:[%s15555_s27 + $0x15e4] sm:$0xf0] }
 0x292   : > { %v12621_v40 = vld [vmem:[%s15555_s27 + $0x17c8] sm:$0xf]  ;;  %v12366_v54 = vor.u32 %v14628_v38, %v12365_v37  ;;  %7585 = vmatpush.bf16.msrb.mxu3 %v11374_v51 }
 0x293   : > { %v14692_v41 = vld [vmem:[%s15555_s27 + $0x17e4] sm:$0xf0]  ;;  %7573 = vmatmul.bf16.vlgmr.msrb.gmra.mxu2 %v15813_v52 }
 0x294   : > { %v12045_v42 = vld [vmem:[%s15555_s27 + $0x1348] sm:$0xf]  ;;  %v12622_v57 = vor.u32 %v14692_v41, %v12621_v40  ;;  %7617 = vmatpush.bf16.msra.mxu2 %v12366_v54  ;;  %v7341_v40 = vadd.f32 %v7340_v34, %v16350_v24 }
 0x295   : > { %v14548_v44 = vld [vmem:[%s15555_s27 + $0x1364] sm:$0xf0]  ;;  %7586 = vmatmul.bf16.vlgmr.msrb.gmra.mxu3 %v15815_v53 }
 0x296   : > { %v11789_v55 = vld [vmem:[%s15555_s27 + $0x1148] sm:$0xf]  ;;  %v12046_v59 = vor.u32 %v14548_v44, %v12045_v42  ;;  %7630 = vmatpush.bf16.msra.mxu3 %v12622_v57  ;;  %v7354_v28 = vadd.f32 %v7353_v8, %v7341_v40 }
 0x297   : > { %v14484_v56 = vld [vmem:[%s15555_s27 + $0x1164] sm:$0xf0] }
 0x298   : > { %v12333_v60 = vld [vmem:[%s15555_s27 + $0x1588] sm:$0xf]  ;;  %v11790_v4 = vor.u32 %v14484_v56, %v11789_v55  ;;  %7606 = vmatpush.bf16.msra.mxu1 %v12046_v59 }
 0x299   : > { %v14620_v61 = vld [vmem:[%s15555_s27 + $0x15a4] sm:$0xf0] }
 0x29a   : > { %v12589_v62 = vld [vmem:[%s15555_s27 + $0x1788] sm:$0xf]  ;;  %v12334_v5 = vor.u32 %v14620_v61, %v12333_v60  ;;  %7593 = vmatpush.bf16.msra.mxu0 %v11790_v4 }
 0x29b   : > { %v14684_v1 = vld [vmem:[%s15555_s27 + $0x17a4] sm:$0xf0] }
 0x29c   : > { %v12013_v19 = vld [vmem:[%s15555_s27 + $0x1308] sm:$0xf]  ;;  %v12590_v7 = vor.u32 %v14684_v1, %v12589_v62  ;;  %7618 = vmatpush.bf16.msra.mxu2 %v12334_v5  ;;  %v7355_v1 = vpop.f32.mrf.mxu1 }
 0x29d   : > { %v14540_v58 = vld [vmem:[%s15555_s27 + $0x1324] sm:$0xf0] }
 0x29e   : > { %v11757_v2 = vld [vmem:[%s15555_s27 + $0x1108] sm:$0xf]  ;;  %v12014_v9 = vor.u32 %v14540_v58, %v12013_v19  ;;  %7631 = vmatpush.bf16.msra.mxu3 %v12590_v7 }
 0x29f   : > { %v14476_v48 = vld [vmem:[%s15555_s27 + $0x1124] sm:$0xf0] }
 0x2a0   : > { %v12301_v10 = vld [vmem:[%s15555_s27 + $0x1548] sm:$0xf]  ;;  %v11758_v20 = vor.u32 %v14476_v48, %v11757_v2  ;;  %7607 = vmatpush.bf16.msra.mxu1 %v12014_v9  ;;  %v7342_v48 = vpop.f32.mrf.mxu0 }
 0x2a1   : > { %v14612_v13 = vld [vmem:[%s15555_s27 + $0x1564] sm:$0xf0] }
 0x2a2   : > { %v12557_v14 = vld [vmem:[%s15555_s27 + $0x1748] sm:$0xf]  ;;  %v12302_v21 = vor.u32 %v14612_v13, %v12301_v10  ;;  %7594 = vmatpush.bf16.msra.mxu0 %v11758_v20 }
 0x2a3   : > { %v14676_v16 = vld [vmem:[%s15555_s27 + $0x1764] sm:$0xf0] }
 0x2a4   : > { %v11981_v17 = vld [vmem:[%s15555_s27 + $0x12c8] sm:$0xf]  ;;  %v12558_v26 = vor.u32 %v14676_v16, %v12557_v14  ;;  %7619 = vmatpush.bf16.msra.mxu2 %v12302_v21 }
 0x2a5   : > { %v14532_v18 = vld [vmem:[%s15555_s27 + $0x12e4] sm:$0xf0] }
 0x2a6   : > { %v11725_v25 = vld [vmem:[%s15555_s27 + $0x10c8] sm:$0xf]  ;;  %v11982_v29 = vor.u32 %v14532_v18, %v11981_v17  ;;  %7632 = vmatpush.bf16.msra.mxu3 %v12558_v26 }
 0x2a7   : > { %v14468_v23 = vld [vmem:[%s15555_s27 + $0x10e4] sm:$0xf0] }
 0x2a8   : > { %v12269_v30 = vld [vmem:[%s15555_s27 + $0x1508] sm:$0xf]  ;;  %v11726_v41 = vor.u32 %v14468_v23, %v11725_v25  ;;  %7608 = vmatpush.bf16.msra.mxu1 %v11982_v29  ;;  %v7366_v25 = vpop.f32.mrf.mxu2 }
 0x2a9   : > { %v14604_v32 = vld [vmem:[%s15555_s27 + $0x1524] sm:$0xf0] }
 0x2aa   : > { %v12525_v33 = vld [vmem:[%s15555_s27 + $0x1708] sm:$0xf]  ;;  %v12270_v42 = vor.u32 %v14604_v32, %v12269_v30  ;;  %7595 = vmatpush.bf16.msra.mxu0 %v11726_v41  ;;  %v7367_v32 = vadd.f32 %v7366_v25, %v7354_v28 }
 0x2ab   : > { %v14668_v36 = vld [vmem:[%s15555_s27 + $0x1724] sm:$0xf0] }
 0x2ac   : > { %v11949_v37 = vld [vmem:[%s15555_s27 + $0x1288] sm:$0xf]  ;;  %v12526_v50 = vor.u32 %v14668_v36, %v12525_v33  ;;  %7620 = vmatpush.bf16.msra.mxu2 %v12270_v42  ;;  %v7379_v33 = vpop.f32.mrf.mxu3 }
 0x2ad   : > { %v14524_v38 = vld [vmem:[%s15555_s27 + $0x12a4] sm:$0xf0]  ;;  %v16421_v42 = vadd.f32 %v7379_v33, %v7367_v32 }
 0x2ae   : > { %v11693_v44 = vld [vmem:[%s15555_s27 + $0x1088] sm:$0xf]  ;;  %v11950_v43 = vor.u32 %v14524_v38, %v11949_v37  ;;  %7633 = vmatpush.bf16.msra.mxu3 %v12526_v50 }
 0x2af   : > { %v14460_v45 = vld [vmem:[%s15555_s27 + $0x10a4] sm:$0xf0] }
 0x2b0   : > { %v12237_v51 = vld [vmem:[%s15555_s27 + $0x14c8] sm:$0xf]  ;;  %v11694_v59 = vor.u32 %v14460_v45, %v11693_v44  ;;  %7609 = vmatpush.bf16.msra.mxu1 %v11950_v43 }
 0x2b1   : > { %v14596_v54 = vld [vmem:[%s15555_s27 + $0x14e4] sm:$0xf0] }
 0x2b2   : > { %v12493_v55 = vld [vmem:[%s15555_s27 + $0x16c8] sm:$0xf]  ;;  %v12238_v60 = vor.u32 %v14596_v54, %v12237_v51  ;;  %7596 = vmatpush.bf16.msra.mxu0 %v11694_v59 }
 0x2b3   : > { %v14660_v24 = vld [vmem:[%s15555_s27 + $0x16e4] sm:$0xf0] }
 0x2b4   : > { %v11917_v56 = vld [vmem:[%s15555_s27 + $0x1248] sm:$0xf]  ;;  %v12494_v19 = vor.u32 %v14660_v24, %v12493_v55  ;;  %7621 = vmatpush.bf16.msra.mxu2 %v12238_v60 }
 0x2b5   : > { %v14516_v57 = vld [vmem:[%s15555_s27 + $0x1264] sm:$0xf0] }
 0x2b6   : > { %v11661_v61 = vld [vmem:[%s15555_s27 + $0x1048] sm:$0xf]  ;;  %v11918_v58 = vor.u32 %v14516_v57, %v11917_v56  ;;  %7634 = vmatpush.bf16.msra.mxu3 %v12494_v19 }
 0x2b7   : > { %v14452_v62 = vld [vmem:[%s15555_s27 + $0x1064] sm:$0xf0] }
 0x2b8   : > { %v12205_v4 = vld [vmem:[%s15555_s27 + $0x1488] sm:$0xf]  ;;  %v11662_v13 = vor.u32 %v14452_v62, %v11661_v61  ;;  %7610 = vmatpush.bf16.msra.mxu1 %v11918_v58 }
 0x2b9   : > { %v14588_v5 = vld [vmem:[%s15555_s27 + $0x14a4] sm:$0xf0] }
 0x2ba   : > { %v12461_v2 = vld [vmem:[%s15555_s27 + $0x1688] sm:$0xf]  ;;  %v12206_v17 = vor.u32 %v14588_v5, %v12205_v4  ;;  %7597 = vmatpush.bf16.msra.mxu0 %v11662_v13  ;;  %v7368_v4 = vpop.f32.mrf.mxu2 }
 0x2bb   : > { %v14652_v7 = vld [vmem:[%s15555_s27 + $0x16a4] sm:$0xf0] }
 0x2bc   : > { %v11885_v9 = vld [vmem:[%s15555_s27 + $0x1208] sm:$0xf]  ;;  %v12462_v23 = vor.u32 %v14652_v7, %v12461_v2  ;;  %7622 = vmatpush.bf16.msra.mxu2 %v12206_v17 }
 0x2bd   : > { %v14508_v10 = vld [vmem:[%s15555_s27 + $0x1224] sm:$0xf0] }
 0x2be   : > { %v13133_v14 = vld [vmem:[%s15555_s27 + $0x1bc8] sm:$0xf]  ;;  %v11886_v8 = vor.u32 %v14508_v10, %v11885_v9  ;;  %7635 = vmatpush.bf16.msra.mxu3 %v12462_v23  ;;  %v7381_v9 = vpop.f32.mrf.mxu3 }
 0x2bf   : > { %v14820_v16 = vld [vmem:[%s15555_s27 + $0x1be4] sm:$0xf0] }
 0x2c0   : > { %v11629_v18 = vld [vmem:[%s15555_s27 + $0x1008] sm:$0xf]  ;;  %v13134_v34 = vor.u32 %v14820_v16, %v13133_v14  ;;  %7611 = vmatpush.bf16.msra.mxu1 %v11886_v8 }
 0x2c1   : > { %v14444_v20 = vld [vmem:[%s15555_s27 + $0x1024] sm:$0xf0] }
 0x2c2   : > { %v12877_v21 = vld [vmem:[%s15555_s27 + $0x19c8] sm:$0xf]  ;;  %v11630_v38 = vor.u32 %v14444_v20, %v11629_v18 }
 0x2c3   : > { %v14756_v26 = vld [vmem:[%s15555_s27 + $0x19e4] sm:$0xf0]  ;;  %7612 = vmatmul.bf16.vlgmr.msra.gmra.mxu1 %v15851_v49 }
 0x2c4   : > { %v12173_v29 = vld [vmem:[%s15555_s27 + $0x1448] sm:$0xf]  ;;  %v12878_v44 = vor.u32 %v14756_v26, %v12877_v21  ;;  %7656 = vmatpush.bf16.msrb.mxu1 %v13134_v34  ;;  %7598 = vmatpush.bf16.msra.mxu0 %v11630_v38 }
 0x2c5   : > { %v14580_v30 = vld [vmem:[%s15555_s27 + $0x1464] sm:$0xf0] }
 0x2c6   : > { %v12429_v36 = vld [vmem:[%s15555_s27 + $0x1648] sm:$0xf]  ;;  %v12174_v45 = vor.u32 %v14580_v30, %v12173_v29 }
 0x2c7   : > { %v14644_v37 = vld [vmem:[%s15555_s27 + $0x1664] sm:$0xf0]  ;;  %7599 = vmatmul.bf16.vlgmr.msra.gmra.mxu0 %v15843_v39 }
 0x2c8   : > { %v13101_v40 = vld [vmem:[%s15555_s27 + $0x1b88] sm:$0xf]  ;;  %v12430_v51 = vor.u32 %v14644_v37, %v12429_v36  ;;  %7643 = vmatpush.bf16.msrb.mxu0 %v12878_v44  ;;  %7623 = vmatpush.bf16.msra.mxu2 %v12174_v45 }
 0x2c9   : > { %v14812_v41 = vld [vmem:[%s15555_s27 + $0x1ba4] sm:$0xf0] }
 0x2ca   : > { %v12845_v28 = vld [vmem:[%s15555_s27 + $0x1988] sm:$0xf]  ;;  %v13102_v56 = vor.u32 %v14812_v41, %v13101_v40  ;;  %7636 = vmatpush.bf16.msra.mxu3 %v12430_v51 }
 0x2cb   : > { %v14748_v50 = vld [vmem:[%s15555_s27 + $0x19a4] sm:$0xf0] }
 0x2cc   : > { %v12141_v43 = vld [vmem:[%s15555_s27 + $0x1408] sm:$0xf]  ;;  %v12846_v19 = vor.u32 %v14748_v50, %v12845_v28  ;;  %7657 = vmatpush.bf16.msrb.mxu1 %v13102_v56  ;;  %v7405_v28 = vpop.f32.mrf.mxu1 }
 0x2cd   : > { %v14572_v54 = vld [vmem:[%s15555_s27 + $0x1424] sm:$0xf0] }
 0x2ce   : > { %v12397_v55 = vld [vmem:[%s15555_s27 + $0x1608] sm:$0xf]  ;;  %v12142_v58 = vor.u32 %v14572_v54, %v12141_v43  ;;  %7644 = vmatpush.bf16.msrb.mxu0 %v12846_v19 }
 0x2cf   : > { %v14636_v24 = vld [vmem:[%s15555_s27 + $0x1624] sm:$0xf0] }
 0x2d0   : > { %v13389_v57 = vld [vmem:[%s15555_s27 + $0x1dc8] sm:$0xf]  ;;  %v12398_v5 = vor.u32 %v14636_v24, %v12397_v55  ;;  %7624 = vmatpush.bf16.msra.mxu2 %v12142_v58  ;;  %v7392_v24 = vpop.f32.mrf.mxu0 }
 0x2d1   : > { %v14884_v59 = vld [vmem:[%s15555_s27 + $0x1de4] sm:$0xf0] }
 0x2d2   : > { %v13645_v60 = vld [vmem:[%s15555_s27 + $0x1fc8] sm:$0xf]  ;;  %v13390_v2 = vor.u32 %v14884_v59, %v13389_v57  ;;  %7637 = vmatpush.bf16.msra.mxu3 %v12398_v5 }
 0x2d3   : > { %v14948_v61 = vld [vmem:[%s15555_s27 + $0x1fe4] sm:$0xf0]  ;;  %7625 = vmatmul.bf16.vlgmr.msra.gmra.mxu2 %v15864_v6 }
 0x2d4   : > { %v13069_v62 = vld [vmem:[%s15555_s27 + $0x1b48] sm:$0xf]  ;;  %v13646_v10 = vor.u32 %v14948_v61, %v13645_v60  ;;  %7669 = vmatpush.bf16.msrb.mxu2 %v13390_v2  ;;  %v7393_v60 = vadd.f32 %v7392_v24, %v16421_v42 }
 0x2d5   : > { %v14804_v1 = vld [vmem:[%s15555_s27 + $0x1b64] sm:$0xf0]  ;;  %7638 = vmatmul.bf16.vlgmr.msra.gmra.mxu3 %v15869_v15 }
 0x2d6   : > { %v12813_v48 = vld [vmem:[%s15555_s27 + $0x1948] sm:$0xf]  ;;  %v13070_v13 = vor.u32 %v14804_v1, %v13069_v62  ;;  %7682 = vmatpush.bf16.msrb.mxu3 %v13646_v10  ;;  %v7406_v58 = vadd.f32 %v7405_v28, %v7393_v60  ;;  %v14040_v60 = vld [vmem:[%s15555_s27 + $0x38c] sm:$0xf] }
 0x2d7   : > { %v14740_v7 = vld [vmem:[%s15555_s27 + $0x1964] sm:$0xf0] }
 0x2d8   : > { %v13357_v14 = vld [vmem:[%s15555_s27 + $0x1d88] sm:$0xf]  ;;  %v12814_v25 = vor.u32 %v14740_v7, %v12813_v48  ;;  %7658 = vmatpush.bf16.msrb.mxu1 %v13070_v13 }
 0x2d9   : > { %v14876_v16 = vld [vmem:[%s15555_s27 + $0x1da4] sm:$0xf0] }
 0x2da   : > { %v13613_v17 = vld [vmem:[%s15555_s27 + $0x1f88] sm:$0xf]  ;;  %v13358_v23 = vor.u32 %v14876_v16, %v13357_v14  ;;  %7645 = vmatpush.bf16.msrb.mxu0 %v12814_v25 }
 0x2db   : > { %v14940_v18 = vld [vmem:[%s15555_s27 + $0x1fa4] sm:$0xf0] }
 0x2dc   : > { %v13037_v20 = vld [vmem:[%s15555_s27 + $0x1b08] sm:$0xf]  ;;  %v13614_v29 = vor.u32 %v14940_v18, %v13613_v17  ;;  %7670 = vmatpush.bf16.msrb.mxu2 %v13358_v23  ;;  %v7407_v18 = vpop.f32.mrf.mxu1 }
 0x2dd   : > { %v14796_v21 = vld [vmem:[%s15555_s27 + $0x1b24] sm:$0xf0]  ;;  %v9999_v18 = vld [vmem:[%s15555_s27 + $0x368] sm:$0xf0] }
 0x2de   : > { %v12781_v8 = vld [vmem:[%s15555_s27 + $0x1908] sm:$0xf]  ;;  %v13038_v30 = vor.u32 %v14796_v21, %v13037_v20  ;;  %7683 = vmatpush.bf16.msrb.mxu3 %v13614_v29 }
 0x2df   : > { %v14732_v26 = vld [vmem:[%s15555_s27 + $0x1924] sm:$0xf0] }
 0x2e0   : > { %v13325_v32 = vld [vmem:[%s15555_s27 + $0x1d48] sm:$0xf]  ;;  %v12782_v40 = vor.u32 %v14732_v26, %v12781_v8  ;;  %7659 = vmatpush.bf16.msrb.mxu1 %v13038_v30  ;;  %v7394_v26 = vpop.f32.mrf.mxu0 }
 0x2e1   : > { %v14868_v33 = vld [vmem:[%s15555_s27 + $0x1d64] sm:$0xf0]  ;;  %v13968_v26 = vld [vmem:[%s15555_s27 + $0x14c] sm:$0xf] }
 0x2e2   : > { %v13581_v34 = vld [vmem:[%s15555_s27 + $0x1f48] sm:$0xf]  ;;  %v13326_v41 = vor.u32 %v14868_v33, %v13325_v32  ;;  %7646 = vmatpush.bf16.msrb.mxu0 %v12782_v40 }
 0x2e3   : > { %v14932_v36 = vld [vmem:[%s15555_s27 + $0x1f64] sm:$0xf0] }
 0x2e4   : > { %v13005_v37 = vld [vmem:[%s15555_s27 + $0x1ac8] sm:$0xf]  ;;  %v13582_v50 = vor.u32 %v14932_v36, %v13581_v34  ;;  %7671 = vmatpush.bf16.msrb.mxu2 %v13326_v41  ;;  %v14048_v34 = vld [vmem:[%s15555_s27 + $0x3cc] sm:$0xf] }
 0x2e5   : > { %v14788_v38 = vld [vmem:[%s15555_s27 + $0x1ae4] sm:$0xf0]  ;;  %v10063_v36 = vld [vmem:[%s15555_s27 + $0x3e8] sm:$0xf0] }
 0x2e6   : > { %v12749_v44 = vld [vmem:[%s15555_s27 + $0x18c8] sm:$0xf]  ;;  %v13006_v43 = vor.u32 %v14788_v38, %v13005_v37  ;;  %7684 = vmatpush.bf16.msrb.mxu3 %v13582_v50  ;;  %v13984_v41 = vld [vmem:[%s15555_s27 + $0x1cc] sm:$0xf]  ;;  %v10066_v24 = vor.u32 %v14048_v34, %v10063_v36 }
 0x2e7   : > { %v14724_v45 = vld [vmem:[%s15555_s27 + $0x18e4] sm:$0xf0]  ;;  %v9807_v50 = vld [vmem:[%s15555_s27 + $0x1e8] sm:$0xf0] }
 0x2e8   : > { %v13293_v51 = vld [vmem:[%s15555_s27 + $0x1d08] sm:$0xf]  ;;  %v12750_v61 = vor.u32 %v14724_v45, %v12749_v44  ;;  %7660 = vmatpush.bf16.msrb.mxu1 %v13006_v43  ;;  %v7418_v44 = vpop.f32.mrf.mxu2  ;;  %v14104_v34 = vld [vmem:[%s15555_s27 + $0x58c] sm:$0xf] }
 0x2e9   : > { %v14860_v54 = vld [vmem:[%s15555_s27 + $0x1d24] sm:$0xf0]  ;;  %v10287_v36 = vld [vmem:[%s15555_s27 + $0x5a8] sm:$0xf0] }
 0x2ea   : > { %v13549_v55 = vld [vmem:[%s15555_s27 + $0x1f08] sm:$0xf]  ;;  %v13294_v62 = vor.u32 %v14860_v54, %v13293_v51  ;;  %7647 = vmatpush.bf16.msrb.mxu0 %v12750_v61  ;;  %v7419_v54 = vadd.f32 %v7418_v44, %v7406_v58  ;;  %v10031_v61 = vld [vmem:[%s15555_s27 + $0x3a8] sm:$0xf0] }
 0x2eb   : > { %v14924_v56 = vld [vmem:[%s15555_s27 + $0x1f24] sm:$0xf0]  ;;  %v13976_v58 = vld [vmem:[%s15555_s27 + $0x18c] sm:$0xf] }
 0x2ec   : > { %v12973_v57 = vld [vmem:[%s15555_s27 + $0x1a88] sm:$0xf]  ;;  %v13550_v4 = vor.u32 %v14924_v56, %v13549_v55  ;;  %7672 = vmatpush.bf16.msrb.mxu2 %v13294_v62  ;;  %v7431_v55 = vpop.f32.mrf.mxu3 }
 0x2ed   : > { %v14780_v59 = vld [vmem:[%s15555_s27 + $0x1aa4] sm:$0xf0]  ;;  %v16492_v62 = vadd.f32 %v7431_v55, %v7419_v54  ;;  %v14096_v54 = vld [vmem:[%s15555_s27 + $0x54c] sm:$0xf] }
 0x2ee   : > { %v12717_v1 = vld [vmem:[%s15555_s27 + $0x1888] sm:$0xf]  ;;  %v12974_v5 = vor.u32 %v14780_v59, %v12973_v57  ;;  %7685 = vmatpush.bf16.msrb.mxu3 %v13550_v4  ;;  %v9775_v4 = vld [vmem:[%s15555_s27 + $0x1a8] sm:$0xf0] }
 0x2ef   : > { %v14716_v19 = vld [vmem:[%s15555_s27 + $0x18a4] sm:$0xf0]  ;;  %v10255_v55 = vld [vmem:[%s15555_s27 + $0x568] sm:$0xf0] }
 0x2f0   : > { %v13261_v2 = vld [vmem:[%s15555_s27 + $0x1cc8] sm:$0xf]  ;;  %v12718_v13 = vor.u32 %v14716_v19, %v12717_v1  ;;  %7661 = vmatpush.bf16.msrb.mxu1 %v12974_v5  ;;  %v9810_v1 = vor.u32 %v13984_v41, %v9807_v50  ;;  %v9967_v41 = vld [vmem:[%s15555_s27 + $0x328] sm:$0xf0] }
 0x2f1   : > { %v14852_v48 = vld [vmem:[%s15555_s27 + $0x1ce4] sm:$0xf0]  ;;  %v9711_v50 = vld [vmem:[%s15555_s27 + $0x128] sm:$0xf0] }
 0x2f2   : > { %v13517_v7 = vld [vmem:[%s15555_s27 + $0x1ec8] sm:$0xf]  ;;  %v13262_v14 = vor.u32 %v14852_v48, %v13261_v2  ;;  %7648 = vmatpush.bf16.msrb.mxu0 %v12718_v13  ;;  %v10319_v13 = vld [vmem:[%s15555_s27 + $0x5e8] sm:$0xf0] }
 0x2f3   : > { %v14916_v42 = vld [vmem:[%s15555_s27 + $0x1ee4] sm:$0xf0] }
 0x2f4   : > { %v12941_v9 = vld [vmem:[%s15555_s27 + $0x1a48] sm:$0xf]  ;;  %v13518_v20 = vor.u32 %v14916_v42, %v13517_v7  ;;  %7673 = vmatpush.bf16.msrb.mxu2 %v13262_v14  ;;  %v14176_v14 = vld [vmem:[%s15555_s27 + $0x7cc] sm:$0xf] }
 0x2f5   : > { %v14772_v10 = vld [vmem:[%s15555_s27 + $0x1a64] sm:$0xf0] }
 0x2f6   : > { %v12685_v16 = vld [vmem:[%s15555_s27 + $0x1848] sm:$0xf]  ;;  %v12942_v21 = vor.u32 %v14772_v10, %v12941_v9  ;;  %7686 = vmatpush.bf16.msrb.mxu3 %v13518_v20  ;;  %v10034_v9 = vor.u32 %v14040_v60, %v10031_v61  ;;  %v14112_v10 = vld [vmem:[%s15555_s27 + $0x5cc] sm:$0xf]  ;;  %v9778_v20 = vor.u32 %v13976_v58, %v9775_v4  ;;  %v10258_v61 = vor.u32 %v14096_v54, %v10255_v55  ;;  %v7457_v58 = vpop.f32.mrf.mxu1 }
 0x2f7   : > { %v14708_v17 = vld [vmem:[%s15555_s27 + $0x1864] sm:$0xf0]  ;;  %v9839_v54 = vld [vmem:[%s15555_s27 + $0x228] sm:$0xf0] }
 0x2f8   : > { %v13229_v25 = vld [vmem:[%s15555_s27 + $0x1c88] sm:$0xf]  ;;  %v12686_v33 = vor.u32 %v14708_v17, %v12685_v16  ;;  %7662 = vmatpush.bf16.msrb.mxu1 %v12942_v21  ;;  %v10575_v16 = vld [vmem:[%s15555_s27 + $0x7e8] sm:$0xf0] }
 0x2f9   : > { %v14844_v23 = vld [vmem:[%s15555_s27 + $0x1ca4] sm:$0xf0]  ;;  %v14032_v17 = vld [vmem:[%s15555_s27 + $0x34c] sm:$0xf] }
 0x2fa   : > { %v13485_v8 = vld [vmem:[%s15555_s27 + $0x1e88] sm:$0xf]  ;;  %v13230_v37 = vor.u32 %v14844_v23, %v13229_v25  ;;  %7649 = vmatpush.bf16.msrb.mxu0 %v12686_v33  ;;  %v7420_v25 = vpop.f32.mrf.mxu2  ;;  %v10002_v33 = vor.u32 %v14032_v17, %v9999_v18  ;;  %v13944_v18 = vld [vmem:[%s15555_s27 + $0x8c] sm:$0xf] }
 0x2fb   : > { %v14908_v29 = vld [vmem:[%s15555_s27 + $0x1ea4] sm:$0xf0] }
 0x2fc   : > { %v12909_v30 = vld [vmem:[%s15555_s27 + $0x1a08] sm:$0xf]  ;;  %v13486_v45 = vor.u32 %v14908_v29, %v13485_v8  ;;  %7674 = vmatpush.bf16.msrb.mxu2 %v13230_v37  ;;  %v10322_v8 = vor.u32 %v14112_v10, %v10319_v13  ;;  %v9743_v29 = vld [vmem:[%s15555_s27 + $0x168] sm:$0xf0] }
 0x2fd   : > { %v14764_v32 = vld [vmem:[%s15555_s27 + $0x1a24] sm:$0xf0]  ;;  %v14168_v37 = vld [vmem:[%s15555_s27 + $0x78c] sm:$0xf]  ;;  %v9746_v44 = vor.u32 %v13968_v26, %v9743_v29 }
 0x2fe   : > { %v12653_v38 = vld [vmem:[%s15555_s27 + $0x1808] sm:$0xf]  ;;  %v12910_v28 = vor.u32 %v14764_v32, %v12909_v30  ;;  %7687 = vmatpush.bf16.msrb.mxu3 %v13486_v45  ;;  %v7433_v30 = vpop.f32.mrf.mxu3  ;;  %v10578_v32 = vor.u32 %v14176_v14, %v10575_v16  ;;  %v10290_v45 = vor.u32 %v14104_v34, %v10287_v36  ;;  %v14008_v10 = vld [vmem:[%s15555_s27 + $0x28c] sm:$0xf] }
 0x2ff   : > { %v14700_v40 = vld [vmem:[%s15555_s27 + $0x1824] sm:$0xf0]  ;;  %v9903_v13 = vld [vmem:[%s15555_s27 + $0x2a8] sm:$0xf0] }
 0x300   : > { %v13197_v43 = vld [vmem:[%s15555_s27 + $0x1c48] sm:$0xf]  ;;  %v12654_v59 = vor.u32 %v14700_v40, %v12653_v38  ;;  %7663 = vmatpush.bf16.msrb.mxu1 %v12910_v28  ;;  %v10543_v38 = vld [vmem:[%s15555_s27 + $0x7a8] sm:$0xf0] }
 0x301   : > { %v14836_v51 = vld [vmem:[%s15555_s27 + $0x1c64] sm:$0xf0]  ;;  %v14024_v40 = vld [vmem:[%s15555_s27 + $0x30c] sm:$0xf] }
 0x302   : > { %v13453_v56 = vld [vmem:[%s15555_s27 + $0x1e48] sm:$0xf]  ;;  %v13198_v19 = vor.u32 %v14836_v51, %v13197_v43  ;;  %7650 = vmatpush.bf16.msrb.mxu0 %v12654_v59  ;;  %v13960_v28 = vld [vmem:[%s15555_s27 + $0x10c] sm:$0xf]  ;;  %v10546_v43 = vor.u32 %v14168_v37, %v10543_v38  ;;  %v9970_v51 = vor.u32 %v14024_v40, %v9967_v41  ;;  %v7459_v38 = vpop.f32.mrf.mxu1 }
 0x303   : > { %v14900_v57 = vld [vmem:[%s15555_s27 + $0x1e64] sm:$0xf0]  ;;  %7664 = vmatmul.bf16.vlgmr.msrb.gmra.mxu1 %v15925_v0  ;;  %v9935_v59 = vld [vmem:[%s15555_s27 + $0x2e8] sm:$0xf0]  ;;  %v9714_v60 = vor.u32 %v13960_v28, %v9711_v50 }
 0x304   : > { %v13165_v5 = vld [vmem:[%s15555_s27 + $0x1c08] sm:$0xf]  ;;  %v13454_v2 = vor.u32 %v14900_v57, %v13453_v56  ;;  %7708 = vmatpush.bf16.msra.mxu1 %v10066_v24  ;;  %7675 = vmatpush.bf16.msrb.mxu2 %v13198_v19  ;;  %v14160_v24 = vld [vmem:[%s15555_s27 + $0x74c] sm:$0xf] }
 0x305   : > { %v14828_v48 = vld [vmem:[%s15555_s27 + $0x1c24] sm:$0xf0]  ;;  %7651 = vmatmul.bf16.vlgmr.msrb.gmra.mxu0 %v15923_v63  ;;  %v10511_v56 = vld [vmem:[%s15555_s27 + $0x768] sm:$0xf0] }
 0x306   : > { %v13421_v7 = vld [vmem:[%s15555_s27 + $0x1e08] sm:$0xf]  ;;  %7695 = vmatpush.bf16.msra.mxu0 %v9810_v1  ;;  %v13166_v21 = vor.u32 %v14828_v48, %v13165_v5  ;;  %7688 = vmatpush.bf16.msrb.mxu3 %v13454_v2  ;;  %v14016_v57 = vld [vmem:[%s15555_s27 + $0x2cc] sm:$0xf]  ;;  %v10514_v4 = vor.u32 %v14160_v24, %v10511_v56 }
 0x307   : > { %v14892_v42 = vld [vmem:[%s15555_s27 + $0x1e24] sm:$0xf0]  ;;  %v13952_v1 = vld [vmem:[%s15555_s27 + $0xcc] sm:$0xf]  ;;  %v9938_v5 = vor.u32 %v14016_v57, %v9935_v59 }
 0x308   : > { %v13422_v23 = vor.u32 %v14892_v42, %v13421_v7  ;;  %7709 = vmatpush.bf16.msra.mxu1 %v10034_v9  ;;  %7676 = vmatpush.bf16.msrb.mxu2 %v13166_v21  ;;  %v9679_v19 = vld [vmem:[%s15555_s27 + $0xe8] sm:$0xf0]  ;;  %v7444_v42 = vpop.f32.mrf.mxu0 }
 0x309   : > { %v14088_v2 = vld [vmem:[%s15555_s27 + $0x50c] sm:$0xf]  ;;  %v7445_v14 = vadd.f32 %v7444_v42, %v16492_v62  ;;  %v9682_v16 = vor.u32 %v13952_v1, %v9679_v19  ;;  %v7470_v1 = vpop.f32.mrf.mxu2 }
 0x30a   : > { %7696 = vmatpush.bf16.msra.mxu0 %v9778_v20  ;;  %7689 = vmatpush.bf16.msrb.mxu3 %v13422_v23  ;;  %v10223_v48 = vld [vmem:[%s15555_s27 + $0x528] sm:$0xf0]  ;;  %v9906_v23 = vor.u32 %v14008_v10, %v9903_v13 }
 0x30b   : > { %7677 = vmatmul.bf16.vlgmr.msrb.gmra.mxu2 %v15943_v31  ;;  %v14152_v7 = vld [vmem:[%s15555_s27 + $0x70c] sm:$0xf]  ;;  %v10226_v17 = vor.u32 %v14088_v2, %v10223_v48  ;;  %v7458_v21 = vadd.f32 %v7457_v58, %v7445_v14 }
 0x30c   : > { %7721 = vmatpush.bf16.msra.mxu2 %v10322_v8  ;;  %7710 = vmatpush.bf16.msra.mxu1 %v10002_v33  ;;  %v10479_v9 = vld [vmem:[%s15555_s27 + $0x728] sm:$0xf0] }
 0x30d   : > { %7690 = vmatmul.bf16.vlgmr.msrb.gmra.mxu3 %v15947_v35  ;;  %v9647_v20 = vld [vmem:[%s15555_s27 + $0xa8] sm:$0xf0]  ;;  %v10482_v25 = vor.u32 %v14152_v7, %v10479_v9  ;;  %v7471_v48 = vadd.f32 %v7470_v1, %v7458_v21  ;;  %v7483_v7 = vpop.f32.mrf.mxu3 }
 0x30e   : > { %7734 = vmatpush.bf16.msra.mxu3 %v10578_v32  ;;  %7697 = vmatpush.bf16.msra.mxu0 %v9746_v44  ;;  %v14080_v8 = vld [vmem:[%s15555_s27 + $0x4cc] sm:$0xf]  ;;  %v9650_v33 = vor.u32 %v13944_v18, %v9647_v20 }
 0x30f   : > { %v10191_v26 = vld [vmem:[%s15555_s27 + $0x4e8] sm:$0xf0] }
 0x310   : > { %7722 = vmatpush.bf16.msra.mxu2 %v10290_v45  ;;  %7711 = vmatpush.bf16.msra.mxu1 %v9970_v51  ;;  %v14144_v29 = vld [vmem:[%s15555_s27 + $0x6cc] sm:$0xf]  ;;  %v10194_v34 = vor.u32 %v14080_v8, %v10191_v26  ;;  %v7446_v50 = vpop.f32.mrf.mxu0 }
 0x311   : > { %v10447_v62 = vld [vmem:[%s15555_s27 + $0x6e8] sm:$0xf0] }
 0x312   : > { %7735 = vmatpush.bf16.msra.mxu3 %v10546_v43  ;;  %7698 = vmatpush.bf16.msra.mxu0 %v9714_v60  ;;  %v14000_v30 = vld [vmem:[%s15555_s27 + $0x24c] sm:$0xf]  ;;  %v10450_v40 = vor.u32 %v14144_v29, %v10447_v62 }
 0x313   : > { %v9871_v32 = vld [vmem:[%s15555_s27 + $0x268] sm:$0xf0] }
 0x314   : > { %7723 = vmatpush.bf16.msra.mxu2 %v10258_v61  ;;  %7712 = vmatpush.bf16.msra.mxu1 %v9938_v5  ;;  %v13936_v36 = vld [vmem:[%s15555_s27 + $0x4c] sm:$0xf]  ;;  %v9874_v41 = vor.u32 %v14000_v30, %v9871_v32 }
 0x315   : > { %v9615_v37 = vld [vmem:[%s15555_s27 + $0x68] sm:$0xf0] }
 0x316   : > { %7736 = vmatpush.bf16.msra.mxu3 %v10514_v4  ;;  %7699 = vmatpush.bf16.msra.mxu0 %v9682_v16  ;;  %v14072_v44 = vld [vmem:[%s15555_s27 + $0x48c] sm:$0xf]  ;;  %v9618_v55 = vor.u32 %v13936_v36, %v9615_v37 }
 0x317   : > { %v10159_v45 = vld [vmem:[%s15555_s27 + $0x4a8] sm:$0xf0] }
 0x318   : > { %7724 = vmatpush.bf16.msra.mxu2 %v10226_v17  ;;  %7713 = vmatpush.bf16.msra.mxu1 %v9906_v23  ;;  %v14136_v28 = vld [vmem:[%s15555_s27 + $0x68c] sm:$0xf]  ;;  %v10162_v57 = vor.u32 %v14072_v44, %v10159_v45  ;;  %v16563_v17 = vadd.f32 %v7483_v7, %v7471_v48  ;;  %v7472_v44 = vpop.f32.mrf.mxu2 }
 0x319   : > { %v10415_v43 = vld [vmem:[%s15555_s27 + $0x6a8] sm:$0xf0] }
 0x31a   : > { %7737 = vmatpush.bf16.msra.mxu3 %v10482_v25  ;;  %v13992_v51 = vld [vmem:[%s15555_s27 + $0x20c] sm:$0xf]  ;;  %7700 = vmatpush.bf16.msra.mxu0 %v9650_v33  ;;  %v10418_v19 = vor.u32 %v14136_v28, %v10415_v43 }
 0x31b   : > { %v14304_v24 = vld [vmem:[%s15555_s27 + $0xbcc] sm:$0xf]  ;;  %v9842_v58 = vor.u32 %v13992_v51, %v9839_v54  ;;  %v7485_v51 = vpop.f32.mrf.mxu3 }
 0x31c   : > { %v11087_v56 = vld [vmem:[%s15555_s27 + $0xbe8] sm:$0xf0]  ;;  %7725 = vmatpush.bf16.msra.mxu2 %v10194_v34  ;;  %7714 = vmatpush.bf16.msra.mxu1 %v9874_v41 }
 0x31d   : > { %v13928_v59 = vld [vmem:[%s15555_s27 + $0xc] sm:$0xf]  ;;  %v11090_v42 = vor.u32 %v14304_v24, %v11087_v56 }
 0x31e   : > { %v9583_v60 = vld [vmem:[%s15555_s27 + $0x28] sm:$0xf0]  ;;  %7738 = vmatpush.bf16.msra.mxu3 %v10450_v40  ;;  %7701 = vmatpush.bf16.msra.mxu0 %v9618_v55 }
 0x31f   : > { %v14240_v61 = vld [vmem:[%s15555_s27 + $0x9cc] sm:$0xf]  ;;  %v9586_v13 = vor.u32 %v13928_v59, %v9583_v60 }
 0x320   : > { %v10831_v4 = vld [vmem:[%s15555_s27 + $0x9e8] sm:$0xf0]  ;;  %7726 = vmatpush.bf16.msra.mxu2 %v10162_v57  ;;  %7715 = vmatpush.bf16.msra.mxu1 %v9842_v58 }
 0x321   : > { %v14064_v5 = vld [vmem:[%s15555_s27 + $0x44c] sm:$0xf]  ;;  %v10834_v18 = vor.u32 %v14240_v61, %v10831_v4 }
 0x322   : > { %v10127_v2 = vld [vmem:[%s15555_s27 + $0x468] sm:$0xf0]  ;;  %7739 = vmatpush.bf16.msra.mxu3 %v10418_v19  ;;  %7702 = vmatpush.bf16.msra.mxu0 %v9586_v13 }
 0x323   : > { %v14128_v9 = vld [vmem:[%s15555_s27 + $0x64c] sm:$0xf]  ;;  %v10130_v20 = vor.u32 %v14064_v5, %v10127_v2  ;;  %7716 = vmatmul.bf16.vlgmr.msra.gmra.mxu1 %v15754_v12 }
 0x324   : > { %v10383_v10 = vld [vmem:[%s15555_s27 + $0x668] sm:$0xf0]  ;;  %7760 = vmatpush.bf16.msrb.mxu1 %v11090_v42 }
 0x325   : > { %v14296_v14 = vld [vmem:[%s15555_s27 + $0xb8c] sm:$0xf]  ;;  %v10386_v8 = vor.u32 %v14128_v9, %v10383_v10  ;;  %7727 = vmatpush.bf16.msra.mxu2 %v10130_v20  ;;  %7703 = vmatmul.bf16.vlgmr.msra.gmra.mxu0 %v15752_v11 }
 0x326   : > { %v11055_v16 = vld [vmem:[%s15555_s27 + $0xba8] sm:$0xf0]  ;;  %7747 = vmatpush.bf16.msrb.mxu0 %v10834_v18 }
 0x327   : > { %v14232_v21 = vld [vmem:[%s15555_s27 + $0x98c] sm:$0xf]  ;;  %v11058_v30 = vor.u32 %v14296_v14, %v11055_v16  ;;  %7740 = vmatpush.bf16.msra.mxu3 %v10386_v8 }
 0x328   : > { %v10799_v25 = vld [vmem:[%s15555_s27 + $0x9a8] sm:$0xf0] }
 0x329   : > { %v14056_v23 = vld [vmem:[%s15555_s27 + $0x40c] sm:$0xf]  ;;  %v10802_v40 = vor.u32 %v14232_v21, %v10799_v25  ;;  %7761 = vmatpush.bf16.msrb.mxu1 %v11058_v30 }
 0x32a   : > { %v10095_v26 = vld [vmem:[%s15555_s27 + $0x428] sm:$0xf0] }
 0x32b   : > { %v14120_v29 = vld [vmem:[%s15555_s27 + $0x60c] sm:$0xf]  ;;  %v10098_v41 = vor.u32 %v14056_v23, %v10095_v26  ;;  %7748 = vmatpush.bf16.msrb.mxu0 %v10802_v40  ;;  %v7509_v23 = vpop.f32.mrf.mxu1 }
 0x32c   : > { %v10351_v62 = vld [vmem:[%s15555_s27 + $0x628] sm:$0xf0] }
 0x32d   : > { %v14368_v32 = vld [vmem:[%s15555_s27 + $0xdcc] sm:$0xf]  ;;  %v10354_v45 = vor.u32 %v14120_v29, %v10351_v62  ;;  %7728 = vmatpush.bf16.msra.mxu2 %v10098_v41 }
 0x32e   : > { %v11343_v33 = vld [vmem:[%s15555_s27 + $0xde8] sm:$0xf0] }
 0x32f   : > { %v14432_v34 = vld [vmem:[%s15555_s27 + $0xfcc] sm:$0xf]  ;;  %v11346_v28 = vor.u32 %v14368_v32, %v11343_v33  ;;  %7741 = vmatpush.bf16.msra.mxu3 %v10354_v45  ;;  %v7496_v32 = vpop.f32.mrf.mxu0 }
 0x330   : > { %v11599_v36 = vld [vmem:[%s15555_s27 + $0xfe8] sm:$0xf0]  ;;  %7729 = vmatmul.bf16.vlgmr.msra.gmra.mxu2 %v15773_v46 }
 0x331   : > { %v14288_v37 = vld [vmem:[%s15555_s27 + $0xb4c] sm:$0xf]  ;;  %v11602_v54 = vor.u32 %v14432_v34, %v11599_v36  ;;  %7773 = vmatpush.bf16.msrb.mxu2 %v11346_v28 }
 0x332   : > { %v11023_v38 = vld [vmem:[%s15555_s27 + $0xb68] sm:$0xf0]  ;;  %7742 = vmatmul.bf16.vlgmr.msra.gmra.mxu3 %v15775_v47 }
 0x333   : > { %v14224_v50 = vld [vmem:[%s15555_s27 + $0x94c] sm:$0xf]  ;;  %v11026_v55 = vor.u32 %v14288_v37, %v11023_v38  ;;  %7786 = vmatpush.bf16.msrb.mxu3 %v11602_v54 }
 0x334   : > { %v10767_v43 = vld [vmem:[%s15555_s27 + $0x968] sm:$0xf0] }
 0x335   : > { %v14360_v24 = vld [vmem:[%s15555_s27 + $0xd8c] sm:$0xf]  ;;  %v10770_v1 = vor.u32 %v14224_v50, %v10767_v43  ;;  %7762 = vmatpush.bf16.msrb.mxu1 %v11026_v55 }
 0x336   : > { %v11311_v56 = vld [vmem:[%s15555_s27 + $0xda8] sm:$0xf0] }
 0x337   : > { %v14424_v57 = vld [vmem:[%s15555_s27 + $0xf8c] sm:$0xf]  ;;  %v11314_v19 = vor.u32 %v14360_v24, %v11311_v56  ;;  %7749 = vmatpush.bf16.msrb.mxu0 %v10770_v1  ;;  %v7511_v1 = vpop.f32.mrf.mxu1 }
 0x338   : > { %v11567_v59 = vld [vmem:[%s15555_s27 + $0xfa8] sm:$0xf0] }
 0x339   : > { %v14280_v60 = vld [vmem:[%s15555_s27 + $0xb0c] sm:$0xf]  ;;  %v11570_v5 = vor.u32 %v14424_v57, %v11567_v59  ;;  %7774 = vmatpush.bf16.msrb.mxu2 %v11314_v19 }
 0x33a   : > { %v10991_v61 = vld [vmem:[%s15555_s27 + $0xb28] sm:$0xf0] }
 0x33b   : > { %v14216_v58 = vld [vmem:[%s15555_s27 + $0x90c] sm:$0xf]  ;;  %v10994_v2 = vor.u32 %v14280_v60, %v10991_v61  ;;  %7787 = vmatpush.bf16.msrb.mxu3 %v11570_v5 }
 0x33c   : > { %v10735_v4 = vld [vmem:[%s15555_s27 + $0x928] sm:$0xf0] }
 0x33d   : > { %v14352_v48 = vld [vmem:[%s15555_s27 + $0xd4c] sm:$0xf]  ;;  %v10738_v18 = vor.u32 %v14216_v58, %v10735_v4  ;;  %7763 = vmatpush.bf16.msrb.mxu1 %v10994_v2 }
 0x33e   : > { %v11279_v7 = vld [vmem:[%s15555_s27 + $0xd68] sm:$0xf0] }
 0x33f   : > { %v14416_v42 = vld [vmem:[%s15555_s27 + $0xf4c] sm:$0xf]  ;;  %v11282_v20 = vor.u32 %v14352_v48, %v11279_v7  ;;  %7750 = vmatpush.bf16.msrb.mxu0 %v10738_v18  ;;  %v7498_v48 = vpop.f32.mrf.mxu0 }
 0x340   : > { %v11535_v9 = vld [vmem:[%s15555_s27 + $0xf68] sm:$0xf0] }
 0x341   : > { %v14272_v10 = vld [vmem:[%s15555_s27 + $0xacc] sm:$0xf]  ;;  %v11538_v8 = vor.u32 %v14416_v42, %v11535_v9  ;;  %7775 = vmatpush.bf16.msrb.mxu2 %v11282_v20 }
 0x342   : > { %v10959_v13 = vld [vmem:[%s15555_s27 + $0xae8] sm:$0xf0] }
 0x343   : > { %v15123_v14 = vld [vmem:[%s16078_s29] sm:$0xff]  ;;  %v10962_v26 = vor.u32 %v14272_v10, %v10959_v13  ;;  %7788 = vmatpush.bf16.msrb.mxu3 %v11538_v8 }
 0x344   : > { %v1881_v16 = vperm.slane %v15123_v14, 2  ;;  %v14208_v21 = vld [vmem:[%s15555_s27 + $0x8cc] sm:$0xf] }
 0x345   : > { %v10703_v25 = vld [vmem:[%s15555_s27 + $0x8e8] sm:$0xf0]  ;;  %7764 = vmatpush.bf16.msrb.mxu1 %v10962_v26 }
 0x346   : > { %v14344_v29 = vld [vmem:[%s15555_s27 + $0xd0c] sm:$0xf]  ;;  %v7497_v37 = vadd.f32 %v7496_v32, %v1881_v16  ;;  %v10706_v38 = vor.u32 %v14208_v21, %v10703_v25  ;;  %v7522_v25 = vpop.f32.mrf.mxu2  ;;  %v7535_v32 = vpop.f32.mrf.mxu3 }
 0x347   : > { %v11247_v62 = vld [vmem:[%s15555_s27 + $0xd28] sm:$0xf0] }
 0x348   : > { %v14408_v30 = vld [vmem:[%s15555_s27 + $0xf0c] sm:$0xf]  ;;  %v11250_v40 = vor.u32 %v14344_v29, %v11247_v62  ;;  %v7510_v45 = vadd.f32 %v7509_v23, %v7497_v37  ;;  %7751 = vmatpush.bf16.msrb.mxu0 %v10706_v38 }
 0x349   : > { %v11503_v33 = vld [vmem:[%s15555_s27 + $0xf28] sm:$0xf0] }
 0x34a   : > { %v14264_v34 = vld [vmem:[%s15555_s27 + $0xa8c] sm:$0xf]  ;;  %v11506_v28 = vor.u32 %v14408_v30, %v11503_v33  ;;  %7776 = vmatpush.bf16.msrb.mxu2 %v11250_v40  ;;  %v7523_v30 = vadd.f32 %v7522_v25, %v7510_v45 }
 0x34b   : > { %v10927_v36 = vld [vmem:[%s15555_s27 + $0xaa8] sm:$0xf0] }
 0x34c   : > { %v14200_v41 = vld [vmem:[%s15555_s27 + $0x88c] sm:$0xf]  ;;  %v10930_v50 = vor.u32 %v14264_v34, %v10927_v36  ;;  %7789 = vmatpush.bf16.msrb.mxu3 %v11506_v28 }
 0x34d   : > { %v10671_v44 = vld [vmem:[%s15555_s27 + $0x8a8] sm:$0xf0] }
 0x34e   : > { %v14336_v43 = vld [vmem:[%s15555_s27 + $0xccc] sm:$0xf]  ;;  %v10674_v57 = vor.u32 %v14200_v41, %v10671_v44  ;;  %7765 = vmatpush.bf16.msrb.mxu1 %v10930_v50  ;;  %v16634_v41 = vadd.f32 %v7535_v32, %v7523_v30 }
 0x34f   : > { %v11215_v51 = vld [vmem:[%s15555_s27 + $0xce8] sm:$0xf0] }
 0x350   : > { %v14400_v54 = vld [vmem:[%s15555_s27 + $0xecc] sm:$0xf]  ;;  %v11218_v59 = vor.u32 %v14336_v43, %v11215_v51  ;;  %7752 = vmatpush.bf16.msrb.mxu0 %v10674_v57 }
 0x351   : > { %v11471_v55 = vld [vmem:[%s15555_s27 + $0xee8] sm:$0xf0] }
 0x352   : > { %v14256_v24 = vld [vmem:[%s15555_s27 + $0xa4c] sm:$0xf]  ;;  %v11474_v19 = vor.u32 %v14400_v54, %v11471_v55  ;;  %7777 = vmatpush.bf16.msrb.mxu2 %v11218_v59 }
 0x353   : > { %v10895_v56 = vld [vmem:[%s15555_s27 + $0xa68] sm:$0xf0] }
 0x354   : > { %v14192_v60 = vld [vmem:[%s15555_s27 + $0x84c] sm:$0xf]  ;;  %v10898_v58 = vor.u32 %v14256_v24, %v10895_v56  ;;  %7790 = vmatpush.bf16.msrb.mxu3 %v11474_v19 }
 0x355   : > { %v10639_v61 = vld [vmem:[%s15555_s27 + $0x868] sm:$0xf0] }
 0x356   : > { %v14328_v4 = vld [vmem:[%s15555_s27 + $0xc8c] sm:$0xf]  ;;  %v10642_v10 = vor.u32 %v14192_v60, %v10639_v61  ;;  %7766 = vmatpush.bf16.msrb.mxu1 %v10898_v58 }
 0x357   : > { %v11183_v5 = vld [vmem:[%s15555_s27 + $0xca8] sm:$0xf0] }
 0x358   : > { %v14392_v2 = vld [vmem:[%s15555_s27 + $0xe8c] sm:$0xf]  ;;  %v11186_v16 = vor.u32 %v14328_v4, %v11183_v5  ;;  %7753 = vmatpush.bf16.msrb.mxu0 %v10642_v10  ;;  %v7524_v5 = vpop.f32.mrf.mxu2 }
 0x359   : > { %v11439_v7 = vld [vmem:[%s15555_s27 + $0xea8] sm:$0xf0] }
 0x35a   : > { %v14248_v42 = vld [vmem:[%s15555_s27 + $0xa0c] sm:$0xf]  ;;  %v11442_v23 = vor.u32 %v14392_v2, %v11439_v7  ;;  %7778 = vmatpush.bf16.msrb.mxu2 %v11186_v16 }
 0x35b   : > { %v10863_v9 = vld [vmem:[%s15555_s27 + $0xa28] sm:$0xf0] }
 0x35c   : > { %v14560_v13 = vld [vmem:[%s15555_s27 + $0x13cc] sm:$0xf]  ;;  %v10866_v8 = vor.u32 %v14248_v42, %v10863_v9  ;;  %7791 = vmatpush.bf16.msrb.mxu3 %v11442_v23  ;;  %v7537_v9 = vpop.f32.mrf.mxu3 }
 0x35d   : > { %v12111_v14 = vld [vmem:[%s15555_s27 + $0x13e8] sm:$0xf0] }
 0x35e   : > { %v14184_v18 = vld [vmem:[%s15555_s27 + $0x80c] sm:$0xf]  ;;  %v12114_v33 = vor.u32 %v14560_v13, %v12111_v14  ;;  %7767 = vmatpush.bf16.msrb.mxu1 %v10866_v8 }
 0x35f   : > { %v10607_v20 = vld [vmem:[%s15555_s27 + $0x828] sm:$0xf0] }
 0x360   : > { %v14496_v21 = vld [vmem:[%s15555_s27 + $0x11cc] sm:$0xf]  ;;  %v10610_v37 = vor.u32 %v14184_v18, %v10607_v20 }
 0x361   : > { %v11855_v26 = vld [vmem:[%s15555_s27 + $0x11e8] sm:$0xf0]  ;;  %7768 = vmatmul.bf16.vlgmr.msrb.gmra.mxu1 %v15799_v27 }
 0x362   : > { %v14320_v29 = vld [vmem:[%s15555_s27 + $0xc4c] sm:$0xf]  ;;  %v11858_v44 = vor.u32 %v14496_v21, %v11855_v26  ;;  %7812 = vmatpush.bf16.msra.mxu1 %v12114_v33  ;;  %7754 = vmatpush.bf16.msrb.mxu0 %v10610_v37 }
 0x363   : > { %v11151_v62 = vld [vmem:[%s15555_s27 + $0xc68] sm:$0xf0] }
 0x364   : > { %v14384_v34 = vld [vmem:[%s15555_s27 + $0xe4c] sm:$0xf]  ;;  %v11154_v28 = vor.u32 %v14320_v29, %v11151_v62 }
 0x365   : > { %v11407_v36 = vld [vmem:[%s15555_s27 + $0xe68] sm:$0xf0]  ;;  %7755 = vmatmul.bf16.vlgmr.msrb.gmra.mxu0 %v15795_v22 }
 0x366   : > { %v14552_v38 = vld [vmem:[%s15555_s27 + $0x138c] sm:$0xf]  ;;  %v11410_v51 = vor.u32 %v14384_v34, %v11407_v36  ;;  %7799 = vmatpush.bf16.msra.mxu0 %v11858_v44  ;;  %7779 = vmatpush.bf16.msrb.mxu2 %v11154_v28 }
 0x367   : > { %v12079_v40 = vld [vmem:[%s15555_s27 + $0x13a8] sm:$0xf0] }
 0x368   : > { %v14488_v45 = vld [vmem:[%s15555_s27 + $0x118c] sm:$0xf]  ;;  %v12082_v56 = vor.u32 %v14552_v38, %v12079_v40  ;;  %7792 = vmatpush.bf16.msrb.mxu3 %v11410_v51 }
 0x369   : > { %v11823_v50 = vld [vmem:[%s15555_s27 + $0x11a8] sm:$0xf0] }
 0x36a   : > { %v14312_v43 = vld [vmem:[%s15555_s27 + $0xc0c] sm:$0xf]  ;;  %v11826_v58 = vor.u32 %v14488_v45, %v11823_v50  ;;  %7813 = vmatpush.bf16.msra.mxu1 %v12082_v56  ;;  %v7561_v50 = vpop.f32.mrf.mxu1  ;;  %v7548_v56 = vpop.f32.mrf.mxu0 }
 0x36b   : > { %v11119_v54 = vld [vmem:[%s15555_s27 + $0xc28] sm:$0xf0] }
 0x36c   : > { %v14376_v55 = vld [vmem:[%s15555_s27 + $0xe0c] sm:$0xf]  ;;  %v11122_v4 = vor.u32 %v14312_v43, %v11119_v54  ;;  %7800 = vmatpush.bf16.msra.mxu0 %v11826_v58 }
 0x36d   : > { %v11375_v24 = vld [vmem:[%s15555_s27 + $0xe28] sm:$0xf0] }
 0x36e   : > { %v14624_v57 = vld [vmem:[%s15555_s27 + $0x15cc] sm:$0xf]  ;;  %v11378_v2 = vor.u32 %v14376_v55, %v11375_v24  ;;  %7780 = vmatpush.bf16.msrb.mxu2 %v11122_v4 }
 0x36f   : > { %v12367_v59 = vld [vmem:[%s15555_s27 + $0x15e8] sm:$0xf0] }
 0x370   : > { %v14688_v60 = vld [vmem:[%s15555_s27 + $0x17cc] sm:$0xf]  ;;  %v12370_v48 = vor.u32 %v14624_v57, %v12367_v59  ;;  %7793 = vmatpush.bf16.msrb.mxu3 %v11378_v2 }
 0x371   : > { %v12623_v61 = vld [vmem:[%s15555_s27 + $0x17e8] sm:$0xf0]  ;;  %7781 = vmatmul.bf16.vlgmr.msrb.gmra.mxu2 %v15813_v52 }
 0x372   : > { %v14544_v1 = vld [vmem:[%s15555_s27 + $0x134c] sm:$0xf]  ;;  %v12626_v10 = vor.u32 %v14688_v60, %v12623_v61  ;;  %7825 = vmatpush.bf16.msra.mxu2 %v12370_v48  ;;  %v7549_v61 = vadd.f32 %v7548_v56, %v16634_v41  ;;  %v7587_v56 = vpop.f32.mrf.mxu3 }
 0x373   : > { %v12047_v19 = vld [vmem:[%s15555_s27 + $0x1368] sm:$0xf0]  ;;  %7794 = vmatmul.bf16.vlgmr.msrb.gmra.mxu3 %v15815_v53 }
 0x374   : > { %v14480_v7 = vld [vmem:[%s15555_s27 + $0x114c] sm:$0xf]  ;;  %v12050_v13 = vor.u32 %v14544_v1, %v12047_v19  ;;  %7838 = vmatpush.bf16.msra.mxu3 %v12626_v10  ;;  %v7562_v5 = vadd.f32 %v7561_v50, %v7549_v61 }
 0x375   : > { %v11791_v42 = vld [vmem:[%s15555_s27 + $0x1168] sm:$0xf0] }
 0x376   : > { %v14616_v14 = vld [vmem:[%s15555_s27 + $0x158c] sm:$0xf]  ;;  %v11794_v23 = vor.u32 %v14480_v7, %v11791_v42  ;;  %7814 = vmatpush.bf16.msra.mxu1 %v12050_v13 }
 0x377   : > { %v12335_v16 = vld [vmem:[%s15555_s27 + $0x15a8] sm:$0xf0] }
 0x378   : > { %v14680_v18 = vld [vmem:[%s15555_s27 + $0x178c] sm:$0xf]  ;;  %v12338_v8 = vor.u32 %v14616_v14, %v12335_v16  ;;  %7801 = vmatpush.bf16.msra.mxu0 %v11794_v23 }
 0x379   : > { %v12591_v20 = vld [vmem:[%s15555_s27 + $0x17a8] sm:$0xf0] }
 0x37a   : > { %v14536_v21 = vld [vmem:[%s15555_s27 + $0x130c] sm:$0xf]  ;;  %v12594_v62 = vor.u32 %v14680_v18, %v12591_v20  ;;  %7826 = vmatpush.bf16.msra.mxu2 %v12338_v8 }
 0x37b   : > { %v12015_v25 = vld [vmem:[%s15555_s27 + $0x1328] sm:$0xf0] }
 0x37c   : > { %v14472_v26 = vld [vmem:[%s15555_s27 + $0x110c] sm:$0xf]  ;;  %v12018_v30 = vor.u32 %v14536_v21, %v12015_v25  ;;  %7839 = vmatpush.bf16.msra.mxu3 %v12594_v62  ;;  %v7563_v21 = vpop.f32.mrf.mxu1  ;;  %v7550_v62 = vpop.f32.mrf.mxu0 }
 0x37d   : > { %v11759_v29 = vld [vmem:[%s15555_s27 + $0x1128] sm:$0xf0] }
 0x37e   : > { %v14608_v32 = vld [vmem:[%s15555_s27 + $0x154c] sm:$0xf]  ;;  %v11762_v40 = vor.u32 %v14472_v26, %v11759_v29  ;;  %7815 = vmatpush.bf16.msra.mxu1 %v12018_v30 }
 0x37f   : > { %v12303_v33 = vld [vmem:[%s15555_s27 + $0x1568] sm:$0xf0] }
 0x380   : > { %v14672_v34 = vld [vmem:[%s15555_s27 + $0x174c] sm:$0xf]  ;;  %v12306_v44 = vor.u32 %v14608_v32, %v12303_v33  ;;  %7802 = vmatpush.bf16.msra.mxu0 %v11762_v40 }
 0x381   : > { %v12559_v36 = vld [vmem:[%s15555_s27 + $0x1768] sm:$0xf0] }
 0x382   : > { %v14528_v37 = vld [vmem:[%s15555_s27 + $0x12cc] sm:$0xf]  ;;  %v12562_v43 = vor.u32 %v14672_v34, %v12559_v36  ;;  %7827 = vmatpush.bf16.msra.mxu2 %v12306_v44 }
 0x383   : > { %v11983_v38 = vld [vmem:[%s15555_s27 + $0x12e8] sm:$0xf0] }
 0x384   : > { %v14464_v28 = vld [vmem:[%s15555_s27 + $0x10cc] sm:$0xf]  ;;  %v11986_v51 = vor.u32 %v14528_v37, %v11983_v38  ;;  %7840 = vmatpush.bf16.msra.mxu3 %v12562_v43 }
 0x385   : > { %v11727_v45 = vld [vmem:[%s15555_s27 + $0x10e8] sm:$0xf0] }
 0x386   : > { %v14600_v54 = vld [vmem:[%s15555_s27 + $0x150c] sm:$0xf]  ;;  %v11730_v1 = vor.u32 %v14464_v28, %v11727_v45  ;;  %7816 = vmatpush.bf16.msra.mxu1 %v11986_v51  ;;  %v7574_v45 = vpop.f32.mrf.mxu2 }
 0x387   : > { %v12271_v55 = vld [vmem:[%s15555_s27 + $0x1528] sm:$0xf0] }
 0x388   : > { %v14664_v24 = vld [vmem:[%s15555_s27 + $0x170c] sm:$0xf]  ;;  %v12274_v19 = vor.u32 %v14600_v54, %v12271_v55  ;;  %7803 = vmatpush.bf16.msra.mxu0 %v11730_v1 }
 0x389   : > { %v12527_v57 = vld [vmem:[%s15555_s27 + $0x1728] sm:$0xf0] }
 0x38a   : > { %v14520_v59 = vld [vmem:[%s15555_s27 + $0x128c] sm:$0xf]  ;;  %v12530_v2 = vor.u32 %v14664_v24, %v12527_v57  ;;  %7828 = vmatpush.bf16.msra.mxu2 %v12274_v19  ;;  %v7575_v24 = vadd.f32 %v7574_v45, %v7562_v5 }
 0x38b   : > { %v11951_v60 = vld [vmem:[%s15555_s27 + $0x12a8] sm:$0xf0] }
 0x38c   : > { %v14456_v58 = vld [vmem:[%s15555_s27 + $0x108c] sm:$0xf]  ;;  %v11954_v48 = vor.u32 %v14520_v59, %v11951_v60  ;;  %7841 = vmatpush.bf16.msra.mxu3 %v12530_v2 }
 0x38d   : > { %v11695_v4 = vld [vmem:[%s15555_s27 + $0x10a8] sm:$0xf0] }
 0x38e   : > { %v14592_v7 = vld [vmem:[%s15555_s27 + $0x14cc] sm:$0xf]  ;;  %v11698_v14 = vor.u32 %v14456_v58, %v11695_v4  ;;  %7817 = vmatpush.bf16.msra.mxu1 %v11954_v48  ;;  %v16705_v58 = vadd.f32 %v7587_v56, %v7575_v24 }
 0x38f   : > { %v12239_v42 = vld [vmem:[%s15555_s27 + $0x14e8] sm:$0xf0] }
 0x390   : > { %v14656_v9 = vld [vmem:[%s15555_s27 + $0x16cc] sm:$0xf]  ;;  %v12242_v16 = vor.u32 %v14592_v7, %v12239_v42  ;;  %7804 = vmatpush.bf16.msra.mxu0 %v11698_v14 }
 0x391   : > { %v12495_v41 = vld [vmem:[%s15555_s27 + $0x16e8] sm:$0xf0] }
 0x392   : > { %v14512_v10 = vld [vmem:[%s15555_s27 + $0x124c] sm:$0xf]  ;;  %v12498_v25 = vor.u32 %v14656_v9, %v12495_v41  ;;  %7829 = vmatpush.bf16.msra.mxu2 %v12242_v16 }
 0x393   : > { %v11919_v13 = vld [vmem:[%s15555_s27 + $0x1268] sm:$0xf0] }
 0x394   : > { %v14448_v18 = vld [vmem:[%s15555_s27 + $0x104c] sm:$0xf]  ;;  %v11922_v23 = vor.u32 %v14512_v10, %v11919_v13  ;;  %7842 = vmatpush.bf16.msra.mxu3 %v12498_v25 }
 0x395   : > { %v11663_v20 = vld [vmem:[%s15555_s27 + $0x1068] sm:$0xf0] }
 0x396   : > { %v14584_v8 = vld [vmem:[%s15555_s27 + $0x148c] sm:$0xf]  ;;  %v11666_v34 = vor.u32 %v14448_v18, %v11663_v20  ;;  %7818 = vmatpush.bf16.msra.mxu1 %v11922_v23 }
 0x397   : > { %v12207_v26 = vld [vmem:[%s15555_s27 + $0x14a8] sm:$0xf0] }
 0x398   : > { %v14648_v29 = vld [vmem:[%s15555_s27 + $0x168c] sm:$0xf]  ;;  %v12210_v38 = vor.u32 %v14584_v8, %v12207_v26  ;;  %7805 = vmatpush.bf16.msra.mxu0 %v11666_v34  ;;  %v7576_v26 = vpop.f32.mrf.mxu2 }
 0x399   : > { %v12463_v30 = vld [vmem:[%s15555_s27 + $0x16a8] sm:$0xf0] }
 0x39a   : > { %v14504_v32 = vld [vmem:[%s15555_s27 + $0x120c] sm:$0xf]  ;;  %v12466_v50 = vor.u32 %v14648_v29, %v12463_v30  ;;  %7830 = vmatpush.bf16.msra.mxu2 %v12210_v38 }
 0x39b   : > { %v11887_v33 = vld [vmem:[%s15555_s27 + $0x1228] sm:$0xf0] }
 0x39c   : > { %v14816_v36 = vld [vmem:[%s15555_s27 + $0x1bcc] sm:$0xf]  ;;  %v11890_v43 = vor.u32 %v14504_v32, %v11887_v33  ;;  %7843 = vmatpush.bf16.msra.mxu3 %v12466_v50  ;;  %v7589_v33 = vpop.f32.mrf.mxu3 }
 0x39d   : > { %v13135_v37 = vld [vmem:[%s15555_s27 + $0x1be8] sm:$0xf0] }
 0x39e   : > { %v14440_v40 = vld [vmem:[%s15555_s27 + $0x100c] sm:$0xf]  ;;  %v13138_v57 = vor.u32 %v14816_v36, %v13135_v37  ;;  %7819 = vmatpush.bf16.msra.mxu1 %v11890_v43 }
 0x39f   : > { %v11631_v44 = vld [vmem:[%s15555_s27 + $0x1028] sm:$0xf0] }
 0x3a0   : > { %v14752_v28 = vld [vmem:[%s15555_s27 + $0x19cc] sm:$0xf]  ;;  %v11634_v61 = vor.u32 %v14440_v40, %v11631_v44 }
 0x3a1   : > { %v12879_v51 = vld [vmem:[%s15555_s27 + $0x19e8] sm:$0xf0]  ;;  %7820 = vmatmul.bf16.vlgmr.msra.gmra.mxu1 %v15851_v49 }
 0x3a2   : > { %v14576_v54 = vld [vmem:[%s15555_s27 + $0x144c] sm:$0xf]  ;;  %v12882_v4 = vor.u32 %v14752_v28, %v12879_v51  ;;  %7864 = vmatpush.bf16.msrb.mxu1 %v13138_v57  ;;  %7806 = vmatpush.bf16.msra.mxu0 %v11634_v61 }
 0x3a3   : > { %v12175_v55 = vld [vmem:[%s15555_s27 + $0x1468] sm:$0xf0] }
 0x3a4   : > { %v14640_v59 = vld [vmem:[%s15555_s27 + $0x164c] sm:$0xf]  ;;  %v12178_v2 = vor.u32 %v14576_v54, %v12175_v55 }
 0x3a5   : > { %v12431_v60 = vld [vmem:[%s15555_s27 + $0x1668] sm:$0xf0]  ;;  %7807 = vmatmul.bf16.vlgmr.msra.gmra.mxu0 %v15843_v39 }
 0x3a6   : > { %v14808_v1 = vld [vmem:[%s15555_s27 + $0x1b8c] sm:$0xf]  ;;  %v12434_v42 = vor.u32 %v14640_v59, %v12431_v60  ;;  %7851 = vmatpush.bf16.msrb.mxu0 %v12882_v4  ;;  %7831 = vmatpush.bf16.msra.mxu2 %v12178_v2 }
 0x3a7   : > { %v13103_v19 = vld [vmem:[%s15555_s27 + $0x1ba8] sm:$0xf0] }
 0x3a8   : > { %v14744_v5 = vld [vmem:[%s15555_s27 + $0x198c] sm:$0xf]  ;;  %v13106_v13 = vor.u32 %v14808_v1, %v13103_v19  ;;  %7844 = vmatpush.bf16.msra.mxu3 %v12434_v42 }
 0x3a9   : > { %v12847_v48 = vld [vmem:[%s15555_s27 + $0x19a8] sm:$0xf0] }
 0x3aa   : > { %v14568_v7 = vld [vmem:[%s15555_s27 + $0x140c] sm:$0xf]  ;;  %v12850_v23 = vor.u32 %v14744_v5, %v12847_v48  ;;  %7865 = vmatpush.bf16.msrb.mxu1 %v13106_v13  ;;  %v7613_v48 = vpop.f32.mrf.mxu1  ;;  %v7600_v13 = vpop.f32.mrf.mxu0 }
 0x3ab   : > { %v12143_v9 = vld [vmem:[%s15555_s27 + $0x1428] sm:$0xf0] }
 0x3ac   : > { %v14632_v41 = vld [vmem:[%s15555_s27 + $0x160c] sm:$0xf]  ;;  %v12146_v8 = vor.u32 %v14568_v7, %v12143_v9  ;;  %7852 = vmatpush.bf16.msrb.mxu0 %v12850_v23 }
 0x3ad   : > { %v12399_v10 = vld [vmem:[%s15555_s27 + $0x1628] sm:$0xf0] }
 0x3ae   : > { %v14880_v14 = vld [vmem:[%s15555_s27 + $0x1dcc] sm:$0xf]  ;;  %v12402_v29 = vor.u32 %v14632_v41, %v12399_v10  ;;  %7832 = vmatpush.bf16.msra.mxu2 %v12146_v8 }
 0x3af   : > { %v13391_v16 = vld [vmem:[%s15555_s27 + $0x1de8] sm:$0xf0] }
 0x3b0   : > { %v14944_v18 = vld [vmem:[%s15555_s27 + $0x1fcc] sm:$0xf]  ;;  %v13394_v62 = vor.u32 %v14880_v14, %v13391_v16  ;;  %7845 = vmatpush.bf16.msra.mxu3 %v12402_v29 }
 0x3b1   : > { %v13647_v20 = vld [vmem:[%s15555_s27 + $0x1fe8] sm:$0xf0]  ;;  %7833 = vmatmul.bf16.vlgmr.msra.gmra.mxu2 %v15864_v6 }
 0x3b2   : > { %v14800_v21 = vld [vmem:[%s15555_s27 + $0x1b4c] sm:$0xf]  ;;  %v13650_v34 = vor.u32 %v14944_v18, %v13647_v20  ;;  %7877 = vmatpush.bf16.msrb.mxu2 %v13394_v62  ;;  %v7601_v20 = vadd.f32 %v7600_v13, %v16705_v58  ;;  %v7639_v13 = vpop.f32.mrf.mxu3 }
 0x3b3   : > { %v13071_v25 = vld [vmem:[%s15555_s27 + $0x1b68] sm:$0xf0]  ;;  %7846 = vmatmul.bf16.vlgmr.msra.gmra.mxu3 %v15869_v15 }
 0x3b4   : > { %v14736_v30 = vld [vmem:[%s15555_s27 + $0x194c] sm:$0xf]  ;;  %v13074_v36 = vor.u32 %v14800_v21, %v13071_v25  ;;  %7890 = vmatpush.bf16.msrb.mxu3 %v13650_v34  ;;  %v7614_v26 = vadd.f32 %v7613_v48, %v7601_v20 }
 0x3b5   : > { %v12815_v32 = vld [vmem:[%s15555_s27 + $0x1968] sm:$0xf0] }
 0x3b6   : > { %v14872_v37 = vld [vmem:[%s15555_s27 + $0x1d8c] sm:$0xf]  ;;  %v12818_v50 = vor.u32 %v14736_v30, %v12815_v32  ;;  %7866 = vmatpush.bf16.msrb.mxu1 %v13074_v36 }
 0x3b7   : > { %v13359_v38 = vld [vmem:[%s15555_s27 + $0x1da8] sm:$0xf0] }
 0x3b8   : > { %v14936_v40 = vld [vmem:[%s15555_s27 + $0x1f8c] sm:$0xf]  ;;  %v13362_v43 = vor.u32 %v14872_v37, %v13359_v38  ;;  %7853 = vmatpush.bf16.msrb.mxu0 %v12818_v50 }
 0x3b9   : > { %v13615_v44 = vld [vmem:[%s15555_s27 + $0x1fa8] sm:$0xf0] }
 0x3ba   : > { %v14792_v28 = vld [vmem:[%s15555_s27 + $0x1b0c] sm:$0xf]  ;;  %v13618_v55 = vor.u32 %v14936_v40, %v13615_v44  ;;  %7878 = vmatpush.bf16.msrb.mxu2 %v13362_v43 }
 0x3bb   : > { %v13039_v45 = vld [vmem:[%s15555_s27 + $0x1b28] sm:$0xf0] }
 0x3bc   : > { %v14728_v51 = vld [vmem:[%s15555_s27 + $0x190c] sm:$0xf]  ;;  %v13042_v24 = vor.u32 %v14792_v28, %v13039_v45  ;;  %7891 = vmatpush.bf16.msrb.mxu3 %v13618_v55  ;;  %v7615_v28 = vpop.f32.mrf.mxu1  ;;  %v7602_v55 = vpop.f32.mrf.mxu0 }
 0x3bd   : > { %v12783_v54 = vld [vmem:[%s15555_s27 + $0x1928] sm:$0xf0]  ;;  %v10005_v28 = vld [vmem:[%s15555_s27 + $0x350] sm:$0xf] }
 0x3be   : > { %v14864_v56 = vld [vmem:[%s15555_s27 + $0x1d4c] sm:$0xf]  ;;  %v12786_v19 = vor.u32 %v14728_v51, %v12783_v54  ;;  %7867 = vmatpush.bf16.msrb.mxu1 %v13042_v24 }
 0x3bf   : > { %v13327_v57 = vld [vmem:[%s15555_s27 + $0x1d68] sm:$0xf0] }
 0x3c0   : > { %v14928_v59 = vld [vmem:[%s15555_s27 + $0x1f4c] sm:$0xf]  ;;  %v13330_v4 = vor.u32 %v14864_v56, %v13327_v57  ;;  %7854 = vmatpush.bf16.msrb.mxu0 %v12786_v19 }
 0x3c1   : > { %v13583_v60 = vld [vmem:[%s15555_s27 + $0x1f68] sm:$0xf0] }
 0x3c2   : > { %v14784_v61 = vld [vmem:[%s15555_s27 + $0x1acc] sm:$0xf]  ;;  %v13586_v7 = vor.u32 %v14928_v59, %v13583_v60  ;;  %7879 = vmatpush.bf16.msrb.mxu2 %v13330_v4  ;;  %v10069_v60 = vld [vmem:[%s15555_s27 + $0x3d0] sm:$0xf] }
 0x3c3   : > { %v13007_v1 = vld [vmem:[%s15555_s27 + $0x1ae8] sm:$0xf0] }
 0x3c4   : > { %v14720_v2 = vld [vmem:[%s15555_s27 + $0x18cc] sm:$0xf]  ;;  %v13010_v42 = vor.u32 %v14784_v61, %v13007_v1  ;;  %7892 = vmatpush.bf16.msrb.mxu3 %v13586_v7  ;;  %v14053_v61 = vld [vmem:[%s15555_s27 + $0x3ec] sm:$0xf0] }
 0x3c5   : > { %v12751_v5 = vld [vmem:[%s15555_s27 + $0x18e8] sm:$0xf0] }
 0x3c6   : > { %v14856_v9 = vld [vmem:[%s15555_s27 + $0x1d0c] sm:$0xf]  ;;  %v12754_v21 = vor.u32 %v14720_v2, %v12751_v5  ;;  %7868 = vmatpush.bf16.msrb.mxu1 %v13010_v42  ;;  %v9813_v2 = vld [vmem:[%s15555_s27 + $0x1d0] sm:$0xf]  ;;  %v7626_v5 = vpop.f32.mrf.mxu2 }
 0x3c7   : > { %v13295_v41 = vld [vmem:[%s15555_s27 + $0x1d28] sm:$0xf0]  ;;  %v13989_v42 = vld [vmem:[%s15555_s27 + $0x1ec] sm:$0xf0] }
 0x3c8   : > { %v14920_v10 = vld [vmem:[%s15555_s27 + $0x1f0c] sm:$0xf]  ;;  %v13298_v25 = vor.u32 %v14856_v9, %v13295_v41  ;;  %7855 = vmatpush.bf16.msrb.mxu0 %v12754_v21  ;;  %v10037_v21 = vld [vmem:[%s15555_s27 + $0x390] sm:$0xf] }
 0x3c9   : > { %v13551_v14 = vld [vmem:[%s15555_s27 + $0x1f28] sm:$0xf0] }
 0x3ca   : > { %v14776_v16 = vld [vmem:[%s15555_s27 + $0x1a8c] sm:$0xf]  ;;  %v13554_v29 = vor.u32 %v14920_v10, %v13551_v14  ;;  %7880 = vmatpush.bf16.msrb.mxu2 %v13298_v25  ;;  %v7627_v10 = vadd.f32 %v7626_v5, %v7614_v26  ;;  %v10070_v14 = vor.u32 %v14053_v61, %v10069_v60  ;;  %v14045_v25 = vld [vmem:[%s15555_s27 + $0x3ac] sm:$0xf0] }
 0x3cb   : > { %v12975_v18 = vld [vmem:[%s15555_s27 + $0x1aa8] sm:$0xf0]  ;;  %v9781_v26 = vld [vmem:[%s15555_s27 + $0x190] sm:$0xf] }
 0x3cc   : > { %v14712_v23 = vld [vmem:[%s15555_s27 + $0x188c] sm:$0xf]  ;;  %v12978_v62 = vor.u32 %v14776_v16, %v12975_v18  ;;  %7893 = vmatpush.bf16.msrb.mxu3 %v13554_v29  ;;  %v10293_v61 = vld [vmem:[%s15555_s27 + $0x590] sm:$0xf] }
 0x3cd   : > { %v12719_v8 = vld [vmem:[%s15555_s27 + $0x18a8] sm:$0xf0]  ;;  %v14029_v5 = vld [vmem:[%s15555_s27 + $0x32c] sm:$0xf0] }
 0x3ce   : > { %v14848_v30 = vld [vmem:[%s15555_s27 + $0x1ccc] sm:$0xf]  ;;  %v12722_v37 = vor.u32 %v14712_v23, %v12719_v8  ;;  %7869 = vmatpush.bf16.msrb.mxu1 %v12978_v62  ;;  %v16776_v23 = vadd.f32 %v7639_v13, %v7627_v10  ;;  %v9814_v8 = vor.u32 %v13989_v42, %v9813_v2  ;;  %v13981_v62 = vld [vmem:[%s15555_s27 + $0x1ac] sm:$0xf0] }
 0x3cf   : > { %v13263_v32 = vld [vmem:[%s15555_s27 + $0x1ce8] sm:$0xf0]  ;;  %v9973_v2 = vld [vmem:[%s15555_s27 + $0x310] sm:$0xf] }
 0x3d0   : > { %v14912_v33 = vld [vmem:[%s15555_s27 + $0x1ecc] sm:$0xf]  ;;  %v13266_v38 = vor.u32 %v14848_v30, %v13263_v32  ;;  %7856 = vmatpush.bf16.msrb.mxu0 %v12722_v37  ;;  %v10325_v37 = vld [vmem:[%s15555_s27 + $0x5d0] sm:$0xf]  ;;  %v9974_v10 = vor.u32 %v14029_v5, %v9973_v2 }
 0x3d1   : > { %v13519_v58 = vld [vmem:[%s15555_s27 + $0x1ee8] sm:$0xf0]  ;;  %v9717_v42 = vld [vmem:[%s15555_s27 + $0x110] sm:$0xf] }
 0x3d2   : > { %v14768_v34 = vld [vmem:[%s15555_s27 + $0x1a4c] sm:$0xf]  ;;  %v13522_v45 = vor.u32 %v14912_v33, %v13519_v58  ;;  %7881 = vmatpush.bf16.msrb.mxu2 %v13266_v38  ;;  %v14117_v38 = vld [vmem:[%s15555_s27 + $0x5ec] sm:$0xf0] }
 0x3d3   : > { %v12943_v36 = vld [vmem:[%s15555_s27 + $0x1a68] sm:$0xf0]  ;;  %v10326_v55 = vor.u32 %v14117_v38, %v10325_v37  ;;  %v10261_v13 = vld [vmem:[%s15555_s27 + $0x550] sm:$0xf] }
 0x3d4   : > { %v14704_v40 = vld [vmem:[%s15555_s27 + $0x184c] sm:$0xf]  ;;  %v12946_v50 = vor.u32 %v14768_v34, %v12943_v36  ;;  %7894 = vmatpush.bf16.msrb.mxu3 %v13522_v45  ;;  %v10038_v36 = vor.u32 %v14045_v25, %v10037_v21  ;;  %v14037_v45 = vld [vmem:[%s15555_s27 + $0x36c] sm:$0xf0] }
 0x3d5   : > { %v12687_v44 = vld [vmem:[%s15555_s27 + $0x1868] sm:$0xf0]  ;;  %v10006_v60 = vor.u32 %v14037_v45, %v10005_v28  ;;  %v14021_v21 = vld [vmem:[%s15555_s27 + $0x2ec] sm:$0xf0] }
 0x3d6   : > { %v14840_v43 = vld [vmem:[%s15555_s27 + $0x1c8c] sm:$0xf]  ;;  %v12690_v59 = vor.u32 %v14704_v40, %v12687_v44  ;;  %7870 = vmatpush.bf16.msrb.mxu1 %v12946_v50  ;;  %v10581_v40 = vld [vmem:[%s15555_s27 + $0x7d0] sm:$0xf]  ;;  %v9782_v50 = vor.u32 %v13981_v62, %v9781_v26  ;;  %v7665_v62 = vpop.f32.mrf.mxu1 }
 0x3d7   : > { %v13231_v51 = vld [vmem:[%s15555_s27 + $0x1ca8] sm:$0xf0]  ;;  %v14181_v44 = vld [vmem:[%s15555_s27 + $0x7ec] sm:$0xf0] }
 0x3d8   : > { %v14904_v54 = vld [vmem:[%s15555_s27 + $0x1e8c] sm:$0xf]  ;;  %v13234_v1 = vor.u32 %v14840_v43, %v13231_v51  ;;  %7857 = vmatpush.bf16.msrb.mxu0 %v12690_v59  ;;  %v7628_v51 = vpop.f32.mrf.mxu2  ;;  %v10582_v59 = vor.u32 %v14181_v44, %v10581_v40  ;;  %v13957_v26 = vld [vmem:[%s15555_s27 + $0xec] sm:$0xf0] }
 0x3d9   : > { %v13487_v24 = vld [vmem:[%s15555_s27 + $0x1ea8] sm:$0xf0]  ;;  %v14157_v37 = vld [vmem:[%s15555_s27 + $0x72c] sm:$0xf0] }
 0x3da   : > { %v14760_v56 = vld [vmem:[%s15555_s27 + $0x1a0c] sm:$0xf]  ;;  %v13490_v48 = vor.u32 %v14904_v54, %v13487_v24  ;;  %7882 = vmatpush.bf16.msrb.mxu2 %v13234_v1  ;;  %v9749_v24 = vld [vmem:[%s15555_s27 + $0x150] sm:$0xf] }
 0x3db   : > { %v12911_v57 = vld [vmem:[%s15555_s27 + $0x1a28] sm:$0xf0]  ;;  %v14109_v1 = vld [vmem:[%s15555_s27 + $0x5ac] sm:$0xf0] }
 0x3dc   : > { %v14696_v19 = vld [vmem:[%s15555_s27 + $0x180c] sm:$0xf]  ;;  %v12914_v7 = vor.u32 %v14760_v56, %v12911_v57  ;;  %7895 = vmatpush.bf16.msrb.mxu3 %v13490_v48  ;;  %v13973_v56 = vld [vmem:[%s15555_s27 + $0x16c] sm:$0xf0]  ;;  %v7641_v57 = vpop.f32.mrf.mxu3 }
 0x3dd   : > { %v12655_v4 = vld [vmem:[%s15555_s27 + $0x1828] sm:$0xf0]  ;;  %v9750_v48 = vor.u32 %v13973_v56, %v9749_v24  ;;  %v9909_v38 = vld [vmem:[%s15555_s27 + $0x290] sm:$0xf] }
 0x3de   : > { %v14832_v9 = vld [vmem:[%s15555_s27 + $0x1c4c] sm:$0xf]  ;;  %v12658_v20 = vor.u32 %v14696_v19, %v12655_v4  ;;  %7871 = vmatpush.bf16.msrb.mxu1 %v12914_v7  ;;  %v10549_v19 = vld [vmem:[%s15555_s27 + $0x790] sm:$0xf]  ;;  %v10294_v7 = vor.u32 %v14109_v1, %v10293_v61  ;;  %v7667_v2 = vpop.f32.mrf.mxu1 }
 0x3df   : > { %v13199_v41 = vld [vmem:[%s15555_s27 + $0x1c68] sm:$0xf0]  ;;  %v14173_v4 = vld [vmem:[%s15555_s27 + $0x7ac] sm:$0xf0] }
 0x3e0   : > { %v14896_v16 = vld [vmem:[%s15555_s27 + $0x1e4c] sm:$0xf]  ;;  %v13202_v29 = vor.u32 %v14832_v9, %v13199_v41  ;;  %7858 = vmatpush.bf16.msrb.mxu0 %v12658_v20  ;;  %v13965_v9 = vld [vmem:[%s15555_s27 + $0x12c] sm:$0xf0]  ;;  %v10550_v41 = vor.u32 %v14173_v4, %v10549_v19 }
 0x3e1   : > { %v13455_v18 = vld [vmem:[%s15555_s27 + $0x1e68] sm:$0xf0]  ;;  %7872 = vmatmul.bf16.vlgmr.msrb.gmra.mxu1 %v15925_v0  ;;  %v9941_v20 = vld [vmem:[%s15555_s27 + $0x2d0] sm:$0xf]  ;;  %v9718_v25 = vor.u32 %v13965_v9, %v9717_v42 }
 0x3e2   : > { %v14824_v30 = vld [vmem:[%s15555_s27 + $0x1c0c] sm:$0xf]  ;;  %v13458_v32 = vor.u32 %v14896_v16, %v13455_v18  ;;  %7916 = vmatpush.bf16.msra.mxu1 %v10070_v14  ;;  %7883 = vmatpush.bf16.msrb.mxu2 %v13202_v29  ;;  %v14101_v14 = vld [vmem:[%s15555_s27 + $0x56c] sm:$0xf0] }
 0x3e3   : > { %v13167_v33 = vld [vmem:[%s15555_s27 + $0x1c28] sm:$0xf0]  ;;  %7859 = vmatmul.bf16.vlgmr.msrb.gmra.mxu0 %v15923_v63  ;;  %v10517_v16 = vld [vmem:[%s15555_s27 + $0x750] sm:$0xf] }
 0x3e4   : > { %v14888_v58 = vld [vmem:[%s15555_s27 + $0x1e0c] sm:$0xf]  ;;  %7903 = vmatpush.bf16.msra.mxu0 %v9814_v8  ;;  %v13170_v43 = vor.u32 %v14824_v30, %v13167_v33  ;;  %7896 = vmatpush.bf16.msrb.mxu3 %v13458_v32  ;;  %v14165_v18 = vld [vmem:[%s15555_s27 + $0x76c] sm:$0xf0]  ;;  %v10262_v8 = vor.u32 %v14101_v14, %v10261_v13  ;;  %v9942_v32 = vor.u32 %v14021_v21, %v9941_v20 }
 0x3e5   : > { %v13423_v34 = vld [vmem:[%s15555_s27 + $0x1e28] sm:$0xf0]  ;;  %v9685_v29 = vld [vmem:[%s15555_s27 + $0xd0] sm:$0xf]  ;;  %v10518_v30 = vor.u32 %v14165_v18, %v10517_v16 }
 0x3e6   : > { %v13426_v54 = vor.u32 %v14888_v58, %v13423_v34  ;;  %7917 = vmatpush.bf16.msra.mxu1 %v10038_v36  ;;  %7884 = vmatpush.bf16.msrb.mxu2 %v13170_v43  ;;  %v10229_v33 = vld [vmem:[%s15555_s27 + $0x510] sm:$0xf]  ;;  %v7652_v36 = vpop.f32.mrf.mxu0  ;;  %v9686_v28 = vor.u32 %v13957_v26, %v9685_v29  ;;  %v7678_v26 = vpop.f32.mrf.mxu2 }
 0x3e7   : > { %v14093_v58 = vld [vmem:[%s15555_s27 + $0x52c] sm:$0xf0]  ;;  %v7653_v44 = vadd.f32 %v7652_v36, %v16776_v23  ;;  %v7691_v36 = vpop.f32.mrf.mxu3 }
 0x3e8   : > { %7904 = vmatpush.bf16.msra.mxu0 %v9782_v50  ;;  %7897 = vmatpush.bf16.msrb.mxu3 %v13426_v54  ;;  %v10485_v34 = vld [vmem:[%s15555_s27 + $0x710] sm:$0xf]  ;;  %v10230_v45 = vor.u32 %v14093_v58, %v10229_v33 }
 0x3e9   : > { %7885 = vmatmul.bf16.vlgmr.msrb.gmra.mxu2 %v15943_v31  ;;  %v14013_v40 = vld [vmem:[%s15555_s27 + $0x2ac] sm:$0xf0]  ;;  %v7666_v51 = vadd.f32 %v7665_v62, %v7653_v44  ;;  %v10486_v54 = vor.u32 %v14157_v37, %v10485_v34 }
 0x3ea   : > { %7929 = vmatpush.bf16.msra.mxu2 %v10326_v55  ;;  %7918 = vmatpush.bf16.msra.mxu1 %v10006_v60  ;;  %v9653_v50 = vld [vmem:[%s15555_s27 + $0x90] sm:$0xf]  ;;  %v9910_v55 = vor.u32 %v14013_v40, %v9909_v38 }
 0x3eb   : > { %7898 = vmatmul.bf16.vlgmr.msrb.gmra.mxu3 %v15947_v35  ;;  %v13949_v43 = vld [vmem:[%s15555_s27 + $0xac] sm:$0xf0]  ;;  %v7679_v34 = vadd.f32 %v7678_v26, %v7666_v51 }
 0x3ec   : > { %7942 = vmatpush.bf16.msra.mxu3 %v10582_v59  ;;  %7905 = vmatpush.bf16.msra.mxu0 %v9750_v48  ;;  %v10197_v24 = vld [vmem:[%s15555_s27 + $0x4d0] sm:$0xf]  ;;  %v9654_v61 = vor.u32 %v13949_v43, %v9653_v50 }
 0x3ed   : > { %v14085_v56 = vld [vmem:[%s15555_s27 + $0x4ec] sm:$0xf0]  ;;  %v16847_v50 = vadd.f32 %v7691_v36, %v7679_v34 }
 0x3ee   : > { %7930 = vmatpush.bf16.msra.mxu2 %v10294_v7  ;;  %7919 = vmatpush.bf16.msra.mxu1 %v9974_v10  ;;  %v10453_v57 = vld [vmem:[%s15555_s27 + $0x6d0] sm:$0xf]  ;;  %v10198_v1 = vor.u32 %v14085_v56, %v10197_v24 }
 0x3ef   : > { %v14149_v23 = vld [vmem:[%s15555_s27 + $0x6ec] sm:$0xf0] }
 0x3f0   : > { %7943 = vmatpush.bf16.msra.mxu3 %v10550_v41  ;;  %7906 = vmatpush.bf16.msra.mxu0 %v9718_v25  ;;  %v9877_v59 = vld [vmem:[%s15555_s27 + $0x250] sm:$0xf]  ;;  %v10454_v5 = vor.u32 %v14149_v23, %v10453_v57  ;;  %v7654_v41 = vpop.f32.mrf.mxu0 }
 0x3f1   : > { %v14005_v60 = vld [vmem:[%s15555_s27 + $0x26c] sm:$0xf0] }
 0x3f2   : > { %7931 = vmatpush.bf16.msra.mxu2 %v10262_v8  ;;  %7920 = vmatpush.bf16.msra.mxu1 %v9942_v32  ;;  %v9621_v19 = vld [vmem:[%s15555_s27 + $0x50] sm:$0xf]  ;;  %v9878_v48 = vor.u32 %v14005_v60, %v9877_v59 }
 0x3f3   : > { %v13941_v4 = vld [vmem:[%s15555_s27 + $0x6c] sm:$0xf0] }
 0x3f4   : > { %7944 = vmatpush.bf16.msra.mxu3 %v10518_v30  ;;  %7907 = vmatpush.bf16.msra.mxu0 %v9686_v28  ;;  %v10165_v7 = vld [vmem:[%s15555_s27 + $0x490] sm:$0xf]  ;;  %v9622_v16 = vor.u32 %v13941_v4, %v9621_v19 }
 0x3f5   : > { %v14077_v42 = vld [vmem:[%s15555_s27 + $0x4ac] sm:$0xf0] }
 0x3f6   : > { %7932 = vmatpush.bf16.msra.mxu2 %v10230_v45  ;;  %7921 = vmatpush.bf16.msra.mxu1 %v9910_v55  ;;  %v10421_v9 = vld [vmem:[%s15555_s27 + $0x690] sm:$0xf]  ;;  %v10166_v21 = vor.u32 %v14077_v42, %v10165_v7  ;;  %v7680_v42 = vpop.f32.mrf.mxu2 }
 0x3f7   : > { %v14141_v10 = vld [vmem:[%s15555_s27 + $0x6ac] sm:$0xf0] }
 0x3f8   : > { %7945 = vmatpush.bf16.msra.mxu3 %v10486_v54  ;;  %v9845_v13 = vld [vmem:[%s15555_s27 + $0x210] sm:$0xf]  ;;  %7908 = vmatpush.bf16.msra.mxu0 %v9654_v61  ;;  %v10422_v62 = vor.u32 %v14141_v10, %v10421_v9 }
 0x3f9   : > { %v13997_v14 = vld [vmem:[%s15555_s27 + $0x22c] sm:$0xf0] }
 0x3fa   : > { %v11093_v18 = vld [vmem:[%s15555_s27 + $0xbd0] sm:$0xf]  ;;  %7933 = vmatpush.bf16.msra.mxu2 %v10198_v1  ;;  %7922 = vmatpush.bf16.msra.mxu1 %v9878_v48  ;;  %v9846_v30 = vor.u32 %v13997_v14, %v9845_v13  ;;  %v7693_v14 = vpop.f32.mrf.mxu3 }
 0x3fb   : > { %v14309_v20 = vld [vmem:[%s15555_s27 + $0xbec] sm:$0xf0] }
 0x3fc   : > { %v9589_v25 = vld [vmem:[%s15555_s27 + $0x10] sm:$0xf]  ;;  %7946 = vmatpush.bf16.msra.mxu3 %v10454_v5  ;;  %v11094_v37 = vor.u32 %v14309_v20, %v11093_v18  ;;  %7909 = vmatpush.bf16.msra.mxu0 %v9622_v16 }
 0x3fd   : > { %v13933_v8 = vld [vmem:[%s15555_s27 + $0x2c] sm:$0xf0] }
 0x3fe   : > { %v10837_v29 = vld [vmem:[%s15555_s27 + $0x9d0] sm:$0xf]  ;;  %v9590_v44 = vor.u32 %v13933_v8, %v9589_v25  ;;  %7934 = vmatpush.bf16.msra.mxu2 %v10166_v21  ;;  %7923 = vmatpush.bf16.msra.mxu1 %v9846_v30 }
 0x3ff   : > { %v14245_v32 = vld [vmem:[%s15555_s27 + $0x9ec] sm:$0xf0] }
 0x400   : > { %v10133_v33 = vld [vmem:[%s15555_s27 + $0x450] sm:$0xf]  ;;  %v10838_v43 = vor.u32 %v14245_v32, %v10837_v29  ;;  %7947 = vmatpush.bf16.msra.mxu3 %v10422_v62  ;;  %7910 = vmatpush.bf16.msra.mxu0 %v9590_v44 }
 0x401   : > { %v14069_v58 = vld [vmem:[%s15555_s27 + $0x46c] sm:$0xf0]  ;;  %7924 = vmatmul.bf16.vlgmr.msra.gmra.mxu1 %v15754_v12 }
 0x402   : > { %v10389_v38 = vld [vmem:[%s15555_s27 + $0x650] sm:$0xf]  ;;  %v10134_v54 = vor.u32 %v14069_v58, %v10133_v33  ;;  %7968 = vmatpush.bf16.msrb.mxu1 %v11094_v37 }
 0x403   : > { %v14133_v40 = vld [vmem:[%s15555_s27 + $0x66c] sm:$0xf0]  ;;  %7911 = vmatmul.bf16.vlgmr.msra.gmra.mxu0 %v15752_v11 }
 0x404   : > { %v11061_v28 = vld [vmem:[%s15555_s27 + $0xb90] sm:$0xf]  ;;  %v10390_v56 = vor.u32 %v14133_v40, %v10389_v38  ;;  %7955 = vmatpush.bf16.msrb.mxu0 %v10838_v43  ;;  %7935 = vmatpush.bf16.msra.mxu2 %v10134_v54 }
 0x405   : > { %v14301_v45 = vld [vmem:[%s15555_s27 + $0xbac] sm:$0xf0] }
 0x406   : > { %v10805_v51 = vld [vmem:[%s15555_s27 + $0x990] sm:$0xf]  ;;  %v11062_v60 = vor.u32 %v14301_v45, %v11061_v28  ;;  %7948 = vmatpush.bf16.msra.mxu3 %v10390_v56  ;;  %v15124_v45 = vld [vmem:[%s16078_s29] sm:$0xff]  ;;  %v7717_v56 = vpop.f32.mrf.mxu1 }
 0x407   : > { %v14237_v55 = vld [vmem:[%s15555_s27 + $0x9ac] sm:$0xf0]  ;;  %v1882_v43 = vperm.slane %v15124_v45, 3 }
 0x408   : > { %v10101_v24 = vld [vmem:[%s15555_s27 + $0x410] sm:$0xf]  ;;  %v10806_v48 = vor.u32 %v14237_v55, %v10805_v51  ;;  %7969 = vmatpush.bf16.msrb.mxu1 %v11062_v60 }
 0x409   : > { %v14061_v57 = vld [vmem:[%s15555_s27 + $0x42c] sm:$0xf0] }
 0x40a   : > { %v10357_v23 = vld [vmem:[%s15555_s27 + $0x610] sm:$0xf]  ;;  %v10102_v7 = vor.u32 %v14061_v57, %v10101_v24  ;;  %7956 = vmatpush.bf16.msrb.mxu0 %v10806_v48 }
 0x40b   : > { %v14125_v59 = vld [vmem:[%s15555_s27 + $0x62c] sm:$0xf0] }
 0x40c   : > { %v11349_v61 = vld [vmem:[%s15555_s27 + $0xdd0] sm:$0xf]  ;;  %v10358_v9 = vor.u32 %v14125_v59, %v10357_v23  ;;  %7936 = vmatpush.bf16.msra.mxu2 %v10102_v7 }
 0x40d   : > { %v14373_v1 = vld [vmem:[%s15555_s27 + $0xdec] sm:$0xf0] }
 0x40e   : > { %v11605_v19 = vld [vmem:[%s15555_s27 + $0xfd0] sm:$0xf]  ;;  %v11350_v41 = vor.u32 %v14373_v1, %v11349_v61  ;;  %7949 = vmatpush.bf16.msra.mxu3 %v10358_v9  ;;  %v7704_v1 = vpop.f32.mrf.mxu0 }
 0x40f   : > { %v14437_v4 = vld [vmem:[%s15555_s27 + $0xfec] sm:$0xf0]  ;;  %7937 = vmatmul.bf16.vlgmr.msra.gmra.mxu2 %v15773_v46 }
 0x410   : > { %v11029_v2 = vld [vmem:[%s15555_s27 + $0xb50] sm:$0xf]  ;;  %v11606_v16 = vor.u32 %v14437_v4, %v11605_v19  ;;  %7981 = vmatpush.bf16.msrb.mxu2 %v11350_v41 }
 0x411   : > { %v14293_v5 = vld [vmem:[%s15555_s27 + $0xb6c] sm:$0xf0]  ;;  %7950 = vmatmul.bf16.vlgmr.msra.gmra.mxu3 %v15775_v47 }
 0x412   : > { %v10773_v10 = vld [vmem:[%s15555_s27 + $0x950] sm:$0xf]  ;;  %v11030_v18 = vor.u32 %v14293_v5, %v11029_v2  ;;  %7994 = vmatpush.bf16.msrb.mxu3 %v11606_v16  ;;  %v7705_v5 = vadd.f32 %v7704_v1, %v1882_v43 }
 0x413   : > { %v14229_v13 = vld [vmem:[%s15555_s27 + $0x96c] sm:$0xf0] }
 0x414   : > { %v11317_v20 = vld [vmem:[%s15555_s27 + $0xd90] sm:$0xf]  ;;  %v10774_v62 = vor.u32 %v14229_v13, %v10773_v10  ;;  %7970 = vmatpush.bf16.msrb.mxu1 %v11030_v18  ;;  %v7718_v41 = vadd.f32 %v7717_v56, %v7705_v5  ;;  %v7730_v56 = vpop.f32.mrf.mxu2 }
 0x415   : > { %v14365_v21 = vld [vmem:[%s15555_s27 + $0xdac] sm:$0xf0] }
 0x416   : > { %v11573_v25 = vld [vmem:[%s15555_s27 + $0xf90] sm:$0xf]  ;;  %v11318_v30 = vor.u32 %v14365_v21, %v11317_v20  ;;  %7957 = vmatpush.bf16.msrb.mxu0 %v10774_v62  ;;  %v7731_v1 = vadd.f32 %v7730_v56, %v7718_v41 }
 0x417   : > { %v14429_v8 = vld [vmem:[%s15555_s27 + $0xfac] sm:$0xf0] }
 0x418   : > { %v10997_v29 = vld [vmem:[%s15555_s27 + $0xb10] sm:$0xf]  ;;  %v11574_v58 = vor.u32 %v14429_v8, %v11573_v25  ;;  %7982 = vmatpush.bf16.msrb.mxu2 %v11318_v30  ;;  %v7719_v30 = vpop.f32.mrf.mxu1 }
 0x419   : > { %v14285_v26 = vld [vmem:[%s15555_s27 + $0xb2c] sm:$0xf0] }
 0x41a   : > { %v10741_v32 = vld [vmem:[%s15555_s27 + $0x910] sm:$0xf]  ;;  %v10998_v34 = vor.u32 %v14285_v26, %v10997_v29  ;;  %7995 = vmatpush.bf16.msrb.mxu3 %v11574_v58 }
 0x41b   : > { %v14221_v33 = vld [vmem:[%s15555_s27 + $0x92c] sm:$0xf0] }
 0x41c   : > { %v11285_v36 = vld [vmem:[%s15555_s27 + $0xd50] sm:$0xf]  ;;  %v10742_v54 = vor.u32 %v14221_v33, %v10741_v32  ;;  %7971 = vmatpush.bf16.msrb.mxu1 %v10998_v34 }
 0x41d   : > { %v14357_v37 = vld [vmem:[%s15555_s27 + $0xd6c] sm:$0xf0] }
 0x41e   : > { %v11541_v38 = vld [vmem:[%s15555_s27 + $0xf50] sm:$0xf]  ;;  %v11286_v51 = vor.u32 %v14357_v37, %v11285_v36  ;;  %7958 = vmatpush.bf16.msrb.mxu0 %v10742_v54  ;;  %v7706_v37 = vpop.f32.mrf.mxu0 }
 0x41f   : > { %v14421_v40 = vld [vmem:[%s15555_s27 + $0xf6c] sm:$0xf0] }
 0x420   : > { %v10965_v44 = vld [vmem:[%s15555_s27 + $0xad0] sm:$0xf]  ;;  %v11542_v57 = vor.u32 %v14421_v40, %v11541_v38  ;;  %7983 = vmatpush.bf16.msrb.mxu2 %v11286_v51 }
 0x421   : > { %v14277_v28 = vld [vmem:[%s15555_s27 + $0xaec] sm:$0xf0] }
 0x422   : > { %v10709_v55 = vld [vmem:[%s15555_s27 + $0x8d0] sm:$0xf]  ;;  %v10966_v23 = vor.u32 %v14277_v28, %v10965_v44  ;;  %7996 = vmatpush.bf16.msrb.mxu3 %v11542_v57 }
 0x423   : > { %v14213_v24 = vld [vmem:[%s15555_s27 + $0x8ec] sm:$0xf0] }
 0x424   : > { %v11253_v59 = vld [vmem:[%s15555_s27 + $0xd10] sm:$0xf]  ;;  %v10710_v48 = vor.u32 %v14213_v24, %v10709_v55  ;;  %7972 = vmatpush.bf16.msrb.mxu1 %v10966_v23 }
 0x425   : > { %v14349_v60 = vld [vmem:[%s15555_s27 + $0xd2c] sm:$0xf0] }
 0x426   : > { %v11509_v61 = vld [vmem:[%s15555_s27 + $0xf10] sm:$0xf]  ;;  %v11254_v7 = vor.u32 %v14349_v60, %v11253_v59  ;;  %7959 = vmatpush.bf16.msrb.mxu0 %v10710_v48 }
 0x427   : > { %v14413_v19 = vld [vmem:[%s15555_s27 + $0xf2c] sm:$0xf0] }
 0x428   : > { %v10933_v4 = vld [vmem:[%s15555_s27 + $0xa90] sm:$0xf]  ;;  %v11510_v10 = vor.u32 %v14413_v19, %v11509_v61  ;;  %7984 = vmatpush.bf16.msrb.mxu2 %v11254_v7  ;;  %v7743_v19 = vpop.f32.mrf.mxu3 }
 0x429   : > { %v14269_v2 = vld [vmem:[%s15555_s27 + $0xaac] sm:$0xf0] }
 0x42a   : > { %v10677_v42 = vld [vmem:[%s15555_s27 + $0x890] sm:$0xf]  ;;  %v10934_v13 = vor.u32 %v14269_v2, %v10933_v4  ;;  %7997 = vmatpush.bf16.msrb.mxu3 %v11510_v10 }
 0x42b   : > { %v14205_v9 = vld [vmem:[%s15555_s27 + $0x8ac] sm:$0xf0] }
 0x42c   : > { %v11221_v14 = vld [vmem:[%s15555_s27 + $0xcd0] sm:$0xf]  ;;  %v10678_v8 = vor.u32 %v14205_v9, %v10677_v42  ;;  %7973 = vmatpush.bf16.msrb.mxu1 %v10934_v13  ;;  %v16918_v9 = vadd.f32 %v7743_v19, %v7731_v1 }
 0x42d   : > { %v14341_v16 = vld [vmem:[%s15555_s27 + $0xcec] sm:$0xf0] }
 0x42e   : > { %v11477_v18 = vld [vmem:[%s15555_s27 + $0xed0] sm:$0xf]  ;;  %v11222_v29 = vor.u32 %v14341_v16, %v11221_v14  ;;  %7960 = vmatpush.bf16.msrb.mxu0 %v10678_v8 }
 0x42f   : > { %v14405_v20 = vld [vmem:[%s15555_s27 + $0xeec] sm:$0xf0] }
 0x430   : > { %v10901_v21 = vld [vmem:[%s15555_s27 + $0xa50] sm:$0xf]  ;;  %v11478_v32 = vor.u32 %v14405_v20, %v11477_v18  ;;  %7985 = vmatpush.bf16.msrb.mxu2 %v11222_v29 }
 0x431   : > { %v14261_v25 = vld [vmem:[%s15555_s27 + $0xa6c] sm:$0xf0] }
 0x432   : > { %v10645_v26 = vld [vmem:[%s15555_s27 + $0x850] sm:$0xf]  ;;  %v10902_v33 = vor.u32 %v14261_v25, %v10901_v21  ;;  %7998 = vmatpush.bf16.msrb.mxu3 %v11478_v32 }
 0x433   : > { %v14197_v62 = vld [vmem:[%s15555_s27 + $0x86c] sm:$0xf0] }
 0x434   : > { %v11189_v58 = vld [vmem:[%s15555_s27 + $0xc90] sm:$0xf]  ;;  %v10646_v28 = vor.u32 %v14197_v62, %v10645_v26  ;;  %7974 = vmatpush.bf16.msrb.mxu1 %v10902_v33 }
 0x435   : > { %v14333_v34 = vld [vmem:[%s15555_s27 + $0xcac] sm:$0xf0] }
 0x436   : > { %v11445_v36 = vld [vmem:[%s15555_s27 + $0xe90] sm:$0xf]  ;;  %v11190_v54 = vor.u32 %v14333_v34, %v11189_v58  ;;  %7961 = vmatpush.bf16.msrb.mxu0 %v10646_v28  ;;  %v7745_v28 = vpop.f32.mrf.mxu3 }
 0x437   : > { %v14397_v38 = vld [vmem:[%s15555_s27 + $0xeac] sm:$0xf0] }
 0x438   : > { %v10869_v40 = vld [vmem:[%s15555_s27 + $0xa10] sm:$0xf]  ;;  %v11446_v57 = vor.u32 %v14397_v38, %v11445_v36  ;;  %7986 = vmatpush.bf16.msrb.mxu2 %v11190_v54  ;;  %v7732_v36 = vpop.f32.mrf.mxu2 }
 0x439   : > { %v14253_v44 = vld [vmem:[%s15555_s27 + $0xa2c] sm:$0xf0] }
 0x43a   : > { %v12117_v45 = vld [vmem:[%s15555_s27 + $0x13d0] sm:$0xf]  ;;  %v10870_v23 = vor.u32 %v14253_v44, %v10869_v40  ;;  %7999 = vmatpush.bf16.msrb.mxu3 %v11446_v57 }
 0x43b   : > { %v14565_v43 = vld [vmem:[%s15555_s27 + $0x13ec] sm:$0xf0] }
 0x43c   : > { %v10613_v51 = vld [vmem:[%s15555_s27 + $0x810] sm:$0xf]  ;;  %v12118_v4 = vor.u32 %v14565_v43, %v12117_v45  ;;  %7975 = vmatpush.bf16.msrb.mxu1 %v10870_v23 }
 0x43d   : > { %v14189_v55 = vld [vmem:[%s15555_s27 + $0x82c] sm:$0xf0] }
 0x43e   : > { %v11861_v24 = vld [vmem:[%s15555_s27 + $0x11d0] sm:$0xf]  ;;  %v10614_v48 = vor.u32 %v14189_v55, %v10613_v51 }
 0x43f   : > { %v14501_v59 = vld [vmem:[%s15555_s27 + $0x11ec] sm:$0xf0]  ;;  %7976 = vmatmul.bf16.vlgmr.msrb.gmra.mxu1 %v15799_v27 }
 0x440   : > { %v11157_v60 = vld [vmem:[%s15555_s27 + $0xc50] sm:$0xf]  ;;  %v11862_v10 = vor.u32 %v14501_v59, %v11861_v24  ;;  %8020 = vmatpush.bf16.msra.mxu1 %v12118_v4  ;;  %7962 = vmatpush.bf16.msrb.mxu0 %v10614_v48 }
 0x441   : > { %v14325_v61 = vld [vmem:[%s15555_s27 + $0xc6c] sm:$0xf0] }
 0x442   : > { %v11413_v2 = vld [vmem:[%s15555_s27 + $0xe50] sm:$0xf]  ;;  %v11158_v13 = vor.u32 %v14325_v61, %v11157_v60 }
 0x443   : > { %v14389_v5 = vld [vmem:[%s15555_s27 + $0xe6c] sm:$0xf0]  ;;  %7963 = vmatmul.bf16.vlgmr.msrb.gmra.mxu0 %v15795_v22 }
 0x444   : > { %v12085_v7 = vld [vmem:[%s15555_s27 + $0x1390] sm:$0xf]  ;;  %v11414_v18 = vor.u32 %v14389_v5, %v11413_v2  ;;  %8007 = vmatpush.bf16.msra.mxu0 %v11862_v10  ;;  %7987 = vmatpush.bf16.msrb.mxu2 %v11158_v13 }
 0x445   : > { %v14557_v42 = vld [vmem:[%s15555_s27 + $0x13ac] sm:$0xf0] }
 0x446   : > { %v11829_v41 = vld [vmem:[%s15555_s27 + $0x1190] sm:$0xf]  ;;  %v12086_v8 = vor.u32 %v14557_v42, %v12085_v7  ;;  %8000 = vmatpush.bf16.msrb.mxu3 %v11414_v18 }
 0x447   : > { %v14493_v14 = vld [vmem:[%s15555_s27 + $0x11ac] sm:$0xf0] }
 0x448   : > { %v11125_v16 = vld [vmem:[%s15555_s27 + $0xc10] sm:$0xf]  ;;  %v11830_v58 = vor.u32 %v14493_v14, %v11829_v41  ;;  %8021 = vmatpush.bf16.msra.mxu1 %v12086_v8 }
 0x449   : > { %v14317_v20 = vld [vmem:[%s15555_s27 + $0xc2c] sm:$0xf0] }
 0x44a   : > { %v11381_v21 = vld [vmem:[%s15555_s27 + $0xe10] sm:$0xf]  ;;  %v11126_v34 = vor.u32 %v14317_v20, %v11125_v16  ;;  %8008 = vmatpush.bf16.msra.mxu0 %v11830_v58  ;;  %v7769_v16 = vpop.f32.mrf.mxu1 }
 0x44b   : > { %v14381_v25 = vld [vmem:[%s15555_s27 + $0xe2c] sm:$0xf0] }
 0x44c   : > { %v12373_v29 = vld [vmem:[%s15555_s27 + $0x15d0] sm:$0xf]  ;;  %v11382_v37 = vor.u32 %v14381_v25, %v11381_v21  ;;  %7988 = vmatpush.bf16.msrb.mxu2 %v11126_v34 }
 0x44d   : > { %v14629_v26 = vld [vmem:[%s15555_s27 + $0x15ec] sm:$0xf0] }
 0x44e   : > { %v12629_v62 = vld [vmem:[%s15555_s27 + $0x17d0] sm:$0xf]  ;;  %v12374_v38 = vor.u32 %v14629_v26, %v12373_v29  ;;  %8001 = vmatpush.bf16.msrb.mxu3 %v11382_v37  ;;  %v7756_v29 = vpop.f32.mrf.mxu0 }
 0x44f   : > { %v14693_v30 = vld [vmem:[%s15555_s27 + $0x17ec] sm:$0xf0]  ;;  %7989 = vmatmul.bf16.vlgmr.msrb.gmra.mxu2 %v15813_v52 }
 0x450   : > { %v12053_v32 = vld [vmem:[%s15555_s27 + $0x1350] sm:$0xf]  ;;  %v12630_v45 = vor.u32 %v14693_v30, %v12629_v62  ;;  %8033 = vmatpush.bf16.msra.mxu2 %v12374_v38 }
 0x451   : > { %v14549_v33 = vld [vmem:[%s15555_s27 + $0x136c] sm:$0xf0]  ;;  %8002 = vmatmul.bf16.vlgmr.msrb.gmra.mxu3 %v15815_v53 }
 0x452   : > { %v11797_v40 = vld [vmem:[%s15555_s27 + $0x1150] sm:$0xf]  ;;  %v12054_v43 = vor.u32 %v14549_v33, %v12053_v32  ;;  %8046 = vmatpush.bf16.msra.mxu3 %v12630_v45  ;;  %v7757_v32 = vadd.f32 %v7756_v29, %v16918_v9 }
 0x453   : > { %v14485_v44 = vld [vmem:[%s15555_s27 + $0x116c] sm:$0xf0] }
 0x454   : > { %v12341_v54 = vld [vmem:[%s15555_s27 + $0x1590] sm:$0xf]  ;;  %v11798_v23 = vor.u32 %v14485_v44, %v11797_v40  ;;  %8022 = vmatpush.bf16.msra.mxu1 %v12054_v43  ;;  %v7770_v37 = vadd.f32 %v7769_v16, %v7757_v32  ;;  %v7782_v16 = vpop.f32.mrf.mxu2 }
 0x455   : > { %v14621_v51 = vld [vmem:[%s15555_s27 + $0x15ac] sm:$0xf0] }
 0x456   : > { %v12597_v55 = vld [vmem:[%s15555_s27 + $0x1790] sm:$0xf]  ;;  %v12342_v59 = vor.u32 %v14621_v51, %v12341_v54  ;;  %8009 = vmatpush.bf16.msra.mxu0 %v11798_v23  ;;  %v7783_v29 = vadd.f32 %v7782_v16, %v7770_v37 }
 0x457   : > { %v14685_v24 = vld [vmem:[%s15555_s27 + $0x17ac] sm:$0xf0] }
 0x458   : > { %v12021_v56 = vld [vmem:[%s15555_s27 + $0x1310] sm:$0xf]  ;;  %v12598_v1 = vor.u32 %v14685_v24, %v12597_v55  ;;  %8034 = vmatpush.bf16.msra.mxu2 %v12342_v59 }
 0x459   : > { %v14541_v57 = vld [vmem:[%s15555_s27 + $0x132c] sm:$0xf0] }
 0x45a   : > { %v11765_v60 = vld [vmem:[%s15555_s27 + $0x1110] sm:$0xf]  ;;  %v12022_v19 = vor.u32 %v14541_v57, %v12021_v56  ;;  %8047 = vmatpush.bf16.msra.mxu3 %v12598_v1  ;;  %v7771_v57 = vpop.f32.mrf.mxu1 }
 0x45b   : > { %v14477_v61 = vld [vmem:[%s15555_s27 + $0x112c] sm:$0xf0] }
 0x45c   : > { %v12309_v4 = vld [vmem:[%s15555_s27 + $0x1550] sm:$0xf]  ;;  %v11766_v10 = vor.u32 %v14477_v61, %v11765_v60  ;;  %8023 = vmatpush.bf16.msra.mxu1 %v12022_v19  ;;  %v7758_v19 = vpop.f32.mrf.mxu0 }
 0x45d   : > { %v14613_v2 = vld [vmem:[%s15555_s27 + $0x156c] sm:$0xf0] }
 0x45e   : > { %v12565_v5 = vld [vmem:[%s15555_s27 + $0x1750] sm:$0xf]  ;;  %v12310_v13 = vor.u32 %v14613_v2, %v12309_v4  ;;  %8010 = vmatpush.bf16.msra.mxu0 %v11766_v10 }
 0x45f   : > { %v14677_v48 = vld [vmem:[%s15555_s27 + $0x176c] sm:$0xf0] }
 0x460   : > { %v11989_v7 = vld [vmem:[%s15555_s27 + $0x12d0] sm:$0xf]  ;;  %v12566_v18 = vor.u32 %v14677_v48, %v12565_v5  ;;  %8035 = vmatpush.bf16.msra.mxu2 %v12310_v13 }
 0x461   : > { %v14533_v42 = vld [vmem:[%s15555_s27 + $0x12ec] sm:$0xf0] }
 0x462   : > { %v11733_v41 = vld [vmem:[%s15555_s27 + $0x10d0] sm:$0xf]  ;;  %v11990_v20 = vor.u32 %v14533_v42, %v11989_v7  ;;  %8048 = vmatpush.bf16.msra.mxu3 %v12566_v18 }
 0x463   : > { %v14469_v14 = vld [vmem:[%s15555_s27 + $0x10ec] sm:$0xf0] }
 0x464   : > { %v12277_v21 = vld [vmem:[%s15555_s27 + $0x1510] sm:$0xf]  ;;  %v11734_v33 = vor.u32 %v14469_v14, %v11733_v41  ;;  %8024 = vmatpush.bf16.msra.mxu1 %v11990_v20 }
 0x465   : > { %v14605_v25 = vld [vmem:[%s15555_s27 + $0x152c] sm:$0xf0] }
 0x466   : > { %v12533_v8 = vld [vmem:[%s15555_s27 + $0x1710] sm:$0xf]  ;;  %v12278_v58 = vor.u32 %v14605_v25, %v12277_v21  ;;  %8011 = vmatpush.bf16.msra.mxu0 %v11734_v33 }
 0x467   : > { %v14669_v26 = vld [vmem:[%s15555_s27 + $0x172c] sm:$0xf0] }
 0x468   : > { %v11957_v62 = vld [vmem:[%s15555_s27 + $0x1290] sm:$0xf]  ;;  %v12534_v38 = vor.u32 %v14669_v26, %v12533_v8  ;;  %8036 = vmatpush.bf16.msra.mxu2 %v12278_v58  ;;  %v7795_v26 = vpop.f32.mrf.mxu3 }
 0x469   : > { %v14525_v30 = vld [vmem:[%s15555_s27 + $0x12ac] sm:$0xf0] }
 0x46a   : > { %v11701_v34 = vld [vmem:[%s15555_s27 + $0x1090] sm:$0xf]  ;;  %v11958_v40 = vor.u32 %v14525_v30, %v11957_v62  ;;  %8049 = vmatpush.bf16.msra.mxu3 %v12534_v38 }
 0x46b   : > { %v14461_v36 = vld [vmem:[%s15555_s27 + $0x10ac] sm:$0xf0] }
 0x46c   : > { %v12245_v44 = vld [vmem:[%s15555_s27 + $0x14d0] sm:$0xf]  ;;  %v11702_v51 = vor.u32 %v14461_v36, %v11701_v34  ;;  %8025 = vmatpush.bf16.msra.mxu1 %v11958_v40  ;;  %v16989_v36 = vadd.f32 %v7795_v26, %v7783_v29 }
 0x46d   : > { %v14597_v28 = vld [vmem:[%s15555_s27 + $0x14ec] sm:$0xf0] }
 0x46e   : > { %v12501_v45 = vld [vmem:[%s15555_s27 + $0x16d0] sm:$0xf]  ;;  %v12246_v55 = vor.u32 %v14597_v28, %v12245_v44  ;;  %8012 = vmatpush.bf16.msra.mxu0 %v11702_v51 }
 0x46f   : > { %v14661_v9 = vld [vmem:[%s15555_s27 + $0x16ec] sm:$0xf0] }
 0x470   : > { %v11925_v43 = vld [vmem:[%s15555_s27 + $0x1250] sm:$0xf]  ;;  %v12502_v23 = vor.u32 %v14661_v9, %v12501_v45  ;;  %8037 = vmatpush.bf16.msra.mxu2 %v12246_v55 }
 0x471   : > { %v14517_v54 = vld [vmem:[%s15555_s27 + $0x126c] sm:$0xf0] }
 0x472   : > { %v11669_v24 = vld [vmem:[%s15555_s27 + $0x1050] sm:$0xf]  ;;  %v11926_v59 = vor.u32 %v14517_v54, %v11925_v43  ;;  %8050 = vmatpush.bf16.msra.mxu3 %v12502_v23 }
 0x473   : > { %v14453_v56 = vld [vmem:[%s15555_s27 + $0x106c] sm:$0xf0] }
 0x474   : > { %v12213_v60 = vld [vmem:[%s15555_s27 + $0x1490] sm:$0xf]  ;;  %v11670_v48 = vor.u32 %v14453_v56, %v11669_v24  ;;  %8026 = vmatpush.bf16.msra.mxu1 %v11926_v59 }
 0x475   : > { %v14589_v61 = vld [vmem:[%s15555_s27 + $0x14ac] sm:$0xf0] }
 0x476   : > { %v12469_v1 = vld [vmem:[%s15555_s27 + $0x1690] sm:$0xf]  ;;  %v12214_v10 = vor.u32 %v14589_v61, %v12213_v60  ;;  %8013 = vmatpush.bf16.msra.mxu0 %v11670_v48  ;;  %v7797_v48 = vpop.f32.mrf.mxu3 }
 0x477   : > { %v14653_v4 = vld [vmem:[%s15555_s27 + $0x16ac] sm:$0xf0] }
 0x478   : > { %v11893_v2 = vld [vmem:[%s15555_s27 + $0x1210] sm:$0xf]  ;;  %v12470_v18 = vor.u32 %v14653_v4, %v12469_v1  ;;  %8038 = vmatpush.bf16.msra.mxu2 %v12214_v10  ;;  %v7784_v1 = vpop.f32.mrf.mxu2 }
 0x479   : > { %v14509_v5 = vld [vmem:[%s15555_s27 + $0x122c] sm:$0xf0] }
 0x47a   : > { %v13141_v7 = vld [vmem:[%s15555_s27 + $0x1bd0] sm:$0xf]  ;;  %v11894_v20 = vor.u32 %v14509_v5, %v11893_v2  ;;  %8051 = vmatpush.bf16.msra.mxu3 %v12470_v18 }
 0x47b   : > { %v14821_v42 = vld [vmem:[%s15555_s27 + $0x1bec] sm:$0xf0] }
 0x47c   : > { %v11637_v13 = vld [vmem:[%s15555_s27 + $0x1010] sm:$0xf]  ;;  %v13142_v62 = vor.u32 %v14821_v42, %v13141_v7  ;;  %8027 = vmatpush.bf16.msra.mxu1 %v11894_v20 }
 0x47d   : > { %v14445_v41 = vld [vmem:[%s15555_s27 + $0x102c] sm:$0xf0] }
 0x47e   : > { %v12885_v14 = vld [vmem:[%s15555_s27 + $0x19d0] sm:$0xf]  ;;  %v11638_v33 = vor.u32 %v14445_v41, %v11637_v13 }
 0x47f   : > { %v14757_v21 = vld [vmem:[%s15555_s27 + $0x19ec] sm:$0xf0]  ;;  %8028 = vmatmul.bf16.vlgmr.msra.gmra.mxu1 %v15851_v49 }
 0x480   : > { %v12181_v25 = vld [vmem:[%s15555_s27 + $0x1450] sm:$0xf]  ;;  %v12886_v38 = vor.u32 %v14757_v21, %v12885_v14  ;;  %8072 = vmatpush.bf16.msrb.mxu1 %v13142_v62  ;;  %8014 = vmatpush.bf16.msra.mxu0 %v11638_v33 }
 0x481   : > { %v14581_v8 = vld [vmem:[%s15555_s27 + $0x146c] sm:$0xf0] }
 0x482   : > { %v12437_v30 = vld [vmem:[%s15555_s27 + $0x1650] sm:$0xf]  ;;  %v12182_v40 = vor.u32 %v14581_v8, %v12181_v25 }
 0x483   : > { %v14645_v32 = vld [vmem:[%s15555_s27 + $0x166c] sm:$0xf0]  ;;  %8015 = vmatmul.bf16.vlgmr.msra.gmra.mxu0 %v15843_v39 }
 0x484   : > { %v13109_v58 = vld [vmem:[%s15555_s27 + $0x1b90] sm:$0xf]  ;;  %v12438_v45 = vor.u32 %v14645_v32, %v12437_v30  ;;  %8059 = vmatpush.bf16.msrb.mxu0 %v12886_v38  ;;  %8039 = vmatpush.bf16.msra.mxu2 %v12182_v40 }
 0x485   : > { %v14813_v34 = vld [vmem:[%s15555_s27 + $0x1bac] sm:$0xf0] }
 0x486   : > { %v12853_v37 = vld [vmem:[%s15555_s27 + $0x1990] sm:$0xf]  ;;  %v13110_v51 = vor.u32 %v14813_v34, %v13109_v58  ;;  %8052 = vmatpush.bf16.msra.mxu3 %v12438_v45 }
 0x487   : > { %v14749_v44 = vld [vmem:[%s15555_s27 + $0x19ac] sm:$0xf0] }
 0x488   : > { %v12149_v28 = vld [vmem:[%s15555_s27 + $0x1410] sm:$0xf]  ;;  %v12854_v60 = vor.u32 %v14749_v44, %v12853_v37  ;;  %8073 = vmatpush.bf16.msrb.mxu1 %v13110_v51 }
 0x489   : > { %v14573_v9 = vld [vmem:[%s15555_s27 + $0x142c] sm:$0xf0] }
 0x48a   : > { %v12405_v43 = vld [vmem:[%s15555_s27 + $0x1610] sm:$0xf]  ;;  %v12150_v61 = vor.u32 %v14573_v9, %v12149_v28  ;;  %8060 = vmatpush.bf16.msrb.mxu0 %v12854_v60  ;;  %v7821_v28 = vpop.f32.mrf.mxu1 }
 0x48b   : > { %v14637_v54 = vld [vmem:[%s15555_s27 + $0x162c] sm:$0xf0] }
 0x48c   : > { %v13397_v55 = vld [vmem:[%s15555_s27 + $0x1dd0] sm:$0xf]  ;;  %v12406_v19 = vor.u32 %v14637_v54, %v12405_v43  ;;  %8040 = vmatpush.bf16.msra.mxu2 %v12150_v61 }
 0x48d   : > { %v14885_v24 = vld [vmem:[%s15555_s27 + $0x1dec] sm:$0xf0] }
 0x48e   : > { %v13653_v56 = vld [vmem:[%s15555_s27 + $0x1fd0] sm:$0xf]  ;;  %v13398_v4 = vor.u32 %v14885_v24, %v13397_v55  ;;  %8053 = vmatpush.bf16.msra.mxu3 %v12406_v19  ;;  %v7808_v55 = vpop.f32.mrf.mxu0 }
 0x48f   : > { %v14949_v57 = vld [vmem:[%s15555_s27 + $0x1fec] sm:$0xf0]  ;;  %8041 = vmatmul.bf16.vlgmr.msra.gmra.mxu2 %v15864_v6 }
 0x490   : > { %v13077_v23 = vld [vmem:[%s15555_s27 + $0x1b50] sm:$0xf]  ;;  %v13654_v7 = vor.u32 %v14949_v57, %v13653_v56  ;;  %8085 = vmatpush.bf16.msrb.mxu2 %v13398_v4 }
 0x491   : > { %v14805_v59 = vld [vmem:[%s15555_s27 + $0x1b6c] sm:$0xf0]  ;;  %8054 = vmatmul.bf16.vlgmr.msra.gmra.mxu3 %v15869_v15 }
 0x492   : > { %v12821_v2 = vld [vmem:[%s15555_s27 + $0x1950] sm:$0xf]  ;;  %v13078_v42 = vor.u32 %v14805_v59, %v13077_v23  ;;  %8098 = vmatpush.bf16.msrb.mxu3 %v13654_v7  ;;  %v7809_v23 = vadd.f32 %v7808_v55, %v16989_v36 }
 0x493   : > { %v14741_v5 = vld [vmem:[%s15555_s27 + $0x196c] sm:$0xf0] }
 0x494   : > { %v13365_v10 = vld [vmem:[%s15555_s27 + $0x1d90] sm:$0xf]  ;;  %v12822_v20 = vor.u32 %v14741_v5, %v12821_v2  ;;  %8074 = vmatpush.bf16.msrb.mxu1 %v13078_v42  ;;  %v7822_v19 = vadd.f32 %v7821_v28, %v7809_v23  ;;  %v7834_v28 = vpop.f32.mrf.mxu2 }
 0x495   : > { %v14877_v13 = vld [vmem:[%s15555_s27 + $0x1dac] sm:$0xf0] }
 0x496   : > { %v13621_v41 = vld [vmem:[%s15555_s27 + $0x1f90] sm:$0xf]  ;;  %v13366_v21 = vor.u32 %v14877_v13, %v13365_v10  ;;  %8061 = vmatpush.bf16.msrb.mxu0 %v12822_v20  ;;  %v7835_v55 = vadd.f32 %v7834_v28, %v7822_v19  ;;  %v13977_v19 = vld [vmem:[%s15555_s27 + $0x194] sm:$0xf] }
 0x497   : > { %v14941_v14 = vld [vmem:[%s15555_s27 + $0x1fac] sm:$0xf0]  ;;  %v14025_v28 = vld [vmem:[%s15555_s27 + $0x314] sm:$0xf] }
 0x498   : > { %v13045_v16 = vld [vmem:[%s15555_s27 + $0x1b10] sm:$0xf]  ;;  %v13622_v29 = vor.u32 %v14941_v14, %v13621_v41  ;;  %8086 = vmatpush.bf16.msrb.mxu2 %v13366_v21 }
 0x499   : > { %v14797_v18 = vld [vmem:[%s15555_s27 + $0x1b2c] sm:$0xf0] }
 0x49a   : > { %v12789_v25 = vld [vmem:[%s15555_s27 + $0x1910] sm:$0xf]  ;;  %v13046_v26 = vor.u32 %v14797_v18, %v13045_v16  ;;  %8099 = vmatpush.bf16.msrb.mxu3 %v13622_v29  ;;  %v7823_v18 = vpop.f32.mrf.mxu1 }
 0x49b   : > { %v14733_v8 = vld [vmem:[%s15555_s27 + $0x192c] sm:$0xf0]  ;;  %v10583_v18 = vld [vmem:[%s15555_s27 + $0x7f0] sm:$0xf0] }
 0x49c   : > { %v13333_v62 = vld [vmem:[%s15555_s27 + $0x1d50] sm:$0xf]  ;;  %v12790_v38 = vor.u32 %v14733_v8, %v12789_v25  ;;  %8075 = vmatpush.bf16.msrb.mxu1 %v13046_v26  ;;  %v7810_v26 = vpop.f32.mrf.mxu0 }
 0x49d   : > { %v14869_v30 = vld [vmem:[%s15555_s27 + $0x1d6c] sm:$0xf0] }
 0x49e   : > { %v13589_v32 = vld [vmem:[%s15555_s27 + $0x1f50] sm:$0xf]  ;;  %v13334_v40 = vor.u32 %v14869_v30, %v13333_v62  ;;  %8062 = vmatpush.bf16.msrb.mxu0 %v12790_v38 }
 0x49f   : > { %v14933_v33 = vld [vmem:[%s15555_s27 + $0x1f6c] sm:$0xf0] }
 0x4a0   : > { %v13013_v58 = vld [vmem:[%s15555_s27 + $0x1ad0] sm:$0xf]  ;;  %v13590_v45 = vor.u32 %v14933_v33, %v13589_v32  ;;  %8087 = vmatpush.bf16.msrb.mxu2 %v13334_v40 }
 0x4a1   : > { %v14789_v34 = vld [vmem:[%s15555_s27 + $0x1aec] sm:$0xf0] }
 0x4a2   : > { %v12757_v37 = vld [vmem:[%s15555_s27 + $0x18d0] sm:$0xf]  ;;  %v13014_v9 = vor.u32 %v14789_v34, %v13013_v58  ;;  %8100 = vmatpush.bf16.msrb.mxu3 %v13590_v45  ;;  %v14049_v58 = vld [vmem:[%s15555_s27 + $0x3d4] sm:$0xf] }
 0x4a3   : > { %v14725_v44 = vld [vmem:[%s15555_s27 + $0x18ec] sm:$0xf0]  ;;  %v10071_v34 = vld [vmem:[%s15555_s27 + $0x3f0] sm:$0xf0] }
 0x4a4   : > { %v13301_v43 = vld [vmem:[%s15555_s27 + $0x1d10] sm:$0xf]  ;;  %v12758_v59 = vor.u32 %v14725_v44, %v12757_v37  ;;  %8076 = vmatpush.bf16.msrb.mxu1 %v13014_v9  ;;  %v13985_v44 = vld [vmem:[%s15555_s27 + $0x1d4] sm:$0xf] }
 0x4a5   : > { %v14861_v54 = vld [vmem:[%s15555_s27 + $0x1d2c] sm:$0xf0] }
 0x4a6   : > { %v13557_v51 = vld [vmem:[%s15555_s27 + $0x1f10] sm:$0xf]  ;;  %v13302_v60 = vor.u32 %v14861_v54, %v13301_v43  ;;  %8063 = vmatpush.bf16.msrb.mxu0 %v12758_v59  ;;  %v9815_v43 = vld [vmem:[%s15555_s27 + $0x1f0] sm:$0xf0] }
 0x4a7   : > { %v14925_v24 = vld [vmem:[%s15555_s27 + $0x1f2c] sm:$0xf0] }
 0x4a8   : > { %v12981_v56 = vld [vmem:[%s15555_s27 + $0x1a90] sm:$0xf]  ;;  %v13558_v4 = vor.u32 %v14925_v24, %v13557_v51  ;;  %8088 = vmatpush.bf16.msrb.mxu2 %v13302_v60  ;;  %v7847_v24 = vpop.f32.mrf.mxu3  ;;  %v14041_v60 = vld [vmem:[%s15555_s27 + $0x394] sm:$0xf] }
 0x4a9   : > { %v14781_v57 = vld [vmem:[%s15555_s27 + $0x1aac] sm:$0xf0] }
 0x4aa   : > { %v12725_v61 = vld [vmem:[%s15555_s27 + $0x1890] sm:$0xf]  ;;  %v12982_v2 = vor.u32 %v14781_v57, %v12981_v56  ;;  %8101 = vmatpush.bf16.msrb.mxu3 %v13558_v4  ;;  %v10074_v56 = vor.u32 %v14049_v58, %v10071_v34  ;;  %v9818_v4 = vor.u32 %v13985_v44, %v9815_v43  ;;  %v10551_v44 = vld [vmem:[%s15555_s27 + $0x7b0] sm:$0xf0] }
 0x4ab   : > { %v14717_v1 = vld [vmem:[%s15555_s27 + $0x18ac] sm:$0xf0] }
 0x4ac   : > { %v13269_v5 = vld [vmem:[%s15555_s27 + $0x1cd0] sm:$0xf]  ;;  %v12726_v13 = vor.u32 %v14717_v1, %v12725_v61  ;;  %8077 = vmatpush.bf16.msrb.mxu1 %v12982_v2  ;;  %v10039_v61 = vld [vmem:[%s15555_s27 + $0x3b0] sm:$0xf0]  ;;  %v17060_v1 = vadd.f32 %v7847_v24, %v7835_v55 }
 0x4ad   : > { %v14853_v48 = vld [vmem:[%s15555_s27 + $0x1cec] sm:$0xf0] }
 0x4ae   : > { %v13525_v7 = vld [vmem:[%s15555_s27 + $0x1ed0] sm:$0xf]  ;;  %v13270_v41 = vor.u32 %v14853_v48, %v13269_v5  ;;  %8064 = vmatpush.bf16.msrb.mxu0 %v12726_v13  ;;  %v9783_v5 = vld [vmem:[%s15555_s27 + $0x1b0] sm:$0xf0]  ;;  %v10042_v13 = vor.u32 %v14041_v60, %v10039_v61 }
 0x4af   : > { %v14917_v36 = vld [vmem:[%s15555_s27 + $0x1eec] sm:$0xf0]  ;;  %v14017_v60 = vld [vmem:[%s15555_s27 + $0x2d4] sm:$0xf] }
 0x4b0   : > { %v12949_v42 = vld [vmem:[%s15555_s27 + $0x1a50] sm:$0xf]  ;;  %v13526_v20 = vor.u32 %v14917_v36, %v13525_v7  ;;  %8089 = vmatpush.bf16.msrb.mxu2 %v13270_v41  ;;  %v14113_v41 = vld [vmem:[%s15555_s27 + $0x5d4] sm:$0xf] }
 0x4b1   : > { %v14773_v10 = vld [vmem:[%s15555_s27 + $0x1a6c] sm:$0xf0]  ;;  %v9943_v61 = vld [vmem:[%s15555_s27 + $0x2f0] sm:$0xf0] }
 0x4b2   : > { %v12693_v14 = vld [vmem:[%s15555_s27 + $0x1850] sm:$0xf]  ;;  %v12950_v21 = vor.u32 %v14773_v10, %v12949_v42  ;;  %8102 = vmatpush.bf16.msrb.mxu3 %v13526_v20  ;;  %v14033_v20 = vld [vmem:[%s15555_s27 + $0x354] sm:$0xf] }
 0x4b3   : > { %v14709_v16 = vld [vmem:[%s15555_s27 + $0x186c] sm:$0xf0] }
 0x4b4   : > { %v13237_v25 = vld [vmem:[%s15555_s27 + $0x1c90] sm:$0xf]  ;;  %v12694_v33 = vor.u32 %v14709_v16, %v12693_v14  ;;  %8078 = vmatpush.bf16.msrb.mxu1 %v12950_v21  ;;  %v10327_v14 = vld [vmem:[%s15555_s27 + $0x5f0] sm:$0xf0] }
 0x4b5   : > { %v14845_v8 = vld [vmem:[%s15555_s27 + $0x1cac] sm:$0xf0]  ;;  %v14177_v16 = vld [vmem:[%s15555_s27 + $0x7d4] sm:$0xf] }
 0x4b6   : > { %v13493_v29 = vld [vmem:[%s15555_s27 + $0x1e90] sm:$0xf]  ;;  %v13238_v38 = vor.u32 %v14845_v8, %v13237_v25  ;;  %8065 = vmatpush.bf16.msrb.mxu0 %v12694_v33  ;;  %v10007_v21 = vld [vmem:[%s15555_s27 + $0x370] sm:$0xf0]  ;;  %v9786_v25 = vor.u32 %v13977_v19, %v9783_v5  ;;  %v7849_v33 = vpop.f32.mrf.mxu3  ;;  %v10586_v58 = vor.u32 %v14177_v16, %v10583_v18 }
 0x4b7   : > { %v14909_v62 = vld [vmem:[%s15555_s27 + $0x1eac] sm:$0xf0]  ;;  %v10010_v34 = vor.u32 %v14033_v20, %v10007_v21  ;;  %v13953_v19 = vld [vmem:[%s15555_s27 + $0xd4] sm:$0xf] }
 0x4b8   : > { %v12917_v30 = vld [vmem:[%s15555_s27 + $0x1a10] sm:$0xf]  ;;  %v13494_v45 = vor.u32 %v14909_v62, %v13493_v29  ;;  %8090 = vmatpush.bf16.msrb.mxu2 %v13238_v38  ;;  %v7836_v29 = vpop.f32.mrf.mxu2  ;;  %v10330_v62 = vor.u32 %v14113_v41, %v10327_v14  ;;  %v14105_v38 = vld [vmem:[%s15555_s27 + $0x594] sm:$0xf]  ;;  %v7860_v41 = vpop.f32.mrf.mxu0 }
 0x4b9   : > { %v14765_v32 = vld [vmem:[%s15555_s27 + $0x1a2c] sm:$0xf0]  ;;  %v9687_v5 = vld [vmem:[%s15555_s27 + $0xf0] sm:$0xf0]  ;;  %v7861_v20 = vadd.f32 %v7860_v41, %v17060_v1 }
 0x4ba   : > { %v12661_v40 = vld [vmem:[%s15555_s27 + $0x1810] sm:$0xf]  ;;  %v12918_v9 = vor.u32 %v14765_v32, %v12917_v30  ;;  %8103 = vmatpush.bf16.msrb.mxu3 %v13494_v45  ;;  %v13969_v30 = vld [vmem:[%s15555_s27 + $0x154] sm:$0xf]  ;;  %v9690_v21 = vor.u32 %v13953_v19, %v9687_v5 }
 0x4bb   : > { %v14701_v37 = vld [vmem:[%s15555_s27 + $0x182c] sm:$0xf0]  ;;  %v9751_v32 = vld [vmem:[%s15555_s27 + $0x170] sm:$0xf0] }
 0x4bc   : > { %v13205_v54 = vld [vmem:[%s15555_s27 + $0x1c50] sm:$0xf]  ;;  %v12662_v59 = vor.u32 %v14701_v37, %v12661_v40  ;;  %8079 = vmatpush.bf16.msrb.mxu1 %v12918_v9  ;;  %v10295_v40 = vld [vmem:[%s15555_s27 + $0x5b0] sm:$0xf0]  ;;  %v9754_v9 = vor.u32 %v13969_v30, %v9751_v32 }
 0x4bd   : > { %v14837_v51 = vld [vmem:[%s15555_s27 + $0x1c6c] sm:$0xf0]  ;;  %v14169_v37 = vld [vmem:[%s15555_s27 + $0x794] sm:$0xf]  ;;  %v10298_v43 = vor.u32 %v14105_v38, %v10295_v40 }
 0x4be   : > { %v13461_v57 = vld [vmem:[%s15555_s27 + $0x1e50] sm:$0xf]  ;;  %v13206_v2 = vor.u32 %v14837_v51, %v13205_v54  ;;  %8066 = vmatpush.bf16.msrb.mxu0 %v12662_v59  ;;  %v9975_v45 = vld [vmem:[%s15555_s27 + $0x330] sm:$0xf0]  ;;  %v10554_v55 = vor.u32 %v14169_v37, %v10551_v44 }
 0x4bf   : > { %v14901_v23 = vld [vmem:[%s15555_s27 + $0x1e6c] sm:$0xf0]  ;;  %8080 = vmatmul.bf16.vlgmr.msrb.gmra.mxu1 %v15925_v0  ;;  %v13961_v54 = vld [vmem:[%s15555_s27 + $0x114] sm:$0xf]  ;;  %v9978_v24 = vor.u32 %v14025_v28, %v9975_v45 }
 0x4c0   : > { %v13173_v48 = vld [vmem:[%s15555_s27 + $0x1c10] sm:$0xf]  ;;  %v13462_v7 = vor.u32 %v14901_v23, %v13461_v57  ;;  %8124 = vmatpush.bf16.msra.mxu1 %v10074_v56  ;;  %8091 = vmatpush.bf16.msrb.mxu2 %v13206_v2  ;;  %v9719_v51 = vld [vmem:[%s15555_s27 + $0x130] sm:$0xf0] }
 0x4c1   : > { %v14829_v36 = vld [vmem:[%s15555_s27 + $0x1c2c] sm:$0xf0]  ;;  %8067 = vmatmul.bf16.vlgmr.msrb.gmra.mxu0 %v15923_v63  ;;  %v14097_v56 = vld [vmem:[%s15555_s27 + $0x554] sm:$0xf] }
 0x4c2   : > { %v13429_v42 = vld [vmem:[%s15555_s27 + $0x1e10] sm:$0xf]  ;;  %8111 = vmatpush.bf16.msra.mxu0 %v9818_v4  ;;  %v13174_v8 = vor.u32 %v14829_v36, %v13173_v48  ;;  %8104 = vmatpush.bf16.msrb.mxu3 %v13462_v7  ;;  %v10263_v57 = vld [vmem:[%s15555_s27 + $0x570] sm:$0xf0]  ;;  %v9722_v4 = vor.u32 %v13961_v54, %v9719_v51  ;;  %v7873_v48 = vpop.f32.mrf.mxu1  ;;  %v9946_v36 = vor.u32 %v14017_v60, %v9943_v61 }
 0x4c3   : > { %v14893_v10 = vld [vmem:[%s15555_s27 + $0x1e2c] sm:$0xf0]  ;;  %v14161_v23 = vld [vmem:[%s15555_s27 + $0x754] sm:$0xf]  ;;  %v10266_v2 = vor.u32 %v14097_v56, %v10263_v57 }
 0x4c4   : > { %v13430_v26 = vor.u32 %v14893_v10, %v13429_v42  ;;  %8125 = vmatpush.bf16.msra.mxu1 %v10042_v13  ;;  %8092 = vmatpush.bf16.msrb.mxu2 %v13174_v8  ;;  %v10519_v59 = vld [vmem:[%s15555_s27 + $0x770] sm:$0xf0] }
 0x4c5   : > { %v10522_v7 = vor.u32 %v14161_v23, %v10519_v59  ;;  %v14089_v42 = vld [vmem:[%s15555_s27 + $0x514] sm:$0xf] }
 0x4c6   : > { %8112 = vmatpush.bf16.msra.mxu0 %v9786_v25  ;;  %8105 = vmatpush.bf16.msrb.mxu3 %v13430_v26  ;;  %v10231_v10 = vld [vmem:[%s15555_s27 + $0x530] sm:$0xf0]  ;;  %v7874_v26 = vadd.f32 %v7873_v48, %v7861_v20  ;;  %v7886_v48 = vpop.f32.mrf.mxu2 }
 0x4c7   : > { %8093 = vmatmul.bf16.vlgmr.msrb.gmra.mxu2 %v15943_v31  ;;  %v14153_v13 = vld [vmem:[%s15555_s27 + $0x714] sm:$0xf]  ;;  %v10234_v25 = vor.u32 %v14089_v42, %v10231_v10 }
 0x4c8   : > { %8137 = vmatpush.bf16.msra.mxu2 %v10330_v62  ;;  %8126 = vmatpush.bf16.msra.mxu1 %v10010_v34  ;;  %v10487_v14 = vld [vmem:[%s15555_s27 + $0x730] sm:$0xf0]  ;;  %v7887_v41 = vadd.f32 %v7886_v48, %v7874_v26 }
 0x4c9   : > { %8106 = vmatmul.bf16.vlgmr.msrb.gmra.mxu3 %v15947_v35  ;;  %v14009_v16 = vld [vmem:[%s15555_s27 + $0x294] sm:$0xf]  ;;  %v10490_v62 = vor.u32 %v14153_v13, %v10487_v14  ;;  %v7899_v14 = vpop.f32.mrf.mxu3 }
 0x4ca   : > { %8150 = vmatpush.bf16.msra.mxu3 %v10586_v58  ;;  %8113 = vmatpush.bf16.msra.mxu0 %v9754_v9  ;;  %v9911_v18 = vld [vmem:[%s15555_s27 + $0x2b0] sm:$0xf0]  ;;  %v7875_v45 = vpop.f32.mrf.mxu1 }
 0x4cb   : > { %v13945_v8 = vld [vmem:[%s15555_s27 + $0x94] sm:$0xf]  ;;  %v9914_v30 = vor.u32 %v14009_v16, %v9911_v18 }
 0x4cc   : > { %8138 = vmatpush.bf16.msra.mxu2 %v10298_v43  ;;  %8127 = vmatpush.bf16.msra.mxu1 %v9978_v24  ;;  %v9655_v29 = vld [vmem:[%s15555_s27 + $0xb0] sm:$0xf0]  ;;  %v7862_v24 = vpop.f32.mrf.mxu0 }
 0x4cd   : > { %v14081_v32 = vld [vmem:[%s15555_s27 + $0x4d4] sm:$0xf]  ;;  %v9658_v40 = vor.u32 %v13945_v8, %v9655_v29  ;;  %v17131_v29 = vadd.f32 %v7899_v14, %v7887_v41 }
 0x4ce   : > { %8151 = vmatpush.bf16.msra.mxu3 %v10554_v55  ;;  %8114 = vmatpush.bf16.msra.mxu0 %v9722_v4  ;;  %v10199_v33 = vld [vmem:[%s15555_s27 + $0x4f0] sm:$0xf0] }
 0x4cf   : > { %v14145_v58 = vld [vmem:[%s15555_s27 + $0x6d4] sm:$0xf]  ;;  %v10202_v37 = vor.u32 %v14081_v32, %v10199_v33 }
 0x4d0   : > { %8139 = vmatpush.bf16.msra.mxu2 %v10266_v2  ;;  %8128 = vmatpush.bf16.msra.mxu1 %v9946_v36  ;;  %v10455_v1 = vld [vmem:[%s15555_s27 + $0x6f0] sm:$0xf0] }
 0x4d1   : > { %v14001_v34 = vld [vmem:[%s15555_s27 + $0x254] sm:$0xf]  ;;  %v10458_v9 = vor.u32 %v14145_v58, %v10455_v1 }
 0x4d2   : > { %8152 = vmatpush.bf16.msra.mxu3 %v10522_v7  ;;  %v9879_v38 = vld [vmem:[%s15555_s27 + $0x270] sm:$0xf0]  ;;  %8115 = vmatpush.bf16.msra.mxu0 %v9690_v21 }
 0x4d3   : > { %v13937_v44 = vld [vmem:[%s15555_s27 + $0x54] sm:$0xf]  ;;  %v9882_v43 = vor.u32 %v14001_v34, %v9879_v38 }
 0x4d4   : > { %8140 = vmatpush.bf16.msra.mxu2 %v10234_v25  ;;  %v9623_v28 = vld [vmem:[%s15555_s27 + $0x70] sm:$0xf0]  ;;  %8129 = vmatpush.bf16.msra.mxu1 %v9914_v30 }
 0x4d5   : > { %v14073_v54 = vld [vmem:[%s15555_s27 + $0x494] sm:$0xf]  ;;  %v9626_v59 = vor.u32 %v13937_v44, %v9623_v28 }
 0x4d6   : > { %8153 = vmatpush.bf16.msra.mxu3 %v10490_v62  ;;  %v10167_v51 = vld [vmem:[%s15555_s27 + $0x4b0] sm:$0xf0]  ;;  %8116 = vmatpush.bf16.msra.mxu0 %v9658_v40 }
 0x4d7   : > { %v14137_v55 = vld [vmem:[%s15555_s27 + $0x694] sm:$0xf]  ;;  %v10170_v4 = vor.u32 %v14073_v54, %v10167_v51 }
 0x4d8   : > { %v10423_v56 = vld [vmem:[%s15555_s27 + $0x6b0] sm:$0xf0]  ;;  %8141 = vmatpush.bf16.msra.mxu2 %v10202_v37  ;;  %8130 = vmatpush.bf16.msra.mxu1 %v9882_v43 }
 0x4d9   : > { %v13993_v57 = vld [vmem:[%s15555_s27 + $0x214] sm:$0xf]  ;;  %v10426_v7 = vor.u32 %v14137_v55, %v10423_v56  ;;  %v7888_v55 = vpop.f32.mrf.mxu2 }
 0x4da   : > { %v9847_v23 = vld [vmem:[%s15555_s27 + $0x230] sm:$0xf0]  ;;  %8154 = vmatpush.bf16.msra.mxu3 %v10458_v9  ;;  %8117 = vmatpush.bf16.msra.mxu0 %v9626_v59  ;;  %v7901_v59 = vpop.f32.mrf.mxu3 }
 0x4db   : > { %v14305_v60 = vld [vmem:[%s15555_s27 + $0xbd4] sm:$0xf]  ;;  %v9850_v36 = vor.u32 %v13993_v57, %v9847_v23 }
 0x4dc   : > { %v11095_v61 = vld [vmem:[%s15555_s27 + $0xbf0] sm:$0xf0]  ;;  %8142 = vmatpush.bf16.msra.mxu2 %v10170_v4 }
 0x4dd   : > { %v13929_v2 = vld [vmem:[%s15555_s27 + $0x14] sm:$0xf]  ;;  %v11098_v16 = vor.u32 %v14305_v60, %v11095_v61  ;;  %8131 = vmatpush.bf16.msra.mxu1 %v9850_v36 }
 0x4de   : > { %v9591_v19 = vld [vmem:[%s15555_s27 + $0x30] sm:$0xf0]  ;;  %8155 = vmatpush.bf16.msra.mxu3 %v10426_v7 }
 0x4df   : > { %v14241_v5 = vld [vmem:[%s15555_s27 + $0x9d4] sm:$0xf]  ;;  %v9594_v21 = vor.u32 %v13929_v2, %v9591_v19 }
 0x4e0   : > { %v10839_v42 = vld [vmem:[%s15555_s27 + $0x9f0] sm:$0xf0]  ;;  %8132 = vmatmul.bf16.vlgmr.msra.gmra.mxu1 %v15754_v12 }
 0x4e1   : > { %v14065_v10 = vld [vmem:[%s15555_s27 + $0x454] sm:$0xf]  ;;  %v10842_v62 = vor.u32 %v14241_v5, %v10839_v42  ;;  %8176 = vmatpush.bf16.msrb.mxu1 %v11098_v16  ;;  %8118 = vmatpush.bf16.msra.mxu0 %v9594_v21 }
 0x4e2   : > { %v10135_v13 = vld [vmem:[%s15555_s27 + $0x470] sm:$0xf0] }
 0x4e3   : > { %v14129_v18 = vld [vmem:[%s15555_s27 + $0x654] sm:$0xf]  ;;  %v10138_v30 = vor.u32 %v14065_v10, %v10135_v13 }
 0x4e4   : > { %v10391_v20 = vld [vmem:[%s15555_s27 + $0x670] sm:$0xf0]  ;;  %8119 = vmatmul.bf16.vlgmr.msra.gmra.mxu0 %v15752_v11 }
 0x4e5   : > { %v14297_v25 = vld [vmem:[%s15555_s27 + $0xb94] sm:$0xf]  ;;  %v10394_v58 = vor.u32 %v14129_v18, %v10391_v20  ;;  %8163 = vmatpush.bf16.msrb.mxu0 %v10842_v62  ;;  %8143 = vmatpush.bf16.msra.mxu2 %v10138_v30  ;;  %v15125_v62 = vld [vmem:[%s16078_s29] sm:$0xff] }
 0x4e6   : > { %v11063_v8 = vld [vmem:[%s15555_s27 + $0xbb0] sm:$0xf0]  ;;  %v1883_v30 = vperm.slane %v15125_v62, 4 }
 0x4e7   : > { %v14233_v26 = vld [vmem:[%s15555_s27 + $0x994] sm:$0xf]  ;;  %v11066_v40 = vor.u32 %v14297_v25, %v11063_v8  ;;  %8156 = vmatpush.bf16.msra.mxu3 %v10394_v58 }
 0x4e8   : > { %v10807_v32 = vld [vmem:[%s15555_s27 + $0x9b0] sm:$0xf0] }
 0x4e9   : > { %v14057_v33 = vld [vmem:[%s15555_s27 + $0x414] sm:$0xf]  ;;  %v10810_v54 = vor.u32 %v14233_v26, %v10807_v32  ;;  %8177 = vmatpush.bf16.msrb.mxu1 %v11066_v40 }
 0x4ea   : > { %v10103_v1 = vld [vmem:[%s15555_s27 + $0x430] sm:$0xf0] }
 0x4eb   : > { %v14121_v34 = vld [vmem:[%s15555_s27 + $0x614] sm:$0xf]  ;;  %v10106_v51 = vor.u32 %v14057_v33, %v10103_v1  ;;  %8164 = vmatpush.bf16.msrb.mxu0 %v10810_v54  ;;  %v7925_v1 = vpop.f32.mrf.mxu1 }
 0x4ec   : > { %v10359_v38 = vld [vmem:[%s15555_s27 + $0x630] sm:$0xf0] }
 0x4ed   : > { %v14369_v37 = vld [vmem:[%s15555_s27 + $0xdd4] sm:$0xf]  ;;  %v10362_v24 = vor.u32 %v14121_v34, %v10359_v38  ;;  %8144 = vmatpush.bf16.msra.mxu2 %v10106_v51 }
 0x4ee   : > { %v11351_v44 = vld [vmem:[%s15555_s27 + $0xdf0] sm:$0xf0] }
 0x4ef   : > { %v14433_v28 = vld [vmem:[%s15555_s27 + $0xfd4] sm:$0xf]  ;;  %v11354_v56 = vor.u32 %v14369_v37, %v11351_v44  ;;  %8157 = vmatpush.bf16.msra.mxu3 %v10362_v24 }
 0x4f0   : > { %v11607_v45 = vld [vmem:[%s15555_s27 + $0xff0] sm:$0xf0]  ;;  %8145 = vmatmul.bf16.vlgmr.msra.gmra.mxu2 %v15773_v46 }
 0x4f1   : > { %v14289_v9 = vld [vmem:[%s15555_s27 + $0xb54] sm:$0xf]  ;;  %v11610_v60 = vor.u32 %v14433_v28, %v11607_v45  ;;  %8189 = vmatpush.bf16.msrb.mxu2 %v11354_v56  ;;  %v7912_v28 = vpop.f32.mrf.mxu0 }
 0x4f2   : > { %v11031_v43 = vld [vmem:[%s15555_s27 + $0xb70] sm:$0xf0]  ;;  %8158 = vmatmul.bf16.vlgmr.msra.gmra.mxu3 %v15775_v47  ;;  %v7913_v54 = vadd.f32 %v7912_v28, %v1883_v30 }
 0x4f3   : > { %v14225_v57 = vld [vmem:[%s15555_s27 + $0x954] sm:$0xf]  ;;  %v11034_v61 = vor.u32 %v14289_v9, %v11031_v43  ;;  %8202 = vmatpush.bf16.msrb.mxu3 %v11610_v60 }
 0x4f4   : > { %v10775_v23 = vld [vmem:[%s15555_s27 + $0x970] sm:$0xf0] }
 0x4f5   : > { %v14361_v4 = vld [vmem:[%s15555_s27 + $0xd94] sm:$0xf]  ;;  %v10778_v36 = vor.u32 %v14225_v57, %v10775_v23  ;;  %8178 = vmatpush.bf16.msrb.mxu1 %v11034_v61  ;;  %v7926_v57 = vadd.f32 %v7925_v1, %v7913_v54 }
 0x4f6   : > { %v11319_v2 = vld [vmem:[%s15555_s27 + $0xdb0] sm:$0xf0] }
 0x4f7   : > { %v14425_v19 = vld [vmem:[%s15555_s27 + $0xf94] sm:$0xf]  ;;  %v11322_v42 = vor.u32 %v14361_v4, %v11319_v2  ;;  %8165 = vmatpush.bf16.msrb.mxu0 %v10778_v36 }
 0x4f8   : > { %v11575_v5 = vld [vmem:[%s15555_s27 + $0xfb0] sm:$0xf0] }
 0x4f9   : > { %v14281_v48 = vld [vmem:[%s15555_s27 + $0xb14] sm:$0xf]  ;;  %v11578_v41 = vor.u32 %v14425_v19, %v11575_v5  ;;  %8190 = vmatpush.bf16.msrb.mxu2 %v11322_v42 }
 0x4fa   : > { %v10999_v7 = vld [vmem:[%s15555_s27 + $0xb30] sm:$0xf0] }
 0x4fb   : > { %v14217_v10 = vld [vmem:[%s15555_s27 + $0x914] sm:$0xf]  ;;  %v11002_v14 = vor.u32 %v14281_v48, %v10999_v7  ;;  %8203 = vmatpush.bf16.msrb.mxu3 %v11578_v41 }
 0x4fc   : > { %v10743_v13 = vld [vmem:[%s15555_s27 + $0x930] sm:$0xf0] }
 0x4fd   : > { %v14353_v16 = vld [vmem:[%s15555_s27 + $0xd54] sm:$0xf]  ;;  %v10746_v26 = vor.u32 %v14217_v10, %v10743_v13  ;;  %8179 = vmatpush.bf16.msrb.mxu1 %v11002_v14  ;;  %v7927_v10 = vpop.f32.mrf.mxu1 }
 0x4fe   : > { %v11287_v18 = vld [vmem:[%s15555_s27 + $0xd70] sm:$0xf0] }
 0x4ff   : > { %v14417_v20 = vld [vmem:[%s15555_s27 + $0xf54] sm:$0xf]  ;;  %v11290_v32 = vor.u32 %v14353_v16, %v11287_v18  ;;  %8166 = vmatpush.bf16.msrb.mxu0 %v10746_v26 }
 0x500   : > { %v11543_v21 = vld [vmem:[%s15555_s27 + $0xf70] sm:$0xf0] }
 0x501   : > { %v14273_v25 = vld [vmem:[%s15555_s27 + $0xad4] sm:$0xf]  ;;  %v11546_v34 = vor.u32 %v14417_v20, %v11543_v21  ;;  %8191 = vmatpush.bf16.msrb.mxu2 %v11290_v32  ;;  %v7914_v20 = vpop.f32.mrf.mxu0 }
 0x502   : > { %v10967_v8 = vld [vmem:[%s15555_s27 + $0xaf0] sm:$0xf0] }
 0x503   : > { %v14209_v33 = vld [vmem:[%s15555_s27 + $0x8d4] sm:$0xf]  ;;  %v10970_v38 = vor.u32 %v14273_v25, %v10967_v8  ;;  %8204 = vmatpush.bf16.msrb.mxu3 %v11546_v34  ;;  %v7938_v34 = vpop.f32.mrf.mxu2 }
 0x504   : > { %v10711_v58 = vld [vmem:[%s15555_s27 + $0x8f0] sm:$0xf0] }
 0x505   : > { %v14345_v40 = vld [vmem:[%s15555_s27 + $0xd14] sm:$0xf]  ;;  %v10714_v51 = vor.u32 %v14209_v33, %v10711_v58  ;;  %8180 = vmatpush.bf16.msrb.mxu1 %v10970_v38 }
 0x506   : > { %v11255_v37 = vld [vmem:[%s15555_s27 + $0xd30] sm:$0xf0] }
 0x507   : > { %v14409_v44 = vld [vmem:[%s15555_s27 + $0xf14] sm:$0xf]  ;;  %v11258_v55 = vor.u32 %v14345_v40, %v11255_v37  ;;  %8167 = vmatpush.bf16.msrb.mxu0 %v10714_v51 }
 0x508   : > { %v11511_v45 = vld [vmem:[%s15555_s27 + $0xf30] sm:$0xf0] }
 0x509   : > { %v14265_v9 = vld [vmem:[%s15555_s27 + $0xa94] sm:$0xf]  ;;  %v11514_v23 = vor.u32 %v14409_v44, %v11511_v45  ;;  %8192 = vmatpush.bf16.msrb.mxu2 %v11258_v55  ;;  %v7939_v45 = vadd.f32 %v7938_v34, %v7926_v57 }
 0x50a   : > { %v10935_v43 = vld [vmem:[%s15555_s27 + $0xab0] sm:$0xf0] }
 0x50b   : > { %v14201_v24 = vld [vmem:[%s15555_s27 + $0x894] sm:$0xf]  ;;  %v10938_v59 = vor.u32 %v14265_v9, %v10935_v43  ;;  %8205 = vmatpush.bf16.msrb.mxu3 %v11514_v23  ;;  %v7951_v9 = vpop.f32.mrf.mxu3  ;;  %v7940_v20 = vpop.f32.mrf.mxu2 }
 0x50c   : > { %v10679_v56 = vld [vmem:[%s15555_s27 + $0x8b0] sm:$0xf0]  ;;  %v17202_v23 = vadd.f32 %v7951_v9, %v7939_v45 }
 0x50d   : > { %v14337_v60 = vld [vmem:[%s15555_s27 + $0xcd4] sm:$0xf]  ;;  %v10682_v48 = vor.u32 %v14201_v24, %v10679_v56  ;;  %8181 = vmatpush.bf16.msrb.mxu1 %v10938_v59 }
 0x50e   : > { %v11223_v61 = vld [vmem:[%s15555_s27 + $0xcf0] sm:$0xf0] }
 0x50f   : > { %v14401_v4 = vld [vmem:[%s15555_s27 + $0xed4] sm:$0xf]  ;;  %v11226_v7 = vor.u32 %v14337_v60, %v11223_v61  ;;  %8168 = vmatpush.bf16.msrb.mxu0 %v10682_v48 }
 0x510   : > { %v11479_v2 = vld [vmem:[%s15555_s27 + $0xef0] sm:$0xf0] }
 0x511   : > { %v14257_v19 = vld [vmem:[%s15555_s27 + $0xa54] sm:$0xf]  ;;  %v11482_v13 = vor.u32 %v14401_v4, %v11479_v2  ;;  %8193 = vmatpush.bf16.msrb.mxu2 %v11226_v7 }
 0x512   : > { %v10903_v5 = vld [vmem:[%s15555_s27 + $0xa70] sm:$0xf0] }
 0x513   : > { %v14193_v36 = vld [vmem:[%s15555_s27 + $0x854] sm:$0xf]  ;;  %v10906_v41 = vor.u32 %v14257_v19, %v10903_v5  ;;  %8206 = vmatpush.bf16.msrb.mxu3 %v11482_v13 }
 0x514   : > { %v10647_v42 = vld [vmem:[%s15555_s27 + $0x870] sm:$0xf0] }
 0x515   : > { %v14329_v14 = vld [vmem:[%s15555_s27 + $0xc94] sm:$0xf]  ;;  %v10650_v62 = vor.u32 %v14193_v36, %v10647_v42  ;;  %8182 = vmatpush.bf16.msrb.mxu1 %v10906_v41 }
 0x516   : > { %v11191_v16 = vld [vmem:[%s15555_s27 + $0xcb0] sm:$0xf0] }
 0x517   : > { %v14393_v18 = vld [vmem:[%s15555_s27 + $0xe94] sm:$0xf]  ;;  %v11194_v32 = vor.u32 %v14329_v14, %v11191_v16  ;;  %8169 = vmatpush.bf16.msrb.mxu0 %v10650_v62 }
 0x518   : > { %v11447_v21 = vld [vmem:[%s15555_s27 + $0xeb0] sm:$0xf0] }
 0x519   : > { %v14249_v25 = vld [vmem:[%s15555_s27 + $0xa14] sm:$0xf]  ;;  %v11450_v38 = vor.u32 %v14393_v18, %v11447_v21  ;;  %8194 = vmatpush.bf16.msrb.mxu2 %v11194_v32 }
 0x51a   : > { %v10871_v8 = vld [vmem:[%s15555_s27 + $0xa30] sm:$0xf0] }
 0x51b   : > { %v14561_v30 = vld [vmem:[%s15555_s27 + $0x13d4] sm:$0xf]  ;;  %v10874_v40 = vor.u32 %v14249_v25, %v10871_v8  ;;  %8207 = vmatpush.bf16.msrb.mxu3 %v11450_v38 }
 0x51c   : > { %v12119_v26 = vld [vmem:[%s15555_s27 + $0x13f0] sm:$0xf0] }
 0x51d   : > { %v14185_v33 = vld [vmem:[%s15555_s27 + $0x814] sm:$0xf]  ;;  %v12122_v43 = vor.u32 %v14561_v30, %v12119_v26  ;;  %8183 = vmatpush.bf16.msrb.mxu1 %v10874_v40  ;;  %v7953_v30 = vpop.f32.mrf.mxu3 }
 0x51e   : > { %v10615_v58 = vld [vmem:[%s15555_s27 + $0x830] sm:$0xf0] }
 0x51f   : > { %v14497_v1 = vld [vmem:[%s15555_s27 + $0x11d4] sm:$0xf]  ;;  %v10618_v55 = vor.u32 %v14185_v33, %v10615_v58 }
 0x520   : > { %v11863_v37 = vld [vmem:[%s15555_s27 + $0x11f0] sm:$0xf0]  ;;  %8184 = vmatmul.bf16.vlgmr.msrb.gmra.mxu1 %v15799_v27 }
 0x521   : > { %v14321_v44 = vld [vmem:[%s15555_s27 + $0xc54] sm:$0xf]  ;;  %v11866_v59 = vor.u32 %v14497_v1, %v11863_v37  ;;  %8228 = vmatpush.bf16.msra.mxu1 %v12122_v43  ;;  %8170 = vmatpush.bf16.msrb.mxu0 %v10618_v55 }
 0x522   : > { %v11159_v28 = vld [vmem:[%s15555_s27 + $0xc70] sm:$0xf0] }
 0x523   : > { %v14385_v54 = vld [vmem:[%s15555_s27 + $0xe54] sm:$0xf]  ;;  %v11162_v60 = vor.u32 %v14321_v44, %v11159_v28 }
 0x524   : > { %v11415_v51 = vld [vmem:[%s15555_s27 + $0xe70] sm:$0xf0]  ;;  %8171 = vmatmul.bf16.vlgmr.msrb.gmra.mxu0 %v15795_v22 }
 0x525   : > { %v14553_v24 = vld [vmem:[%s15555_s27 + $0x1394] sm:$0xf]  ;;  %v11418_v2 = vor.u32 %v14385_v54, %v11415_v51  ;;  %8215 = vmatpush.bf16.msra.mxu0 %v11866_v59  ;;  %8195 = vmatpush.bf16.msrb.mxu2 %v11162_v60 }
 0x526   : > { %v12087_v56 = vld [vmem:[%s15555_s27 + $0x13b0] sm:$0xf0] }
 0x527   : > { %v14489_v57 = vld [vmem:[%s15555_s27 + $0x1194] sm:$0xf]  ;;  %v12090_v7 = vor.u32 %v14553_v24, %v12087_v56  ;;  %8208 = vmatpush.bf16.msrb.mxu3 %v11418_v2  ;;  %v7977_v2 = vpop.f32.mrf.mxu1 }
 0x528   : > { %v11831_v61 = vld [vmem:[%s15555_s27 + $0x11b0] sm:$0xf0] }
 0x529   : > { %v14313_v4 = vld [vmem:[%s15555_s27 + $0xc14] sm:$0xf]  ;;  %v11834_v16 = vor.u32 %v14489_v57, %v11831_v61  ;;  %8229 = vmatpush.bf16.msra.mxu1 %v12090_v7 }
 0x52a   : > { %v11127_v19 = vld [vmem:[%s15555_s27 + $0xc30] sm:$0xf0] }
 0x52b   : > { %v14377_v5 = vld [vmem:[%s15555_s27 + $0xe14] sm:$0xf]  ;;  %v11130_v18 = vor.u32 %v14313_v4, %v11127_v19  ;;  %8216 = vmatpush.bf16.msra.mxu0 %v11834_v16 }
 0x52c   : > { %v11383_v48 = vld [vmem:[%s15555_s27 + $0xe30] sm:$0xf0] }
 0x52d   : > { %v14625_v36 = vld [vmem:[%s15555_s27 + $0x15d4] sm:$0xf]  ;;  %v11386_v21 = vor.u32 %v14377_v5, %v11383_v48  ;;  %8196 = vmatpush.bf16.msrb.mxu2 %v11130_v18 }
 0x52e   : > { %v12375_v42 = vld [vmem:[%s15555_s27 + $0x15f0] sm:$0xf0] }
 0x52f   : > { %v14689_v10 = vld [vmem:[%s15555_s27 + $0x17d4] sm:$0xf]  ;;  %v12378_v25 = vor.u32 %v14625_v36, %v12375_v42  ;;  %8209 = vmatpush.bf16.msrb.mxu3 %v11386_v21  ;;  %v7964_v42 = vpop.f32.mrf.mxu0 }
 0x530   : > { %v12631_v13 = vld [vmem:[%s15555_s27 + $0x17f0] sm:$0xf0]  ;;  %8197 = vmatmul.bf16.vlgmr.msrb.gmra.mxu2 %v15813_v52 }
 0x531   : > { %v14545_v41 = vld [vmem:[%s15555_s27 + $0x1354] sm:$0xf]  ;;  %v12634_v26 = vor.u32 %v14689_v10, %v12631_v13  ;;  %8241 = vmatpush.bf16.msra.mxu2 %v12378_v25 }
 0x532   : > { %v12055_v14 = vld [vmem:[%s15555_s27 + $0x1370] sm:$0xf0]  ;;  %8210 = vmatmul.bf16.vlgmr.msrb.gmra.mxu3 %v15815_v53 }
 0x533   : > { %v14481_v8 = vld [vmem:[%s15555_s27 + $0x1154] sm:$0xf]  ;;  %v12058_v32 = vor.u32 %v14545_v41, %v12055_v14  ;;  %8254 = vmatpush.bf16.msra.mxu3 %v12634_v26  ;;  %v7965_v14 = vadd.f32 %v7964_v42, %v17202_v23 }
 0x534   : > { %v11799_v62 = vld [vmem:[%s15555_s27 + $0x1170] sm:$0xf0] }
 0x535   : > { %v14617_v33 = vld [vmem:[%s15555_s27 + $0x1594] sm:$0xf]  ;;  %v11802_v37 = vor.u32 %v14481_v8, %v11799_v62  ;;  %8230 = vmatpush.bf16.msra.mxu1 %v12058_v32  ;;  %v7978_v25 = vadd.f32 %v7977_v2, %v7965_v14 }
 0x536   : > { %v12343_v58 = vld [vmem:[%s15555_s27 + $0x15b0] sm:$0xf0] }
 0x537   : > { %v14681_v1 = vld [vmem:[%s15555_s27 + $0x1794] sm:$0xf]  ;;  %v12346_v44 = vor.u32 %v14617_v33, %v12343_v58  ;;  %8217 = vmatpush.bf16.msra.mxu0 %v11802_v37  ;;  %v7979_v37 = vpop.f32.mrf.mxu1 }
 0x538   : > { %v12599_v34 = vld [vmem:[%s15555_s27 + $0x17b0] sm:$0xf0] }
 0x539   : > { %v14537_v38 = vld [vmem:[%s15555_s27 + $0x1314] sm:$0xf]  ;;  %v12602_v9 = vor.u32 %v14681_v1, %v12599_v34  ;;  %8242 = vmatpush.bf16.msra.mxu2 %v12346_v44 }
 0x53a   : > { %v12023_v40 = vld [vmem:[%s15555_s27 + $0x1330] sm:$0xf0] }
 0x53b   : > { %v14473_v28 = vld [vmem:[%s15555_s27 + $0x1114] sm:$0xf]  ;;  %v12026_v43 = vor.u32 %v14537_v38, %v12023_v40  ;;  %8255 = vmatpush.bf16.msra.mxu3 %v12602_v9 }
 0x53c   : > { %v11767_v45 = vld [vmem:[%s15555_s27 + $0x1130] sm:$0xf0] }
 0x53d   : > { %v14609_v54 = vld [vmem:[%s15555_s27 + $0x1554] sm:$0xf]  ;;  %v11770_v60 = vor.u32 %v14473_v28, %v11767_v45  ;;  %8231 = vmatpush.bf16.msra.mxu1 %v12026_v43 }
 0x53e   : > { %v12311_v51 = vld [vmem:[%s15555_s27 + $0x1570] sm:$0xf0] }
 0x53f   : > { %v14673_v55 = vld [vmem:[%s15555_s27 + $0x1754] sm:$0xf]  ;;  %v12314_v57 = vor.u32 %v14609_v54, %v12311_v51  ;;  %8218 = vmatpush.bf16.msra.mxu0 %v11770_v60  ;;  %v7966_v54 = vpop.f32.mrf.mxu0 }
 0x540   : > { %v12567_v24 = vld [vmem:[%s15555_s27 + $0x1770] sm:$0xf0] }
 0x541   : > { %v14529_v56 = vld [vmem:[%s15555_s27 + $0x12d4] sm:$0xf]  ;;  %v12570_v19 = vor.u32 %v14673_v55, %v12567_v24  ;;  %8243 = vmatpush.bf16.msra.mxu2 %v12314_v57 }
 0x542   : > { %v11991_v59 = vld [vmem:[%s15555_s27 + $0x12f0] sm:$0xf0] }
 0x543   : > { %v14465_v61 = vld [vmem:[%s15555_s27 + $0x10d4] sm:$0xf]  ;;  %v11994_v5 = vor.u32 %v14529_v56, %v11991_v59  ;;  %8256 = vmatpush.bf16.msra.mxu3 %v12570_v19  ;;  %v7990_v19 = vpop.f32.mrf.mxu2 }
 0x544   : > { %v11735_v4 = vld [vmem:[%s15555_s27 + $0x10f0] sm:$0xf0] }
 0x545   : > { %v14601_v48 = vld [vmem:[%s15555_s27 + $0x1514] sm:$0xf]  ;;  %v11738_v16 = vor.u32 %v14465_v61, %v11735_v4  ;;  %8232 = vmatpush.bf16.msra.mxu1 %v11994_v5 }
 0x546   : > { %v12279_v7 = vld [vmem:[%s15555_s27 + $0x1530] sm:$0xf0] }
 0x547   : > { %v14665_v36 = vld [vmem:[%s15555_s27 + $0x1714] sm:$0xf]  ;;  %v12282_v18 = vor.u32 %v14601_v48, %v12279_v7  ;;  %8219 = vmatpush.bf16.msra.mxu0 %v11738_v16 }
 0x548   : > { %v12535_v10 = vld [vmem:[%s15555_s27 + $0x1730] sm:$0xf0] }
 0x549   : > { %v14521_v13 = vld [vmem:[%s15555_s27 + $0x1294] sm:$0xf]  ;;  %v12538_v8 = vor.u32 %v14665_v36, %v12535_v10  ;;  %8244 = vmatpush.bf16.msra.mxu2 %v12282_v18  ;;  %v7991_v10 = vadd.f32 %v7990_v19, %v7978_v25 }
 0x54a   : > { %v11959_v41 = vld [vmem:[%s15555_s27 + $0x12b0] sm:$0xf0] }
 0x54b   : > { %v14457_v20 = vld [vmem:[%s15555_s27 + $0x1094] sm:$0xf]  ;;  %v11962_v62 = vor.u32 %v14521_v13, %v11959_v41  ;;  %8257 = vmatpush.bf16.msra.mxu3 %v12538_v8  ;;  %v8003_v13 = vpop.f32.mrf.mxu3  ;;  %v7992_v54 = vpop.f32.mrf.mxu2 }
 0x54c   : > { %v11703_v21 = vld [vmem:[%s15555_s27 + $0x10b0] sm:$0xf0]  ;;  %v17273_v8 = vadd.f32 %v8003_v13, %v7991_v10 }
 0x54d   : > { %v14593_v30 = vld [vmem:[%s15555_s27 + $0x14d4] sm:$0xf]  ;;  %v11706_v1 = vor.u32 %v14457_v20, %v11703_v21  ;;  %8233 = vmatpush.bf16.msra.mxu1 %v11962_v62 }
 0x54e   : > { %v12247_v26 = vld [vmem:[%s15555_s27 + $0x14f0] sm:$0xf0] }
 0x54f   : > { %v14657_v32 = vld [vmem:[%s15555_s27 + $0x16d4] sm:$0xf]  ;;  %v12250_v34 = vor.u32 %v14593_v30, %v12247_v26  ;;  %8220 = vmatpush.bf16.msra.mxu0 %v11706_v1 }
 0x550   : > { %v12503_v23 = vld [vmem:[%s15555_s27 + $0x16f0] sm:$0xf0] }
 0x551   : > { %v14513_v33 = vld [vmem:[%s15555_s27 + $0x1254] sm:$0xf]  ;;  %v12506_v44 = vor.u32 %v14657_v32, %v12503_v23  ;;  %8245 = vmatpush.bf16.msra.mxu2 %v12250_v34 }
 0x552   : > { %v11927_v58 = vld [vmem:[%s15555_s27 + $0x1270] sm:$0xf0] }
 0x553   : > { %v14449_v38 = vld [vmem:[%s15555_s27 + $0x1054] sm:$0xf]  ;;  %v11930_v28 = vor.u32 %v14513_v33, %v11927_v58  ;;  %8258 = vmatpush.bf16.msra.mxu3 %v12506_v44 }
 0x554   : > { %v11671_v40 = vld [vmem:[%s15555_s27 + $0x1070] sm:$0xf0] }
 0x555   : > { %v14585_v45 = vld [vmem:[%s15555_s27 + $0x1494] sm:$0xf]  ;;  %v11674_v56 = vor.u32 %v14449_v38, %v11671_v40  ;;  %8234 = vmatpush.bf16.msra.mxu1 %v11930_v28 }
 0x556   : > { %v12215_v9 = vld [vmem:[%s15555_s27 + $0x14b0] sm:$0xf0] }
 0x557   : > { %v14649_v43 = vld [vmem:[%s15555_s27 + $0x1694] sm:$0xf]  ;;  %v12218_v57 = vor.u32 %v14585_v45, %v12215_v9  ;;  %8221 = vmatpush.bf16.msra.mxu0 %v11674_v56 }
 0x558   : > { %v12471_v51 = vld [vmem:[%s15555_s27 + $0x16b0] sm:$0xf0] }
 0x559   : > { %v14505_v55 = vld [vmem:[%s15555_s27 + $0x1214] sm:$0xf]  ;;  %v12474_v5 = vor.u32 %v14649_v43, %v12471_v51  ;;  %8246 = vmatpush.bf16.msra.mxu2 %v12218_v57 }
 0x55a   : > { %v11895_v24 = vld [vmem:[%s15555_s27 + $0x1230] sm:$0xf0] }
 0x55b   : > { %v14817_v59 = vld [vmem:[%s15555_s27 + $0x1bd4] sm:$0xf]  ;;  %v11898_v48 = vor.u32 %v14505_v55, %v11895_v24  ;;  %8259 = vmatpush.bf16.msra.mxu3 %v12474_v5 }
 0x55c   : > { %v13143_v60 = vld [vmem:[%s15555_s27 + $0x1bf0] sm:$0xf0] }
 0x55d   : > { %v14441_v61 = vld [vmem:[%s15555_s27 + $0x1014] sm:$0xf]  ;;  %v13146_v41 = vor.u32 %v14817_v59, %v13143_v60  ;;  %8235 = vmatpush.bf16.msra.mxu1 %v11898_v48  ;;  %v8005_v59 = vpop.f32.mrf.mxu3 }
 0x55e   : > { %v11639_v4 = vld [vmem:[%s15555_s27 + $0x1030] sm:$0xf0] }
 0x55f   : > { %v14753_v2 = vld [vmem:[%s15555_s27 + $0x19d4] sm:$0xf]  ;;  %v11642_v18 = vor.u32 %v14441_v61, %v11639_v4 }
 0x560   : > { %v12887_v7 = vld [vmem:[%s15555_s27 + $0x19f0] sm:$0xf0]  ;;  %8236 = vmatmul.bf16.vlgmr.msra.gmra.mxu1 %v15851_v49 }
 0x561   : > { %v14577_v36 = vld [vmem:[%s15555_s27 + $0x1454] sm:$0xf]  ;;  %v12890_v62 = vor.u32 %v14753_v2, %v12887_v7  ;;  %8280 = vmatpush.bf16.msrb.mxu1 %v13146_v41  ;;  %8222 = vmatpush.bf16.msra.mxu0 %v11642_v18 }
 0x562   : > { %v12183_v42 = vld [vmem:[%s15555_s27 + $0x1470] sm:$0xf0] }
 0x563   : > { %v14641_v14 = vld [vmem:[%s15555_s27 + $0x1654] sm:$0xf]  ;;  %v12186_v30 = vor.u32 %v14577_v36, %v12183_v42 }
 0x564   : > { %v12439_v16 = vld [vmem:[%s15555_s27 + $0x1670] sm:$0xf0]  ;;  %8223 = vmatmul.bf16.vlgmr.msra.gmra.mxu0 %v15843_v39 }
 0x565   : > { %v14809_v20 = vld [vmem:[%s15555_s27 + $0x1b94] sm:$0xf]  ;;  %v12442_v23 = vor.u32 %v14641_v14, %v12439_v16  ;;  %8267 = vmatpush.bf16.msrb.mxu0 %v12890_v62  ;;  %8247 = vmatpush.bf16.msra.mxu2 %v12186_v30 }
 0x566   : > { %v13111_v21 = vld [vmem:[%s15555_s27 + $0x1bb0] sm:$0xf0] }
 0x567   : > { %v14745_v25 = vld [vmem:[%s15555_s27 + $0x1994] sm:$0xf]  ;;  %v13114_v34 = vor.u32 %v14809_v20, %v13111_v21  ;;  %8260 = vmatpush.bf16.msra.mxu3 %v12442_v23  ;;  %v8029_v23 = vpop.f32.mrf.mxu1 }
 0x568   : > { %v12855_v26 = vld [vmem:[%s15555_s27 + $0x19b0] sm:$0xf0] }
 0x569   : > { %v14569_v32 = vld [vmem:[%s15555_s27 + $0x1414] sm:$0xf]  ;;  %v12858_v9 = vor.u32 %v14745_v25, %v12855_v26  ;;  %8281 = vmatpush.bf16.msrb.mxu1 %v13114_v34 }
 0x56a   : > { %v12151_v33 = vld [vmem:[%s15555_s27 + $0x1430] sm:$0xf0] }
 0x56b   : > { %v14633_v58 = vld [vmem:[%s15555_s27 + $0x1614] sm:$0xf]  ;;  %v12154_v43 = vor.u32 %v14569_v32, %v12151_v33  ;;  %8268 = vmatpush.bf16.msrb.mxu0 %v12858_v9 }
 0x56c   : > { %v12407_v1 = vld [vmem:[%s15555_s27 + $0x1630] sm:$0xf0] }
 0x56d   : > { %v14881_v38 = vld [vmem:[%s15555_s27 + $0x1dd4] sm:$0xf]  ;;  %v12410_v51 = vor.u32 %v14633_v58, %v12407_v1  ;;  %8248 = vmatpush.bf16.msra.mxu2 %v12154_v43 }
 0x56e   : > { %v13399_v40 = vld [vmem:[%s15555_s27 + $0x1df0] sm:$0xf0] }
 0x56f   : > { %v14945_v37 = vld [vmem:[%s15555_s27 + $0x1fd4] sm:$0xf]  ;;  %v13402_v55 = vor.u32 %v14881_v38, %v13399_v40  ;;  %8261 = vmatpush.bf16.msra.mxu3 %v12410_v51  ;;  %v8016_v40 = vpop.f32.mrf.mxu0 }
 0x570   : > { %v13655_v44 = vld [vmem:[%s15555_s27 + $0x1ff0] sm:$0xf0]  ;;  %8249 = vmatmul.bf16.vlgmr.msra.gmra.mxu2 %v15864_v6 }
 0x571   : > { %v14801_v28 = vld [vmem:[%s15555_s27 + $0x1b54] sm:$0xf]  ;;  %v13658_v60 = vor.u32 %v14945_v37, %v13655_v44  ;;  %8293 = vmatpush.bf16.msrb.mxu2 %v13402_v55 }
 0x572   : > { %v13079_v45 = vld [vmem:[%s15555_s27 + $0x1b70] sm:$0xf0]  ;;  %8262 = vmatmul.bf16.vlgmr.msra.gmra.mxu3 %v15869_v15 }
 0x573   : > { %v14737_v24 = vld [vmem:[%s15555_s27 + $0x1954] sm:$0xf]  ;;  %v13082_v57 = vor.u32 %v14801_v28, %v13079_v45  ;;  %8306 = vmatpush.bf16.msrb.mxu3 %v13658_v60  ;;  %v8017_v45 = vadd.f32 %v8016_v40, %v17273_v8 }
 0x574   : > { %v12823_v56 = vld [vmem:[%s15555_s27 + $0x1970] sm:$0xf0] }
 0x575   : > { %v14873_v61 = vld [vmem:[%s15555_s27 + $0x1d94] sm:$0xf]  ;;  %v12826_v7 = vor.u32 %v14737_v24, %v12823_v56  ;;  %8282 = vmatpush.bf16.msrb.mxu1 %v13082_v57  ;;  %v8030_v55 = vadd.f32 %v8029_v23, %v8017_v45  ;;  %v9821_v23 = vld [vmem:[%s15555_s27 + $0x1d8] sm:$0xf] }
 0x576   : > { %v13367_v4 = vld [vmem:[%s15555_s27 + $0x1db0] sm:$0xf0] }
 0x577   : > { %v14937_v2 = vld [vmem:[%s15555_s27 + $0x1f94] sm:$0xf]  ;;  %v13370_v36 = vor.u32 %v14873_v61, %v13367_v4  ;;  %8269 = vmatpush.bf16.msrb.mxu0 %v12826_v7  ;;  %v8031_v7 = vpop.f32.mrf.mxu1 }
 0x578   : > { %v13623_v19 = vld [vmem:[%s15555_s27 + $0x1fb0] sm:$0xf0]  ;;  %v10589_v7 = vld [vmem:[%s15555_s27 + $0x7d8] sm:$0xf] }
 0x579   : > { %v14793_v5 = vld [vmem:[%s15555_s27 + $0x1b14] sm:$0xf]  ;;  %v13626_v13 = vor.u32 %v14937_v2, %v13623_v19  ;;  %8294 = vmatpush.bf16.msrb.mxu2 %v13370_v36 }
 0x57a   : > { %v13047_v48 = vld [vmem:[%s15555_s27 + $0x1b30] sm:$0xf0] }
 0x57b   : > { %v14729_v42 = vld [vmem:[%s15555_s27 + $0x1914] sm:$0xf]  ;;  %v13050_v41 = vor.u32 %v14793_v5, %v13047_v48  ;;  %8307 = vmatpush.bf16.msrb.mxu3 %v13626_v13 }
 0x57c   : > { %v12791_v10 = vld [vmem:[%s15555_s27 + $0x1930] sm:$0xf0] }
 0x57d   : > { %v14865_v14 = vld [vmem:[%s15555_s27 + $0x1d54] sm:$0xf]  ;;  %v12794_v30 = vor.u32 %v14729_v42, %v12791_v10  ;;  %8283 = vmatpush.bf16.msrb.mxu1 %v13050_v41 }
 0x57e   : > { %v13335_v16 = vld [vmem:[%s15555_s27 + $0x1d70] sm:$0xf0] }
 0x57f   : > { %v14929_v18 = vld [vmem:[%s15555_s27 + $0x1f54] sm:$0xf]  ;;  %v13338_v25 = vor.u32 %v14865_v14, %v13335_v16  ;;  %8270 = vmatpush.bf16.msrb.mxu0 %v12794_v30  ;;  %v8018_v14 = vpop.f32.mrf.mxu0  ;;  %v14054_v30 = vld [vmem:[%s15555_s27 + $0x3f4] sm:$0xf0] }
 0x580   : > { %v13591_v20 = vld [vmem:[%s15555_s27 + $0x1f70] sm:$0xf0] }
 0x581   : > { %v14785_v21 = vld [vmem:[%s15555_s27 + $0x1ad4] sm:$0xf]  ;;  %v13594_v33 = vor.u32 %v14929_v18, %v13591_v20  ;;  %8295 = vmatpush.bf16.msrb.mxu2 %v13338_v25 }
 0x582   : > { %v13015_v62 = vld [vmem:[%s15555_s27 + $0x1af0] sm:$0xf0] }
 0x583   : > { %v14721_v26 = vld [vmem:[%s15555_s27 + $0x18d4] sm:$0xf]  ;;  %v13018_v58 = vor.u32 %v14785_v21, %v13015_v62  ;;  %8308 = vmatpush.bf16.msrb.mxu3 %v13594_v33  ;;  %v10077_v62 = vld [vmem:[%s15555_s27 + $0x3d8] sm:$0xf]  ;;  %v8042_v33 = vpop.f32.mrf.mxu2 }
 0x584   : > { %v12759_v32 = vld [vmem:[%s15555_s27 + $0x18f0] sm:$0xf0] }
 0x585   : > { %v14857_v1 = vld [vmem:[%s15555_s27 + $0x1d14] sm:$0xf]  ;;  %v12762_v9 = vor.u32 %v14721_v26, %v12759_v32  ;;  %8284 = vmatpush.bf16.msrb.mxu1 %v13018_v58 }
 0x586   : > { %v13303_v34 = vld [vmem:[%s15555_s27 + $0x1d30] sm:$0xf0] }
 0x587   : > { %v14921_v38 = vld [vmem:[%s15555_s27 + $0x1f14] sm:$0xf]  ;;  %v13306_v43 = vor.u32 %v14857_v1, %v13303_v34  ;;  %8271 = vmatpush.bf16.msrb.mxu0 %v12762_v9  ;;  %v13990_v34 = vld [vmem:[%s15555_s27 + $0x1f4] sm:$0xf0] }
 0x588   : > { %v13559_v37 = vld [vmem:[%s15555_s27 + $0x1f30] sm:$0xf0] }
 0x589   : > { %v14777_v44 = vld [vmem:[%s15555_s27 + $0x1a94] sm:$0xf]  ;;  %v13562_v24 = vor.u32 %v14921_v38, %v13559_v37  ;;  %8296 = vmatpush.bf16.msrb.mxu2 %v13306_v43  ;;  %v8043_v37 = vadd.f32 %v8042_v33, %v8030_v55  ;;  %v9789_v55 = vld [vmem:[%s15555_s27 + $0x198] sm:$0xf] }
 0x58a   : > { %v12983_v28 = vld [vmem:[%s15555_s27 + $0x1ab0] sm:$0xf0]  ;;  %v14174_v33 = vld [vmem:[%s15555_s27 + $0x7b4] sm:$0xf0] }
 0x58b   : > { %v14713_v54 = vld [vmem:[%s15555_s27 + $0x1894] sm:$0xf]  ;;  %v12986_v56 = vor.u32 %v14777_v44, %v12983_v28  ;;  %8309 = vmatpush.bf16.msrb.mxu3 %v13562_v24  ;;  %v8055_v44 = vpop.f32.mrf.mxu3  ;;  %v10078_v28 = vor.u32 %v14054_v30, %v10077_v62  ;;  %v8044_v14 = vpop.f32.mrf.mxu2 }
 0x58c   : > { %v12727_v51 = vld [vmem:[%s15555_s27 + $0x18b0] sm:$0xf0]  ;;  %v17344_v24 = vadd.f32 %v8055_v44, %v8043_v37  ;;  %v13966_v37 = vld [vmem:[%s15555_s27 + $0x134] sm:$0xf0] }
 0x58d   : > { %v14849_v59 = vld [vmem:[%s15555_s27 + $0x1cd4] sm:$0xf]  ;;  %v12730_v2 = vor.u32 %v14713_v54, %v12727_v51  ;;  %8285 = vmatpush.bf16.msrb.mxu1 %v12986_v56  ;;  %v10045_v54 = vld [vmem:[%s15555_s27 + $0x398] sm:$0xf]  ;;  %v9822_v56 = vor.u32 %v13990_v34, %v9821_v23 }
 0x58e   : > { %v13271_v60 = vld [vmem:[%s15555_s27 + $0x1cf0] sm:$0xf0]  ;;  %v14046_v51 = vld [vmem:[%s15555_s27 + $0x3b4] sm:$0xf0] }
 0x58f   : > { %v14913_v57 = vld [vmem:[%s15555_s27 + $0x1ed4] sm:$0xf]  ;;  %v13274_v19 = vor.u32 %v14849_v59, %v13271_v60  ;;  %8272 = vmatpush.bf16.msrb.mxu0 %v12730_v2  ;;  %v13982_v60 = vld [vmem:[%s15555_s27 + $0x1b4] sm:$0xf0] }
 0x590   : > { %v13527_v8 = vld [vmem:[%s15555_s27 + $0x1ef0] sm:$0xf0]  ;;  %v10557_v23 = vld [vmem:[%s15555_s27 + $0x798] sm:$0xf] }
 0x591   : > { %v14769_v61 = vld [vmem:[%s15555_s27 + $0x1a54] sm:$0xf]  ;;  %v13530_v36 = vor.u32 %v14913_v57, %v13527_v8  ;;  %8297 = vmatpush.bf16.msrb.mxu2 %v13274_v19  ;;  %v10046_v19 = vor.u32 %v14046_v51, %v10045_v54  ;;  %v10558_v44 = vor.u32 %v14174_v33, %v10557_v23  ;;  %v14166_v54 = vld [vmem:[%s15555_s27 + $0x774] sm:$0xf0] }
 0x592   : > { %v12951_v4 = vld [vmem:[%s15555_s27 + $0x1a70] sm:$0xf0]  ;;  %v9949_v51 = vld [vmem:[%s15555_s27 + $0x2d8] sm:$0xf] }
 0x593   : > { %v14705_v5 = vld [vmem:[%s15555_s27 + $0x1854] sm:$0xf]  ;;  %v12954_v42 = vor.u32 %v14769_v61, %v12951_v4  ;;  %8310 = vmatpush.bf16.msrb.mxu3 %v13530_v36  ;;  %v14182_v36 = vld [vmem:[%s15555_s27 + $0x7f4] sm:$0xf0]  ;;  %v8057_v62 = vpop.f32.mrf.mxu3 }
 0x594   : > { %v12695_v48 = vld [vmem:[%s15555_s27 + $0x1870] sm:$0xf0]  ;;  %v10590_v30 = vor.u32 %v14182_v36, %v10589_v7  ;;  %v14158_v7 = vld [vmem:[%s15555_s27 + $0x734] sm:$0xf0] }
 0x595   : > { %v14841_v10 = vld [vmem:[%s15555_s27 + $0x1c94] sm:$0xf]  ;;  %v12698_v21 = vor.u32 %v14705_v5, %v12695_v48  ;;  %8286 = vmatpush.bf16.msrb.mxu1 %v12954_v42  ;;  %v10333_v5 = vld [vmem:[%s15555_s27 + $0x5d8] sm:$0xf] }
 0x596   : > { %v13239_v13 = vld [vmem:[%s15555_s27 + $0x1cb0] sm:$0xf0]  ;;  %v14118_v48 = vld [vmem:[%s15555_s27 + $0x5f4] sm:$0xf0] }
 0x597   : > { %v14905_v41 = vld [vmem:[%s15555_s27 + $0x1e94] sm:$0xf]  ;;  %v13242_v25 = vor.u32 %v14841_v10, %v13239_v13  ;;  %8273 = vmatpush.bf16.msrb.mxu0 %v12698_v21  ;;  %v10013_v42 = vld [vmem:[%s15555_s27 + $0x358] sm:$0xf]  ;;  %v9790_v13 = vor.u32 %v13982_v60, %v9789_v55 }
 0x598   : > { %v13495_v16 = vld [vmem:[%s15555_s27 + $0x1eb0] sm:$0xf0]  ;;  %v14038_v10 = vld [vmem:[%s15555_s27 + $0x374] sm:$0xf0] }
 0x599   : > { %v14761_v18 = vld [vmem:[%s15555_s27 + $0x1a14] sm:$0xf]  ;;  %v13498_v58 = vor.u32 %v14905_v41, %v13495_v16  ;;  %8298 = vmatpush.bf16.msrb.mxu2 %v13242_v25  ;;  %v13974_v21 = vld [vmem:[%s15555_s27 + $0x174] sm:$0xf0]  ;;  %v10014_v25 = vor.u32 %v14038_v10, %v10013_v42 }
 0x59a   : > { %v12919_v20 = vld [vmem:[%s15555_s27 + $0x1a30] sm:$0xf0]  ;;  %v9693_v60 = vld [vmem:[%s15555_s27 + $0xd8] sm:$0xf] }
 0x59b   : > { %v14697_v26 = vld [vmem:[%s15555_s27 + $0x1814] sm:$0xf]  ;;  %v12922_v1 = vor.u32 %v14761_v18, %v12919_v20  ;;  %8311 = vmatpush.bf16.msrb.mxu3 %v13498_v58  ;;  %v10334_v18 = vor.u32 %v14118_v48, %v10333_v5  ;;  %v9757_v20 = vld [vmem:[%s15555_s27 + $0x158] sm:$0xf]  ;;  %v8068_v48 = vpop.f32.mrf.mxu0 }
 0x59c   : > { %v12663_v32 = vld [vmem:[%s15555_s27 + $0x1830] sm:$0xf0]  ;;  %v9981_v58 = vld [vmem:[%s15555_s27 + $0x318] sm:$0xf]  ;;  %v9758_v34 = vor.u32 %v13974_v21, %v9757_v20  ;;  %v8069_v10 = vadd.f32 %v8068_v48, %v17344_v24 }
 0x59d   : > { %v14833_v38 = vld [vmem:[%s15555_s27 + $0x1c54] sm:$0xf]  ;;  %v12666_v43 = vor.u32 %v14697_v26, %v12663_v32  ;;  %8287 = vmatpush.bf16.msrb.mxu1 %v12922_v1  ;;  %v10301_v26 = vld [vmem:[%s15555_s27 + $0x598] sm:$0xf] }
 0x59e   : > { %v13207_v40 = vld [vmem:[%s15555_s27 + $0x1c70] sm:$0xf0]  ;;  %v14110_v32 = vld [vmem:[%s15555_s27 + $0x5b4] sm:$0xf0] }
 0x59f   : > { %v14897_v45 = vld [vmem:[%s15555_s27 + $0x1e54] sm:$0xf]  ;;  %v13210_v59 = vor.u32 %v14833_v38, %v13207_v40  ;;  %8274 = vmatpush.bf16.msrb.mxu0 %v12666_v43  ;;  %v14030_v1 = vld [vmem:[%s15555_s27 + $0x334] sm:$0xf0]  ;;  %v10302_v38 = vor.u32 %v14110_v32, %v10301_v26 }
 0x5a0   : > { %v13463_v9 = vld [vmem:[%s15555_s27 + $0x1e70] sm:$0xf0]  ;;  %8288 = vmatmul.bf16.vlgmr.msrb.gmra.mxu1 %v15925_v0  ;;  %v9725_v40 = vld [vmem:[%s15555_s27 + $0x118] sm:$0xf] }
 0x5a1   : > { %v14825_v57 = vld [vmem:[%s15555_s27 + $0x1c14] sm:$0xf]  ;;  %v13466_v8 = vor.u32 %v14897_v45, %v13463_v9  ;;  %8332 = vmatpush.bf16.msra.mxu1 %v10078_v28  ;;  %8299 = vmatpush.bf16.msrb.mxu2 %v13210_v59  ;;  %v9982_v28 = vor.u32 %v14030_v1, %v9981_v58  ;;  %v10269_v45 = vld [vmem:[%s15555_s27 + $0x558] sm:$0xf]  ;;  %v9726_v59 = vor.u32 %v13966_v37, %v9725_v40 }
 0x5a2   : > { %v13175_v61 = vld [vmem:[%s15555_s27 + $0x1c30] sm:$0xf0]  ;;  %8275 = vmatmul.bf16.vlgmr.msrb.gmra.mxu0 %v15923_v63  ;;  %v14102_v9 = vld [vmem:[%s15555_s27 + $0x574] sm:$0xf0] }
 0x5a3   : > { %v14889_v4 = vld [vmem:[%s15555_s27 + $0x1e14] sm:$0xf]  ;;  %8319 = vmatpush.bf16.msra.mxu0 %v9822_v56  ;;  %v13178_v41 = vor.u32 %v14825_v57, %v13175_v61  ;;  %8312 = vmatpush.bf16.msrb.mxu3 %v13466_v8  ;;  %v10525_v43 = vld [vmem:[%s15555_s27 + $0x758] sm:$0xf]  ;;  %v10270_v55 = vor.u32 %v14102_v9, %v10269_v45  ;;  %v8081_v8 = vpop.f32.mrf.mxu1  ;;  %v8070_v45 = vpop.f32.mrf.mxu0 }
 0x5a4   : > { %v13431_v2 = vld [vmem:[%s15555_s27 + $0x1e30] sm:$0xf0]  ;;  %v14022_v56 = vld [vmem:[%s15555_s27 + $0x2f4] sm:$0xf0]  ;;  %v10526_v61 = vor.u32 %v14166_v54, %v10525_v43 }
 0x5a5   : > { %v13434_v16 = vor.u32 %v14889_v4, %v13431_v2  ;;  %8333 = vmatpush.bf16.msra.mxu1 %v10046_v19  ;;  %8300 = vmatpush.bf16.msrb.mxu2 %v13178_v41  ;;  %v13958_v57 = vld [vmem:[%s15555_s27 + $0xf4] sm:$0xf0]  ;;  %v9950_v4 = vor.u32 %v14022_v56, %v9949_v51 }
 0x5a6   : > { %v10237_v2 = vld [vmem:[%s15555_s27 + $0x518] sm:$0xf] }
 0x5a7   : > { %8320 = vmatpush.bf16.msra.mxu0 %v9790_v13  ;;  %8313 = vmatpush.bf16.msrb.mxu3 %v13434_v16  ;;  %v14094_v19 = vld [vmem:[%s15555_s27 + $0x534] sm:$0xf0]  ;;  %v9694_v13 = vor.u32 %v13958_v57, %v9693_v60 }
 0x5a8   : > { %8301 = vmatmul.bf16.vlgmr.msrb.gmra.mxu2 %v15943_v31  ;;  %v10493_v5 = vld [vmem:[%s15555_s27 + $0x718] sm:$0xf]  ;;  %v10238_v41 = vor.u32 %v14094_v19, %v10237_v2 }
 0x5a9   : > { %8345 = vmatpush.bf16.msra.mxu2 %v10334_v18  ;;  %8334 = vmatpush.bf16.msra.mxu1 %v10014_v25  ;;  %v9917_v36 = vld [vmem:[%s15555_s27 + $0x298] sm:$0xf]  ;;  %v8082_v18 = vadd.f32 %v8081_v8, %v8069_v10  ;;  %v10494_v20 = vor.u32 %v14158_v7, %v10493_v5 }
 0x5aa   : > { %8314 = vmatmul.bf16.vlgmr.msrb.gmra.mxu3 %v15947_v35  ;;  %v14014_v42 = vld [vmem:[%s15555_s27 + $0x2b4] sm:$0xf0] }
 0x5ab   : > { %8358 = vmatpush.bf16.msra.mxu3 %v10590_v30  ;;  %8321 = vmatpush.bf16.msra.mxu0 %v9758_v34  ;;  %v9661_v14 = vld [vmem:[%s15555_s27 + $0x98] sm:$0xf]  ;;  %v9918_v21 = vor.u32 %v14014_v42, %v9917_v36  ;;  %v8083_v34 = vpop.f32.mrf.mxu1  ;;  %v8107_v36 = vpop.f32.mrf.mxu3 }
 0x5ac   : > { %v13950_v16 = vld [vmem:[%s15555_s27 + $0xb4] sm:$0xf0] }
 0x5ad   : > { %8346 = vmatpush.bf16.msra.mxu2 %v10302_v38  ;;  %8335 = vmatpush.bf16.msra.mxu1 %v9982_v28  ;;  %v10205_v62 = vld [vmem:[%s15555_s27 + $0x4d8] sm:$0xf]  ;;  %v9662_v23 = vor.u32 %v13950_v16, %v9661_v14 }
 0x5ae   : > { %v14086_v30 = vld [vmem:[%s15555_s27 + $0x4f4] sm:$0xf0] }
 0x5af   : > { %8359 = vmatpush.bf16.msra.mxu3 %v10558_v44  ;;  %8322 = vmatpush.bf16.msra.mxu0 %v9726_v59  ;;  %v10461_v25 = vld [vmem:[%s15555_s27 + $0x6d8] sm:$0xf]  ;;  %v10206_v33 = vor.u32 %v14086_v30, %v10205_v62 }
 0x5b0   : > { %v14150_v24 = vld [vmem:[%s15555_s27 + $0x6f4] sm:$0xf0] }
 0x5b1   : > { %8347 = vmatpush.bf16.msra.mxu2 %v10270_v55  ;;  %8336 = vmatpush.bf16.msra.mxu1 %v9950_v4  ;;  %v9885_v26 = vld [vmem:[%s15555_s27 + $0x258] sm:$0xf]  ;;  %v10462_v38 = vor.u32 %v14150_v24, %v10461_v25 }
 0x5b2   : > { %v14006_v32 = vld [vmem:[%s15555_s27 + $0x274] sm:$0xf0] }
 0x5b3   : > { %8360 = vmatpush.bf16.msra.mxu3 %v10526_v61  ;;  %8323 = vmatpush.bf16.msra.mxu0 %v9694_v13  ;;  %v9629_v58 = vld [vmem:[%s15555_s27 + $0x58] sm:$0xf]  ;;  %v9886_v40 = vor.u32 %v14006_v32, %v9885_v26  ;;  %v8094_v61 = vpop.f32.mrf.mxu2 }
 0x5b4   : > { %v13942_v1 = vld [vmem:[%s15555_s27 + $0x74] sm:$0xf0]  ;;  %v8095_v7 = vadd.f32 %v8094_v61, %v8082_v18 }
 0x5b5   : > { %8348 = vmatpush.bf16.msra.mxu2 %v10238_v41  ;;  %8337 = vmatpush.bf16.msra.mxu1 %v9918_v21  ;;  %v10173_v37 = vld [vmem:[%s15555_s27 + $0x498] sm:$0xf]  ;;  %v9630_v51 = vor.u32 %v13942_v1, %v9629_v58 }
 0x5b6   : > { %v14078_v44 = vld [vmem:[%s15555_s27 + $0x4b4] sm:$0xf0] }
 0x5b7   : > { %8361 = vmatpush.bf16.msra.mxu3 %v10494_v20  ;;  %v10429_v28 = vld [vmem:[%s15555_s27 + $0x698] sm:$0xf]  ;;  %8324 = vmatpush.bf16.msra.mxu0 %v9662_v23  ;;  %v10174_v55 = vor.u32 %v14078_v44, %v10173_v37  ;;  %v17415_v20 = vadd.f32 %v8107_v36, %v8095_v7 }
 0x5b8   : > { %v14142_v9 = vld [vmem:[%s15555_s27 + $0x6b4] sm:$0xf0] }
 0x5b9   : > { %v9853_v43 = vld [vmem:[%s15555_s27 + $0x218] sm:$0xf]  ;;  %8349 = vmatpush.bf16.msra.mxu2 %v10206_v33  ;;  %8338 = vmatpush.bf16.msra.mxu1 %v9886_v40  ;;  %v10430_v4 = vor.u32 %v14142_v9, %v10429_v28 }
 0x5ba   : > { %v13998_v54 = vld [vmem:[%s15555_s27 + $0x234] sm:$0xf0] }
 0x5bb   : > { %v11101_v56 = vld [vmem:[%s15555_s27 + $0xbd8] sm:$0xf]  ;;  %8362 = vmatpush.bf16.msra.mxu3 %v10462_v38  ;;  %v9854_v2 = vor.u32 %v13998_v54, %v9853_v43  ;;  %8325 = vmatpush.bf16.msra.mxu0 %v9630_v51  ;;  %v8096_v45 = vpop.f32.mrf.mxu2 }
 0x5bc   : > { %v14310_v59 = vld [vmem:[%s15555_s27 + $0xbf4] sm:$0xf0] }
 0x5bd   : > { %v9597_v60 = vld [vmem:[%s15555_s27 + $0x18] sm:$0xf]  ;;  %v11102_v42 = vor.u32 %v14310_v59, %v11101_v56  ;;  %8350 = vmatpush.bf16.msra.mxu2 %v10174_v55  ;;  %8339 = vmatpush.bf16.msra.mxu1 %v9854_v2  ;;  %v8109_v56 = vpop.f32.mrf.mxu3 }
 0x5be   : > { %v13934_v57 = vld [vmem:[%s15555_s27 + $0x34] sm:$0xf0] }
 0x5bf   : > { %v10845_v8 = vld [vmem:[%s15555_s27 + $0x9d8] sm:$0xf]  ;;  %v9598_v41 = vor.u32 %v13934_v57, %v9597_v60  ;;  %8363 = vmatpush.bf16.msra.mxu3 %v10430_v4 }
 0x5c0   : > { %v14246_v19 = vld [vmem:[%s15555_s27 + $0x9f4] sm:$0xf0]  ;;  %8340 = vmatmul.bf16.vlgmr.msra.gmra.mxu1 %v15754_v12 }
 0x5c1   : > { %v10141_v5 = vld [vmem:[%s15555_s27 + $0x458] sm:$0xf]  ;;  %v10846_v21 = vor.u32 %v14246_v19, %v10845_v8  ;;  %8384 = vmatpush.bf16.msrb.mxu1 %v11102_v42  ;;  %8326 = vmatpush.bf16.msra.mxu0 %v9598_v41 }
 0x5c2   : > { %v14070_v48 = vld [vmem:[%s15555_s27 + $0x474] sm:$0xf0] }
 0x5c3   : > { %v10397_v10 = vld [vmem:[%s15555_s27 + $0x658] sm:$0xf]  ;;  %v10142_v62 = vor.u32 %v14070_v48, %v10141_v5 }
 0x5c4   : > { %v14134_v13 = vld [vmem:[%s15555_s27 + $0x674] sm:$0xf0]  ;;  %8327 = vmatmul.bf16.vlgmr.msra.gmra.mxu0 %v15752_v11 }
 0x5c5   : > { %v11069_v14 = vld [vmem:[%s15555_s27 + $0xb98] sm:$0xf]  ;;  %v10398_v24 = vor.u32 %v14134_v13, %v10397_v10  ;;  %8371 = vmatpush.bf16.msrb.mxu0 %v10846_v21  ;;  %8351 = vmatpush.bf16.msra.mxu2 %v10142_v62  ;;  %v15126_v62 = vld [vmem:[%s16078_s29] sm:$0xff] }
 0x5c6   : > { %v14302_v16 = vld [vmem:[%s15555_s27 + $0xbb4] sm:$0xf0] }
 0x5c7   : > { %v10813_v18 = vld [vmem:[%s15555_s27 + $0x998] sm:$0xf]  ;;  %v11070_v33 = vor.u32 %v14302_v16, %v11069_v14  ;;  %8364 = vmatpush.bf16.msra.mxu3 %v10398_v24 }
 0x5c8   : > { %v14238_v30 = vld [vmem:[%s15555_s27 + $0x9b4] sm:$0xf0] }
 0x5c9   : > { %v10109_v25 = vld [vmem:[%s15555_s27 + $0x418] sm:$0xf]  ;;  %v10814_v44 = vor.u32 %v14238_v30, %v10813_v18  ;;  %8385 = vmatpush.bf16.msrb.mxu1 %v11070_v33  ;;  %v1884_v18 = vperm.slane %v15126_v62, 5 }
 0x5ca   : > { %v14062_v26 = vld [vmem:[%s15555_s27 + $0x434] sm:$0xf0] }
 0x5cb   : > { %v10365_v32 = vld [vmem:[%s15555_s27 + $0x618] sm:$0xf]  ;;  %v10110_v28 = vor.u32 %v14062_v26, %v10109_v25  ;;  %8372 = vmatpush.bf16.msrb.mxu0 %v10814_v44 }
 0x5cc   : > { %v14126_v23 = vld [vmem:[%s15555_s27 + $0x634] sm:$0xf0] }
 0x5cd   : > { %v11357_v58 = vld [vmem:[%s15555_s27 + $0xdd8] sm:$0xf]  ;;  %v10366_v9 = vor.u32 %v14126_v23, %v10365_v32  ;;  %8352 = vmatpush.bf16.msra.mxu2 %v10110_v28  ;;  %v8133_v32 = vpop.f32.mrf.mxu1 }
 0x5ce   : > { %v14374_v1 = vld [vmem:[%s15555_s27 + $0xdf4] sm:$0xf0] }
 0x5cf   : > { %v11613_v34 = vld [vmem:[%s15555_s27 + $0xfd8] sm:$0xf]  ;;  %v11358_v43 = vor.u32 %v14374_v1, %v11357_v58  ;;  %8365 = vmatpush.bf16.msra.mxu3 %v10366_v9 }
 0x5d0   : > { %v14438_v38 = vld [vmem:[%s15555_s27 + $0xff4] sm:$0xf0]  ;;  %8353 = vmatmul.bf16.vlgmr.msra.gmra.mxu2 %v15773_v46 }
 0x5d1   : > { %v11037_v40 = vld [vmem:[%s15555_s27 + $0xb58] sm:$0xf]  ;;  %v11614_v59 = vor.u32 %v14438_v38, %v11613_v34  ;;  %8397 = vmatpush.bf16.msrb.mxu2 %v11358_v43  ;;  %v8120_v38 = vpop.f32.mrf.mxu0 }
 0x5d2   : > { %v14294_v37 = vld [vmem:[%s15555_s27 + $0xb74] sm:$0xf0]  ;;  %8366 = vmatmul.bf16.vlgmr.msra.gmra.mxu3 %v15775_v47  ;;  %v8121_v28 = vadd.f32 %v8120_v38, %v1884_v18 }
 0x5d3   : > { %v10781_v54 = vld [vmem:[%s15555_s27 + $0x958] sm:$0xf]  ;;  %v11038_v55 = vor.u32 %v14294_v37, %v11037_v40  ;;  %8410 = vmatpush.bf16.msrb.mxu3 %v11614_v59 }
 0x5d4   : > { %v14230_v51 = vld [vmem:[%s15555_s27 + $0x974] sm:$0xf0] }
 0x5d5   : > { %v11325_v60 = vld [vmem:[%s15555_s27 + $0xd98] sm:$0xf]  ;;  %v10782_v19 = vor.u32 %v14230_v51, %v10781_v54  ;;  %8386 = vmatpush.bf16.msrb.mxu1 %v11038_v55  ;;  %v8134_v51 = vadd.f32 %v8133_v32, %v8121_v28 }
 0x5d6   : > { %v14366_v57 = vld [vmem:[%s15555_s27 + $0xdb4] sm:$0xf0] }
 0x5d7   : > { %v11581_v8 = vld [vmem:[%s15555_s27 + $0xf98] sm:$0xf]  ;;  %v11326_v5 = vor.u32 %v14366_v57, %v11325_v60  ;;  %8373 = vmatpush.bf16.msrb.mxu0 %v10782_v19 }
 0x5d8   : > { %v14430_v61 = vld [vmem:[%s15555_s27 + $0xfb4] sm:$0xf0] }
 0x5d9   : > { %v11005_v4 = vld [vmem:[%s15555_s27 + $0xb18] sm:$0xf]  ;;  %v11582_v36 = vor.u32 %v14430_v61, %v11581_v8  ;;  %8398 = vmatpush.bf16.msrb.mxu2 %v11326_v5 }
 0x5da   : > { %v14286_v2 = vld [vmem:[%s15555_s27 + $0xb34] sm:$0xf0] }
 0x5db   : > { %v10749_v48 = vld [vmem:[%s15555_s27 + $0x918] sm:$0xf]  ;;  %v11006_v42 = vor.u32 %v14286_v2, %v11005_v4  ;;  %8411 = vmatpush.bf16.msrb.mxu3 %v11582_v36 }
 0x5dc   : > { %v14222_v7 = vld [vmem:[%s15555_s27 + $0x934] sm:$0xf0] }
 0x5dd   : > { %v11293_v10 = vld [vmem:[%s15555_s27 + $0xd58] sm:$0xf]  ;;  %v10750_v30 = vor.u32 %v14222_v7, %v10749_v48  ;;  %8387 = vmatpush.bf16.msrb.mxu1 %v11006_v42  ;;  %v8135_v7 = vpop.f32.mrf.mxu1 }
 0x5de   : > { %v14358_v13 = vld [vmem:[%s15555_s27 + $0xd74] sm:$0xf0] }
 0x5df   : > { %v11549_v41 = vld [vmem:[%s15555_s27 + $0xf58] sm:$0xf]  ;;  %v11294_v25 = vor.u32 %v14358_v13, %v11293_v10  ;;  %8374 = vmatpush.bf16.msrb.mxu0 %v10750_v30 }
 0x5e0   : > { %v14422_v14 = vld [vmem:[%s15555_s27 + $0xf74] sm:$0xf0] }
 0x5e1   : > { %v10973_v16 = vld [vmem:[%s15555_s27 + $0xad8] sm:$0xf]  ;;  %v11550_v23 = vor.u32 %v14422_v14, %v11549_v41  ;;  %8399 = vmatpush.bf16.msrb.mxu2 %v11294_v25  ;;  %v8122_v14 = vpop.f32.mrf.mxu0 }
 0x5e2   : > { %v14278_v21 = vld [vmem:[%s15555_s27 + $0xaf4] sm:$0xf0] }
 0x5e3   : > { %v10717_v24 = vld [vmem:[%s15555_s27 + $0x8d8] sm:$0xf]  ;;  %v10974_v33 = vor.u32 %v14278_v21, %v10973_v16  ;;  %8412 = vmatpush.bf16.msrb.mxu3 %v11550_v23 }
 0x5e4   : > { %v14214_v26 = vld [vmem:[%s15555_s27 + $0x8f4] sm:$0xf0] }
 0x5e5   : > { %v11261_v58 = vld [vmem:[%s15555_s27 + $0xd18] sm:$0xf]  ;;  %v10718_v45 = vor.u32 %v14214_v26, %v10717_v24  ;;  %8388 = vmatpush.bf16.msrb.mxu1 %v10974_v33  ;;  %v8146_v33 = vpop.f32.mrf.mxu2 }
 0x5e6   : > { %v14350_v1 = vld [vmem:[%s15555_s27 + $0xd34] sm:$0xf0] }
 0x5e7   : > { %v11517_v34 = vld [vmem:[%s15555_s27 + $0xf18] sm:$0xf]  ;;  %v11262_v9 = vor.u32 %v14350_v1, %v11261_v58  ;;  %8375 = vmatpush.bf16.msrb.mxu0 %v10718_v45 }
 0x5e8   : > { %v14414_v40 = vld [vmem:[%s15555_s27 + $0xf34] sm:$0xf0] }
 0x5e9   : > { %v10941_v37 = vld [vmem:[%s15555_s27 + $0xa98] sm:$0xf]  ;;  %v11518_v56 = vor.u32 %v14414_v40, %v11517_v34  ;;  %8400 = vmatpush.bf16.msrb.mxu2 %v11262_v9 }
 0x5ea   : > { %v14270_v44 = vld [vmem:[%s15555_s27 + $0xab4] sm:$0xf0] }
 0x5eb   : > { %v10685_v43 = vld [vmem:[%s15555_s27 + $0x898] sm:$0xf]  ;;  %v10942_v59 = vor.u32 %v14270_v44, %v10941_v37  ;;  %8413 = vmatpush.bf16.msrb.mxu3 %v11518_v56  ;;  %v8147_v37 = vadd.f32 %v8146_v33, %v8134_v51  ;;  %v8159_v44 = vpop.f32.mrf.mxu3 }
 0x5ec   : > { %v14206_v54 = vld [vmem:[%s15555_s27 + $0x8b4] sm:$0xf0] }
 0x5ed   : > { %v11229_v55 = vld [vmem:[%s15555_s27 + $0xcd8] sm:$0xf]  ;;  %v10686_v2 = vor.u32 %v14206_v54, %v10685_v43  ;;  %8389 = vmatpush.bf16.msrb.mxu1 %v10942_v59  ;;  %v17486_v59 = vadd.f32 %v8159_v44, %v8147_v37 }
 0x5ee   : > { %v14342_v60 = vld [vmem:[%s15555_s27 + $0xcf4] sm:$0xf0] }
 0x5ef   : > { %v11485_v57 = vld [vmem:[%s15555_s27 + $0xed8] sm:$0xf]  ;;  %v11230_v19 = vor.u32 %v14342_v60, %v11229_v55  ;;  %8376 = vmatpush.bf16.msrb.mxu0 %v10686_v2 }
 0x5f0   : > { %v14406_v8 = vld [vmem:[%s15555_s27 + $0xef4] sm:$0xf0] }
 0x5f1   : > { %v10909_v61 = vld [vmem:[%s15555_s27 + $0xa58] sm:$0xf]  ;;  %v11486_v36 = vor.u32 %v14406_v8, %v11485_v57  ;;  %8401 = vmatpush.bf16.msrb.mxu2 %v11230_v19 }
 0x5f2   : > { %v14262_v4 = vld [vmem:[%s15555_s27 + $0xa74] sm:$0xf0] }
 0x5f3   : > { %v10653_v5 = vld [vmem:[%s15555_s27 + $0x858] sm:$0xf]  ;;  %v10910_v42 = vor.u32 %v14262_v4, %v10909_v61  ;;  %8414 = vmatpush.bf16.msrb.mxu3 %v11486_v36 }
 0x5f4   : > { %v14198_v48 = vld [vmem:[%s15555_s27 + $0x874] sm:$0xf0] }
 0x5f5   : > { %v11197_v10 = vld [vmem:[%s15555_s27 + $0xc98] sm:$0xf]  ;;  %v10654_v18 = vor.u32 %v14198_v48, %v10653_v5  ;;  %8390 = vmatpush.bf16.msrb.mxu1 %v10910_v42 }
 0x5f6   : > { %v14334_v13 = vld [vmem:[%s15555_s27 + $0xcb4] sm:$0xf0] }
 0x5f7   : > { %v11453_v41 = vld [vmem:[%s15555_s27 + $0xe98] sm:$0xf]  ;;  %v11198_v24 = vor.u32 %v14334_v13, %v11197_v10  ;;  %8377 = vmatpush.bf16.msrb.mxu0 %v10654_v18 }
 0x5f8   : > { %v14398_v16 = vld [vmem:[%s15555_s27 + $0xeb4] sm:$0xf0] }
 0x5f9   : > { %v10877_v21 = vld [vmem:[%s15555_s27 + $0xa18] sm:$0xf]  ;;  %v11454_v58 = vor.u32 %v14398_v16, %v11453_v41  ;;  %8402 = vmatpush.bf16.msrb.mxu2 %v11198_v24  ;;  %v8148_v16 = vpop.f32.mrf.mxu2 }
 0x5fa   : > { %v14254_v62 = vld [vmem:[%s15555_s27 + $0xa34] sm:$0xf0] }
 0x5fb   : > { %v12125_v30 = vld [vmem:[%s15555_s27 + $0x13d8] sm:$0xf]  ;;  %v10878_v1 = vor.u32 %v14254_v62, %v10877_v21  ;;  %8415 = vmatpush.bf16.msrb.mxu3 %v11454_v58 }
 0x5fc   : > { %v14566_v25 = vld [vmem:[%s15555_s27 + $0x13f4] sm:$0xf0] }
 0x5fd   : > { %v10621_v26 = vld [vmem:[%s15555_s27 + $0x818] sm:$0xf]  ;;  %v12126_v28 = vor.u32 %v14566_v25, %v12125_v30  ;;  %8391 = vmatpush.bf16.msrb.mxu1 %v10878_v1  ;;  %v8161_v25 = vpop.f32.mrf.mxu3 }
 0x5fe   : > { %v14190_v32 = vld [vmem:[%s15555_s27 + $0x834] sm:$0xf0] }
 0x5ff   : > { %v11869_v23 = vld [vmem:[%s15555_s27 + $0x11d8] sm:$0xf]  ;;  %v10622_v43 = vor.u32 %v14190_v32, %v10621_v26 }
 0x600   : > { %v14502_v34 = vld [vmem:[%s15555_s27 + $0x11f4] sm:$0xf0]  ;;  %8392 = vmatmul.bf16.vlgmr.msrb.gmra.mxu1 %v15799_v27 }
 0x601   : > { %v11165_v38 = vld [vmem:[%s15555_s27 + $0xc58] sm:$0xf]  ;;  %v11870_v55 = vor.u32 %v14502_v34, %v11869_v23  ;;  %8436 = vmatpush.bf16.msra.mxu1 %v12126_v28  ;;  %8378 = vmatpush.bf16.msrb.mxu0 %v10622_v43 }
 0x602   : > { %v14326_v40 = vld [vmem:[%s15555_s27 + $0xc74] sm:$0xf0] }
 0x603   : > { %v11421_v45 = vld [vmem:[%s15555_s27 + $0xe58] sm:$0xf]  ;;  %v11166_v60 = vor.u32 %v14326_v40, %v11165_v38 }
 0x604   : > { %v14390_v9 = vld [vmem:[%s15555_s27 + $0xe74] sm:$0xf0]  ;;  %8379 = vmatmul.bf16.vlgmr.msrb.gmra.mxu0 %v15795_v22 }
 0x605   : > { %v12093_v54 = vld [vmem:[%s15555_s27 + $0x1398] sm:$0xf]  ;;  %v11422_v61 = vor.u32 %v14390_v9, %v11421_v45  ;;  %8423 = vmatpush.bf16.msra.mxu0 %v11870_v55  ;;  %8403 = vmatpush.bf16.msrb.mxu2 %v11166_v60 }
 0x606   : > { %v14558_v56 = vld [vmem:[%s15555_s27 + $0x13b4] sm:$0xf0] }
 0x607   : > { %v11837_v51 = vld [vmem:[%s15555_s27 + $0x1198] sm:$0xf]  ;;  %v12094_v5 = vor.u32 %v14558_v56, %v12093_v54  ;;  %8416 = vmatpush.bf16.msrb.mxu3 %v11422_v61 }
 0x608   : > { %v14494_v57 = vld [vmem:[%s15555_s27 + $0x11b4] sm:$0xf0] }
 0x609   : > { %v11133_v8 = vld [vmem:[%s15555_s27 + $0xc18] sm:$0xf]  ;;  %v11838_v41 = vor.u32 %v14494_v57, %v11837_v51  ;;  %8437 = vmatpush.bf16.msra.mxu1 %v12094_v5 }
 0x60a   : > { %v14318_v4 = vld [vmem:[%s15555_s27 + $0xc34] sm:$0xf0] }
 0x60b   : > { %v11389_v2 = vld [vmem:[%s15555_s27 + $0xe18] sm:$0xf]  ;;  %v11134_v14 = vor.u32 %v14318_v4, %v11133_v8  ;;  %8424 = vmatpush.bf16.msra.mxu0 %v11838_v41  ;;  %v8185_v4 = vpop.f32.mrf.mxu1 }
 0x60c   : > { %v14382_v19 = vld [vmem:[%s15555_s27 + $0xe34] sm:$0xf0] }
 0x60d   : > { %v12381_v48 = vld [vmem:[%s15555_s27 + $0x15d8] sm:$0xf]  ;;  %v11390_v21 = vor.u32 %v14382_v19, %v11389_v2  ;;  %8404 = vmatpush.bf16.msrb.mxu2 %v11134_v14 }
 0x60e   : > { %v14630_v7 = vld [vmem:[%s15555_s27 + $0x15f4] sm:$0xf0] }
 0x60f   : > { %v12637_v36 = vld [vmem:[%s15555_s27 + $0x17d8] sm:$0xf]  ;;  %v12382_v62 = vor.u32 %v14630_v7, %v12381_v48  ;;  %8417 = vmatpush.bf16.msrb.mxu3 %v11390_v21 }
 0x610   : > { %v14694_v42 = vld [vmem:[%s15555_s27 + $0x17f4] sm:$0xf0]  ;;  %8405 = vmatmul.bf16.vlgmr.msrb.gmra.mxu2 %v15813_v52 }
 0x611   : > { %v12061_v10 = vld [vmem:[%s15555_s27 + $0x1358] sm:$0xf]  ;;  %v12638_v24 = vor.u32 %v14694_v42, %v12637_v36  ;;  %8449 = vmatpush.bf16.msra.mxu2 %v12382_v62  ;;  %v8172_v36 = vpop.f32.mrf.mxu0 }
 0x612   : > { %v14550_v13 = vld [vmem:[%s15555_s27 + $0x1374] sm:$0xf0]  ;;  %8418 = vmatmul.bf16.vlgmr.msrb.gmra.mxu3 %v15815_v53  ;;  %v8173_v41 = vadd.f32 %v8172_v36, %v17486_v59 }
 0x613   : > { %v11805_v18 = vld [vmem:[%s15555_s27 + $0x1158] sm:$0xf]  ;;  %v12062_v26 = vor.u32 %v14550_v13, %v12061_v10  ;;  %8462 = vmatpush.bf16.msra.mxu3 %v12638_v24 }
 0x614   : > { %v14486_v30 = vld [vmem:[%s15555_s27 + $0x1174] sm:$0xf0] }
 0x615   : > { %v12349_v32 = vld [vmem:[%s15555_s27 + $0x1598] sm:$0xf]  ;;  %v11806_v38 = vor.u32 %v14486_v30, %v11805_v18  ;;  %8438 = vmatpush.bf16.msra.mxu1 %v12062_v26  ;;  %v8186_v18 = vadd.f32 %v8185_v4, %v8173_v41 }
 0x616   : > { %v14622_v23 = vld [vmem:[%s15555_s27 + $0x15b4] sm:$0xf0] }
 0x617   : > { %v12605_v33 = vld [vmem:[%s15555_s27 + $0x1798] sm:$0xf]  ;;  %v12350_v40 = vor.u32 %v14622_v23, %v12349_v32  ;;  %8425 = vmatpush.bf16.msra.mxu0 %v11806_v38 }
 0x618   : > { %v14686_v58 = vld [vmem:[%s15555_s27 + $0x17b4] sm:$0xf0] }
 0x619   : > { %v12029_v1 = vld [vmem:[%s15555_s27 + $0x1318] sm:$0xf]  ;;  %v12606_v28 = vor.u32 %v14686_v58, %v12605_v33  ;;  %8450 = vmatpush.bf16.msra.mxu2 %v12350_v40  ;;  %v8187_v40 = vpop.f32.mrf.mxu1 }
 0x61a   : > { %v14542_v34 = vld [vmem:[%s15555_s27 + $0x1334] sm:$0xf0] }
 0x61b   : > { %v11773_v37 = vld [vmem:[%s15555_s27 + $0x1118] sm:$0xf]  ;;  %v12030_v45 = vor.u32 %v14542_v34, %v12029_v1  ;;  %8463 = vmatpush.bf16.msra.mxu3 %v12606_v28 }
 0x61c   : > { %v14478_v44 = vld [vmem:[%s15555_s27 + $0x1134] sm:$0xf0] }
 0x61d   : > { %v12317_v9 = vld [vmem:[%s15555_s27 + $0x1558] sm:$0xf]  ;;  %v11774_v51 = vor.u32 %v14478_v44, %v11773_v37  ;;  %8439 = vmatpush.bf16.msra.mxu1 %v12030_v45 }
 0x61e   : > { %v14614_v43 = vld [vmem:[%s15555_s27 + $0x1574] sm:$0xf0] }
 0x61f   : > { %v12573_v54 = vld [vmem:[%s15555_s27 + $0x1758] sm:$0xf]  ;;  %v12318_v57 = vor.u32 %v14614_v43, %v12317_v9  ;;  %8426 = vmatpush.bf16.msra.mxu0 %v11774_v51  ;;  %v8174_v43 = vpop.f32.mrf.mxu0 }
 0x620   : > { %v14678_v56 = vld [vmem:[%s15555_s27 + $0x1774] sm:$0xf0] }
 0x621   : > { %v11997_v55 = vld [vmem:[%s15555_s27 + $0x12d8] sm:$0xf]  ;;  %v12574_v2 = vor.u32 %v14678_v56, %v12573_v54  ;;  %8451 = vmatpush.bf16.msra.mxu2 %v12318_v57 }
 0x622   : > { %v14534_v60 = vld [vmem:[%s15555_s27 + $0x12f4] sm:$0xf0] }
 0x623   : > { %v11741_v8 = vld [vmem:[%s15555_s27 + $0x10d8] sm:$0xf]  ;;  %v11998_v19 = vor.u32 %v14534_v60, %v11997_v55  ;;  %8464 = vmatpush.bf16.msra.mxu3 %v12574_v2 }
 0x624   : > { %v14470_v61 = vld [vmem:[%s15555_s27 + $0x10f4] sm:$0xf0] }
 0x625   : > { %v12285_v5 = vld [vmem:[%s15555_s27 + $0x1518] sm:$0xf]  ;;  %v11742_v14 = vor.u32 %v14470_v61, %v11741_v8  ;;  %8440 = vmatpush.bf16.msra.mxu1 %v11998_v19  ;;  %v8198_v19 = vpop.f32.mrf.mxu2 }
 0x626   : > { %v14606_v48 = vld [vmem:[%s15555_s27 + $0x1534] sm:$0xf0] }
 0x627   : > { %v12541_v7 = vld [vmem:[%s15555_s27 + $0x1718] sm:$0xf]  ;;  %v12286_v16 = vor.u32 %v14606_v48, %v12285_v5  ;;  %8427 = vmatpush.bf16.msra.mxu0 %v11742_v14 }
 0x628   : > { %v14670_v42 = vld [vmem:[%s15555_s27 + $0x1734] sm:$0xf0] }
 0x629   : > { %v11965_v10 = vld [vmem:[%s15555_s27 + $0x1298] sm:$0xf]  ;;  %v12542_v30 = vor.u32 %v14670_v42, %v12541_v7  ;;  %8452 = vmatpush.bf16.msra.mxu2 %v12286_v16 }
 0x62a   : > { %v14526_v13 = vld [vmem:[%s15555_s27 + $0x12b4] sm:$0xf0] }
 0x62b   : > { %v11709_v21 = vld [vmem:[%s15555_s27 + $0x1098] sm:$0xf]  ;;  %v11966_v25 = vor.u32 %v14526_v13, %v11965_v10  ;;  %8465 = vmatpush.bf16.msra.mxu3 %v12542_v30  ;;  %v8199_v10 = vadd.f32 %v8198_v19, %v8186_v18  ;;  %v8211_v13 = vpop.f32.mrf.mxu3 }
 0x62c   : > { %v14462_v62 = vld [vmem:[%s15555_s27 + $0x10b4] sm:$0xf0] }
 0x62d   : > { %v12253_v24 = vld [vmem:[%s15555_s27 + $0x14d8] sm:$0xf]  ;;  %v11710_v58 = vor.u32 %v14462_v62, %v11709_v21  ;;  %8441 = vmatpush.bf16.msra.mxu1 %v11966_v25  ;;  %v17557_v25 = vadd.f32 %v8211_v13, %v8199_v10 }
 0x62e   : > { %v14598_v26 = vld [vmem:[%s15555_s27 + $0x14f4] sm:$0xf0] }
 0x62f   : > { %v12509_v32 = vld [vmem:[%s15555_s27 + $0x16d8] sm:$0xf]  ;;  %v12254_v1 = vor.u32 %v14598_v26, %v12253_v24  ;;  %8428 = vmatpush.bf16.msra.mxu0 %v11710_v58 }
 0x630   : > { %v14662_v59 = vld [vmem:[%s15555_s27 + $0x16f4] sm:$0xf0] }
 0x631   : > { %v11933_v23 = vld [vmem:[%s15555_s27 + $0x1258] sm:$0xf]  ;;  %v12510_v37 = vor.u32 %v14662_v59, %v12509_v32  ;;  %8453 = vmatpush.bf16.msra.mxu2 %v12254_v1 }
 0x632   : > { %v14518_v33 = vld [vmem:[%s15555_s27 + $0x1274] sm:$0xf0] }
 0x633   : > { %v11677_v34 = vld [vmem:[%s15555_s27 + $0x1058] sm:$0xf]  ;;  %v11934_v44 = vor.u32 %v14518_v33, %v11933_v23  ;;  %8466 = vmatpush.bf16.msra.mxu3 %v12510_v37 }
 0x634   : > { %v14454_v38 = vld [vmem:[%s15555_s27 + $0x1074] sm:$0xf0] }
 0x635   : > { %v12221_v28 = vld [vmem:[%s15555_s27 + $0x1498] sm:$0xf]  ;;  %v11678_v60 = vor.u32 %v14454_v38, %v11677_v34  ;;  %8442 = vmatpush.bf16.msra.mxu1 %v11934_v44 }
 0x636   : > { %v14590_v45 = vld [vmem:[%s15555_s27 + $0x14b4] sm:$0xf0] }
 0x637   : > { %v12477_v9 = vld [vmem:[%s15555_s27 + $0x1698] sm:$0xf]  ;;  %v12222_v8 = vor.u32 %v14590_v45, %v12221_v28  ;;  %8429 = vmatpush.bf16.msra.mxu0 %v11678_v60 }
 0x638   : > { %v14654_v54 = vld [vmem:[%s15555_s27 + $0x16b4] sm:$0xf0] }
 0x639   : > { %v11901_v56 = vld [vmem:[%s15555_s27 + $0x1218] sm:$0xf]  ;;  %v12478_v5 = vor.u32 %v14654_v54, %v12477_v9  ;;  %8454 = vmatpush.bf16.msra.mxu2 %v12222_v8  ;;  %v8200_v54 = vpop.f32.mrf.mxu2 }
 0x63a   : > { %v14510_v55 = vld [vmem:[%s15555_s27 + $0x1234] sm:$0xf0] }
 0x63b   : > { %v13149_v51 = vld [vmem:[%s15555_s27 + $0x1bd8] sm:$0xf]  ;;  %v11902_v48 = vor.u32 %v14510_v55, %v11901_v56  ;;  %8467 = vmatpush.bf16.msra.mxu3 %v12478_v5 }
 0x63c   : > { %v14822_v57 = vld [vmem:[%s15555_s27 + $0x1bf4] sm:$0xf0] }
 0x63d   : > { %v11645_v61 = vld [vmem:[%s15555_s27 + $0x1018] sm:$0xf]  ;;  %v13150_v41 = vor.u32 %v14822_v57, %v13149_v51  ;;  %8443 = vmatpush.bf16.msra.mxu1 %v11902_v48  ;;  %v8213_v57 = vpop.f32.mrf.mxu3 }
 0x63e   : > { %v14446_v4 = vld [vmem:[%s15555_s27 + $0x1034] sm:$0xf0] }
 0x63f   : > { %v12893_v2 = vld [vmem:[%s15555_s27 + $0x19d8] sm:$0xf]  ;;  %v11646_v21 = vor.u32 %v14446_v4, %v11645_v61 }
 0x640   : > { %v14758_v7 = vld [vmem:[%s15555_s27 + $0x19f4] sm:$0xf0]  ;;  %8444 = vmatmul.bf16.vlgmr.msra.gmra.mxu1 %v15851_v49 }
 0x641   : > { %v12189_v36 = vld [vmem:[%s15555_s27 + $0x1458] sm:$0xf]  ;;  %v12894_v24 = vor.u32 %v14758_v7, %v12893_v2  ;;  %8488 = vmatpush.bf16.msrb.mxu1 %v13150_v41  ;;  %8430 = vmatpush.bf16.msra.mxu0 %v11646_v21 }
 0x642   : > { %v14582_v42 = vld [vmem:[%s15555_s27 + $0x1474] sm:$0xf0] }
 0x643   : > { %v12445_v14 = vld [vmem:[%s15555_s27 + $0x1658] sm:$0xf]  ;;  %v12190_v26 = vor.u32 %v14582_v42, %v12189_v36 }
 0x644   : > { %v14646_v16 = vld [vmem:[%s15555_s27 + $0x1674] sm:$0xf0]  ;;  %8431 = vmatmul.bf16.vlgmr.msra.gmra.mxu0 %v15843_v39 }
 0x645   : > { %v13117_v62 = vld [vmem:[%s15555_s27 + $0x1b98] sm:$0xf]  ;;  %v12446_v23 = vor.u32 %v14646_v16, %v12445_v14  ;;  %8475 = vmatpush.bf16.msrb.mxu0 %v12894_v24  ;;  %8455 = vmatpush.bf16.msra.mxu2 %v12190_v26 }
 0x646   : > { %v14814_v30 = vld [vmem:[%s15555_s27 + $0x1bb4] sm:$0xf0] }
 0x647   : > { %v12861_v18 = vld [vmem:[%s15555_s27 + $0x1998] sm:$0xf]  ;;  %v13118_v34 = vor.u32 %v14814_v30, %v13117_v62  ;;  %8468 = vmatpush.bf16.msra.mxu3 %v12446_v23 }
 0x648   : > { %v14750_v32 = vld [vmem:[%s15555_s27 + $0x19b4] sm:$0xf0] }
 0x649   : > { %v12157_v59 = vld [vmem:[%s15555_s27 + $0x1418] sm:$0xf]  ;;  %v12862_v9 = vor.u32 %v14750_v32, %v12861_v18  ;;  %8489 = vmatpush.bf16.msrb.mxu1 %v13118_v34 }
 0x64a   : > { %v14574_v33 = vld [vmem:[%s15555_s27 + $0x1434] sm:$0xf0] }
 0x64b   : > { %v12413_v58 = vld [vmem:[%s15555_s27 + $0x1618] sm:$0xf]  ;;  %v12158_v43 = vor.u32 %v14574_v33, %v12157_v59  ;;  %8476 = vmatpush.bf16.msrb.mxu0 %v12862_v9  ;;  %v8237_v33 = vpop.f32.mrf.mxu1 }
 0x64c   : > { %v14638_v1 = vld [vmem:[%s15555_s27 + $0x1634] sm:$0xf0] }
 0x64d   : > { %v13405_v38 = vld [vmem:[%s15555_s27 + $0x1dd8] sm:$0xf]  ;;  %v12414_v56 = vor.u32 %v14638_v1, %v12413_v58  ;;  %8456 = vmatpush.bf16.msra.mxu2 %v12158_v43 }
 0x64e   : > { %v14886_v40 = vld [vmem:[%s15555_s27 + $0x1df4] sm:$0xf0] }
 0x64f   : > { %v13661_v37 = vld [vmem:[%s15555_s27 + $0x1fd8] sm:$0xf]  ;;  %v13406_v55 = vor.u32 %v14886_v40, %v13405_v38  ;;  %8469 = vmatpush.bf16.msra.mxu3 %v12414_v56 }
 0x650   : > { %v14950_v44 = vld [vmem:[%s15555_s27 + $0x1ff4] sm:$0xf0]  ;;  %8457 = vmatmul.bf16.vlgmr.msra.gmra.mxu2 %v15864_v6 }
 0x651   : > { %v13085_v28 = vld [vmem:[%s15555_s27 + $0x1b58] sm:$0xf]  ;;  %v13662_v8 = vor.u32 %v14950_v44, %v13661_v37  ;;  %8501 = vmatpush.bf16.msrb.mxu2 %v13406_v55  ;;  %v8224_v37 = vpop.f32.mrf.mxu0 }
 0x652   : > { %v14806_v45 = vld [vmem:[%s15555_s27 + $0x1b74] sm:$0xf0]  ;;  %8470 = vmatmul.bf16.vlgmr.msra.gmra.mxu3 %v15869_v15  ;;  %v8225_v9 = vadd.f32 %v8224_v37, %v17557_v25 }
 0x653   : > { %v12829_v60 = vld [vmem:[%s15555_s27 + $0x1958] sm:$0xf]  ;;  %v13086_v61 = vor.u32 %v14806_v45, %v13085_v28  ;;  %8514 = vmatpush.bf16.msrb.mxu3 %v13662_v8 }
 0x654   : > { %v14742_v51 = vld [vmem:[%s15555_s27 + $0x1974] sm:$0xf0] }
 0x655   : > { %v13373_v4 = vld [vmem:[%s15555_s27 + $0x1d98] sm:$0xf]  ;;  %v12830_v36 = vor.u32 %v14742_v51, %v12829_v60  ;;  %8490 = vmatpush.bf16.msrb.mxu1 %v13086_v61  ;;  %v8238_v60 = vadd.f32 %v8237_v33, %v8225_v9 }
 0x656   : > { %v14878_v2 = vld [vmem:[%s15555_s27 + $0x1db4] sm:$0xf0] }
 0x657   : > { %v13629_v19 = vld [vmem:[%s15555_s27 + $0x1f98] sm:$0xf]  ;;  %v13374_v42 = vor.u32 %v14878_v2, %v13373_v4  ;;  %8477 = vmatpush.bf16.msrb.mxu0 %v12830_v36 }
 0x658   : > { %v14942_v5 = vld [vmem:[%s15555_s27 + $0x1fb4] sm:$0xf0] }
 0x659   : > { %v13053_v48 = vld [vmem:[%s15555_s27 + $0x1b18] sm:$0xf]  ;;  %v13630_v41 = vor.u32 %v14942_v5, %v13629_v19  ;;  %8502 = vmatpush.bf16.msrb.mxu2 %v13374_v42  ;;  %v8239_v42 = vpop.f32.mrf.mxu1 }
 0x65a   : > { %v14798_v7 = vld [vmem:[%s15555_s27 + $0x1b34] sm:$0xf0]  ;;  %v10335_v42 = vld [vmem:[%s15555_s27 + $0x5f8] sm:$0xf0] }
 0x65b   : > { %v12797_v10 = vld [vmem:[%s15555_s27 + $0x1918] sm:$0xf]  ;;  %v13054_v14 = vor.u32 %v14798_v7, %v13053_v48  ;;  %8515 = vmatpush.bf16.msrb.mxu3 %v13630_v41 }
 0x65c   : > { %v14734_v13 = vld [vmem:[%s15555_s27 + $0x1934] sm:$0xf0] }
 0x65d   : > { %v13341_v16 = vld [vmem:[%s15555_s27 + $0x1d58] sm:$0xf]  ;;  %v12798_v18 = vor.u32 %v14734_v13, %v12797_v10  ;;  %8491 = vmatpush.bf16.msrb.mxu1 %v13054_v14 }
 0x65e   : > { %v14870_v21 = vld [vmem:[%s15555_s27 + $0x1d74] sm:$0xf0] }
 0x65f   : > { %v13597_v62 = vld [vmem:[%s15555_s27 + $0x1f58] sm:$0xf]  ;;  %v13342_v32 = vor.u32 %v14870_v21, %v13341_v16  ;;  %8478 = vmatpush.bf16.msrb.mxu0 %v12798_v18  ;;  %v8226_v21 = vpop.f32.mrf.mxu0  ;;  %v14050_v18 = vld [vmem:[%s15555_s27 + $0x3dc] sm:$0xf] }
 0x660   : > { %v14934_v30 = vld [vmem:[%s15555_s27 + $0x1f74] sm:$0xf0] }
 0x661   : > { %v13021_v24 = vld [vmem:[%s15555_s27 + $0x1ad8] sm:$0xf]  ;;  %v13598_v58 = vor.u32 %v14934_v30, %v13597_v62  ;;  %8503 = vmatpush.bf16.msrb.mxu2 %v13342_v32  ;;  %v10079_v32 = vld [vmem:[%s15555_s27 + $0x3f8] sm:$0xf0] }
 0x662   : > { %v14790_v26 = vld [vmem:[%s15555_s27 + $0x1af4] sm:$0xf0]  ;;  %v10082_v9 = vor.u32 %v14050_v18, %v10079_v32  ;;  %v9759_v18 = vld [vmem:[%s15555_s27 + $0x178] sm:$0xf0] }
 0x663   : > { %v12765_v59 = vld [vmem:[%s15555_s27 + $0x18d8] sm:$0xf]  ;;  %v13022_v1 = vor.u32 %v14790_v26, %v13021_v24  ;;  %8516 = vmatpush.bf16.msrb.mxu3 %v13598_v58  ;;  %v13986_v58 = vld [vmem:[%s15555_s27 + $0x1dc] sm:$0xf] }
 0x664   : > { %v14726_v23 = vld [vmem:[%s15555_s27 + $0x18f4] sm:$0xf0] }
 0x665   : > { %v13309_v34 = vld [vmem:[%s15555_s27 + $0x1d18] sm:$0xf]  ;;  %v12766_v43 = vor.u32 %v14726_v23, %v12765_v59  ;;  %8492 = vmatpush.bf16.msrb.mxu1 %v13022_v1  ;;  %v8250_v1 = vpop.f32.mrf.mxu2 }
 0x666   : > { %v14862_v38 = vld [vmem:[%s15555_s27 + $0x1d34] sm:$0xf0] }
 0x667   : > { %v13565_v40 = vld [vmem:[%s15555_s27 + $0x1f18] sm:$0xf]  ;;  %v13310_v54 = vor.u32 %v14862_v38, %v13309_v34  ;;  %8479 = vmatpush.bf16.msrb.mxu0 %v12766_v43 }
 0x668   : > { %v14926_v44 = vld [vmem:[%s15555_s27 + $0x1f34] sm:$0xf0] }
 0x669   : > { %v12989_v28 = vld [vmem:[%s15555_s27 + $0x1a98] sm:$0xf]  ;;  %v13566_v51 = vor.u32 %v14926_v44, %v13565_v40  ;;  %8504 = vmatpush.bf16.msrb.mxu2 %v13310_v54  ;;  %v9823_v40 = vld [vmem:[%s15555_s27 + $0x1f8] sm:$0xf0] }
 0x66a   : > { %v14782_v45 = vld [vmem:[%s15555_s27 + $0x1ab4] sm:$0xf0] }
 0x66b   : > { %v12733_v56 = vld [vmem:[%s15555_s27 + $0x1898] sm:$0xf]  ;;  %v12990_v57 = vor.u32 %v14782_v45, %v12989_v28  ;;  %8517 = vmatpush.bf16.msrb.mxu3 %v13566_v51  ;;  %v8251_v28 = vadd.f32 %v8250_v1, %v8238_v60  ;;  %v8263_v45 = vpop.f32.mrf.mxu3  ;;  %v10047_v51 = vld [vmem:[%s15555_s27 + $0x3b8] sm:$0xf0] }
 0x66c   : > { %v14718_v55 = vld [vmem:[%s15555_s27 + $0x18b4] sm:$0xf0]  ;;  %v13978_v60 = vld [vmem:[%s15555_s27 + $0x19c] sm:$0xf] }
 0x66d   : > { %v13277_v8 = vld [vmem:[%s15555_s27 + $0x1cd8] sm:$0xf]  ;;  %v12734_v5 = vor.u32 %v14718_v55, %v12733_v56  ;;  %8493 = vmatpush.bf16.msrb.mxu1 %v12990_v57  ;;  %v14042_v55 = vld [vmem:[%s15555_s27 + $0x39c] sm:$0xf]  ;;  %v17628_v57 = vadd.f32 %v8263_v45, %v8251_v28 }
 0x66e   : > { %v14854_v61 = vld [vmem:[%s15555_s27 + $0x1cf4] sm:$0xf0]  ;;  %v14170_v1 = vld [vmem:[%s15555_s27 + $0x79c] sm:$0xf] }
 0x66f   : > { %v13533_v4 = vld [vmem:[%s15555_s27 + $0x1ed8] sm:$0xf]  ;;  %v13278_v48 = vor.u32 %v14854_v61, %v13277_v8  ;;  %8480 = vmatpush.bf16.msrb.mxu0 %v12734_v5  ;;  %v9826_v8 = vor.u32 %v13986_v58, %v9823_v40  ;;  %v10303_v58 = vld [vmem:[%s15555_s27 + $0x5b8] sm:$0xf0] }
 0x670   : > { %v14918_v25 = vld [vmem:[%s15555_s27 + $0x1ef4] sm:$0xf0]  ;;  %v9983_v40 = vld [vmem:[%s15555_s27 + $0x338] sm:$0xf0] }
 0x671   : > { %v12957_v2 = vld [vmem:[%s15555_s27 + $0x1a58] sm:$0xf]  ;;  %v13534_v10 = vor.u32 %v14918_v25, %v13533_v4  ;;  %8505 = vmatpush.bf16.msrb.mxu2 %v13278_v48  ;;  %v9791_v4 = vld [vmem:[%s15555_s27 + $0x1b8] sm:$0xf0] }
 0x672   : > { %v14774_v19 = vld [vmem:[%s15555_s27 + $0x1a74] sm:$0xf0]  ;;  %v13962_v28 = vld [vmem:[%s15555_s27 + $0x11c] sm:$0xf] }
 0x673   : > { %v12701_v7 = vld [vmem:[%s15555_s27 + $0x1858] sm:$0xf]  ;;  %v12958_v13 = vor.u32 %v14774_v19, %v12957_v2  ;;  %8518 = vmatpush.bf16.msrb.mxu3 %v13534_v10  ;;  %v14178_v10 = vld [vmem:[%s15555_s27 + $0x7dc] sm:$0xf]  ;;  %v8265_v32 = vpop.f32.mrf.mxu3 }
 0x674   : > { %v14710_v36 = vld [vmem:[%s15555_s27 + $0x1874] sm:$0xf0]  ;;  %v9727_v45 = vld [vmem:[%s15555_s27 + $0x138] sm:$0xf0] }
 0x675   : > { %v13245_v41 = vld [vmem:[%s15555_s27 + $0x1c98] sm:$0xf]  ;;  %v12702_v26 = vor.u32 %v14710_v36, %v12701_v7  ;;  %8494 = vmatpush.bf16.msrb.mxu1 %v12958_v13  ;;  %v10050_v7 = vor.u32 %v14042_v55, %v10047_v51  ;;  %v14114_v36 = vld [vmem:[%s15555_s27 + $0x5dc] sm:$0xf] }
 0x676   : > { %v14846_v14 = vld [vmem:[%s15555_s27 + $0x1cb4] sm:$0xf0]  ;;  %v10591_v13 = vld [vmem:[%s15555_s27 + $0x7f8] sm:$0xf0] }
 0x677   : > { %v13501_v16 = vld [vmem:[%s15555_s27 + $0x1e98] sm:$0xf]  ;;  %v13246_v59 = vor.u32 %v14846_v14, %v13245_v41  ;;  %8481 = vmatpush.bf16.msrb.mxu0 %v12702_v26  ;;  %v14034_v41 = vld [vmem:[%s15555_s27 + $0x35c] sm:$0xf] }
 0x678   : > { %v14910_v62 = vld [vmem:[%s15555_s27 + $0x1eb4] sm:$0xf0]  ;;  %v10015_v14 = vld [vmem:[%s15555_s27 + $0x378] sm:$0xf0] }
 0x679   : > { %v12925_v30 = vld [vmem:[%s15555_s27 + $0x1a18] sm:$0xf]  ;;  %v13502_v34 = vor.u32 %v14910_v62, %v13501_v16  ;;  %8506 = vmatpush.bf16.msrb.mxu2 %v13246_v59  ;;  %v9794_v16 = vor.u32 %v13978_v60, %v9791_v4  ;;  %v8252_v62 = vpop.f32.mrf.mxu2  ;;  %v13970_v26 = vld [vmem:[%s15555_s27 + $0x15c] sm:$0xf]  ;;  %v10594_v59 = vor.u32 %v14178_v10, %v10591_v13  ;;  %v9730_v60 = vor.u32 %v13962_v28, %v9727_v45  ;;  %v8276_v10 = vpop.f32.mrf.mxu0 }
 0x67a   : > { %v14766_v24 = vld [vmem:[%s15555_s27 + $0x1a34] sm:$0xf0]  ;;  %v14162_v55 = vld [vmem:[%s15555_s27 + $0x75c] sm:$0xf] }
 0x67b   : > { %v12669_v23 = vld [vmem:[%s15555_s27 + $0x1818] sm:$0xf]  ;;  %v12926_v38 = vor.u32 %v14766_v24, %v12925_v30  ;;  %8519 = vmatpush.bf16.msrb.mxu3 %v13502_v34  ;;  %v10338_v24 = vor.u32 %v14114_v36, %v10335_v42  ;;  %v10559_v34 = vld [vmem:[%s15555_s27 + $0x7b8] sm:$0xf0] }
 0x67c   : > { %v14702_v33 = vld [vmem:[%s15555_s27 + $0x1834] sm:$0xf0]  ;;  %v10527_v51 = vld [vmem:[%s15555_s27 + $0x778] sm:$0xf0] }
 0x67d   : > { %v13213_v37 = vld [vmem:[%s15555_s27 + $0x1c58] sm:$0xf]  ;;  %v12670_v56 = vor.u32 %v14702_v33, %v12669_v23  ;;  %8495 = vmatpush.bf16.msrb.mxu1 %v12926_v38  ;;  %v10018_v23 = vor.u32 %v14034_v41, %v10015_v14  ;;  %v14106_v33 = vld [vmem:[%s15555_s27 + $0x59c] sm:$0xf] }
 0x67e   : > { %v14838_v44 = vld [vmem:[%s15555_s27 + $0x1c74] sm:$0xf0]  ;;  %v14026_v38 = vld [vmem:[%s15555_s27 + $0x31c] sm:$0xf] }
 0x67f   : > { %v13469_v43 = vld [vmem:[%s15555_s27 + $0x1e58] sm:$0xf]  ;;  %v13214_v61 = vor.u32 %v14838_v44, %v13213_v37  ;;  %8482 = vmatpush.bf16.msrb.mxu0 %v12670_v56  ;;  %v9762_v37 = vor.u32 %v13970_v26, %v9759_v18  ;;  %v10306_v44 = vor.u32 %v14106_v33, %v10303_v58  ;;  %v10271_v56 = vld [vmem:[%s15555_s27 + $0x578] sm:$0xf0] }
 0x680   : > { %v14902_v54 = vld [vmem:[%s15555_s27 + $0x1e74] sm:$0xf0]  ;;  %8496 = vmatmul.bf16.vlgmr.msrb.gmra.mxu1 %v15925_v0  ;;  %v10239_v36 = vld [vmem:[%s15555_s27 + $0x538] sm:$0xf0] }
 0x681   : > { %v13181_v25 = vld [vmem:[%s15555_s27 + $0x1c18] sm:$0xf]  ;;  %v13470_v2 = vor.u32 %v14902_v54, %v13469_v43  ;;  %8540 = vmatpush.bf16.msra.mxu1 %v10082_v9  ;;  %8507 = vmatpush.bf16.msrb.mxu2 %v13214_v61  ;;  %v10562_v9 = vor.u32 %v14170_v1, %v10559_v34  ;;  %v9986_v43 = vor.u32 %v14026_v38, %v9983_v40  ;;  %v14098_v54 = vld [vmem:[%s15555_s27 + $0x55c] sm:$0xf] }
 0x682   : > { %v14830_v19 = vld [vmem:[%s15555_s27 + $0x1c34] sm:$0xf0]  ;;  %8483 = vmatmul.bf16.vlgmr.msrb.gmra.mxu0 %v15923_v63  ;;  %v9951_v61 = vld [vmem:[%s15555_s27 + $0x2f8] sm:$0xf0]  ;;  %v10274_v4 = vor.u32 %v14098_v54, %v10271_v56  ;;  %v8278_v56 = vpop.f32.mrf.mxu0 }
 0x683   : > { %v13437_v5 = vld [vmem:[%s15555_s27 + $0x1e18] sm:$0xf]  ;;  %8527 = vmatpush.bf16.msra.mxu0 %v9826_v8  ;;  %v13182_v21 = vor.u32 %v14830_v19, %v13181_v25  ;;  %8520 = vmatpush.bf16.msrb.mxu3 %v13470_v2  ;;  %v14018_v8 = vld [vmem:[%s15555_s27 + $0x2dc] sm:$0xf]  ;;  %v8289_v19 = vpop.f32.mrf.mxu1 }
 0x684   : > { %v14894_v48 = vld [vmem:[%s15555_s27 + $0x1e34] sm:$0xf0]  ;;  %v13954_v25 = vld [vmem:[%s15555_s27 + $0xdc] sm:$0xf] }
 0x685   : > { %v13438_v30 = vor.u32 %v14894_v48, %v13437_v5  ;;  %8541 = vmatpush.bf16.msra.mxu1 %v10050_v7  ;;  %8508 = vmatpush.bf16.msrb.mxu2 %v13182_v21  ;;  %v9695_v2 = vld [vmem:[%s15555_s27 + $0xf8] sm:$0xf0]  ;;  %v10530_v5 = vor.u32 %v14162_v55, %v10527_v51  ;;  %v9954_v48 = vor.u32 %v14018_v8, %v9951_v61 }
 0x686   : > { %v14090_v7 = vld [vmem:[%s15555_s27 + $0x51c] sm:$0xf]  ;;  %v9698_v21 = vor.u32 %v13954_v25, %v9695_v2 }
 0x687   : > { %8528 = vmatpush.bf16.msra.mxu0 %v9794_v16  ;;  %8521 = vmatpush.bf16.msrb.mxu3 %v13438_v30  ;;  %v14154_v42 = vld [vmem:[%s15555_s27 + $0x71c] sm:$0xf]  ;;  %v8277_v16 = vadd.f32 %v8276_v10, %v17628_v57  ;;  %v10242_v62 = vor.u32 %v14090_v7, %v10239_v36 }
 0x688   : > { %8509 = vmatmul.bf16.vlgmr.msrb.gmra.mxu2 %v15943_v31  ;;  %v10495_v13 = vld [vmem:[%s15555_s27 + $0x738] sm:$0xf0] }
 0x689   : > { %8553 = vmatpush.bf16.msra.mxu2 %v10338_v24  ;;  %8542 = vmatpush.bf16.msra.mxu1 %v10018_v23  ;;  %v14010_v41 = vld [vmem:[%s15555_s27 + $0x29c] sm:$0xf]  ;;  %v8290_v26 = vadd.f32 %v8289_v19, %v8277_v16  ;;  %v10498_v18 = vor.u32 %v14154_v42, %v10495_v13 }
 0x68a   : > { %8522 = vmatmul.bf16.vlgmr.msrb.gmra.mxu3 %v15947_v35  ;;  %v9919_v14 = vld [vmem:[%s15555_s27 + $0x2b8] sm:$0xf0] }
 0x68b   : > { %8566 = vmatpush.bf16.msra.mxu3 %v10594_v59  ;;  %8529 = vmatpush.bf16.msra.mxu0 %v9762_v37  ;;  %v13946_v30 = vld [vmem:[%s15555_s27 + $0x9c] sm:$0xf]  ;;  %v9922_v32 = vor.u32 %v14010_v41, %v9919_v14  ;;  %v8315_v14 = vpop.f32.mrf.mxu3 }
 0x68c   : > { %v9663_v24 = vld [vmem:[%s15555_s27 + $0xb8] sm:$0xf0] }
 0x68d   : > { %8554 = vmatpush.bf16.msra.mxu2 %v10306_v44  ;;  %8543 = vmatpush.bf16.msra.mxu1 %v9986_v43  ;;  %v14082_v59 = vld [vmem:[%s15555_s27 + $0x4dc] sm:$0xf]  ;;  %v9666_v34 = vor.u32 %v13946_v30, %v9663_v24  ;;  %v8291_v44 = vpop.f32.mrf.mxu1 }
 0x68e   : > { %v10207_v23 = vld [vmem:[%s15555_s27 + $0x4f8] sm:$0xf0] }
 0x68f   : > { %8567 = vmatpush.bf16.msra.mxu3 %v10562_v9  ;;  %8530 = vmatpush.bf16.msra.mxu0 %v9730_v60  ;;  %v14146_v33 = vld [vmem:[%s15555_s27 + $0x6dc] sm:$0xf]  ;;  %v10210_v38 = vor.u32 %v14082_v59, %v10207_v23 }
 0x690   : > { %v10463_v57 = vld [vmem:[%s15555_s27 + $0x6f8] sm:$0xf0] }
 0x691   : > { %8555 = vmatpush.bf16.msra.mxu2 %v10274_v4  ;;  %8544 = vmatpush.bf16.msra.mxu1 %v9954_v48  ;;  %v14002_v58 = vld [vmem:[%s15555_s27 + $0x25c] sm:$0xf]  ;;  %v10466_v28 = vor.u32 %v14146_v33, %v10463_v57  ;;  %v8302_v48 = vpop.f32.mrf.mxu2 }
 0x692   : > { %v9887_v1 = vld [vmem:[%s15555_s27 + $0x278] sm:$0xf0]  ;;  %v8303_v41 = vadd.f32 %v8302_v48, %v8290_v26 }
 0x693   : > { %8568 = vmatpush.bf16.msra.mxu3 %v10530_v5  ;;  %8531 = vmatpush.bf16.msra.mxu0 %v9698_v21  ;;  %v13938_v40 = vld [vmem:[%s15555_s27 + $0x5c] sm:$0xf]  ;;  %v9890_v45 = vor.u32 %v14002_v58, %v9887_v1 }
 0x694   : > { %v9631_v37 = vld [vmem:[%s15555_s27 + $0x78] sm:$0xf0] }
 0x695   : > { %8556 = vmatpush.bf16.msra.mxu2 %v10242_v62  ;;  %8545 = vmatpush.bf16.msra.mxu1 %v9922_v32  ;;  %v14074_v9 = vld [vmem:[%s15555_s27 + $0x49c] sm:$0xf]  ;;  %v9634_v61 = vor.u32 %v13938_v40, %v9631_v37  ;;  %v17699_v32 = vadd.f32 %v8315_v14, %v8303_v41 }
 0x696   : > { %v10175_v43 = vld [vmem:[%s15555_s27 + $0x4b8] sm:$0xf0] }
 0x697   : > { %8569 = vmatpush.bf16.msra.mxu3 %v10498_v18  ;;  %v14138_v54 = vld [vmem:[%s15555_s27 + $0x69c] sm:$0xf]  ;;  %8532 = vmatpush.bf16.msra.mxu0 %v9666_v34  ;;  %v10178_v25 = vor.u32 %v14074_v9, %v10175_v43 }
 0x698   : > { %v10431_v55 = vld [vmem:[%s15555_s27 + $0x6b8] sm:$0xf0] }
 0x699   : > { %v13994_v51 = vld [vmem:[%s15555_s27 + $0x21c] sm:$0xf]  ;;  %8557 = vmatpush.bf16.msra.mxu2 %v10210_v38  ;;  %8546 = vmatpush.bf16.msra.mxu1 %v9890_v45  ;;  %v10434_v7 = vor.u32 %v14138_v54, %v10431_v55  ;;  %v8304_v55 = vpop.f32.mrf.mxu2 }
 0x69a   : > { %v9855_v8 = vld [vmem:[%s15555_s27 + $0x238] sm:$0xf0] }
 0x69b   : > { %v14306_v60 = vld [vmem:[%s15555_s27 + $0xbdc] sm:$0xf]  ;;  %8570 = vmatpush.bf16.msra.mxu3 %v10466_v28  ;;  %v9858_v36 = vor.u32 %v13994_v51, %v9855_v8  ;;  %8533 = vmatpush.bf16.msra.mxu0 %v9634_v61 }
 0x69c   : > { %v11103_v4 = vld [vmem:[%s15555_s27 + $0xbf8] sm:$0xf0] }
 0x69d   : > { %v13930_v2 = vld [vmem:[%s15555_s27 + $0x1c] sm:$0xf]  ;;  %v11106_v16 = vor.u32 %v14306_v60, %v11103_v4  ;;  %8558 = vmatpush.bf16.msra.mxu2 %v10178_v25  ;;  %8547 = vmatpush.bf16.msra.mxu1 %v9858_v36  ;;  %v8317_v4 = vpop.f32.mrf.mxu3 }
 0x69e   : > { %v9599_v19 = vld [vmem:[%s15555_s27 + $0x38] sm:$0xf0] }
 0x69f   : > { %v14242_v5 = vld [vmem:[%s15555_s27 + $0x9dc] sm:$0xf]  ;;  %v9602_v30 = vor.u32 %v13930_v2, %v9599_v19  ;;  %8571 = vmatpush.bf16.msra.mxu3 %v10434_v7 }
 0x6a0   : > { %v10847_v42 = vld [vmem:[%s15555_s27 + $0x9f8] sm:$0xf0]  ;;  %8548 = vmatmul.bf16.vlgmr.msra.gmra.mxu1 %v15754_v12 }
 0x6a1   : > { %v14066_v10 = vld [vmem:[%s15555_s27 + $0x45c] sm:$0xf]  ;;  %v10850_v59 = vor.u32 %v14242_v5, %v10847_v42  ;;  %8592 = vmatpush.bf16.msrb.mxu1 %v11106_v16  ;;  %8534 = vmatpush.bf16.msra.mxu0 %v9602_v30 }
 0x6a2   : > { %v10143_v13 = vld [vmem:[%s15555_s27 + $0x478] sm:$0xf0] }
 0x6a3   : > { %v14130_v21 = vld [vmem:[%s15555_s27 + $0x65c] sm:$0xf]  ;;  %v10146_v23 = vor.u32 %v14066_v10, %v10143_v13 }
 0x6a4   : > { %v10399_v62 = vld [vmem:[%s15555_s27 + $0x678] sm:$0xf0]  ;;  %8535 = vmatmul.bf16.vlgmr.msra.gmra.mxu0 %v15752_v11 }
 0x6a5   : > { %v14298_v24 = vld [vmem:[%s15555_s27 + $0xb9c] sm:$0xf]  ;;  %v10402_v58 = vor.u32 %v14130_v21, %v10399_v62  ;;  %8579 = vmatpush.bf16.msrb.mxu0 %v10850_v59  ;;  %8559 = vmatpush.bf16.msra.mxu2 %v10146_v23  ;;  %v17734_v59 = vld [vmem:[%s16078_s29] sm:$0xff] }
 0x6a6   : > { %v11071_v18 = vld [vmem:[%s15555_s27 + $0xbb8] sm:$0xf0]  ;;  %v1885_v23 = vperm.slane %v17734_v59, 6 }
 0x6a7   : > { %v14234_v26 = vld [vmem:[%s15555_s27 + $0x99c] sm:$0xf]  ;;  %v11074_v40 = vor.u32 %v14298_v24, %v11071_v18  ;;  %8572 = vmatpush.bf16.msra.mxu3 %v10402_v58  ;;  %v8341_v58 = vpop.f32.mrf.mxu1 }
 0x6a8   : > { %v10815_v33 = vld [vmem:[%s15555_s27 + $0x9b8] sm:$0xf0] }
 0x6a9   : > { %v14058_v57 = vld [vmem:[%s15555_s27 + $0x41c] sm:$0xf]  ;;  %v10818_v54 = vor.u32 %v14234_v26, %v10815_v33  ;;  %8593 = vmatpush.bf16.msrb.mxu1 %v11074_v40 }
 0x6aa   : > { %v10111_v1 = vld [vmem:[%s15555_s27 + $0x438] sm:$0xf0] }
 0x6ab   : > { %v14122_v34 = vld [vmem:[%s15555_s27 + $0x61c] sm:$0xf]  ;;  %v10114_v56 = vor.u32 %v14058_v57, %v10111_v1  ;;  %8580 = vmatpush.bf16.msrb.mxu0 %v10818_v54 }
 0x6ac   : > { %v10367_v38 = vld [vmem:[%s15555_s27 + $0x638] sm:$0xf0] }
 0x6ad   : > { %v14370_v37 = vld [vmem:[%s15555_s27 + $0xddc] sm:$0xf]  ;;  %v10370_v51 = vor.u32 %v14122_v34, %v10367_v38  ;;  %8560 = vmatpush.bf16.msra.mxu2 %v10114_v56 }
 0x6ae   : > { %v11359_v44 = vld [vmem:[%s15555_s27 + $0xdf8] sm:$0xf0] }
 0x6af   : > { %v14434_v28 = vld [vmem:[%s15555_s27 + $0xfdc] sm:$0xf]  ;;  %v11362_v8 = vor.u32 %v14370_v37, %v11359_v44  ;;  %8573 = vmatpush.bf16.msra.mxu3 %v10370_v51  ;;  %v8328_v37 = vpop.f32.mrf.mxu0 }
 0x6b0   : > { %v11615_v45 = vld [vmem:[%s15555_s27 + $0xff8] sm:$0xf0]  ;;  %8561 = vmatmul.bf16.vlgmr.msra.gmra.mxu2 %v15773_v46 }
 0x6b1   : > { %v14290_v9 = vld [vmem:[%s15555_s27 + $0xb5c] sm:$0xf]  ;;  %v11618_v25 = vor.u32 %v14434_v28, %v11615_v45  ;;  %8605 = vmatpush.bf16.msrb.mxu2 %v11362_v8 }
 0x6b2   : > { %v11039_v43 = vld [vmem:[%s15555_s27 + $0xb78] sm:$0xf0]  ;;  %8574 = vmatmul.bf16.vlgmr.msra.gmra.mxu3 %v15775_v47 }
 0x6b3   : > { %v14226_v61 = vld [vmem:[%s15555_s27 + $0x95c] sm:$0xf]  ;;  %v11042_v2 = vor.u32 %v14290_v9, %v11039_v43  ;;  %8618 = vmatpush.bf16.msrb.mxu3 %v11618_v25  ;;  %v8329_v9 = vadd.f32 %v8328_v37, %v1885_v23 }
 0x6b4   : > { %v10783_v60 = vld [vmem:[%s15555_s27 + $0x978] sm:$0xf0] }
 0x6b5   : > { %v14362_v19 = vld [vmem:[%s15555_s27 + $0xd9c] sm:$0xf]  ;;  %v10786_v42 = vor.u32 %v14226_v61, %v10783_v60  ;;  %8594 = vmatpush.bf16.msrb.mxu1 %v11042_v2  ;;  %v8342_v51 = vadd.f32 %v8341_v58, %v8329_v9  ;;  %v8354_v58 = vpop.f32.mrf.mxu2 }
 0x6b6   : > { %v11327_v5 = vld [vmem:[%s15555_s27 + $0xdb8] sm:$0xf0] }
 0x6b7   : > { %v14426_v48 = vld [vmem:[%s15555_s27 + $0xf9c] sm:$0xf]  ;;  %v11330_v11 = vor.u32 %v14362_v19, %v11327_v5  ;;  %8581 = vmatpush.bf16.msrb.mxu0 %v10786_v42  ;;  %v8343_v42 = vpop.f32.mrf.mxu1  ;;  %v8355_v37 = vadd.f32 %v8354_v58, %v8342_v51 }
 0x6b8   : > { %v11583_v7 = vld [vmem:[%s15555_s27 + $0xfb8] sm:$0xf0] }
 0x6b9   : > { %v14282_v36 = vld [vmem:[%s15555_s27 + $0xb1c] sm:$0xf]  ;;  %v11586_v41 = vor.u32 %v14426_v48, %v11583_v7  ;;  %8606 = vmatpush.bf16.msrb.mxu2 %v11330_v11 }
 0x6ba   : > { %v11007_v12 = vld [vmem:[%s15555_s27 + $0xb38] sm:$0xf0] }
 0x6bb   : > { %v14218_v10 = vld [vmem:[%s15555_s27 + $0x91c] sm:$0xf]  ;;  %v11010_v14 = vor.u32 %v14282_v36, %v11007_v12  ;;  %8619 = vmatpush.bf16.msrb.mxu3 %v11586_v41 }
 0x6bc   : > { %v10751_v13 = vld [vmem:[%s15555_s27 + $0x938] sm:$0xf0] }
 0x6bd   : > { %v14354_v16 = vld [vmem:[%s15555_s27 + $0xd5c] sm:$0xf]  ;;  %v10754_v26 = vor.u32 %v14218_v10, %v10751_v13  ;;  %8595 = vmatpush.bf16.msrb.mxu1 %v11010_v14 }
 0x6be   : > { %v11295_v21 = vld [vmem:[%s15555_s27 + $0xd78] sm:$0xf0] }
 0x6bf   : > { %v14418_v62 = vld [vmem:[%s15555_s27 + $0xf5c] sm:$0xf]  ;;  %v11298_v33 = vor.u32 %v14354_v16, %v11295_v21  ;;  %8582 = vmatpush.bf16.msrb.mxu0 %v10754_v26  ;;  %v8330_v16 = vpop.f32.mrf.mxu0 }
 0x6c0   : > { %v11551_v30 = vld [vmem:[%s15555_s27 + $0xf78] sm:$0xf0] }
 0x6c1   : > { %v14274_v24 = vld [vmem:[%s15555_s27 + $0xadc] sm:$0xf]  ;;  %v11554_v47 = vor.u32 %v14418_v62, %v11551_v30  ;;  %8607 = vmatpush.bf16.msrb.mxu2 %v11298_v33 }
 0x6c2   : > { %v10975_v18 = vld [vmem:[%s15555_s27 + $0xaf8] sm:$0xf0] }
 0x6c3   : > { %v14210_v46 = vld [vmem:[%s15555_s27 + $0x8dc] sm:$0xf]  ;;  %v10978_v1 = vor.u32 %v14274_v24, %v10975_v18  ;;  %8620 = vmatpush.bf16.msrb.mxu3 %v11554_v47 }
 0x6c4   : > { %v10719_v57 = vld [vmem:[%s15555_s27 + $0x8f8] sm:$0xf0] }
 0x6c5   : > { %v14346_v34 = vld [vmem:[%s15555_s27 + $0xd1c] sm:$0xf]  ;;  %v10722_v43 = vor.u32 %v14210_v46, %v10719_v57  ;;  %8596 = vmatpush.bf16.msrb.mxu1 %v10978_v1 }
 0x6c6   : > { %v11263_v38 = vld [vmem:[%s15555_s27 + $0xd38] sm:$0xf0] }
 0x6c7   : > { %v14410_v40 = vld [vmem:[%s15555_s27 + $0xf1c] sm:$0xf]  ;;  %v11266_v54 = vor.u32 %v14346_v34, %v11263_v38  ;;  %8583 = vmatpush.bf16.msrb.mxu0 %v10722_v43 }
 0x6c8   : > { %v11519_v44 = vld [vmem:[%s15555_s27 + $0xf38] sm:$0xf0] }
 0x6c9   : > { %v14266_v28 = vld [vmem:[%s15555_s27 + $0xa9c] sm:$0xf]  ;;  %v11522_v8 = vor.u32 %v14410_v40, %v11519_v44  ;;  %8608 = vmatpush.bf16.msrb.mxu2 %v11266_v54  ;;  %v8367_v44 = vpop.f32.mrf.mxu3 }
 0x6ca   : > { %v10943_v45 = vld [vmem:[%s15555_s27 + $0xab8] sm:$0xf0] }
 0x6cb   : > { %v14202_v56 = vld [vmem:[%s15555_s27 + $0x89c] sm:$0xf]  ;;  %v10946_v61 = vor.u32 %v14266_v28, %v10943_v45  ;;  %8621 = vmatpush.bf16.msrb.mxu3 %v11522_v8 }
 0x6cc   : > { %v10687_v55 = vld [vmem:[%s15555_s27 + $0x8b8] sm:$0xf0] }
 0x6cd   : > { %v14338_v60 = vld [vmem:[%s15555_s27 + $0xcdc] sm:$0xf]  ;;  %v10690_v48 = vor.u32 %v14202_v56, %v10687_v55  ;;  %8597 = vmatpush.bf16.msrb.mxu1 %v10946_v61  ;;  %v17773_v55 = vadd.f32 %v8367_v44, %v8355_v37 }
 0x6ce   : > { %v11231_v4 = vld [vmem:[%s15555_s27 + $0xcf8] sm:$0xf0] }
 0x6cf   : > { %v14402_v25 = vld [vmem:[%s15555_s27 + $0xedc] sm:$0xf]  ;;  %v11234_v7 = vor.u32 %v14338_v60, %v11231_v4  ;;  %8584 = vmatpush.bf16.msrb.mxu0 %v10690_v48 }
 0x6d0   : > { %v11487_v2 = vld [vmem:[%s15555_s27 + $0xef8] sm:$0xf0] }
 0x6d1   : > { %v14258_v19 = vld [vmem:[%s15555_s27 + $0xa5c] sm:$0xf]  ;;  %v11490_v11 = vor.u32 %v14402_v25, %v11487_v2  ;;  %8609 = vmatpush.bf16.msrb.mxu2 %v11234_v7 }
 0x6d2   : > { %v10911_v5 = vld [vmem:[%s15555_s27 + $0xa78] sm:$0xf0] }
 0x6d3   : > { %v14194_v36 = vld [vmem:[%s15555_s27 + $0x85c] sm:$0xf]  ;;  %v10914_v10 = vor.u32 %v14258_v19, %v10911_v5  ;;  %8622 = vmatpush.bf16.msrb.mxu3 %v11490_v11 }
 0x6d4   : > { %v10655_v12 = vld [vmem:[%s15555_s27 + $0x878] sm:$0xf0] }
 0x6d5   : > { %v14330_v13 = vld [vmem:[%s15555_s27 + $0xc9c] sm:$0xf]  ;;  %v10658_v24 = vor.u32 %v14194_v36, %v10655_v12  ;;  %8598 = vmatpush.bf16.msrb.mxu1 %v10914_v10 }
 0x6d6   : > { %v11199_v41 = vld [vmem:[%s15555_s27 + $0xcb8] sm:$0xf0] }
 0x6d7   : > { %v14394_v14 = vld [vmem:[%s15555_s27 + $0xe9c] sm:$0xf]  ;;  %v11202_v26 = vor.u32 %v14330_v13, %v11199_v41  ;;  %8585 = vmatpush.bf16.msrb.mxu0 %v10658_v24  ;;  %v8369_v24 = vpop.f32.mrf.mxu3 }
 0x6d8   : > { %v11455_v21 = vld [vmem:[%s15555_s27 + $0xeb8] sm:$0xf0] }
 0x6d9   : > { %v14250_v62 = vld [vmem:[%s15555_s27 + $0xa1c] sm:$0xf]  ;;  %v11458_v47 = vor.u32 %v14394_v14, %v11455_v21  ;;  %8610 = vmatpush.bf16.msrb.mxu2 %v11202_v26  ;;  %v8356_v14 = vpop.f32.mrf.mxu2 }
 0x6da   : > { %v10879_v30 = vld [vmem:[%s15555_s27 + $0xa38] sm:$0xf0] }
 0x6db   : > { %v14562_v18 = vld [vmem:[%s15555_s27 + $0x13dc] sm:$0xf]  ;;  %v10882_v1 = vor.u32 %v14250_v62, %v10879_v30  ;;  %8623 = vmatpush.bf16.msrb.mxu3 %v11458_v47 }
 0x6dc   : > { %v12127_v23 = vld [vmem:[%s15555_s27 + $0x13f8] sm:$0xf0] }
 0x6dd   : > { %v14186_v33 = vld [vmem:[%s15555_s27 + $0x81c] sm:$0xf]  ;;  %v12130_v28 = vor.u32 %v14562_v18, %v12127_v23  ;;  %8599 = vmatpush.bf16.msrb.mxu1 %v10882_v1 }
 0x6de   : > { %v10623_v46 = vld [vmem:[%s15555_s27 + $0x838] sm:$0xf0] }
 0x6df   : > { %v14498_v57 = vld [vmem:[%s15555_s27 + $0x11dc] sm:$0xf]  ;;  %v10626_v43 = vor.u32 %v14186_v33, %v10623_v46 }
 0x6e0   : > { %v11871_v34 = vld [vmem:[%s15555_s27 + $0x11f8] sm:$0xf0]  ;;  %8600 = vmatmul.bf16.vlgmr.msrb.gmra.mxu1 %v15799_v27 }
 0x6e1   : > { %v14322_v38 = vld [vmem:[%s15555_s27 + $0xc5c] sm:$0xf]  ;;  %v11874_v8 = vor.u32 %v14498_v57, %v11871_v34  ;;  %8644 = vmatpush.bf16.msra.mxu1 %v12130_v28  ;;  %8586 = vmatpush.bf16.msrb.mxu0 %v10626_v43 }
 0x6e2   : > { %v11167_v40 = vld [vmem:[%s15555_s27 + $0xc78] sm:$0xf0] }
 0x6e3   : > { %v14386_v45 = vld [vmem:[%s15555_s27 + $0xe5c] sm:$0xf]  ;;  %v11170_v61 = vor.u32 %v14322_v38, %v11167_v40 }
 0x6e4   : > { %v11423_v9 = vld [vmem:[%s15555_s27 + $0xe78] sm:$0xf0]  ;;  %8587 = vmatmul.bf16.vlgmr.msrb.gmra.mxu0 %v15795_v22 }
 0x6e5   : > { %v14554_v54 = vld [vmem:[%s15555_s27 + $0x139c] sm:$0xf]  ;;  %v11426_v25 = vor.u32 %v14386_v45, %v11423_v9  ;;  %8631 = vmatpush.bf16.msra.mxu0 %v11874_v8  ;;  %8611 = vmatpush.bf16.msrb.mxu2 %v11170_v61 }
 0x6e6   : > { %v12095_v56 = vld [vmem:[%s15555_s27 + $0x13b8] sm:$0xf0] }
 0x6e7   : > { %v14490_v51 = vld [vmem:[%s15555_s27 + $0x119c] sm:$0xf]  ;;  %v12098_v48 = vor.u32 %v14554_v54, %v12095_v56  ;;  %8624 = vmatpush.bf16.msrb.mxu3 %v11426_v25 }
 0x6e8   : > { %v11839_v60 = vld [vmem:[%s15555_s27 + $0x11b8] sm:$0xf0] }
 0x6e9   : > { %v14314_v4 = vld [vmem:[%s15555_s27 + $0xc1c] sm:$0xf]  ;;  %v11842_v13 = vor.u32 %v14490_v51, %v11839_v60  ;;  %8645 = vmatpush.bf16.msra.mxu1 %v12098_v48  ;;  %v8393_v51 = vpop.f32.mrf.mxu1 }
 0x6ea   : > { %v11135_v2 = vld [vmem:[%s15555_s27 + $0xc38] sm:$0xf0] }
 0x6eb   : > { %v14378_v19 = vld [vmem:[%s15555_s27 + $0xe1c] sm:$0xf]  ;;  %v11138_v41 = vor.u32 %v14314_v4, %v11135_v2  ;;  %8632 = vmatpush.bf16.msra.mxu0 %v11842_v13 }
 0x6ec   : > { %v11391_v5 = vld [vmem:[%s15555_s27 + $0xe38] sm:$0xf0] }
 0x6ed   : > { %v14626_v7 = vld [vmem:[%s15555_s27 + $0x15dc] sm:$0xf]  ;;  %v11394_v16 = vor.u32 %v14378_v19, %v11391_v5  ;;  %8612 = vmatpush.bf16.msrb.mxu2 %v11138_v41 }
 0x6ee   : > { %v12383_v36 = vld [vmem:[%s15555_s27 + $0x15f8] sm:$0xf0] }
 0x6ef   : > { %v14690_v12 = vld [vmem:[%s15555_s27 + $0x17dc] sm:$0xf]  ;;  %v12386_v21 = vor.u32 %v14626_v7, %v12383_v36  ;;  %8625 = vmatpush.bf16.msrb.mxu3 %v11394_v16 }
 0x6f0   : > { %v12639_v42 = vld [vmem:[%s15555_s27 + $0x17f8] sm:$0xf0]  ;;  %8613 = vmatmul.bf16.vlgmr.msrb.gmra.mxu2 %v15813_v52 }
 0x6f1   : > { %v14546_v11 = vld [vmem:[%s15555_s27 + $0x135c] sm:$0xf]  ;;  %v12642_v18 = vor.u32 %v14690_v12, %v12639_v42  ;;  %8657 = vmatpush.bf16.msra.mxu2 %v12386_v21 }
 0x6f2   : > { %v12063_v10 = vld [vmem:[%s15555_s27 + $0x1378] sm:$0xf0]  ;;  %8626 = vmatmul.bf16.vlgmr.msrb.gmra.mxu3 %v15815_v53  ;;  %v8380_v53 = vpop.f32.mrf.mxu0 }
 0x6f3   : > { %v14482_v62 = vld [vmem:[%s15555_s27 + $0x115c] sm:$0xf]  ;;  %v12066_v23 = vor.u32 %v14546_v11, %v12063_v10  ;;  %8670 = vmatpush.bf16.msra.mxu3 %v12642_v18  ;;  %v8381_v7 = vadd.f32 %v8380_v53, %v17773_v55 }
 0x6f4   : > { %v11807_v30 = vld [vmem:[%s15555_s27 + $0x1178] sm:$0xf0] }
 0x6f5   : > { %v14618_v26 = vld [vmem:[%s15555_s27 + $0x159c] sm:$0xf]  ;;  %v11810_v47 = vor.u32 %v14482_v62, %v11807_v30  ;;  %8646 = vmatpush.bf16.msra.mxu1 %v12066_v23  ;;  %v8394_v10 = vadd.f32 %v8393_v51, %v8381_v7 }
 0x6f6   : > { %v12351_v33 = vld [vmem:[%s15555_s27 + $0x15b8] sm:$0xf0] }
 0x6f7   : > { %v14682_v46 = vld [vmem:[%s15555_s27 + $0x179c] sm:$0xf]  ;;  %v12354_v22 = vor.u32 %v14618_v26, %v12351_v33  ;;  %8633 = vmatpush.bf16.msra.mxu0 %v11810_v47  ;;  %v8395_v33 = vpop.f32.mrf.mxu1 }
 0x6f8   : > { %v12607_v57 = vld [vmem:[%s15555_s27 + $0x17b8] sm:$0xf0] }
 0x6f9   : > { %v14538_v58 = vld [vmem:[%s15555_s27 + $0x131c] sm:$0xf]  ;;  %v12610_v38 = vor.u32 %v14682_v46, %v12607_v57  ;;  %8658 = vmatpush.bf16.msra.mxu2 %v12354_v22 }
 0x6fa   : > { %v12031_v27 = vld [vmem:[%s15555_s27 + $0x1338] sm:$0xf0]  ;;  %v8382_v22 = vpop.f32.mrf.mxu0 }
 0x6fb   : > { %v14474_v1 = vld [vmem:[%s15555_s27 + $0x111c] sm:$0xf]  ;;  %v12034_v40 = vor.u32 %v14538_v58, %v12031_v27  ;;  %8671 = vmatpush.bf16.msra.mxu3 %v12610_v38 }
 0x6fc   : > { %v11775_v34 = vld [vmem:[%s15555_s27 + $0x1138] sm:$0xf0] }
 0x6fd   : > { %v14610_v37 = vld [vmem:[%s15555_s27 + $0x155c] sm:$0xf]  ;;  %v11778_v54 = vor.u32 %v14474_v1, %v11775_v34  ;;  %8647 = vmatpush.bf16.msra.mxu1 %v12034_v40 }
 0x6fe   : > { %v12319_v44 = vld [vmem:[%s15555_s27 + $0x1578] sm:$0xf0] }
 0x6ff   : > { %v14674_v28 = vld [vmem:[%s15555_s27 + $0x175c] sm:$0xf]  ;;  %v12322_v56 = vor.u32 %v14610_v37, %v12319_v44  ;;  %8634 = vmatpush.bf16.msra.mxu0 %v11778_v54  ;;  %v8406_v54 = vpop.f32.mrf.mxu2 }
 0x700   : > { %v12575_v45 = vld [vmem:[%s15555_s27 + $0x1778] sm:$0xf0] }
 0x701   : > { %v14530_v9 = vld [vmem:[%s15555_s27 + $0x12dc] sm:$0xf]  ;;  %v12578_v52 = vor.u32 %v14674_v28, %v12575_v45  ;;  %8659 = vmatpush.bf16.msra.mxu2 %v12322_v56 }
 0x702   : > { %v11999_v43 = vld [vmem:[%s15555_s27 + $0x12f8] sm:$0xf0] }
 0x703   : > { %v14466_v8 = vld [vmem:[%s15555_s27 + $0x10dc] sm:$0xf]  ;;  %v12002_v60 = vor.u32 %v14530_v9, %v11999_v43  ;;  %8672 = vmatpush.bf16.msra.mxu3 %v12578_v52 }
 0x704   : > { %v11743_v61 = vld [vmem:[%s15555_s27 + $0x10f8] sm:$0xf0] }
 0x705   : > { %v14602_v4 = vld [vmem:[%s15555_s27 + $0x151c] sm:$0xf]  ;;  %v11746_v36 = vor.u32 %v14466_v8, %v11743_v61  ;;  %8648 = vmatpush.bf16.msra.mxu1 %v12002_v60  ;;  %v8407_v60 = vadd.f32 %v8406_v54, %v8394_v10 }
 0x706   : > { %v12287_v25 = vld [vmem:[%s15555_s27 + $0x1538] sm:$0xf0] }
 0x707   : > { %v14666_v2 = vld [vmem:[%s15555_s27 + $0x171c] sm:$0xf]  ;;  %v12290_v12 = vor.u32 %v14602_v4, %v12287_v25  ;;  %8635 = vmatpush.bf16.msra.mxu0 %v11746_v36  ;;  %v8419_v4 = vpop.f32.mrf.mxu3 }
 0x708   : > { %v12543_v19 = vld [vmem:[%s15555_s27 + $0x1738] sm:$0xf0]  ;;  %v17844_v7 = vadd.f32 %v8419_v4, %v8407_v60 }
 0x709   : > { %v14522_v5 = vld [vmem:[%s15555_s27 + $0x129c] sm:$0xf]  ;;  %v12546_v13 = vor.u32 %v14666_v2, %v12543_v19  ;;  %8660 = vmatpush.bf16.msra.mxu2 %v12290_v12 }
 0x70a   : > { %v11967_v48 = vld [vmem:[%s15555_s27 + $0x12b8] sm:$0xf0] }
 0x70b   : > { %v14458_v42 = vld [vmem:[%s15555_s27 + $0x109c] sm:$0xf]  ;;  %v11970_v41 = vor.u32 %v14522_v5, %v11967_v48  ;;  %8673 = vmatpush.bf16.msra.mxu3 %v12546_v13 }
 0x70c   : > { %v11711_v11 = vld [vmem:[%s15555_s27 + $0x10b8] sm:$0xf0] }
 0x70d   : > { %v14594_v14 = vld [vmem:[%s15555_s27 + $0x14dc] sm:$0xf]  ;;  %v11714_v24 = vor.u32 %v14458_v42, %v11711_v11  ;;  %8649 = vmatpush.bf16.msra.mxu1 %v11970_v41 }
 0x70e   : > { %v12255_v16 = vld [vmem:[%s15555_s27 + $0x14f8] sm:$0xf0] }
 0x70f   : > { %v14658_v21 = vld [vmem:[%s15555_s27 + $0x16dc] sm:$0xf]  ;;  %v12258_v18 = vor.u32 %v14594_v14, %v12255_v16  ;;  %8636 = vmatpush.bf16.msra.mxu0 %v11714_v24  ;;  %v8421_v22 = vpop.f32.mrf.mxu3 }
 0x710   : > { %v12511_v55 = vld [vmem:[%s15555_s27 + $0x16f8] sm:$0xf0] }
 0x711   : > { %v14514_v62 = vld [vmem:[%s15555_s27 + $0x125c] sm:$0xf]  ;;  %v12514_v46 = vor.u32 %v14658_v21, %v12511_v55  ;;  %8661 = vmatpush.bf16.msra.mxu2 %v12258_v18 }
 0x712   : > { %v11935_v30 = vld [vmem:[%s15555_s27 + $0x1278] sm:$0xf0] }
 0x713   : > { %v14450_v23 = vld [vmem:[%s15555_s27 + $0x105c] sm:$0xf]  ;;  %v11938_v57 = vor.u32 %v14514_v62, %v11935_v30  ;;  %8674 = vmatpush.bf16.msra.mxu3 %v12514_v46  ;;  %v8408_v46 = vpop.f32.mrf.mxu2 }
 0x714   : > { %v11679_v26 = vld [vmem:[%s15555_s27 + $0x1078] sm:$0xf0] }
 0x715   : > { %v14586_v58 = vld [vmem:[%s15555_s27 + $0x149c] sm:$0xf]  ;;  %v11682_v40 = vor.u32 %v14450_v23, %v11679_v26  ;;  %8650 = vmatpush.bf16.msra.mxu1 %v11938_v57 }
 0x716   : > { %v12223_v27 = vld [vmem:[%s15555_s27 + $0x14b8] sm:$0xf0] }
 0x717   : > { %v14650_v47 = vld [vmem:[%s15555_s27 + $0x169c] sm:$0xf]  ;;  %v12226_v28 = vor.u32 %v14586_v58, %v12223_v27  ;;  %8637 = vmatpush.bf16.msra.mxu0 %v11682_v40 }
 0x718   : > { %v12479_v1 = vld [vmem:[%s15555_s27 + $0x16b8] sm:$0xf0] }
 0x719   : > { %v14506_v34 = vld [vmem:[%s15555_s27 + $0x121c] sm:$0xf]  ;;  %v12482_v56 = vor.u32 %v14650_v47, %v12479_v1  ;;  %8662 = vmatpush.bf16.msra.mxu2 %v12226_v28 }
 0x71a   : > { %v11903_v38 = vld [vmem:[%s15555_s27 + $0x1238] sm:$0xf0] }
 0x71b   : > { %v14818_v37 = vld [vmem:[%s15555_s27 + $0x1bdc] sm:$0xf]  ;;  %v11906_v8 = vor.u32 %v14506_v34, %v11903_v38  ;;  %8675 = vmatpush.bf16.msra.mxu3 %v12482_v56 }
 0x71c   : > { %v13151_v44 = vld [vmem:[%s15555_s27 + $0x1bf8] sm:$0xf0] }
 0x71d   : > { %v14442_v45 = vld [vmem:[%s15555_s27 + $0x101c] sm:$0xf]  ;;  %v13154_v25 = vor.u32 %v14818_v37, %v13151_v44  ;;  %8651 = vmatpush.bf16.msra.mxu1 %v11906_v8 }
 0x71e   : > { %v11647_v9 = vld [vmem:[%s15555_s27 + $0x1038] sm:$0xf0] }
 0x71f   : > { %v14754_v43 = vld [vmem:[%s15555_s27 + $0x19dc] sm:$0xf]  ;;  %v11650_v19 = vor.u32 %v14442_v45, %v11647_v9 }
 0x720   : > { %v12895_v61 = vld [vmem:[%s15555_s27 + $0x19f8] sm:$0xf0]  ;;  %8652 = vmatmul.bf16.vlgmr.msra.gmra.mxu1 %v15851_v49 }
 0x721   : > { %v14578_v51 = vld [vmem:[%s15555_s27 + $0x145c] sm:$0xf]  ;;  %v12898_v36 = vor.u32 %v14754_v43, %v12895_v61  ;;  %8696 = vmatpush.bf16.msrb.mxu1 %v13154_v25  ;;  %8638 = vmatpush.bf16.msra.mxu0 %v11650_v19 }
 0x722   : > { %v12191_v52 = vld [vmem:[%s15555_s27 + $0x1478] sm:$0xf0] }
 0x723   : > { %v14642_v2 = vld [vmem:[%s15555_s27 + $0x165c] sm:$0xf]  ;;  %v12194_v12 = vor.u32 %v14578_v51, %v12191_v52 }
 0x724   : > { %v12447_v53 = vld [vmem:[%s15555_s27 + $0x1678] sm:$0xf0]  ;;  %8639 = vmatmul.bf16.vlgmr.msra.gmra.mxu0 %v15843_v39 }
 0x725   : > { %v14810_v5 = vld [vmem:[%s15555_s27 + $0x1b9c] sm:$0xf]  ;;  %v12450_v13 = vor.u32 %v14642_v2, %v12447_v53  ;;  %8683 = vmatpush.bf16.msrb.mxu0 %v12898_v36  ;;  %8663 = vmatpush.bf16.msra.mxu2 %v12194_v12 }
 0x726   : > { %v13119_v48 = vld [vmem:[%s15555_s27 + $0x1bb8] sm:$0xf0] }
 0x727   : > { %v14746_v42 = vld [vmem:[%s15555_s27 + $0x199c] sm:$0xf]  ;;  %v13122_v21 = vor.u32 %v14810_v5, %v13119_v48  ;;  %8676 = vmatpush.bf16.msra.mxu3 %v12450_v13 }
 0x728   : > { %v12863_v11 = vld [vmem:[%s15555_s27 + $0x19b8] sm:$0xf0] }
 0x729   : > { %v14570_v10 = vld [vmem:[%s15555_s27 + $0x141c] sm:$0xf]  ;;  %v12866_v26 = vor.u32 %v14746_v42, %v12863_v11  ;;  %8697 = vmatpush.bf16.msrb.mxu1 %v13122_v21  ;;  %v17885_v42 = vpop.f32.mrf.mxu0 }
 0x72a   : > { %v12159_v41 = vld [vmem:[%s15555_s27 + $0x1438] sm:$0xf0] }
 0x72b   : > { %v14634_v14 = vld [vmem:[%s15555_s27 + $0x161c] sm:$0xf]  ;;  %v12162_v33 = vor.u32 %v14570_v10, %v12159_v41  ;;  %8684 = vmatpush.bf16.msrb.mxu0 %v12866_v26 }
 0x72c   : > { %v12415_v16 = vld [vmem:[%s15555_s27 + $0x1638] sm:$0xf0] }
 0x72d   : > { %v14882_v55 = vld [vmem:[%s15555_s27 + $0x1ddc] sm:$0xf]  ;;  %v12418_v57 = vor.u32 %v14634_v14, %v12415_v16  ;;  %8664 = vmatpush.bf16.msra.mxu2 %v12162_v33 }
 0x72e   : > { %v13407_v62 = vld [vmem:[%s15555_s27 + $0x1df8] sm:$0xf0] }
 0x72f   : > { %v14946_v30 = vld [vmem:[%s15555_s27 + $0x1fdc] sm:$0xf]  ;;  %v13410_v58 = vor.u32 %v14882_v55, %v13407_v62  ;;  %8677 = vmatpush.bf16.msra.mxu3 %v12418_v57 }
 0x730   : > { %v13663_v24 = vld [vmem:[%s15555_s27 + $0x1ff8] sm:$0xf0]  ;;  %8665 = vmatmul.bf16.vlgmr.msra.gmra.mxu2 %v15864_v6  ;;  %v17880_v6 = vpop.f32.mrf.mxu1 }
 0x731   : > { %v14802_v18 = vld [vmem:[%s15555_s27 + $0x1b5c] sm:$0xf]  ;;  %v13666_v1 = vor.u32 %v14946_v30, %v13663_v24  ;;  %8709 = vmatpush.bf16.msrb.mxu2 %v13410_v58 }
 0x732   : > { %v13087_v23 = vld [vmem:[%s15555_s27 + $0x1b78] sm:$0xf0]  ;;  %8678 = vmatmul.bf16.vlgmr.msra.gmra.mxu3 %v15869_v15 }
 0x733   : > { %v14738_v27 = vld [vmem:[%s15555_s27 + $0x195c] sm:$0xf]  ;;  %v13090_v34 = vor.u32 %v14802_v18, %v13087_v23  ;;  %8722 = vmatpush.bf16.msrb.mxu3 %v13666_v1 }
 0x734   : > { %v12831_v47 = vld [vmem:[%s15555_s27 + $0x1978] sm:$0xf0] }
 0x735   : > { %v14874_v38 = vld [vmem:[%s15555_s27 + $0x1d9c] sm:$0xf]  ;;  %v12834_v45 = vor.u32 %v14738_v27, %v12831_v47  ;;  %8698 = vmatpush.bf16.msrb.mxu1 %v13090_v34 }
 0x736   : > { %v13375_v40 = vld [vmem:[%s15555_s27 + $0x1db8] sm:$0xf0] }
 0x737   : > { %v14938_v37 = vld [vmem:[%s15555_s27 + $0x1f9c] sm:$0xf]  ;;  %v13378_v39 = vor.u32 %v14874_v38, %v13375_v40  ;;  %8685 = vmatpush.bf16.msrb.mxu0 %v12834_v45 }
 0x738   : > { %v13631_v44 = vld [vmem:[%s15555_s27 + $0x1fb8] sm:$0xf0]  ;;  %v8447_v47 = vpop.f32.mrf.mxu1 }
 0x739   : > { %v14794_v28 = vld [vmem:[%s15555_s27 + $0x1b1c] sm:$0xf]  ;;  %v13634_v54 = vor.u32 %v14938_v37, %v13631_v44  ;;  %8710 = vmatpush.bf16.msrb.mxu2 %v13378_v39  ;;  %v8434_v37 = vpop.f32.mrf.mxu0  ;;  %v14953_v47 = vld [vmem:[%s15565_s12 + $0x10] sm:$0xff] }
 0x73a   : > { %v13055_v49 = vld [vmem:[%s15555_s27 + $0x1b38] sm:$0xf0]  ;;  %v8736_v37 = vmax.f32 %v16563_v17, 0.0 }
 0x73b   : > { %v14730_v9 = vld [vmem:[%s15555_s27 + $0x191c] sm:$0xf]  ;;  %v13058_v56 = vor.u32 %v14794_v28, %v13055_v49  ;;  %8723 = vmatpush.bf16.msrb.mxu3 %v13634_v54  ;;  %v17908_v54 = vpop.f32.mrf.mxu2 }
 0x73c   : > { %v12799_v43 = vld [vmem:[%s15555_s27 + $0x1938] sm:$0xf0]  ;;  %v8744_v17 = vmin.f32 %v8736_v37, 6.0 }
 0x73d   : > { %v14866_v8 = vld [vmem:[%s15555_s27 + $0x1d5c] sm:$0xf]  ;;  %v12802_v25 = vor.u32 %v14730_v9, %v12799_v43  ;;  %8699 = vmatpush.bf16.msrb.mxu1 %v13058_v56 }
 0x73e   : > { %v13343_v61 = vld [vmem:[%s15555_s27 + $0x1d78] sm:$0xf0] }
 0x73f   : > { %v14930_v51 = vld [vmem:[%s15555_s27 + $0x1f5c] sm:$0xf]  ;;  %v13346_v2 = vor.u32 %v14866_v8, %v13343_v61  ;;  %8686 = vmatpush.bf16.msrb.mxu0 %v12802_v25 }
 0x740   : > { %v13599_v52 = vld [vmem:[%s15555_s27 + $0x1f78] sm:$0xf0] }
 0x741   : > { %v14786_v60 = vld [vmem:[%s15555_s27 + $0x1adc] sm:$0xf]  ;;  %v13602_v5 = vor.u32 %v14930_v51, %v13599_v52  ;;  %8711 = vmatpush.bf16.msrb.mxu2 %v13346_v2  ;;  %v17912_v52 = vpop.f32.mrf.mxu3 }
 0x742   : > { %v13023_v4 = vld [vmem:[%s15555_s27 + $0x1af8] sm:$0xf0] }
 0x743   : > { %v14722_v53 = vld [vmem:[%s15555_s27 + $0x18dc] sm:$0xf]  ;;  %v13026_v48 = vor.u32 %v14786_v60, %v13023_v4  ;;  %8724 = vmatpush.bf16.msrb.mxu3 %v13602_v5  ;;  %v14966_v60 = vld [vmem:[%s15565_s12 + $0x78] sm:$0xff] }
 0x744   : > { %v12767_v19 = vld [vmem:[%s15555_s27 + $0x18f8] sm:$0xf0] }
 0x745   : > { %v14858_v36 = vld [vmem:[%s15555_s27 + $0x1d1c] sm:$0xf]  ;;  %v12770_v41 = vor.u32 %v14722_v53, %v12767_v19  ;;  %8700 = vmatpush.bf16.msrb.mxu1 %v13026_v48  ;;  %v14958_v53 = vld [vmem:[%s15565_s12 + $0x38] sm:$0xff] }
 0x746   : > { %v13311_v12 = vld [vmem:[%s15555_s27 + $0x1d38] sm:$0xf0] }
 0x747   : > { %v14922_v15 = vld [vmem:[%s15555_s27 + $0x1f1c] sm:$0xf]  ;;  %v13314_v14 = vor.u32 %v14858_v36, %v13311_v12  ;;  %8687 = vmatpush.bf16.msrb.mxu0 %v12770_v41  ;;  %v14965_v12 = vld [vmem:[%s15565_s12 + $0x70] sm:$0xff]  ;;  %v8460_v41 = vpop.f32.mrf.mxu2 }
 0x748   : > { %v13567_v11 = vld [vmem:[%s15555_s27 + $0x1f38] sm:$0xf0] }
 0x749   : > { %v14778_v10 = vld [vmem:[%s15555_s27 + $0x1a9c] sm:$0xf]  ;;  %v13570_v55 = vor.u32 %v14922_v15, %v13567_v11  ;;  %8712 = vmatpush.bf16.msrb.mxu2 %v13314_v14 }
 0x74a   : > { %v12991_v13 = vld [vmem:[%s15555_s27 + $0x1ab8] sm:$0xf0] }
 0x74b   : > { %v14714_v16 = vld [vmem:[%s15555_s27 + $0x189c] sm:$0xf]  ;;  %v12994_v62 = vor.u32 %v14778_v10, %v12991_v13  ;;  %8725 = vmatpush.bf16.msrb.mxu3 %v13570_v55  ;;  %v14957_v10 = vld [vmem:[%s15565_s12 + $0x30] sm:$0xff]  ;;  %v14982_v55 = vld [vmem:[%s15565_s12 + $0xf8] sm:$0xff] }
 0x74c   : > { %v12735_v21 = vld [vmem:[%s15555_s27 + $0x18b8] sm:$0xf0] }
 0x74d   : > { %v14850_v30 = vld [vmem:[%s15555_s27 + $0x1cdc] sm:$0xf]  ;;  %v12738_v46 = vor.u32 %v14714_v16, %v12735_v21  ;;  %8701 = vmatpush.bf16.msrb.mxu1 %v12994_v62  ;;  %v14974_v16 = vld [vmem:[%s15565_s12 + $0xb8] sm:$0xff]  ;;  %v8473_v21 = vpop.f32.mrf.mxu3 }
 0x74e   : > { %v13279_v24 = vld [vmem:[%s15555_s27 + $0x1cf8] sm:$0xf0] }
 0x74f   : > { %v14914_v18 = vld [vmem:[%s15555_s27 + $0x1edc] sm:$0xf]  ;;  %v13282_v57 = vor.u32 %v14850_v30, %v13279_v24  ;;  %8688 = vmatpush.bf16.msrb.mxu0 %v12738_v46  ;;  %v14981_v24 = vld [vmem:[%s15565_s12 + $0xf0] sm:$0xff]  ;;  %v14962_v46 = vld [vmem:[%s15565_s12 + $0x58] sm:$0xff] }
 0x750   : > { %v13535_v23 = vld [vmem:[%s15555_s27 + $0x1ef8] sm:$0xf0] }
 0x751   : > { %v14770_v26 = vld [vmem:[%s15555_s27 + $0x1a5c] sm:$0xf]  ;;  %v13538_v22 = vor.u32 %v14914_v18, %v13535_v23  ;;  %8713 = vmatpush.bf16.msrb.mxu2 %v13282_v57  ;;  %v14963_v18 = vld [vmem:[%s15565_s12 + $0x60] sm:$0xff]  ;;  %v17941_v57 = vpop.f32.mrf.mxu0 }
 0x752   : > { %v12959_v33 = vld [vmem:[%s15555_s27 + $0x1a78] sm:$0xf0] }
 0x753   : > { %v14706_v58 = vld [vmem:[%s15555_s27 + $0x185c] sm:$0xf]  ;;  %v12962_v1 = vor.u32 %v14770_v26, %v12959_v33  ;;  %8726 = vmatpush.bf16.msrb.mxu3 %v13538_v22  ;;  %v17937_v26 = vpop.f32.mrf.mxu1  ;;  %v14970_v22 = vld [vmem:[%s15565_s12 + $0x98] sm:$0xff] }
 0x754   : > { %v12703_v27 = vld [vmem:[%s15555_s27 + $0x1878] sm:$0xf0] }
 0x755   : > { %v14842_v34 = vld [vmem:[%s15555_s27 + $0x1c9c] sm:$0xf]  ;;  %v12706_v45 = vor.u32 %v14706_v58, %v12703_v27  ;;  %8702 = vmatpush.bf16.msrb.mxu1 %v12962_v1  ;;  %v14979_v58 = vld [vmem:[%s15565_s12 + $0xe0] sm:$0xff]  ;;  %v14961_v27 = vld [vmem:[%s15565_s12 + $0x50] sm:$0xff] }
 0x756   : > { %v13247_v38 = vld [vmem:[%s15555_s27 + $0x1cb8] sm:$0xf0] }
 0x757   : > { %v14906_v40 = vld [vmem:[%s15555_s27 + $0x1e9c] sm:$0xf]  ;;  %v13250_v39 = vor.u32 %v14842_v34, %v13247_v38  ;;  %8689 = vmatpush.bf16.msrb.mxu0 %v12706_v45  ;;  %v14978_v34 = vld [vmem:[%s15565_s12 + $0xd8] sm:$0xff]  ;;  %v17955_v45 = vpop.f32.mrf.mxu2 }
 0x758   : > { %v13503_v44 = vld [vmem:[%s15555_s27 + $0x1eb8] sm:$0xf0] }
 0x759   : > { %v14762_v28 = vld [vmem:[%s15555_s27 + $0x1a1c] sm:$0xf]  ;;  %v13506_v56 = vor.u32 %v14906_v40, %v13503_v44  ;;  %8714 = vmatpush.bf16.msrb.mxu2 %v13250_v39  ;;  %v8486_v40 = vpop.f32.mrf.mxu0  ;;  %v14977_v39 = vld [vmem:[%s15565_s12 + $0xd0] sm:$0xff] }
 0x75a   : > { %v12927_v49 = vld [vmem:[%s15555_s27 + $0x1a38] sm:$0xf0] }
 0x75b   : > { %v14698_v9 = vld [vmem:[%s15555_s27 + $0x181c] sm:$0xf]  ;;  %v12930_v8 = vor.u32 %v14762_v28, %v12927_v49  ;;  %8727 = vmatpush.bf16.msrb.mxu3 %v13506_v56  ;;  %v8499_v1 = vpop.f32.mrf.mxu1  ;;  %v8735_v28 = vmax.f32 %v16279_v3, 0.0  ;;  %v14969_v49 = vld [vmem:[%s15565_s12 + $0x90] sm:$0xff]  ;;  %v14998_v56 = vld [vmem:[%s15565_s12 + $0x178] sm:$0xff] }
 0x75c   : > { %v12671_v43 = vld [vmem:[%s15555_s27 + $0x1838] sm:$0xf0]  ;;  %v14990_v3 = vld [vmem:[%s15565_s12 + $0x138] sm:$0xff] }
 0x75d   : > { %v14834_v61 = vld [vmem:[%s15555_s27 + $0x1c5c] sm:$0xf]  ;;  %v12674_v2 = vor.u32 %v14698_v9, %v12671_v43  ;;  %8703 = vmatpush.bf16.msrb.mxu1 %v12930_v8  ;;  %v14959_v9 = vld [vmem:[%s15565_s12 + $0x40] sm:$0xff]  ;;  %v17959_v43 = vpop.f32.mrf.mxu3 }
 0x75e   : > { %v13215_v51 = vld [vmem:[%s15555_s27 + $0x1c78] sm:$0xf0]  ;;  %v14951_v8 = vld [vmem:[%s15565_s12] sm:$0xff] }
 0x75f   : > { %v14898_v4 = vld [vmem:[%s15555_s27 + $0x1e5c] sm:$0xf]  ;;  %v13218_v19 = vor.u32 %v14834_v61, %v13215_v51  ;;  %8690 = vmatpush.bf16.msrb.mxu0 %v12674_v2  ;;  %v8743_v61 = vmin.f32 %v8735_v28, 6.0  ;;  %v14997_v2 = vld [vmem:[%s15565_s12 + $0x170] sm:$0xff] }
 0x760   : > { %v13471_v25 = vld [vmem:[%s15555_s27 + $0x1e78] sm:$0xf0]  ;;  %8704 = vmatmul.bf16.vlgmr.msrb.gmra.mxu1 %v15925_v0  ;;  %v14973_v0 = vld [vmem:[%s15565_s12 + $0xb0] sm:$0xff] }
 0x761   : > { %v13474_v5 = vor.u32 %v14898_v4, %v13471_v25  ;;  %v14826_v48 = vld [vmem:[%s15555_s27 + $0x1c1c] sm:$0xf]  ;;  %9284 = vmatpush.bf16.msra.mxu1 %v14966_v60  ;;  %8715 = vmatpush.bf16.msrb.mxu2 %v13218_v19  ;;  %v8737_v60 = vmax.f32 %v16847_v50, 0.0  ;;  %v8738_v25 = vmax.f32 %v17131_v29, 0.0  ;;  %v8751_v19 = vpack.c.bf16 %v8743_v61, %v8743_v61  ;;  %v14967_v50 = vld [vmem:[%s15565_s12 + $0x80] sm:$0xff] }
 0x762   : > { %v13183_v36 = vld [vmem:[%s15555_s27 + $0x1c38] sm:$0xf0]  ;;  %8691 = vmatmul.bf16.vlgmr.msrb.gmra.mxu0 %v15923_v63  ;;  %v14955_v63 = vld [vmem:[%s15565_s12 + $0x20] sm:$0xff] }
 0x763   : > { %v14890_v15 = vld [vmem:[%s15555_s27 + $0x1e1c] sm:$0xf]  ;;  %9271 = vmatpush.bf16.msra.mxu0 %v14958_v53  ;;  %v13186_v13 = vor.u32 %v14826_v48, %v13183_v36  ;;  %8728 = vmatpush.bf16.msrb.mxu3 %v13474_v5  ;;  %v8752_v53 = vpack.c.bf16 %v8744_v17, %v8744_v17  ;;  %v8433_v5 = vadd.f32 %v17885_v42, %v17844_v7  ;;  %v14989_v48 = vld [vmem:[%s15565_s12 + $0x130] sm:$0xff]  ;;  %v8745_v36 = vmin.f32 %v8737_v60, 6.0  ;;  %v14975_v29 = vld [vmem:[%s15565_s12 + $0xc0] sm:$0xff] }
 0x764   : > { %v13439_v11 = vld [vmem:[%s15555_s27 + $0x1e38] sm:$0xf0] }
 0x765   : > { %v13442_v14 = vor.u32 %v14890_v15, %v13439_v11  ;;  %9285 = vmatpush.bf16.msra.mxu1 %v14965_v12  ;;  %v14964_v62 = vld [vmem:[%s15565_s12 + $0x68] sm:$0xff]  ;;  %8716 = vmatpush.bf16.msrb.mxu2 %v13186_v13  ;;  %v8512_v12 = vpop.f32.mrf.mxu2  ;;  %v15006_v15 = vld [vmem:[%s15565_s12 + $0x1b8] sm:$0xff]  ;;  %v8746_v11 = vmin.f32 %v8738_v25, 6.0  ;;  %v8446_v7 = vadd.f32 %v17880_v6, %v8433_v5  ;;  %v8753_v41 = vpack.c.bf16 %v8745_v36, %v8745_v36 }
 0x766   : > { %v14956_v30 = vld [vmem:[%s15565_s12 + $0x28] sm:$0xff]  ;;  %v1886_v6 = vperm.slane %v17734_v59, 7  ;;  %v15003_v59 = vld [vmem:[%s15565_s12 + $0x1a0] sm:$0xff] }
 0x767   : > { %9272 = vmatpush.bf16.msra.mxu0 %v14957_v10  ;;  %8729 = vmatpush.bf16.msrb.mxu3 %v13442_v14  ;;  %v14972_v23 = vld [vmem:[%s15565_s12 + $0xa8] sm:$0xff]  ;;  %v8525_v10 = vpop.f32.mrf.mxu3  ;;  %v15005_v14 = vld [vmem:[%s15565_s12 + $0x1b0] sm:$0xff]  ;;  %v8459_v21 = vadd.f32 %v17908_v54, %v8446_v7  ;;  %v14994_v54 = vld [vmem:[%s15565_s12 + $0x158] sm:$0xff] }
 0x768   : > { %8717 = vmatmul.bf16.vlgmr.msrb.gmra.mxu2 %v15943_v31  ;;  %v14980_v33 = vld [vmem:[%s15565_s12 + $0xe8] sm:$0xff]  ;;  %v14954_v31 = vld [vmem:[%s15565_s12 + $0x18] sm:$0xff] }
 0x769   : > { %9297 = vmatpush.bf16.msra.mxu2 %v14974_v16  ;;  %9286 = vmatpush.bf16.msra.mxu1 %v14964_v62  ;;  %v14960_v38 = vld [vmem:[%s15565_s12 + $0x48] sm:$0xff]  ;;  %v8754_v16 = vpack.c.bf16 %v8746_v11, %v8746_v11  ;;  %v14987_v62 = vld [vmem:[%s15565_s12 + $0x120] sm:$0xff] }
 0x76a   : > { %8730 = vmatmul.bf16.vlgmr.msrb.gmra.mxu3 %v15947_v35  ;;  %v14971_v35 = vld [vmem:[%s15565_s12 + $0xa0] sm:$0xff]  ;;  %v14952_v44 = vld [vmem:[%s15565_s12 + $0x8] sm:$0xff] }
 0x76b   : > { %9310 = vmatpush.bf16.msra.mxu3 %v14982_v55  ;;  %9273 = vmatpush.bf16.msra.mxu0 %v14956_v30  ;;  %v14968_v51 = vld [vmem:[%s15565_s12 + $0x88] sm:$0xff]  ;;  %v14995_v55 = vld [vmem:[%s15565_s12 + $0x160] sm:$0xff] }
 0x76c   : > { %v14976_v4 = vld [vmem:[%s15565_s12 + $0xc8] sm:$0xff]  ;;  %v15011_v11 = vld [vmem:[%s15565_s12 + $0x1e0] sm:$0xff] }
 0x76d   : > { %9298 = vmatpush.bf16.msra.mxu2 %v14973_v0  ;;  %9287 = vmatpush.bf16.msra.mxu1 %v14963_v18  ;;  %v14996_v13 = vld [vmem:[%s15565_s12 + $0x168] sm:$0xff]  ;;  %v8472_v0 = vadd.f32 %v17912_v52, %v8459_v21  ;;  %v8536_v18 = vpop.f32.mrf.mxu0  ;;  %v8562_v37 = vpop.f32.mrf.mxu2 }
 0x76e   : > { %v14988_v42 = vld [vmem:[%s15565_s12 + $0x128] sm:$0xff] }
 0x76f   : > { %9311 = vmatpush.bf16.msra.mxu3 %v14981_v24  ;;  %9274 = vmatpush.bf16.msra.mxu0 %v14955_v63  ;;  %v15004_v30 = vld [vmem:[%s15565_s12 + $0x1a8] sm:$0xff]  ;;  %v8549_v24 = vpop.f32.mrf.mxu1  ;;  %v8485_v63 = vadd.f32 %v17941_v57, %v8472_v0 }
 0x770   : > { %v15008_v21 = vld [vmem:[%s15565_s12 + $0x1c8] sm:$0xff] }
 0x771   : > { %9299 = vmatpush.bf16.msra.mxu2 %v14972_v23  ;;  %9288 = vmatpush.bf16.msra.mxu1 %v14962_v46  ;;  %v8537_v23 = vadd.f32 %v8536_v18, %v1886_v6  ;;  %v8498_v52 = vadd.f32 %v17937_v26, %v8485_v63  ;;  %v15001_v26 = vld [vmem:[%s15565_s12 + $0x190] sm:$0xff] }
 0x773   : > { %9312 = vmatpush.bf16.msra.mxu3 %v14980_v33  ;;  %9275 = vmatpush.bf16.msra.mxu0 %v14954_v31  ;;  %v14986_v33 = vld [vmem:[%s15565_s12 + $0x118] sm:$0xff]  ;;  %v8550_v46 = vadd.f32 %v8549_v24, %v8537_v23  ;;  %v14993_v31 = vld [vmem:[%s15565_s12 + $0x150] sm:$0xff]  ;;  %v8511_v57 = vadd.f32 %v17955_v45, %v8498_v52  ;;  %v8575_v45 = vpop.f32.mrf.mxu3 }
 0x775   : > { %9300 = vmatpush.bf16.msra.mxu2 %v14971_v35  ;;  %9289 = vmatpush.bf16.msra.mxu1 %v14961_v27  ;;  %v14985_v35 = vld [vmem:[%s15565_s12 + $0x110] sm:$0xff]  ;;  %v8538_v1 = vpop.f32.mrf.mxu0  ;;  %v8524_v40 = vadd.f32 %v17959_v43, %v8511_v57  ;;  %v14999_v43 = vld [vmem:[%s15565_s12 + $0x180] sm:$0xff] }
 0x777   : > { %9313 = vmatpush.bf16.msra.mxu3 %v14979_v58  ;;  %9276 = vmatpush.bf16.msra.mxu0 %v14953_v47  ;;  %v15002_v58 = vld [vmem:[%s15565_s12 + $0x198] sm:$0xff]  ;;  %v8551_v27 = vpop.f32.mrf.mxu1  ;;  %v14992_v47 = vld [vmem:[%s15565_s12 + $0x148] sm:$0xff]  ;;  %v8741_v17 = vmax.f32 %v8524_v40, 0.0 }
 0x779   : > { %9301 = vmatpush.bf16.msra.mxu2 %v14970_v22  ;;  %9290 = vmatpush.bf16.msra.mxu1 %v14960_v38  ;;  %v8740_v22 = vmax.f32 %v17699_v32, 0.0  ;;  %v8739_v38 = vmax.f32 %v17415_v20, 0.0  ;;  %v8749_v61 = vmin.f32 %v8741_v17, 6.0 }
 0x77b   : > { %9314 = vmatpush.bf16.msra.mxu3 %v14978_v34  ;;  %9277 = vmatpush.bf16.msra.mxu0 %v14952_v44  ;;  %v14984_v34 = vld [vmem:[%s15565_s12 + $0x108] sm:$0xff]  ;;  %v14991_v44 = vld [vmem:[%s15565_s12 + $0x140] sm:$0xff]  ;;  %v8748_v28 = vmin.f32 %v8740_v22, 6.0  ;;  %v8747_v32 = vmin.f32 %v8739_v38, 6.0  ;;  %v8757_v60 = vpack.c.bf16 %v8749_v61, %v8749_v61 }
 0x77d   : > { %9302 = vmatpush.bf16.msra.mxu2 %v14969_v49  ;;  %9291 = vmatpush.bf16.msra.mxu1 %v14959_v9  ;;  %v8563_v49 = vadd.f32 %v8562_v37, %v8550_v46  ;;  %v8756_v20 = vpack.c.bf16 %v8748_v28, %v8748_v28  ;;  %v8588_v25 = vpop.f32.mrf.mxu0 }
 0x77f   : > { %9315 = vmatpush.bf16.msra.mxu3 %v14977_v39  ;;  %9278 = vmatpush.bf16.msra.mxu0 %v14951_v8  ;;  %v14983_v39 = vld [vmem:[%s15565_s12 + $0x100] sm:$0xff]  ;;  %v8576_v9 = vadd.f32 %v8575_v45, %v8563_v49  ;;  %v8755_v8 = vpack.c.bf16 %v8747_v32, %v8747_v32 }
 0x780   : > { %9292 = vmatmul.bf16.vlgmr.msra.gmra.mxu1 %v8752_v53 }
 0x781   : > { %9336 = vmatpush.bf16.msrb.mxu1 %v14998_v56  ;;  %9303 = vmatpush.bf16.msra.mxu2 %v14968_v51  ;;  %v15000_v56 = vld [vmem:[%s15565_s12 + $0x188] sm:$0xff]  ;;  %v8577_v51 = vpop.f32.mrf.mxu3 }
 0x782   : > { %9279 = vmatmul.bf16.vlgmr.msra.gmra.mxu0 %v8751_v19 }
 0x783   : > { %9323 = vmatpush.bf16.msrb.mxu0 %v14990_v3  ;;  %9316 = vmatpush.bf16.msra.mxu3 %v14976_v4  ;;  %v8564_v3 = vpop.f32.mrf.mxu2  ;;  %v8601_v4 = vpop.f32.mrf.mxu1 }
 0x785   : > { %9337 = vmatpush.bf16.msrb.mxu1 %v14997_v2  ;;  %9304 = vmatpush.bf16.msra.mxu2 %v14967_v50  ;;  %v8590_v53 = vpop.f32.mrf.mxu0  ;;  %v15013_v50 = vld [vmem:[%s15565_s12 + $0x1f0] sm:$0xff] }
 0x787   : > { %9324 = vmatpush.bf16.msrb.mxu0 %v14989_v48  ;;  %9317 = vmatpush.bf16.msra.mxu3 %v14975_v29  ;;  %v15014_v48 = vld [vmem:[%s15565_s12 + $0x1f8] sm:$0xff]  ;;  %v15012_v29 = vld [vmem:[%s15565_s12 + $0x1e8] sm:$0xff] }
 0x788   : > { %9305 = vmatmul.bf16.vlgmr.msra.gmra.mxu2 %v8753_v41 }
 0x789   : > { %9349 = vmatpush.bf16.msrb.mxu2 %v15006_v15  ;;  %9338 = vmatpush.bf16.msrb.mxu1 %v14996_v13  ;;  %v8627_v5 = vpop.f32.mrf.mxu3  ;;  %v15010_v13 = vld [vmem:[%s15565_s12 + $0x1d8] sm:$0xff] }
 0x78a   : > { %9318 = vmatmul.bf16.vlgmr.msra.gmra.mxu3 %v8754_v16 }
 0x78b   : > { %9325 = vmatpush.bf16.msrb.mxu0 %v14988_v42  ;;  %v8603_v2 = vpop.f32.mrf.mxu1  ;;  %v8614_v19 = vpop.f32.mrf.mxu2  ;;  %9362 = vmatpush.bf16.msrb.mxu3 %v15014_v48  ;;  %v15009_v42 = vld [vmem:[%s15565_s12 + $0x1d0] sm:$0xff] }
 0x78d   : > { %9350 = vmatpush.bf16.msrb.mxu2 %v15005_v14  ;;  %9339 = vmatpush.bf16.msrb.mxu1 %v14995_v55  ;;  %v8589_v14 = vadd.f32 %v8588_v25, %v8576_v9 }
 0x78f   : > { %9326 = vmatpush.bf16.msrb.mxu0 %v14987_v62  ;;  %9363 = vmatpush.bf16.msrb.mxu3 %v15013_v50  ;;  %v8602_v6 = vadd.f32 %v8601_v4, %v8589_v14  ;;  %v15007_v62 = vld [vmem:[%s15565_s12 + $0x1c0] sm:$0xff] }
 0x791   : > { %9351 = vmatpush.bf16.msrb.mxu2 %v15004_v30  ;;  %9340 = vmatpush.bf16.msrb.mxu1 %v14994_v54  ;;  %v8629_v12 = vpop.f32.mrf.mxu3  ;;  %v8615_v30 = vadd.f32 %v8614_v19, %v8602_v6 }
 0x793   : > { %9327 = vmatpush.bf16.msrb.mxu0 %v14986_v33  ;;  %v8616_v36 = vpop.f32.mrf.mxu2  ;;  %9364 = vmatpush.bf16.msrb.mxu3 %v15012_v29  ;;  %v8628_v54 = vadd.f32 %v8627_v5, %v8615_v30 }
 0x795   : > { %9352 = vmatpush.bf16.msrb.mxu2 %v15003_v59  ;;  %9341 = vmatpush.bf16.msrb.mxu1 %v14993_v31 }
 0x797   : > { %9328 = vmatpush.bf16.msrb.mxu0 %v14985_v35  ;;  %9365 = vmatpush.bf16.msrb.mxu3 %v15011_v11 }
 0x799   : > { %9353 = vmatpush.bf16.msrb.mxu2 %v15002_v58  ;;  %9342 = vmatpush.bf16.msrb.mxu1 %v14992_v47 }
 0x79b   : > { %9329 = vmatpush.bf16.msrb.mxu0 %v14984_v34  ;;  %9366 = vmatpush.bf16.msrb.mxu3 %v15010_v13 }
 0x79d   : > { %9354 = vmatpush.bf16.msrb.mxu2 %v15001_v26  ;;  %9343 = vmatpush.bf16.msrb.mxu1 %v14991_v44  ;;  %v8653_v15 = vpop.f32.mrf.mxu1 }
 0x79f   : > { %9330 = vmatpush.bf16.msrb.mxu0 %v14983_v39  ;;  %9367 = vmatpush.bf16.msrb.mxu3 %v15009_v42 }
 0x7a0   : > { %9344 = vmatmul.bf16.vlgmr.msrb.gmra.mxu1 %v8756_v20 }
 0x7a1   : > { %9355 = vmatpush.bf16.msrb.mxu2 %v15000_v56  ;;  %v8640_v10 = vpop.f32.mrf.mxu0 }
 0x7a2   : > { %9331 = vmatmul.bf16.vlgmr.msrb.gmra.mxu0 %v8755_v8  ;;  %v8641_v18 = vadd.f32 %v8640_v10, %v8628_v54 }
 0x7a3   : > { %9368 = vmatpush.bf16.msrb.mxu3 %v15008_v21 }
 0x7a4   : > { %v8654_v63 = vadd.f32 %v8653_v15, %v8641_v18 }
 0x7a5   : > { %9356 = vmatpush.bf16.msrb.mxu2 %v14999_v43  ;;  %v8655_v7 = vpop.f32.mrf.mxu1 }
 0x7a7   : > { %9369 = vmatpush.bf16.msrb.mxu3 %v15007_v62 }
 0x7a8   : > { %9357 = vmatmul.bf16.vlgmr.msrb.gmra.mxu2 %v8757_v60 }
 0x7a9   : > { %v8642_v41 = vpop.f32.mrf.mxu0 }
 0x7b3   : > { %v8666_v16 = vpop.f32.mrf.mxu2 }
 0x7b4   : > { %v8667_v33 = vadd.f32 %v8666_v16, %v8654_v63 }
 0x7b5   : > { %v8679_v55 = vpop.f32.mrf.mxu3 }
 0x7b6   : > { %v8680_v46 = vadd.f32 %v8679_v55, %v8667_v33 }
 0x7bb   : > { %v8668_v0 = vpop.f32.mrf.mxu2 }
 0x7bd   : > { %v8681_v24 = vpop.f32.mrf.mxu3 }
 0x7dd   : > { %v8705_v23 = vpop.f32.mrf.mxu1 }
 0x7df   : > { %v8692_v59 = vpop.f32.mrf.mxu0 }
 0x7e0   : > { %v8693_v31 = vadd.f32 %v8692_v59, %v8680_v46 }
 0x7e2   : > { %v8706_v58 = vadd.f32 %v8705_v23, %v8693_v31 }
 0x7e5   : > { %v8707_v52 = vpop.f32.mrf.mxu1 }
 0x7e7   : > { %v8694_v35 = vpop.f32.mrf.mxu0 }
 0x7eb   : > { %v8718_v57 = vpop.f32.mrf.mxu2 }
 0x7ec   : > { %v8719_v27 = vadd.f32 %v8718_v57, %v8706_v58 }
 0x7ed   : > { %v8731_v47 = vpop.f32.mrf.mxu3 }
 0x7ee   : > { %v8732_v22 = vadd.f32 %v8731_v47, %v8719_v27 }
 0x7f0   : > { %v8742_v1 = vmax.f32 %v8732_v22, 0.0 }
 0x7f2   : > { %v8750_v34 = vmin.f32 %v8742_v1, 6.0 }
 0x7f3   : > { %v8720_v38 = vpop.f32.mrf.mxu2 }
 0x7f4   : > { %v8758_v26 = vpack.c.bf16 %v8750_v34, %v8750_v34 }
 0x7f5   : > { %v8733_v40 = vpop.f32.mrf.mxu3 }
 0x7f6   : > { %9370 = vmatmul.bf16.vlgmr.msrb.gmra.mxu3 %v8758_v26 }
 0x7fd   : > { %v9293_v37 = vpop.f32.mrf.mxu1 }
 0x7ff   : > { %v9280_v44 = vpop.f32.mrf.mxu0 }
 0x800   : > { %v9294_v28 = vadd.f32 %v9293_v37, %v9280_v44 }
 0x805   : > { %v9295_v49 = vpop.f32.mrf.mxu1 }
 0x807   : > { %v9282_v45 = vpop.f32.mrf.mxu0 }
 0x80b   : > { %v9306_v39 = vpop.f32.mrf.mxu2 }
 0x80c   : > { %v9307_v32 = vadd.f32 %v9306_v39, %v9294_v28 }
 0x80d   : > { %v9319_v9 = vpop.f32.mrf.mxu3 }
 0x80e   : > { %v9320_v56 = vadd.f32 %v9319_v9, %v9307_v32 }
 0x813   : > { %v9308_v17 = vpop.f32.mrf.mxu2 }
 0x815   : > { %v9321_v20 = vpop.f32.mrf.mxu3 }
 0x81d   : > { %v9345_v8 = vpop.f32.mrf.mxu1 }
 0x81f   : > { %v9332_v43 = vpop.f32.mrf.mxu0 }
 0x820   : > { %v9333_v61 = vadd.f32 %v9332_v43, %v9320_v56 }
 0x822   : > { %v9346_v3 = vadd.f32 %v9345_v8, %v9333_v61 }
 0x825   : > { %v9347_v51 = vpop.f32.mrf.mxu1 }
 0x827   : > { %v9334_v60 = vpop.f32.mrf.mxu0 }
 0x82b   : > { %v9358_v4 = vpop.f32.mrf.mxu2 }
 0x82c   : > { %v9359_v25 = vadd.f32 %v9358_v4, %v9346_v3 }
 0x833   : > { %v9360_v2 = vpop.f32.mrf.mxu2 }
 0x879   : > { %v9371_v53 = vpop.f32.mrf.mxu3 }
 0x87a   : > { %v9372_v19 = vadd.f32 %v9371_v53, %v9359_v25 }
 0x87c   : > { %9390 = vst [vmem:[%s396_s18] sm:$0xff] %v9372_v19 }
 0x881   : > { %v9373_v5 = vpop.f32.mrf.mxu3 }
 0x882 PF: > { %s24_s26 = sadd.s32 1, %s15374_s26   ;;  %s18060_s21 = smov %s15358_s22 }
 0x883   : > { %p21_p2 = scmp.ge.s32.totalorder %s24_s26, 4   ;;  %s18061_s22 = smov %s15362_s23 }
 0x884   : > { %s18062_s23 = smov %s15518_s7  ;;  %s18063_s24 = smov %s15370_s25 }
 0x885   : > { %s18064_s25 = smov %s18066_s17  ;;  %23 = sbr.rel (!%p21_p2) target bundleno = 14 (0xe), region = 131 }
 0x88a   :  { %9410 = vsyncpa [#allocation5], 1 }
 0x88b   :  { %9412 = vsyncpa [#allocation5 + $0x1], 1 }
 0x88c   :  { %9413 = vsyncpa [#allocation7], 1 }
 0x88d   :  { %9414 = vsyncpa [#allocation10], 1 }
 0x88e   :  { %9416 = vsyncpa [#allocation10 + $0x1], 1 }
 0x88f   :  { %9417 = vsyncpa [#allocation13], 1 }
 0x890   :  { %9419 = vsyncpa [#allocation13 + $0x1], 1 }

</bundles_post_ra>
